<compile_context>
chip_gen: v6e
topology: v6e:2x2x1
jax: 0.10.0
libtpu: 0.0.40
codegen_flags: <defaults>
</compile_context>

<pallas_src>
import functools

import jax
import jax.numpy as jnp
from jax.experimental import pallas as pl
from jax.experimental.pallas import tpu as pltpu

C_PAD = 128          # lane-dense channel width used for every activation
_HI = jax.lax.Precision.HIGHEST   # reference-only


# --------------------------- in-kernel helpers ------------------------------

def _valid_rows_f32(m, batch, lin):
    """(m,1) f32 mask: 1.0 on real rows of the flat padded layout, 0.0 on the
    per-sample zero-padding rows."""
    lpad = lin + 2
    ri = jax.lax.broadcasted_iota(jnp.int32, (m, 1), 0)
    valid = (ri >= 1) & (ri <= lin)                      # sample 0
    for b in range(1, batch):
        lo = b * lpad
        valid = valid | ((ri >= lo + 1) & (ri <= lo + lin))
    return jnp.where(valid, 1.0, 0.0).astype(jnp.float32)


def _shift_mats(m):
    """S_minus/S_plus with (S_minus @ X)[i] = X[i-1], (S_plus @ X)[i] = X[i+1]
    (zero at the ends).  Built from iota so no gather/roll is needed."""
    r = jax.lax.broadcasted_iota(jnp.int32, (m, m), 0)
    c = jax.lax.broadcasted_iota(jnp.int32, (m, m), 1)
    s_minus = jnp.where(c == r - 1, 1.0, 0.0).astype(jnp.float32)
    s_plus = jnp.where(c == r + 1, 1.0, 0.0).astype(jnp.float32)
    return s_minus, s_plus


def _pool_mats(batch, lin):
    """Selection matrices for MaxPool1d(2,2) including re-padding:
    out = max(S0 @ x, S1 @ x) maps (B*(lin+2),C) -> (B*(lin/2+2),C)."""
    lout = lin // 2
    m_in = batch * (lin + 2)
    m_out = batch * (lout + 2)
    ro = jax.lax.broadcasted_iota(jnp.int32, (m_out, m_in), 0)
    ci = jax.lax.broadcasted_iota(jnp.int32, (m_out, m_in), 1)
    hit0 = None
    hit1 = None
    for b in range(batch):
        p = ro - b * (lout + 2)          # out position inside sample b
        q = ci - b * (lin + 2)           # in  position inside sample b
        row_ok = (p >= 1) & (p <= lout)
        h0 = row_ok & (q == 2 * p - 1)
        h1 = row_ok & (q == 2 * p)
        hit0 = h0 if hit0 is None else (hit0 | h0)
        hit1 = h1 if hit1 is None else (hit1 | h1)
    s0 = jnp.where(hit0, 1.0, 0.0).astype(jnp.float32)
    s1 = jnp.where(hit1, 1.0, 0.0).astype(jnp.float32)
    return s0, s1


def _conv3(x, w_ref, w_base, bias, s_minus, s_plus, validf):
    """Conv1d(k=3, stride=1, pad=1) on the flat padded layout:
    out[i] = x[i-1] @ W0 + x[i] @ W1 + x[i+1] @ W2 (+ bias), masked."""
    f32 = jnp.float32
    xm = jnp.dot(s_minus, x, preferred_element_type=f32)
    xp = jnp.dot(s_plus, x, preferred_element_type=f32)
    acc = jnp.dot(xm, w_ref[w_base + 0], preferred_element_type=f32)
    acc = acc + jnp.dot(x, w_ref[w_base + 1], preferred_element_type=f32)
    acc = acc + jnp.dot(xp, w_ref[w_base + 2], preferred_element_type=f32)
    if bias is not None:
        acc = acc + bias                  # (1,128) sublane broadcast
    return acc * validf                   # keep padding rows exactly zero


def _bn_relu(x, validf, n_valid, eps, gamma=None, beta=None, residual=None):
    """Training-mode BatchNorm1d (batch stats over the B*L valid rows, biased
    variance) + optional affine + optional residual add + ReLU + re-mask."""
    inv_n = 1.0 / float(n_valid)
    mean = jnp.sum(x, axis=0, keepdims=True) * inv_n        # padding rows are 0
    centered = x - mean
    masked = centered * validf
    var = jnp.sum(masked * masked, axis=0, keepdims=True) * inv_n
    y = centered * jax.lax.rsqrt(var + eps)
    if gamma is not None:
        y = y * gamma + beta
    if residual is not None:
        y = y + residual
    return jnp.maximum(y, 0.0) * validf


# ------------------------------ fused kernel --------------------------------

def _fused_forward_kernel(batch, data_dim, z_dim, n_res_blocks,
                          x_ref, stem_w_ref, res_w_ref, res_b_ref,
                          res_g_ref, res_be_ref, fc_w_ref, o_ref):
    f32 = jnp.float32
    stem_eps = 1e-4     # BatchNorm1d(..., eps=0.0001, affine=False)
    res_eps = 1e-5      # BatchNorm1d default

    x = x_ref[...]                        # (B*(D+2), 128), signal in channel 0
    lin = data_dim

    # ---- stems: conv(k3,p1,no bias) -> BN(affine=False) -> ReLU -> pool(2,2)
    for stage in range(3):
        m = batch * (lin + 2)
        validf = _valid_rows_f32(m, batch, lin)
        s_minus, s_plus = _shift_mats(m)
        # NOTE: conv1 (Cin=1) reuses the generic MXU path with zero-padded
        # weights; at these sizes the wasted MXU lanes are irrelevant.
        y = _conv3(x, stem_w_ref, stage * 3, None, s_minus, s_plus, validf)
        y = _bn_relu(y, validf, batch * lin, stem_eps)
        s0, s1 = _pool_mats(batch, lin)
        x = jnp.maximum(jnp.dot(s0, y, preferred_element_type=f32),
                        jnp.dot(s1, y, preferred_element_type=f32))
        lin //= 2

    # ---- 4 residual blocks at (L=lin, C=128): reuse one set of shift/mask
    m = batch * (lin + 2)
    validf = _valid_rows_f32(m, batch, lin)
    s_minus, s_plus = _shift_mats(m)
    n_valid = batch * lin
    for blk in range(n_res_blocks):
        identity = x
        wb = blk * 6           # 2 convs x 3 taps
        pb = blk * 2
        y = _conv3(x, res_w_ref, wb, res_b_ref[pb], s_minus, s_plus, validf)
        y = _bn_relu(y, validf, n_valid, res_eps,
                     gamma=res_g_ref[pb], beta=res_be_ref[pb])
        y = _conv3(y, res_w_ref, wb + 3, res_b_ref[pb + 1],
                   s_minus, s_plus, validf)
        x = _bn_relu(y, validf, n_valid, res_eps,
                     gamma=res_g_ref[pb + 1], beta=res_be_ref[pb + 1],
                     residual=identity)

    # ---- fc1 (bias=False): out[b] = sum_l act[b, l, :] @ Wfc[l]
    # (Wfc pre-permuted on host so no transpose / flatten is needed here.)
    lf = lin
    rb = jax.lax.broadcasted_iota(jnp.int32, (batch, m), 0)
    cj = jax.lax.broadcasted_iota(jnp.int32, (batch, m), 1)
    out = None
    for pos in range(lf):
        sel = jnp.where(cj == rb * (lf + 2) + 1 + pos, 1.0, 0.0).astype(f32)
        xl = jnp.dot(sel, x, preferred_element_type=f32)        # (B, 128)
        term = jnp.dot(xl, fc_w_ref[pos], preferred_element_type=f32)
        out = term if out is None else out + term
    o_ref[...] = out


def _full_spec(shape):
    ndim = len(shape)
    return pl.BlockSpec(shape, lambda i, _n=ndim: (0,) * _n)


def swat_lenet_resnet_forward(x, params):
    """x: (B, data_dim) f32; params: packed kernel params (see pack_params)."""
    batch, data_dim = x.shape
    z_dim = params["fc_w"].shape[-1]
    assert data_dim % 8 == 0, "data_dim must be divisible by 8 (3 poolings)"

    # One-time input prep (inside jit): per-sample zero-padded, channel-last,
    # lane-dense flat layout (B*(D+2), 128) with the scalar series in ch 0.
    xp = jnp.pad(x.astype(jnp.float32), ((0, 0), (1, 1)))           # (B, D+2)
    x_emb = jnp.pad(xp.reshape(batch * (data_dim + 2), 1),
                    ((0, 0), (0, C_PAD - 1)))                        # (M1, 128)

    n_res_blocks = params["res_w"].shape[0] // 6
    kern = functools.partial(_fused_forward_kernel,
                             batch, data_dim, z_dim, n_res_blocks)
    ins = (x_emb, params["stem_w"], params["res_w"], params["res_b"],
           params["res_g"], params["res_be"], params["fc_w"])
    return pl.pallas_call(
        kern,
        out_shape=jax.ShapeDtypeStruct((batch, z_dim), jnp.float32),
        grid=(1,),
        in_specs=[_full_spec(a.shape) for a in ins],
        out_specs=pl.BlockSpec((batch, z_dim), lambda i: (0, 0)),
        compiler_params=pltpu.CompilerParams(
            dimension_semantics=("arbitrary",)),
    )(*ins)


# ------------------------- parameter construction ---------------------------

def init_raw_params(key, data_dim, z_dim):
    """Torch-layout random parameters (deterministic test data)."""
    keys = jax.random.split(key, 64)
    it = iter(keys)

    def nrm(shape, scale=0.05):
        return scale * jax.random.normal(next(it), shape, jnp.float32)

    raw = {
        "conv1_w": nrm((32, 1, 3)),       # Conv1d(1, 32, 3, bias=False)
        "conv2_w": nrm((64, 32, 3)),      # Conv1d(32, 64, 3, bias=False)
        "conv3_w": nrm((128, 64, 3)),     # Conv1d(64, 128, 3, bias=False)
        "resblocks": [],
        "fc1_w": nrm((z_dim, 128 * (data_dim // 8))),  # Linear, bias=False
    }
    for _ in range(4):
        raw["resblocks"].append({
            "w1": nrm((128, 128, 3)), "b1": nrm((128,)),
            "g1": 1.0 + nrm((128,)), "be1": nrm((128,)),
            "w2": nrm((128, 128, 3)), "b2": nrm((128,)),
            "g2": 1.0 + nrm((128,)), "be2": nrm((128,)),
        })
    return raw


def pack_params(raw, data_dim, z_dim):
    """One-time host-side repack: per-tap (Cin,Cout) weight slices padded to
    128x128, resblock params stacked, fc1 pre-permuted to (L, C, z_dim)."""
    lf = data_dim // 8

    def conv_taps(w):                     # (Cout, Cin, 3) -> (3, 128, 128)
        cout, cin, _ = w.shape
        taps = jnp.transpose(w, (2, 1, 0))                # (3, Cin, Cout)
        return jnp.pad(taps, ((0, 0), (0, C_PAD - cin), (0, C_PAD - cout)))

    stem_w = jnp.concatenate([conv_taps(raw["conv1_w"]),
                              conv_taps(raw["conv2_w"]),
                              conv_taps(raw["conv3_w"])], axis=0)   # (9,128,128)
    res_w = jnp.concatenate(
        [conv_taps(p[name]) for p in raw["resblocks"] for name in ("w1", "w2")],
        axis=0)                                                     # (24,128,128)

    def stack_rows(names):
        rows = [p[n].reshape(1, C_PAD)
                for p in raw["resblocks"] for n in names]
        return jnp.stack(rows, axis=0)                              # (8,1,128)

    # torch flatten of (B,C,L) is C-major: flat idx = c*L + l
    fc_w = jnp.transpose(raw["fc1_w"].reshape(z_dim, C_PAD, lf), (2, 1, 0))

    return {"stem_w": stem_w, "res_w": res_w,
            "res_b": stack_rows(("b1", "b2")),
            "res_g": stack_rows(("g1", "g2")),
            "res_be": stack_rows(("be1", "be2")),
            "fc_w": fc_w}


# ------------------------ pure-JAX reference (check) -------------------------

def _ref_conv1d_k3_p1(x_blc, w_oik, bias):
    B, L, cin = x_blc.shape
    cout = w_oik.shape[0]
    xp = jnp.pad(x_blc, ((0, 0), (1, 1), (0, 0)))
    patches = jnp.concatenate([xp[:, k:k + L, :] for k in range(3)], axis=-1)
    wmat = jnp.transpose(w_oik, (2, 1, 0)).reshape(3 * cin, cout)
    y = jnp.dot(patches.reshape(B * L, 3 * cin), wmat, precision=_HI) + bias
    return y.reshape(B, L, cout)


def _ref_bn(x_mc, eps, gamma=None, beta=None):
    mean = jnp.mean(x_mc, axis=0, keepdims=True)
    var = jnp.mean(jnp.square(x_mc - mean), axis=0, keepdims=True)
    y = (x_mc - mean) * jax.lax.rsqrt(var + eps)
    if gamma is not None:
        y = y * gamma + beta
    return y


def _ref_pool2(x_blc):
    B, L, C = x_blc.shape
    return jnp.max(x_blc.reshape(B, L // 2, 2, C), axis=2)


def reference_forward(x, raw):
    B, D = x.shape
    h = x[:, :, None].astype(jnp.float32)
    L = D
    for w, c in ((raw["conv1_w"], 32), (raw["conv2_w"], 64), (raw["conv3_w"], 128)):
        h = _ref_conv1d_k3_p1(h, w, jnp.zeros((c,), jnp.float32))
        h = jnp.maximum(_ref_bn(h.reshape(B * L, c), 1e-4), 0.0).reshape(B, L, c)
        h = _ref_pool2(h)
        L //= 2
    for p in raw["resblocks"]:
        idn = h
        y = _ref_conv1d_k3_p1(h, p["w1"], p["b1"])
        y = jnp.maximum(_ref_bn(y.reshape(B * L, 128), 1e-5, p["g1"], p["be1"]),
                        0.0).reshape(B, L, 128)
        y = _ref_conv1d_k3_p1(y, p["w2"], p["b2"])
        y = _ref_bn(y.reshape(B * L, 128), 1e-5, p["g2"], p["be2"]).reshape(B, L, 128)
        h = jnp.maximum(y + idn, 0.0)
    flat = jnp.transpose(h, (0, 2, 1)).reshape(B, 128 * L)
    return jnp.dot(flat, raw["fc1_w"].T, precision=_HI)


# ----------------------------------- main ------------------------------------

if __name__ == "__main__":
    data_dim, z_dim, batch = 32, 32, 4
    key = jax.random.PRNGKey(0)
    kp, kx = jax.random.split(key)
    raw = init_raw_params(kp, data_dim, z_dim)
    params = pack_params(raw, data_dim, z_dim)
    x = jax.random.normal(kx, (batch, data_dim), jnp.float32)

    out = jax.block_until_ready(jax.jit(swat_lenet_resnet_forward)(x, params))
    assert out.shape == (batch, z_dim), out.shape
    assert bool(jnp.all(jnp.isfinite(out)))

    # cross-check against a pure-JAX reference (loose tol: MXU f32 passes
    # differ from HIGHEST-precision XLA matmuls; structural bugs give O(1) err)
    ref = jax.block_until_ready(jax.jit(reference_forward)(x, raw))
    err = float(jnp.max(jnp.abs(out - ref)))
    scale = float(jnp.max(jnp.abs(ref)))
    assert err <= 0.05 * scale + 1e-4, (err, scale)

    print("KERNEL_OK")
</pallas_src>

<mosaic_0001>
module attributes {stable_mosaic.version = 11 : i64} {
  func.func @_fused_forward_kernel(%arg0: i32, %arg1: memref<136x128xf32, #tpu.memory_space<vmem>>, %arg2: memref<9x128x128xf32, #tpu.memory_space<vmem>>, %arg3: memref<24x128x128xf32, #tpu.memory_space<vmem>>, %arg4: memref<8x1x128xf32, #tpu.memory_space<vmem>>, %arg5: memref<8x1x128xf32, #tpu.memory_space<vmem>>, %arg6: memref<8x1x128xf32, #tpu.memory_space<vmem>>, %arg7: memref<4x128x32xf32, #tpu.memory_space<vmem>>, %arg8: memref<4x32xf32, #tpu.memory_space<vmem>>) attributes {dimension_semantics = [#tpu.dimension_semantics<arbitrary>], iteration_bounds = array<i64: 1>, scalar_prefetch = 0 : i64, scratch_operands = 0 : i64, tpu.core_type = #tpu.core_type<tc>, window_params = [{pipeline_mode = #tpu.pipeline_mode<synchronous>, transform_indices = @transform_0, window_bounds = array<i64: 136, 128>}, {pipeline_mode = #tpu.pipeline_mode<synchronous>, transform_indices = @transform_1, window_bounds = array<i64: 9, 128, 128>}, {pipeline_mode = #tpu.pipeline_mode<synchronous>, transform_indices = @transform_2, window_bounds = array<i64: 24, 128, 128>}, {pipeline_mode = #tpu.pipeline_mode<synchronous>, transform_indices = @transform_3, window_bounds = array<i64: 8, 1, 128>}, {pipeline_mode = #tpu.pipeline_mode<synchronous>, transform_indices = @transform_4, window_bounds = array<i64: 8, 1, 128>}, {pipeline_mode = #tpu.pipeline_mode<synchronous>, transform_indices = @transform_5, window_bounds = array<i64: 8, 1, 128>}, {pipeline_mode = #tpu.pipeline_mode<synchronous>, transform_indices = @transform_6, window_bounds = array<i64: 4, 128, 32>}, {pipeline_mode = #tpu.pipeline_mode<synchronous>, transform_indices = @transform_7, window_bounds = array<i64: 4, 32>}]} {
    %c0 = arith.constant 0 : index
    %c0_0 = arith.constant 0 : index
    %0 = vector.load %arg1[%c0, %c0_0] : memref<136x128xf32, #tpu.memory_space<vmem>>, vector<136x128xf32>
    %1 = tpu.iota {dimensions = array<i32: 0>} : vector<136x1xi32>
    %c1_i32 = arith.constant 1 : i32
    %2 = vector.broadcast %c1_i32 : i32 to vector<136x1xi32>
    %3 = arith.cmpi sge, %1, %2 : vector<136x1xi32>
    %c32_i32 = arith.constant 32 : i32
    %4 = vector.broadcast %c32_i32 : i32 to vector<136x1xi32>
    %5 = arith.cmpi sle, %1, %4 : vector<136x1xi32>
    %6 = arith.andi %3, %5 : vector<136x1xi1>
    %c35_i32 = arith.constant 35 : i32
    %7 = vector.broadcast %c35_i32 : i32 to vector<136x1xi32>
    %8 = arith.cmpi sge, %1, %7 : vector<136x1xi32>
    %c66_i32 = arith.constant 66 : i32
    %9 = vector.broadcast %c66_i32 : i32 to vector<136x1xi32>
    %10 = arith.cmpi sle, %1, %9 : vector<136x1xi32>
    %11 = arith.andi %8, %10 : vector<136x1xi1>
    %12 = arith.ori %6, %11 : vector<136x1xi1>
    %c69_i32 = arith.constant 69 : i32
    %13 = vector.broadcast %c69_i32 : i32 to vector<136x1xi32>
    %14 = arith.cmpi sge, %1, %13 : vector<136x1xi32>
    %c100_i32 = arith.constant 100 : i32
    %15 = vector.broadcast %c100_i32 : i32 to vector<136x1xi32>
    %16 = arith.cmpi sle, %1, %15 : vector<136x1xi32>
    %17 = arith.andi %14, %16 : vector<136x1xi1>
    %18 = arith.ori %12, %17 : vector<136x1xi1>
    %c103_i32 = arith.constant 103 : i32
    %19 = vector.broadcast %c103_i32 : i32 to vector<136x1xi32>
    %20 = arith.cmpi sge, %1, %19 : vector<136x1xi32>
    %c134_i32 = arith.constant 134 : i32
    %21 = vector.broadcast %c134_i32 : i32 to vector<136x1xi32>
    %22 = arith.cmpi sle, %1, %21 : vector<136x1xi32>
    %23 = arith.andi %20, %22 : vector<136x1xi1>
    %24 = arith.ori %18, %23 : vector<136x1xi1>
    %cst = arith.constant 1.000000e+00 : f32
    %cst_1 = arith.constant 0.000000e+00 : f32
    %25 = vector.broadcast %cst : f32 to vector<136x1xf32>
    %26 = vector.broadcast %cst_1 : f32 to vector<136x1xf32>
    %27 = arith.select %24, %25, %26 : vector<136x1xi1>, vector<136x1xf32>
    %28 = tpu.iota {dimensions = array<i32: 0>} : vector<136x136xi32>
    %29 = tpu.iota {dimensions = array<i32: 1>} : vector<136x136xi32>
    %c1_i32_2 = arith.constant 1 : i32
    %30 = vector.broadcast %c1_i32_2 : i32 to vector<136x136xi32>
    %31 = arith.subi %28, %30 : vector<136x136xi32>
    %32 = arith.cmpi eq, %29, %31 : vector<136x136xi32>
    %cst_3 = arith.constant 1.000000e+00 : f32
    %cst_4 = arith.constant 0.000000e+00 : f32
    %33 = vector.broadcast %cst_3 : f32 to vector<136x136xf32>
    %34 = vector.broadcast %cst_4 : f32 to vector<136x136xf32>
    %35 = arith.select %32, %33, %34 : vector<136x136xi1>, vector<136x136xf32>
    %c1_i32_5 = arith.constant 1 : i32
    %36 = vector.broadcast %c1_i32_5 : i32 to vector<136x136xi32>
    %37 = arith.addi %28, %36 : vector<136x136xi32>
    %38 = arith.cmpi eq, %29, %37 : vector<136x136xi32>
    %cst_6 = arith.constant 1.000000e+00 : f32
    %cst_7 = arith.constant 0.000000e+00 : f32
    %39 = vector.broadcast %cst_6 : f32 to vector<136x136xf32>
    %40 = vector.broadcast %cst_7 : f32 to vector<136x136xf32>
    %41 = arith.select %38, %39, %40 : vector<136x136xi1>, vector<136x136xf32>
    %cst_8 = arith.constant dense<0.000000e+00> : vector<136x128xf32>
    %42 = tpu.matmul %35, %0, %cst_8 {dimension_numbers = #tpu.dot_dimension_numbers<[1], [0], [0], [1], [0, 0, 1, 1], [], []>} : vector<136x136xf32>, vector<136x128xf32>, vector<136x128xf32> -> vector<136x128xf32>
    %cst_9 = arith.constant dense<0.000000e+00> : vector<136x128xf32>
    %43 = tpu.matmul %41, %0, %cst_9 {dimension_numbers = #tpu.dot_dimension_numbers<[1], [0], [0], [1], [0, 0, 1, 1], [], []>} : vector<136x136xf32>, vector<136x128xf32>, vector<136x128xf32> -> vector<136x128xf32>
    %c0_10 = arith.constant 0 : index
    %c0_11 = arith.constant 0 : index
    %c0_12 = arith.constant 0 : index
    %44 = vector.load %arg2[%c0_10, %c0_11, %c0_12] : memref<9x128x128xf32, #tpu.memory_space<vmem>>, vector<1x128x128xf32>
    %45 = vector.shape_cast %44 : vector<1x128x128xf32> to vector<128x128xf32>
    %cst_13 = arith.constant dense<0.000000e+00> : vector<136x128xf32>
    %46 = tpu.matmul %42, %45, %cst_13 {dimension_numbers = #tpu.dot_dimension_numbers<[1], [0], [0], [1], [0, 0, 1, 1], [], []>} : vector<136x128xf32>, vector<128x128xf32>, vector<136x128xf32> -> vector<136x128xf32>
    %c1 = arith.constant 1 : index
    %c0_14 = arith.constant 0 : index
    %c0_15 = arith.constant 0 : index
    %47 = vector.load %arg2[%c1, %c0_14, %c0_15] : memref<9x128x128xf32, #tpu.memory_space<vmem>>, vector<1x128x128xf32>
    %48 = vector.shape_cast %47 : vector<1x128x128xf32> to vector<128x128xf32>
    %cst_16 = arith.constant dense<0.000000e+00> : vector<136x128xf32>
    %49 = tpu.matmul %0, %48, %cst_16 {dimension_numbers = #tpu.dot_dimension_numbers<[1], [0], [0], [1], [0, 0, 1, 1], [], []>} : vector<136x128xf32>, vector<128x128xf32>, vector<136x128xf32> -> vector<136x128xf32>
    %50 = arith.addf %46, %49 : vector<136x128xf32>
    %c2 = arith.constant 2 : index
    %c0_17 = arith.constant 0 : index
    %c0_18 = arith.constant 0 : index
    %51 = vector.load %arg2[%c2, %c0_17, %c0_18] : memref<9x128x128xf32, #tpu.memory_space<vmem>>, vector<1x128x128xf32>
    %52 = vector.shape_cast %51 : vector<1x128x128xf32> to vector<128x128xf32>
    %cst_19 = arith.constant dense<0.000000e+00> : vector<136x128xf32>
    %53 = tpu.matmul %43, %52, %cst_19 {dimension_numbers = #tpu.dot_dimension_numbers<[1], [0], [0], [1], [0, 0, 1, 1], [], []>} : vector<136x128xf32>, vector<128x128xf32>, vector<136x128xf32> -> vector<136x128xf32>
    %54 = arith.addf %50, %53 : vector<136x128xf32>
    %55 = vector.broadcast %27 : vector<136x1xf32> to vector<136x128xf32>
    %56 = arith.mulf %54, %55 : vector<136x128xf32>
    %cst_20 = arith.constant dense<0.000000e+00> : vector<128xf32>
    %57 = vector.multi_reduction <add>, %56, %cst_20 [0] : vector<136x128xf32> to vector<128xf32>
    %58 = vector.shape_cast %57 : vector<128xf32> to vector<1x128xf32>
    %cst_21 = arith.constant 7.812500e-03 : f32
    %59 = vector.broadcast %cst_21 : f32 to vector<1x128xf32>
    %60 = arith.mulf %58, %59 : vector<1x128xf32>
    %61 = vector.broadcast %60 : vector<1x128xf32> to vector<136x128xf32>
    %62 = arith.subf %56, %61 : vector<136x128xf32>
    %63 = vector.broadcast %27 : vector<136x1xf32> to vector<136x128xf32>
    %64 = arith.mulf %62, %63 : vector<136x128xf32>
    %65 = arith.mulf %64, %64 : vector<136x128xf32>
    %cst_22 = arith.constant dense<0.000000e+00> : vector<128xf32>
    %66 = vector.multi_reduction <add>, %65, %cst_22 [0] : vector<136x128xf32> to vector<128xf32>
    %67 = vector.shape_cast %66 : vector<128xf32> to vector<1x128xf32>
    %cst_23 = arith.constant 7.812500e-03 : f32
    %68 = vector.broadcast %cst_23 : f32 to vector<1x128xf32>
    %69 = arith.mulf %67, %68 : vector<1x128xf32>
    %cst_24 = arith.constant 9.99999974E-5 : f32
    %70 = vector.broadcast %cst_24 : f32 to vector<1x128xf32>
    %71 = arith.addf %69, %70 : vector<1x128xf32>
    %72 = math.rsqrt %71 : vector<1x128xf32>
    %73 = vector.broadcast %72 : vector<1x128xf32> to vector<136x128xf32>
    %74 = arith.mulf %62, %73 : vector<136x128xf32>
    %cst_25 = arith.constant 0.000000e+00 : f32
    %75 = vector.broadcast %cst_25 : f32 to vector<136x128xf32>
    %76 = arith.maximumf %74, %75 : vector<136x128xf32>
    %77 = vector.broadcast %27 : vector<136x1xf32> to vector<136x128xf32>
    %78 = arith.mulf %76, %77 : vector<136x128xf32>
    %79 = tpu.iota {dimensions = array<i32: 0>} : vector<72x136xi32>
    %80 = tpu.iota {dimensions = array<i32: 1>} : vector<72x136xi32>
    %c0_i32 = arith.constant 0 : i32
    %81 = vector.broadcast %c0_i32 : i32 to vector<72x136xi32>
    %82 = arith.subi %79, %81 : vector<72x136xi32>
    %c0_i32_26 = arith.constant 0 : i32
    %83 = vector.broadcast %c0_i32_26 : i32 to vector<72x136xi32>
    %84 = arith.subi %80, %83 : vector<72x136xi32>
    %c1_i32_27 = arith.constant 1 : i32
    %85 = vector.broadcast %c1_i32_27 : i32 to vector<72x136xi32>
    %86 = arith.cmpi sge, %82, %85 : vector<72x136xi32>
    %c16_i32 = arith.constant 16 : i32
    %87 = vector.broadcast %c16_i32 : i32 to vector<72x136xi32>
    %88 = arith.cmpi sle, %82, %87 : vector<72x136xi32>
    %89 = arith.andi %86, %88 : vector<72x136xi1>
    %c2_i32 = arith.constant 2 : i32
    %90 = vector.broadcast %c2_i32 : i32 to vector<72x136xi32>
    %91 = arith.muli %90, %82 : vector<72x136xi32>
    %c1_i32_28 = arith.constant 1 : i32
    %92 = vector.broadcast %c1_i32_28 : i32 to vector<72x136xi32>
    %93 = arith.subi %91, %92 : vector<72x136xi32>
    %94 = arith.cmpi eq, %84, %93 : vector<72x136xi32>
    %95 = arith.andi %89, %94 : vector<72x136xi1>
    %c2_i32_29 = arith.constant 2 : i32
    %96 = vector.broadcast %c2_i32_29 : i32 to vector<72x136xi32>
    %97 = arith.muli %96, %82 : vector<72x136xi32>
    %98 = arith.cmpi eq, %84, %97 : vector<72x136xi32>
    %99 = arith.andi %89, %98 : vector<72x136xi1>
    %c18_i32 = arith.constant 18 : i32
    %100 = vector.broadcast %c18_i32 : i32 to vector<72x136xi32>
    %101 = arith.subi %79, %100 : vector<72x136xi32>
    %c34_i32 = arith.constant 34 : i32
    %102 = vector.broadcast %c34_i32 : i32 to vector<72x136xi32>
    %103 = arith.subi %80, %102 : vector<72x136xi32>
    %c1_i32_30 = arith.constant 1 : i32
    %104 = vector.broadcast %c1_i32_30 : i32 to vector<72x136xi32>
    %105 = arith.cmpi sge, %101, %104 : vector<72x136xi32>
    %c16_i32_31 = arith.constant 16 : i32
    %106 = vector.broadcast %c16_i32_31 : i32 to vector<72x136xi32>
    %107 = arith.cmpi sle, %101, %106 : vector<72x136xi32>
    %108 = arith.andi %105, %107 : vector<72x136xi1>
    %c2_i32_32 = arith.constant 2 : i32
    %109 = vector.broadcast %c2_i32_32 : i32 to vector<72x136xi32>
    %110 = arith.muli %109, %101 : vector<72x136xi32>
    %c1_i32_33 = arith.constant 1 : i32
    %111 = vector.broadcast %c1_i32_33 : i32 to vector<72x136xi32>
    %112 = arith.subi %110, %111 : vector<72x136xi32>
    %113 = arith.cmpi eq, %103, %112 : vector<72x136xi32>
    %114 = arith.andi %108, %113 : vector<72x136xi1>
    %c2_i32_34 = arith.constant 2 : i32
    %115 = vector.broadcast %c2_i32_34 : i32 to vector<72x136xi32>
    %116 = arith.muli %115, %101 : vector<72x136xi32>
    %117 = arith.cmpi eq, %103, %116 : vector<72x136xi32>
    %118 = arith.andi %108, %117 : vector<72x136xi1>
    %119 = arith.ori %95, %114 : vector<72x136xi1>
    %120 = arith.ori %99, %118 : vector<72x136xi1>
    %c36_i32 = arith.constant 36 : i32
    %121 = vector.broadcast %c36_i32 : i32 to vector<72x136xi32>
    %122 = arith.subi %79, %121 : vector<72x136xi32>
    %c68_i32 = arith.constant 68 : i32
    %123 = vector.broadcast %c68_i32 : i32 to vector<72x136xi32>
    %124 = arith.subi %80, %123 : vector<72x136xi32>
    %c1_i32_35 = arith.constant 1 : i32
    %125 = vector.broadcast %c1_i32_35 : i32 to vector<72x136xi32>
    %126 = arith.cmpi sge, %122, %125 : vector<72x136xi32>
    %c16_i32_36 = arith.constant 16 : i32
    %127 = vector.broadcast %c16_i32_36 : i32 to vector<72x136xi32>
    %128 = arith.cmpi sle, %122, %127 : vector<72x136xi32>
    %129 = arith.andi %126, %128 : vector<72x136xi1>
    %c2_i32_37 = arith.constant 2 : i32
    %130 = vector.broadcast %c2_i32_37 : i32 to vector<72x136xi32>
    %131 = arith.muli %130, %122 : vector<72x136xi32>
    %c1_i32_38 = arith.constant 1 : i32
    %132 = vector.broadcast %c1_i32_38 : i32 to vector<72x136xi32>
    %133 = arith.subi %131, %132 : vector<72x136xi32>
    %134 = arith.cmpi eq, %124, %133 : vector<72x136xi32>
    %135 = arith.andi %129, %134 : vector<72x136xi1>
    %c2_i32_39 = arith.constant 2 : i32
    %136 = vector.broadcast %c2_i32_39 : i32 to vector<72x136xi32>
    %137 = arith.muli %136, %122 : vector<72x136xi32>
    %138 = arith.cmpi eq, %124, %137 : vector<72x136xi32>
    %139 = arith.andi %129, %138 : vector<72x136xi1>
    %140 = arith.ori %119, %135 : vector<72x136xi1>
    %141 = arith.ori %120, %139 : vector<72x136xi1>
    %c54_i32 = arith.constant 54 : i32
    %142 = vector.broadcast %c54_i32 : i32 to vector<72x136xi32>
    %143 = arith.subi %79, %142 : vector<72x136xi32>
    %c102_i32 = arith.constant 102 : i32
    %144 = vector.broadcast %c102_i32 : i32 to vector<72x136xi32>
    %145 = arith.subi %80, %144 : vector<72x136xi32>
    %c1_i32_40 = arith.constant 1 : i32
    %146 = vector.broadcast %c1_i32_40 : i32 to vector<72x136xi32>
    %147 = arith.cmpi sge, %143, %146 : vector<72x136xi32>
    %c16_i32_41 = arith.constant 16 : i32
    %148 = vector.broadcast %c16_i32_41 : i32 to vector<72x136xi32>
    %149 = arith.cmpi sle, %143, %148 : vector<72x136xi32>
    %150 = arith.andi %147, %149 : vector<72x136xi1>
    %c2_i32_42 = arith.constant 2 : i32
    %151 = vector.broadcast %c2_i32_42 : i32 to vector<72x136xi32>
    %152 = arith.muli %151, %143 : vector<72x136xi32>
    %c1_i32_43 = arith.constant 1 : i32
    %153 = vector.broadcast %c1_i32_43 : i32 to vector<72x136xi32>
    %154 = arith.subi %152, %153 : vector<72x136xi32>
    %155 = arith.cmpi eq, %145, %154 : vector<72x136xi32>
    %156 = arith.andi %150, %155 : vector<72x136xi1>
    %c2_i32_44 = arith.constant 2 : i32
    %157 = vector.broadcast %c2_i32_44 : i32 to vector<72x136xi32>
    %158 = arith.muli %157, %143 : vector<72x136xi32>
    %159 = arith.cmpi eq, %145, %158 : vector<72x136xi32>
    %160 = arith.andi %150, %159 : vector<72x136xi1>
    %161 = arith.ori %140, %156 : vector<72x136xi1>
    %162 = arith.ori %141, %160 : vector<72x136xi1>
    %cst_45 = arith.constant 1.000000e+00 : f32
    %cst_46 = arith.constant 0.000000e+00 : f32
    %163 = vector.broadcast %cst_45 : f32 to vector<72x136xf32>
    %164 = vector.broadcast %cst_46 : f32 to vector<72x136xf32>
    %165 = arith.select %161, %163, %164 : vector<72x136xi1>, vector<72x136xf32>
    %cst_47 = arith.constant 1.000000e+00 : f32
    %cst_48 = arith.constant 0.000000e+00 : f32
    %166 = vector.broadcast %cst_47 : f32 to vector<72x136xf32>
    %167 = vector.broadcast %cst_48 : f32 to vector<72x136xf32>
    %168 = arith.select %162, %166, %167 : vector<72x136xi1>, vector<72x136xf32>
    %cst_49 = arith.constant dense<0.000000e+00> : vector<72x128xf32>
    %169 = tpu.matmul %165, %78, %cst_49 {dimension_numbers = #tpu.dot_dimension_numbers<[1], [0], [0], [1], [0, 0, 1, 1], [], []>} : vector<72x136xf32>, vector<136x128xf32>, vector<72x128xf32> -> vector<72x128xf32>
    %cst_50 = arith.constant dense<0.000000e+00> : vector<72x128xf32>
    %170 = tpu.matmul %168, %78, %cst_50 {dimension_numbers = #tpu.dot_dimension_numbers<[1], [0], [0], [1], [0, 0, 1, 1], [], []>} : vector<72x136xf32>, vector<136x128xf32>, vector<72x128xf32> -> vector<72x128xf32>
    %171 = arith.maximumf %169, %170 : vector<72x128xf32>
    %172 = tpu.iota {dimensions = array<i32: 0>} : vector<72x1xi32>
    %c1_i32_51 = arith.constant 1 : i32
    %173 = vector.broadcast %c1_i32_51 : i32 to vector<72x1xi32>
    %174 = arith.cmpi sge, %172, %173 : vector<72x1xi32>
    %c16_i32_52 = arith.constant 16 : i32
    %175 = vector.broadcast %c16_i32_52 : i32 to vector<72x1xi32>
    %176 = arith.cmpi sle, %172, %175 : vector<72x1xi32>
    %177 = arith.andi %174, %176 : vector<72x1xi1>
    %c19_i32 = arith.constant 19 : i32
    %178 = vector.broadcast %c19_i32 : i32 to vector<72x1xi32>
    %179 = arith.cmpi sge, %172, %178 : vector<72x1xi32>
    %c34_i32_53 = arith.constant 34 : i32
    %180 = vector.broadcast %c34_i32_53 : i32 to vector<72x1xi32>
    %181 = arith.cmpi sle, %172, %180 : vector<72x1xi32>
    %182 = arith.andi %179, %181 : vector<72x1xi1>
    %183 = arith.ori %177, %182 : vector<72x1xi1>
    %c37_i32 = arith.constant 37 : i32
    %184 = vector.broadcast %c37_i32 : i32 to vector<72x1xi32>
    %185 = arith.cmpi sge, %172, %184 : vector<72x1xi32>
    %c52_i32 = arith.constant 52 : i32
    %186 = vector.broadcast %c52_i32 : i32 to vector<72x1xi32>
    %187 = arith.cmpi sle, %172, %186 : vector<72x1xi32>
    %188 = arith.andi %185, %187 : vector<72x1xi1>
    %189 = arith.ori %183, %188 : vector<72x1xi1>
    %c55_i32 = arith.constant 55 : i32
    %190 = vector.broadcast %c55_i32 : i32 to vector<72x1xi32>
    %191 = arith.cmpi sge, %172, %190 : vector<72x1xi32>
    %c70_i32 = arith.constant 70 : i32
    %192 = vector.broadcast %c70_i32 : i32 to vector<72x1xi32>
    %193 = arith.cmpi sle, %172, %192 : vector<72x1xi32>
    %194 = arith.andi %191, %193 : vector<72x1xi1>
    %195 = arith.ori %189, %194 : vector<72x1xi1>
    %cst_54 = arith.constant 1.000000e+00 : f32
    %cst_55 = arith.constant 0.000000e+00 : f32
    %196 = vector.broadcast %cst_54 : f32 to vector<72x1xf32>
    %197 = vector.broadcast %cst_55 : f32 to vector<72x1xf32>
    %198 = arith.select %195, %196, %197 : vector<72x1xi1>, vector<72x1xf32>
    %199 = tpu.iota {dimensions = array<i32: 0>} : vector<72x72xi32>
    %200 = tpu.iota {dimensions = array<i32: 1>} : vector<72x72xi32>
    %c1_i32_56 = arith.constant 1 : i32
    %201 = vector.broadcast %c1_i32_56 : i32 to vector<72x72xi32>
    %202 = arith.subi %199, %201 : vector<72x72xi32>
    %203 = arith.cmpi eq, %200, %202 : vector<72x72xi32>
    %cst_57 = arith.constant 1.000000e+00 : f32
    %cst_58 = arith.constant 0.000000e+00 : f32
    %204 = vector.broadcast %cst_57 : f32 to vector<72x72xf32>
    %205 = vector.broadcast %cst_58 : f32 to vector<72x72xf32>
    %206 = arith.select %203, %204, %205 : vector<72x72xi1>, vector<72x72xf32>
    %c1_i32_59 = arith.constant 1 : i32
    %207 = vector.broadcast %c1_i32_59 : i32 to vector<72x72xi32>
    %208 = arith.addi %199, %207 : vector<72x72xi32>
    %209 = arith.cmpi eq, %200, %208 : vector<72x72xi32>
    %cst_60 = arith.constant 1.000000e+00 : f32
    %cst_61 = arith.constant 0.000000e+00 : f32
    %210 = vector.broadcast %cst_60 : f32 to vector<72x72xf32>
    %211 = vector.broadcast %cst_61 : f32 to vector<72x72xf32>
    %212 = arith.select %209, %210, %211 : vector<72x72xi1>, vector<72x72xf32>
    %cst_62 = arith.constant dense<0.000000e+00> : vector<72x128xf32>
    %213 = tpu.matmul %206, %171, %cst_62 {dimension_numbers = #tpu.dot_dimension_numbers<[1], [0], [0], [1], [0, 0, 1, 1], [], []>} : vector<72x72xf32>, vector<72x128xf32>, vector<72x128xf32> -> vector<72x128xf32>
    %cst_63 = arith.constant dense<0.000000e+00> : vector<72x128xf32>
    %214 = tpu.matmul %212, %171, %cst_63 {dimension_numbers = #tpu.dot_dimension_numbers<[1], [0], [0], [1], [0, 0, 1, 1], [], []>} : vector<72x72xf32>, vector<72x128xf32>, vector<72x128xf32> -> vector<72x128xf32>
    %c3 = arith.constant 3 : index
    %c0_64 = arith.constant 0 : index
    %c0_65 = arith.constant 0 : index
    %215 = vector.load %arg2[%c3, %c0_64, %c0_65] : memref<9x128x128xf32, #tpu.memory_space<vmem>>, vector<1x128x128xf32>
    %216 = vector.shape_cast %215 : vector<1x128x128xf32> to vector<128x128xf32>
    %cst_66 = arith.constant dense<0.000000e+00> : vector<72x128xf32>
    %217 = tpu.matmul %213, %216, %cst_66 {dimension_numbers = #tpu.dot_dimension_numbers<[1], [0], [0], [1], [0, 0, 1, 1], [], []>} : vector<72x128xf32>, vector<128x128xf32>, vector<72x128xf32> -> vector<72x128xf32>
    %c4 = arith.constant 4 : index
    %c0_67 = arith.constant 0 : index
    %c0_68 = arith.constant 0 : index
    %218 = vector.load %arg2[%c4, %c0_67, %c0_68] : memref<9x128x128xf32, #tpu.memory_space<vmem>>, vector<1x128x128xf32>
    %219 = vector.shape_cast %218 : vector<1x128x128xf32> to vector<128x128xf32>
    %cst_69 = arith.constant dense<0.000000e+00> : vector<72x128xf32>
    %220 = tpu.matmul %171, %219, %cst_69 {dimension_numbers = #tpu.dot_dimension_numbers<[1], [0], [0], [1], [0, 0, 1, 1], [], []>} : vector<72x128xf32>, vector<128x128xf32>, vector<72x128xf32> -> vector<72x128xf32>
    %221 = arith.addf %217, %220 : vector<72x128xf32>
    %c5 = arith.constant 5 : index
    %c0_70 = arith.constant 0 : index
    %c0_71 = arith.constant 0 : index
    %222 = vector.load %arg2[%c5, %c0_70, %c0_71] : memref<9x128x128xf32, #tpu.memory_space<vmem>>, vector<1x128x128xf32>
    %223 = vector.shape_cast %222 : vector<1x128x128xf32> to vector<128x128xf32>
    %cst_72 = arith.constant dense<0.000000e+00> : vector<72x128xf32>
    %224 = tpu.matmul %214, %223, %cst_72 {dimension_numbers = #tpu.dot_dimension_numbers<[1], [0], [0], [1], [0, 0, 1, 1], [], []>} : vector<72x128xf32>, vector<128x128xf32>, vector<72x128xf32> -> vector<72x128xf32>
    %225 = arith.addf %221, %224 : vector<72x128xf32>
    %226 = vector.broadcast %198 : vector<72x1xf32> to vector<72x128xf32>
    %227 = arith.mulf %225, %226 : vector<72x128xf32>
    %cst_73 = arith.constant dense<0.000000e+00> : vector<128xf32>
    %228 = vector.multi_reduction <add>, %227, %cst_73 [0] : vector<72x128xf32> to vector<128xf32>
    %229 = vector.shape_cast %228 : vector<128xf32> to vector<1x128xf32>
    %cst_74 = arith.constant 1.562500e-02 : f32
    %230 = vector.broadcast %cst_74 : f32 to vector<1x128xf32>
    %231 = arith.mulf %229, %230 : vector<1x128xf32>
    %232 = vector.broadcast %231 : vector<1x128xf32> to vector<72x128xf32>
    %233 = arith.subf %227, %232 : vector<72x128xf32>
    %234 = vector.broadcast %198 : vector<72x1xf32> to vector<72x128xf32>
    %235 = arith.mulf %233, %234 : vector<72x128xf32>
    %236 = arith.mulf %235, %235 : vector<72x128xf32>
    %cst_75 = arith.constant dense<0.000000e+00> : vector<128xf32>
    %237 = vector.multi_reduction <add>, %236, %cst_75 [0] : vector<72x128xf32> to vector<128xf32>
    %238 = vector.shape_cast %237 : vector<128xf32> to vector<1x128xf32>
    %cst_76 = arith.constant 1.562500e-02 : f32
    %239 = vector.broadcast %cst_76 : f32 to vector<1x128xf32>
    %240 = arith.mulf %238, %239 : vector<1x128xf32>
    %cst_77 = arith.constant 9.99999974E-5 : f32
    %241 = vector.broadcast %cst_77 : f32 to vector<1x128xf32>
    %242 = arith.addf %240, %241 : vector<1x128xf32>
    %243 = math.rsqrt %242 : vector<1x128xf32>
    %244 = vector.broadcast %243 : vector<1x128xf32> to vector<72x128xf32>
    %245 = arith.mulf %233, %244 : vector<72x128xf32>
    %cst_78 = arith.constant 0.000000e+00 : f32
    %246 = vector.broadcast %cst_78 : f32 to vector<72x128xf32>
    %247 = arith.maximumf %245, %246 : vector<72x128xf32>
    %248 = vector.broadcast %198 : vector<72x1xf32> to vector<72x128xf32>
    %249 = arith.mulf %247, %248 : vector<72x128xf32>
    %250 = tpu.iota {dimensions = array<i32: 0>} : vector<40x72xi32>
    %251 = tpu.iota {dimensions = array<i32: 1>} : vector<40x72xi32>
    %c0_i32_79 = arith.constant 0 : i32
    %252 = vector.broadcast %c0_i32_79 : i32 to vector<40x72xi32>
    %253 = arith.subi %250, %252 : vector<40x72xi32>
    %c0_i32_80 = arith.constant 0 : i32
    %254 = vector.broadcast %c0_i32_80 : i32 to vector<40x72xi32>
    %255 = arith.subi %251, %254 : vector<40x72xi32>
    %c1_i32_81 = arith.constant 1 : i32
    %256 = vector.broadcast %c1_i32_81 : i32 to vector<40x72xi32>
    %257 = arith.cmpi sge, %253, %256 : vector<40x72xi32>
    %c8_i32 = arith.constant 8 : i32
    %258 = vector.broadcast %c8_i32 : i32 to vector<40x72xi32>
    %259 = arith.cmpi sle, %253, %258 : vector<40x72xi32>
    %260 = arith.andi %257, %259 : vector<40x72xi1>
    %c2_i32_82 = arith.constant 2 : i32
    %261 = vector.broadcast %c2_i32_82 : i32 to vector<40x72xi32>
    %262 = arith.muli %261, %253 : vector<40x72xi32>
    %c1_i32_83 = arith.constant 1 : i32
    %263 = vector.broadcast %c1_i32_83 : i32 to vector<40x72xi32>
    %264 = arith.subi %262, %263 : vector<40x72xi32>
    %265 = arith.cmpi eq, %255, %264 : vector<40x72xi32>
    %266 = arith.andi %260, %265 : vector<40x72xi1>
    %c2_i32_84 = arith.constant 2 : i32
    %267 = vector.broadcast %c2_i32_84 : i32 to vector<40x72xi32>
    %268 = arith.muli %267, %253 : vector<40x72xi32>
    %269 = arith.cmpi eq, %255, %268 : vector<40x72xi32>
    %270 = arith.andi %260, %269 : vector<40x72xi1>
    %c10_i32 = arith.constant 10 : i32
    %271 = vector.broadcast %c10_i32 : i32 to vector<40x72xi32>
    %272 = arith.subi %250, %271 : vector<40x72xi32>
    %c18_i32_85 = arith.constant 18 : i32
    %273 = vector.broadcast %c18_i32_85 : i32 to vector<40x72xi32>
    %274 = arith.subi %251, %273 : vector<40x72xi32>
    %c1_i32_86 = arith.constant 1 : i32
    %275 = vector.broadcast %c1_i32_86 : i32 to vector<40x72xi32>
    %276 = arith.cmpi sge, %272, %275 : vector<40x72xi32>
    %c8_i32_87 = arith.constant 8 : i32
    %277 = vector.broadcast %c8_i32_87 : i32 to vector<40x72xi32>
    %278 = arith.cmpi sle, %272, %277 : vector<40x72xi32>
    %279 = arith.andi %276, %278 : vector<40x72xi1>
    %c2_i32_88 = arith.constant 2 : i32
    %280 = vector.broadcast %c2_i32_88 : i32 to vector<40x72xi32>
    %281 = arith.muli %280, %272 : vector<40x72xi32>
    %c1_i32_89 = arith.constant 1 : i32
    %282 = vector.broadcast %c1_i32_89 : i32 to vector<40x72xi32>
    %283 = arith.subi %281, %282 : vector<40x72xi32>
    %284 = arith.cmpi eq, %274, %283 : vector<40x72xi32>
    %285 = arith.andi %279, %284 : vector<40x72xi1>
    %c2_i32_90 = arith.constant 2 : i32
    %286 = vector.broadcast %c2_i32_90 : i32 to vector<40x72xi32>
    %287 = arith.muli %286, %272 : vector<40x72xi32>
    %288 = arith.cmpi eq, %274, %287 : vector<40x72xi32>
    %289 = arith.andi %279, %288 : vector<40x72xi1>
    %290 = arith.ori %266, %285 : vector<40x72xi1>
    %291 = arith.ori %270, %289 : vector<40x72xi1>
    %c20_i32 = arith.constant 20 : i32
    %292 = vector.broadcast %c20_i32 : i32 to vector<40x72xi32>
    %293 = arith.subi %250, %292 : vector<40x72xi32>
    %c36_i32_91 = arith.constant 36 : i32
    %294 = vector.broadcast %c36_i32_91 : i32 to vector<40x72xi32>
    %295 = arith.subi %251, %294 : vector<40x72xi32>
    %c1_i32_92 = arith.constant 1 : i32
    %296 = vector.broadcast %c1_i32_92 : i32 to vector<40x72xi32>
    %297 = arith.cmpi sge, %293, %296 : vector<40x72xi32>
    %c8_i32_93 = arith.constant 8 : i32
    %298 = vector.broadcast %c8_i32_93 : i32 to vector<40x72xi32>
    %299 = arith.cmpi sle, %293, %298 : vector<40x72xi32>
    %300 = arith.andi %297, %299 : vector<40x72xi1>
    %c2_i32_94 = arith.constant 2 : i32
    %301 = vector.broadcast %c2_i32_94 : i32 to vector<40x72xi32>
    %302 = arith.muli %301, %293 : vector<40x72xi32>
    %c1_i32_95 = arith.constant 1 : i32
    %303 = vector.broadcast %c1_i32_95 : i32 to vector<40x72xi32>
    %304 = arith.subi %302, %303 : vector<40x72xi32>
    %305 = arith.cmpi eq, %295, %304 : vector<40x72xi32>
    %306 = arith.andi %300, %305 : vector<40x72xi1>
    %c2_i32_96 = arith.constant 2 : i32
    %307 = vector.broadcast %c2_i32_96 : i32 to vector<40x72xi32>
    %308 = arith.muli %307, %293 : vector<40x72xi32>
    %309 = arith.cmpi eq, %295, %308 : vector<40x72xi32>
    %310 = arith.andi %300, %309 : vector<40x72xi1>
    %311 = arith.ori %290, %306 : vector<40x72xi1>
    %312 = arith.ori %291, %310 : vector<40x72xi1>
    %c30_i32 = arith.constant 30 : i32
    %313 = vector.broadcast %c30_i32 : i32 to vector<40x72xi32>
    %314 = arith.subi %250, %313 : vector<40x72xi32>
    %c54_i32_97 = arith.constant 54 : i32
    %315 = vector.broadcast %c54_i32_97 : i32 to vector<40x72xi32>
    %316 = arith.subi %251, %315 : vector<40x72xi32>
    %c1_i32_98 = arith.constant 1 : i32
    %317 = vector.broadcast %c1_i32_98 : i32 to vector<40x72xi32>
    %318 = arith.cmpi sge, %314, %317 : vector<40x72xi32>
    %c8_i32_99 = arith.constant 8 : i32
    %319 = vector.broadcast %c8_i32_99 : i32 to vector<40x72xi32>
    %320 = arith.cmpi sle, %314, %319 : vector<40x72xi32>
    %321 = arith.andi %318, %320 : vector<40x72xi1>
    %c2_i32_100 = arith.constant 2 : i32
    %322 = vector.broadcast %c2_i32_100 : i32 to vector<40x72xi32>
    %323 = arith.muli %322, %314 : vector<40x72xi32>
    %c1_i32_101 = arith.constant 1 : i32
    %324 = vector.broadcast %c1_i32_101 : i32 to vector<40x72xi32>
    %325 = arith.subi %323, %324 : vector<40x72xi32>
    %326 = arith.cmpi eq, %316, %325 : vector<40x72xi32>
    %327 = arith.andi %321, %326 : vector<40x72xi1>
    %c2_i32_102 = arith.constant 2 : i32
    %328 = vector.broadcast %c2_i32_102 : i32 to vector<40x72xi32>
    %329 = arith.muli %328, %314 : vector<40x72xi32>
    %330 = arith.cmpi eq, %316, %329 : vector<40x72xi32>
    %331 = arith.andi %321, %330 : vector<40x72xi1>
    %332 = arith.ori %311, %327 : vector<40x72xi1>
    %333 = arith.ori %312, %331 : vector<40x72xi1>
    %cst_103 = arith.constant 1.000000e+00 : f32
    %cst_104 = arith.constant 0.000000e+00 : f32
    %334 = vector.broadcast %cst_103 : f32 to vector<40x72xf32>
    %335 = vector.broadcast %cst_104 : f32 to vector<40x72xf32>
    %336 = arith.select %332, %334, %335 : vector<40x72xi1>, vector<40x72xf32>
    %cst_105 = arith.constant 1.000000e+00 : f32
    %cst_106 = arith.constant 0.000000e+00 : f32
    %337 = vector.broadcast %cst_105 : f32 to vector<40x72xf32>
    %338 = vector.broadcast %cst_106 : f32 to vector<40x72xf32>
    %339 = arith.select %333, %337, %338 : vector<40x72xi1>, vector<40x72xf32>
    %cst_107 = arith.constant dense<0.000000e+00> : vector<40x128xf32>
    %340 = tpu.matmul %336, %249, %cst_107 {dimension_numbers = #tpu.dot_dimension_numbers<[1], [0], [0], [1], [0, 0, 1, 1], [], []>} : vector<40x72xf32>, vector<72x128xf32>, vector<40x128xf32> -> vector<40x128xf32>
    %cst_108 = arith.constant dense<0.000000e+00> : vector<40x128xf32>
    %341 = tpu.matmul %339, %249, %cst_108 {dimension_numbers = #tpu.dot_dimension_numbers<[1], [0], [0], [1], [0, 0, 1, 1], [], []>} : vector<40x72xf32>, vector<72x128xf32>, vector<40x128xf32> -> vector<40x128xf32>
    %342 = arith.maximumf %340, %341 : vector<40x128xf32>
    %343 = tpu.iota {dimensions = array<i32: 0>} : vector<40x1xi32>
    %c1_i32_109 = arith.constant 1 : i32
    %344 = vector.broadcast %c1_i32_109 : i32 to vector<40x1xi32>
    %345 = arith.cmpi sge, %343, %344 : vector<40x1xi32>
    %c8_i32_110 = arith.constant 8 : i32
    %346 = vector.broadcast %c8_i32_110 : i32 to vector<40x1xi32>
    %347 = arith.cmpi sle, %343, %346 : vector<40x1xi32>
    %348 = arith.andi %345, %347 : vector<40x1xi1>
    %c11_i32 = arith.constant 11 : i32
    %349 = vector.broadcast %c11_i32 : i32 to vector<40x1xi32>
    %350 = arith.cmpi sge, %343, %349 : vector<40x1xi32>
    %c18_i32_111 = arith.constant 18 : i32
    %351 = vector.broadcast %c18_i32_111 : i32 to vector<40x1xi32>
    %352 = arith.cmpi sle, %343, %351 : vector<40x1xi32>
    %353 = arith.andi %350, %352 : vector<40x1xi1>
    %354 = arith.ori %348, %353 : vector<40x1xi1>
    %c21_i32 = arith.constant 21 : i32
    %355 = vector.broadcast %c21_i32 : i32 to vector<40x1xi32>
    %356 = arith.cmpi sge, %343, %355 : vector<40x1xi32>
    %c28_i32 = arith.constant 28 : i32
    %357 = vector.broadcast %c28_i32 : i32 to vector<40x1xi32>
    %358 = arith.cmpi sle, %343, %357 : vector<40x1xi32>
    %359 = arith.andi %356, %358 : vector<40x1xi1>
    %360 = arith.ori %354, %359 : vector<40x1xi1>
    %c31_i32 = arith.constant 31 : i32
    %361 = vector.broadcast %c31_i32 : i32 to vector<40x1xi32>
    %362 = arith.cmpi sge, %343, %361 : vector<40x1xi32>
    %c38_i32 = arith.constant 38 : i32
    %363 = vector.broadcast %c38_i32 : i32 to vector<40x1xi32>
    %364 = arith.cmpi sle, %343, %363 : vector<40x1xi32>
    %365 = arith.andi %362, %364 : vector<40x1xi1>
    %366 = arith.ori %360, %365 : vector<40x1xi1>
    %cst_112 = arith.constant 1.000000e+00 : f32
    %cst_113 = arith.constant 0.000000e+00 : f32
    %367 = vector.broadcast %cst_112 : f32 to vector<40x1xf32>
    %368 = vector.broadcast %cst_113 : f32 to vector<40x1xf32>
    %369 = arith.select %366, %367, %368 : vector<40x1xi1>, vector<40x1xf32>
    %370 = tpu.iota {dimensions = array<i32: 0>} : vector<40x40xi32>
    %371 = tpu.iota {dimensions = array<i32: 1>} : vector<40x40xi32>
    %c1_i32_114 = arith.constant 1 : i32
    %372 = vector.broadcast %c1_i32_114 : i32 to vector<40x40xi32>
    %373 = arith.subi %370, %372 : vector<40x40xi32>
    %374 = arith.cmpi eq, %371, %373 : vector<40x40xi32>
    %cst_115 = arith.constant 1.000000e+00 : f32
    %cst_116 = arith.constant 0.000000e+00 : f32
    %375 = vector.broadcast %cst_115 : f32 to vector<40x40xf32>
    %376 = vector.broadcast %cst_116 : f32 to vector<40x40xf32>
    %377 = arith.select %374, %375, %376 : vector<40x40xi1>, vector<40x40xf32>
    %c1_i32_117 = arith.constant 1 : i32
    %378 = vector.broadcast %c1_i32_117 : i32 to vector<40x40xi32>
    %379 = arith.addi %370, %378 : vector<40x40xi32>
    %380 = arith.cmpi eq, %371, %379 : vector<40x40xi32>
    %cst_118 = arith.constant 1.000000e+00 : f32
    %cst_119 = arith.constant 0.000000e+00 : f32
    %381 = vector.broadcast %cst_118 : f32 to vector<40x40xf32>
    %382 = vector.broadcast %cst_119 : f32 to vector<40x40xf32>
    %383 = arith.select %380, %381, %382 : vector<40x40xi1>, vector<40x40xf32>
    %cst_120 = arith.constant dense<0.000000e+00> : vector<40x128xf32>
    %384 = tpu.matmul %377, %342, %cst_120 {dimension_numbers = #tpu.dot_dimension_numbers<[1], [0], [0], [1], [0, 0, 1, 1], [], []>} : vector<40x40xf32>, vector<40x128xf32>, vector<40x128xf32> -> vector<40x128xf32>
    %cst_121 = arith.constant dense<0.000000e+00> : vector<40x128xf32>
    %385 = tpu.matmul %383, %342, %cst_121 {dimension_numbers = #tpu.dot_dimension_numbers<[1], [0], [0], [1], [0, 0, 1, 1], [], []>} : vector<40x40xf32>, vector<40x128xf32>, vector<40x128xf32> -> vector<40x128xf32>
    %c6 = arith.constant 6 : index
    %c0_122 = arith.constant 0 : index
    %c0_123 = arith.constant 0 : index
    %386 = vector.load %arg2[%c6, %c0_122, %c0_123] : memref<9x128x128xf32, #tpu.memory_space<vmem>>, vector<1x128x128xf32>
    %387 = vector.shape_cast %386 : vector<1x128x128xf32> to vector<128x128xf32>
    %cst_124 = arith.constant dense<0.000000e+00> : vector<40x128xf32>
    %388 = tpu.matmul %384, %387, %cst_124 {dimension_numbers = #tpu.dot_dimension_numbers<[1], [0], [0], [1], [0, 0, 1, 1], [], []>} : vector<40x128xf32>, vector<128x128xf32>, vector<40x128xf32> -> vector<40x128xf32>
    %c7 = arith.constant 7 : index
    %c0_125 = arith.constant 0 : index
    %c0_126 = arith.constant 0 : index
    %389 = vector.load %arg2[%c7, %c0_125, %c0_126] : memref<9x128x128xf32, #tpu.memory_space<vmem>>, vector<1x128x128xf32>
    %390 = vector.shape_cast %389 : vector<1x128x128xf32> to vector<128x128xf32>
    %cst_127 = arith.constant dense<0.000000e+00> : vector<40x128xf32>
    %391 = tpu.matmul %342, %390, %cst_127 {dimension_numbers = #tpu.dot_dimension_numbers<[1], [0], [0], [1], [0, 0, 1, 1], [], []>} : vector<40x128xf32>, vector<128x128xf32>, vector<40x128xf32> -> vector<40x128xf32>
    %392 = arith.addf %388, %391 : vector<40x128xf32>
    %c8 = arith.constant 8 : index
    %c0_128 = arith.constant 0 : index
    %c0_129 = arith.constant 0 : index
    %393 = vector.load %arg2[%c8, %c0_128, %c0_129] : memref<9x128x128xf32, #tpu.memory_space<vmem>>, vector<1x128x128xf32>
    %394 = vector.shape_cast %393 : vector<1x128x128xf32> to vector<128x128xf32>
    %cst_130 = arith.constant dense<0.000000e+00> : vector<40x128xf32>
    %395 = tpu.matmul %385, %394, %cst_130 {dimension_numbers = #tpu.dot_dimension_numbers<[1], [0], [0], [1], [0, 0, 1, 1], [], []>} : vector<40x128xf32>, vector<128x128xf32>, vector<40x128xf32> -> vector<40x128xf32>
    %396 = arith.addf %392, %395 : vector<40x128xf32>
    %397 = vector.broadcast %369 : vector<40x1xf32> to vector<40x128xf32>
    %398 = arith.mulf %396, %397 : vector<40x128xf32>
    %cst_131 = arith.constant dense<0.000000e+00> : vector<128xf32>
    %399 = vector.multi_reduction <add>, %398, %cst_131 [0] : vector<40x128xf32> to vector<128xf32>
    %400 = vector.shape_cast %399 : vector<128xf32> to vector<1x128xf32>
    %cst_132 = arith.constant 3.125000e-02 : f32
    %401 = vector.broadcast %cst_132 : f32 to vector<1x128xf32>
    %402 = arith.mulf %400, %401 : vector<1x128xf32>
    %403 = vector.broadcast %402 : vector<1x128xf32> to vector<40x128xf32>
    %404 = arith.subf %398, %403 : vector<40x128xf32>
    %405 = vector.broadcast %369 : vector<40x1xf32> to vector<40x128xf32>
    %406 = arith.mulf %404, %405 : vector<40x128xf32>
    %407 = arith.mulf %406, %406 : vector<40x128xf32>
    %cst_133 = arith.constant dense<0.000000e+00> : vector<128xf32>
    %408 = vector.multi_reduction <add>, %407, %cst_133 [0] : vector<40x128xf32> to vector<128xf32>
    %409 = vector.shape_cast %408 : vector<128xf32> to vector<1x128xf32>
    %cst_134 = arith.constant 3.125000e-02 : f32
    %410 = vector.broadcast %cst_134 : f32 to vector<1x128xf32>
    %411 = arith.mulf %409, %410 : vector<1x128xf32>
    %cst_135 = arith.constant 9.99999974E-5 : f32
    %412 = vector.broadcast %cst_135 : f32 to vector<1x128xf32>
    %413 = arith.addf %411, %412 : vector<1x128xf32>
    %414 = math.rsqrt %413 : vector<1x128xf32>
    %415 = vector.broadcast %414 : vector<1x128xf32> to vector<40x128xf32>
    %416 = arith.mulf %404, %415 : vector<40x128xf32>
    %cst_136 = arith.constant 0.000000e+00 : f32
    %417 = vector.broadcast %cst_136 : f32 to vector<40x128xf32>
    %418 = arith.maximumf %416, %417 : vector<40x128xf32>
    %419 = vector.broadcast %369 : vector<40x1xf32> to vector<40x128xf32>
    %420 = arith.mulf %418, %419 : vector<40x128xf32>
    %421 = tpu.iota {dimensions = array<i32: 0>} : vector<24x40xi32>
    %422 = tpu.iota {dimensions = array<i32: 1>} : vector<24x40xi32>
    %c0_i32_137 = arith.constant 0 : i32
    %423 = vector.broadcast %c0_i32_137 : i32 to vector<24x40xi32>
    %424 = arith.subi %421, %423 : vector<24x40xi32>
    %c0_i32_138 = arith.constant 0 : i32
    %425 = vector.broadcast %c0_i32_138 : i32 to vector<24x40xi32>
    %426 = arith.subi %422, %425 : vector<24x40xi32>
    %c1_i32_139 = arith.constant 1 : i32
    %427 = vector.broadcast %c1_i32_139 : i32 to vector<24x40xi32>
    %428 = arith.cmpi sge, %424, %427 : vector<24x40xi32>
    %c4_i32 = arith.constant 4 : i32
    %429 = vector.broadcast %c4_i32 : i32 to vector<24x40xi32>
    %430 = arith.cmpi sle, %424, %429 : vector<24x40xi32>
    %431 = arith.andi %428, %430 : vector<24x40xi1>
    %c2_i32_140 = arith.constant 2 : i32
    %432 = vector.broadcast %c2_i32_140 : i32 to vector<24x40xi32>
    %433 = arith.muli %432, %424 : vector<24x40xi32>
    %c1_i32_141 = arith.constant 1 : i32
    %434 = vector.broadcast %c1_i32_141 : i32 to vector<24x40xi32>
    %435 = arith.subi %433, %434 : vector<24x40xi32>
    %436 = arith.cmpi eq, %426, %435 : vector<24x40xi32>
    %437 = arith.andi %431, %436 : vector<24x40xi1>
    %c2_i32_142 = arith.constant 2 : i32
    %438 = vector.broadcast %c2_i32_142 : i32 to vector<24x40xi32>
    %439 = arith.muli %438, %424 : vector<24x40xi32>
    %440 = arith.cmpi eq, %426, %439 : vector<24x40xi32>
    %441 = arith.andi %431, %440 : vector<24x40xi1>
    %c6_i32 = arith.constant 6 : i32
    %442 = vector.broadcast %c6_i32 : i32 to vector<24x40xi32>
    %443 = arith.subi %421, %442 : vector<24x40xi32>
    %c10_i32_143 = arith.constant 10 : i32
    %444 = vector.broadcast %c10_i32_143 : i32 to vector<24x40xi32>
    %445 = arith.subi %422, %444 : vector<24x40xi32>
    %c1_i32_144 = arith.constant 1 : i32
    %446 = vector.broadcast %c1_i32_144 : i32 to vector<24x40xi32>
    %447 = arith.cmpi sge, %443, %446 : vector<24x40xi32>
    %c4_i32_145 = arith.constant 4 : i32
    %448 = vector.broadcast %c4_i32_145 : i32 to vector<24x40xi32>
    %449 = arith.cmpi sle, %443, %448 : vector<24x40xi32>
    %450 = arith.andi %447, %449 : vector<24x40xi1>
    %c2_i32_146 = arith.constant 2 : i32
    %451 = vector.broadcast %c2_i32_146 : i32 to vector<24x40xi32>
    %452 = arith.muli %451, %443 : vector<24x40xi32>
    %c1_i32_147 = arith.constant 1 : i32
    %453 = vector.broadcast %c1_i32_147 : i32 to vector<24x40xi32>
    %454 = arith.subi %452, %453 : vector<24x40xi32>
    %455 = arith.cmpi eq, %445, %454 : vector<24x40xi32>
    %456 = arith.andi %450, %455 : vector<24x40xi1>
    %c2_i32_148 = arith.constant 2 : i32
    %457 = vector.broadcast %c2_i32_148 : i32 to vector<24x40xi32>
    %458 = arith.muli %457, %443 : vector<24x40xi32>
    %459 = arith.cmpi eq, %445, %458 : vector<24x40xi32>
    %460 = arith.andi %450, %459 : vector<24x40xi1>
    %461 = arith.ori %437, %456 : vector<24x40xi1>
    %462 = arith.ori %441, %460 : vector<24x40xi1>
    %c12_i32 = arith.constant 12 : i32
    %463 = vector.broadcast %c12_i32 : i32 to vector<24x40xi32>
    %464 = arith.subi %421, %463 : vector<24x40xi32>
    %c20_i32_149 = arith.constant 20 : i32
    %465 = vector.broadcast %c20_i32_149 : i32 to vector<24x40xi32>
    %466 = arith.subi %422, %465 : vector<24x40xi32>
    %c1_i32_150 = arith.constant 1 : i32
    %467 = vector.broadcast %c1_i32_150 : i32 to vector<24x40xi32>
    %468 = arith.cmpi sge, %464, %467 : vector<24x40xi32>
    %c4_i32_151 = arith.constant 4 : i32
    %469 = vector.broadcast %c4_i32_151 : i32 to vector<24x40xi32>
    %470 = arith.cmpi sle, %464, %469 : vector<24x40xi32>
    %471 = arith.andi %468, %470 : vector<24x40xi1>
    %c2_i32_152 = arith.constant 2 : i32
    %472 = vector.broadcast %c2_i32_152 : i32 to vector<24x40xi32>
    %473 = arith.muli %472, %464 : vector<24x40xi32>
    %c1_i32_153 = arith.constant 1 : i32
    %474 = vector.broadcast %c1_i32_153 : i32 to vector<24x40xi32>
    %475 = arith.subi %473, %474 : vector<24x40xi32>
    %476 = arith.cmpi eq, %466, %475 : vector<24x40xi32>
    %477 = arith.andi %471, %476 : vector<24x40xi1>
    %c2_i32_154 = arith.constant 2 : i32
    %478 = vector.broadcast %c2_i32_154 : i32 to vector<24x40xi32>
    %479 = arith.muli %478, %464 : vector<24x40xi32>
    %480 = arith.cmpi eq, %466, %479 : vector<24x40xi32>
    %481 = arith.andi %471, %480 : vector<24x40xi1>
    %482 = arith.ori %461, %477 : vector<24x40xi1>
    %483 = arith.ori %462, %481 : vector<24x40xi1>
    %c18_i32_155 = arith.constant 18 : i32
    %484 = vector.broadcast %c18_i32_155 : i32 to vector<24x40xi32>
    %485 = arith.subi %421, %484 : vector<24x40xi32>
    %c30_i32_156 = arith.constant 30 : i32
    %486 = vector.broadcast %c30_i32_156 : i32 to vector<24x40xi32>
    %487 = arith.subi %422, %486 : vector<24x40xi32>
    %c1_i32_157 = arith.constant 1 : i32
    %488 = vector.broadcast %c1_i32_157 : i32 to vector<24x40xi32>
    %489 = arith.cmpi sge, %485, %488 : vector<24x40xi32>
    %c4_i32_158 = arith.constant 4 : i32
    %490 = vector.broadcast %c4_i32_158 : i32 to vector<24x40xi32>
    %491 = arith.cmpi sle, %485, %490 : vector<24x40xi32>
    %492 = arith.andi %489, %491 : vector<24x40xi1>
    %c2_i32_159 = arith.constant 2 : i32
    %493 = vector.broadcast %c2_i32_159 : i32 to vector<24x40xi32>
    %494 = arith.muli %493, %485 : vector<24x40xi32>
    %c1_i32_160 = arith.constant 1 : i32
    %495 = vector.broadcast %c1_i32_160 : i32 to vector<24x40xi32>
    %496 = arith.subi %494, %495 : vector<24x40xi32>
    %497 = arith.cmpi eq, %487, %496 : vector<24x40xi32>
    %498 = arith.andi %492, %497 : vector<24x40xi1>
    %c2_i32_161 = arith.constant 2 : i32
    %499 = vector.broadcast %c2_i32_161 : i32 to vector<24x40xi32>
    %500 = arith.muli %499, %485 : vector<24x40xi32>
    %501 = arith.cmpi eq, %487, %500 : vector<24x40xi32>
    %502 = arith.andi %492, %501 : vector<24x40xi1>
    %503 = arith.ori %482, %498 : vector<24x40xi1>
    %504 = arith.ori %483, %502 : vector<24x40xi1>
    %cst_162 = arith.constant 1.000000e+00 : f32
    %cst_163 = arith.constant 0.000000e+00 : f32
    %505 = vector.broadcast %cst_162 : f32 to vector<24x40xf32>
    %506 = vector.broadcast %cst_163 : f32 to vector<24x40xf32>
    %507 = arith.select %503, %505, %506 : vector<24x40xi1>, vector<24x40xf32>
    %cst_164 = arith.constant 1.000000e+00 : f32
    %cst_165 = arith.constant 0.000000e+00 : f32
    %508 = vector.broadcast %cst_164 : f32 to vector<24x40xf32>
    %509 = vector.broadcast %cst_165 : f32 to vector<24x40xf32>
    %510 = arith.select %504, %508, %509 : vector<24x40xi1>, vector<24x40xf32>
    %cst_166 = arith.constant dense<0.000000e+00> : vector<24x128xf32>
    %511 = tpu.matmul %507, %420, %cst_166 {dimension_numbers = #tpu.dot_dimension_numbers<[1], [0], [0], [1], [0, 0, 1, 1], [], []>} : vector<24x40xf32>, vector<40x128xf32>, vector<24x128xf32> -> vector<24x128xf32>
    %cst_167 = arith.constant dense<0.000000e+00> : vector<24x128xf32>
    %512 = tpu.matmul %510, %420, %cst_167 {dimension_numbers = #tpu.dot_dimension_numbers<[1], [0], [0], [1], [0, 0, 1, 1], [], []>} : vector<24x40xf32>, vector<40x128xf32>, vector<24x128xf32> -> vector<24x128xf32>
    %513 = arith.maximumf %511, %512 : vector<24x128xf32>
    %514 = tpu.iota {dimensions = array<i32: 0>} : vector<24x1xi32>
    %c1_i32_168 = arith.constant 1 : i32
    %515 = vector.broadcast %c1_i32_168 : i32 to vector<24x1xi32>
    %516 = arith.cmpi sge, %514, %515 : vector<24x1xi32>
    %c4_i32_169 = arith.constant 4 : i32
    %517 = vector.broadcast %c4_i32_169 : i32 to vector<24x1xi32>
    %518 = arith.cmpi sle, %514, %517 : vector<24x1xi32>
    %519 = arith.andi %516, %518 : vector<24x1xi1>
    %c7_i32 = arith.constant 7 : i32
    %520 = vector.broadcast %c7_i32 : i32 to vector<24x1xi32>
    %521 = arith.cmpi sge, %514, %520 : vector<24x1xi32>
    %c10_i32_170 = arith.constant 10 : i32
    %522 = vector.broadcast %c10_i32_170 : i32 to vector<24x1xi32>
    %523 = arith.cmpi sle, %514, %522 : vector<24x1xi32>
    %524 = arith.andi %521, %523 : vector<24x1xi1>
    %525 = arith.ori %519, %524 : vector<24x1xi1>
    %c13_i32 = arith.constant 13 : i32
    %526 = vector.broadcast %c13_i32 : i32 to vector<24x1xi32>
    %527 = arith.cmpi sge, %514, %526 : vector<24x1xi32>
    %c16_i32_171 = arith.constant 16 : i32
    %528 = vector.broadcast %c16_i32_171 : i32 to vector<24x1xi32>
    %529 = arith.cmpi sle, %514, %528 : vector<24x1xi32>
    %530 = arith.andi %527, %529 : vector<24x1xi1>
    %531 = arith.ori %525, %530 : vector<24x1xi1>
    %c19_i32_172 = arith.constant 19 : i32
    %532 = vector.broadcast %c19_i32_172 : i32 to vector<24x1xi32>
    %533 = arith.cmpi sge, %514, %532 : vector<24x1xi32>
    %c22_i32 = arith.constant 22 : i32
    %534 = vector.broadcast %c22_i32 : i32 to vector<24x1xi32>
    %535 = arith.cmpi sle, %514, %534 : vector<24x1xi32>
    %536 = arith.andi %533, %535 : vector<24x1xi1>
    %537 = arith.ori %531, %536 : vector<24x1xi1>
    %cst_173 = arith.constant 1.000000e+00 : f32
    %cst_174 = arith.constant 0.000000e+00 : f32
    %538 = vector.broadcast %cst_173 : f32 to vector<24x1xf32>
    %539 = vector.broadcast %cst_174 : f32 to vector<24x1xf32>
    %540 = arith.select %537, %538, %539 : vector<24x1xi1>, vector<24x1xf32>
    %541 = tpu.iota {dimensions = array<i32: 0>} : vector<24x24xi32>
    %542 = tpu.iota {dimensions = array<i32: 1>} : vector<24x24xi32>
    %c1_i32_175 = arith.constant 1 : i32
    %543 = vector.broadcast %c1_i32_175 : i32 to vector<24x24xi32>
    %544 = arith.subi %541, %543 : vector<24x24xi32>
    %545 = arith.cmpi eq, %542, %544 : vector<24x24xi32>
    %cst_176 = arith.constant 1.000000e+00 : f32
    %cst_177 = arith.constant 0.000000e+00 : f32
    %546 = vector.broadcast %cst_176 : f32 to vector<24x24xf32>
    %547 = vector.broadcast %cst_177 : f32 to vector<24x24xf32>
    %548 = arith.select %545, %546, %547 : vector<24x24xi1>, vector<24x24xf32>
    %c1_i32_178 = arith.constant 1 : i32
    %549 = vector.broadcast %c1_i32_178 : i32 to vector<24x24xi32>
    %550 = arith.addi %541, %549 : vector<24x24xi32>
    %551 = arith.cmpi eq, %542, %550 : vector<24x24xi32>
    %cst_179 = arith.constant 1.000000e+00 : f32
    %cst_180 = arith.constant 0.000000e+00 : f32
    %552 = vector.broadcast %cst_179 : f32 to vector<24x24xf32>
    %553 = vector.broadcast %cst_180 : f32 to vector<24x24xf32>
    %554 = arith.select %551, %552, %553 : vector<24x24xi1>, vector<24x24xf32>
    %c0_181 = arith.constant 0 : index
    %c0_182 = arith.constant 0 : index
    %c0_183 = arith.constant 0 : index
    %555 = vector.load %arg4[%c0_181, %c0_182, %c0_183] : memref<8x1x128xf32, #tpu.memory_space<vmem>>, vector<1x1x128xf32>
    %556 = vector.shape_cast %555 : vector<1x1x128xf32> to vector<1x128xf32>
    %cst_184 = arith.constant dense<0.000000e+00> : vector<24x128xf32>
    %557 = tpu.matmul %548, %513, %cst_184 {dimension_numbers = #tpu.dot_dimension_numbers<[1], [0], [0], [1], [0, 0, 1, 1], [], []>} : vector<24x24xf32>, vector<24x128xf32>, vector<24x128xf32> -> vector<24x128xf32>
    %cst_185 = arith.constant dense<0.000000e+00> : vector<24x128xf32>
    %558 = tpu.matmul %554, %513, %cst_185 {dimension_numbers = #tpu.dot_dimension_numbers<[1], [0], [0], [1], [0, 0, 1, 1], [], []>} : vector<24x24xf32>, vector<24x128xf32>, vector<24x128xf32> -> vector<24x128xf32>
    %c0_186 = arith.constant 0 : index
    %c0_187 = arith.constant 0 : index
    %c0_188 = arith.constant 0 : index
    %559 = vector.load %arg3[%c0_186, %c0_187, %c0_188] : memref<24x128x128xf32, #tpu.memory_space<vmem>>, vector<1x128x128xf32>
    %560 = vector.shape_cast %559 : vector<1x128x128xf32> to vector<128x128xf32>
    %cst_189 = arith.constant dense<0.000000e+00> : vector<24x128xf32>
    %561 = tpu.matmul %557, %560, %cst_189 {dimension_numbers = #tpu.dot_dimension_numbers<[1], [0], [0], [1], [0, 0, 1, 1], [], []>} : vector<24x128xf32>, vector<128x128xf32>, vector<24x128xf32> -> vector<24x128xf32>
    %c1_190 = arith.constant 1 : index
    %c0_191 = arith.constant 0 : index
    %c0_192 = arith.constant 0 : index
    %562 = vector.load %arg3[%c1_190, %c0_191, %c0_192] : memref<24x128x128xf32, #tpu.memory_space<vmem>>, vector<1x128x128xf32>
    %563 = vector.shape_cast %562 : vector<1x128x128xf32> to vector<128x128xf32>
    %cst_193 = arith.constant dense<0.000000e+00> : vector<24x128xf32>
    %564 = tpu.matmul %513, %563, %cst_193 {dimension_numbers = #tpu.dot_dimension_numbers<[1], [0], [0], [1], [0, 0, 1, 1], [], []>} : vector<24x128xf32>, vector<128x128xf32>, vector<24x128xf32> -> vector<24x128xf32>
    %565 = arith.addf %561, %564 : vector<24x128xf32>
    %c2_194 = arith.constant 2 : index
    %c0_195 = arith.constant 0 : index
    %c0_196 = arith.constant 0 : index
    %566 = vector.load %arg3[%c2_194, %c0_195, %c0_196] : memref<24x128x128xf32, #tpu.memory_space<vmem>>, vector<1x128x128xf32>
    %567 = vector.shape_cast %566 : vector<1x128x128xf32> to vector<128x128xf32>
    %cst_197 = arith.constant dense<0.000000e+00> : vector<24x128xf32>
    %568 = tpu.matmul %558, %567, %cst_197 {dimension_numbers = #tpu.dot_dimension_numbers<[1], [0], [0], [1], [0, 0, 1, 1], [], []>} : vector<24x128xf32>, vector<128x128xf32>, vector<24x128xf32> -> vector<24x128xf32>
    %569 = arith.addf %565, %568 : vector<24x128xf32>
    %570 = vector.broadcast %556 : vector<1x128xf32> to vector<24x128xf32>
    %571 = arith.addf %569, %570 : vector<24x128xf32>
    %572 = vector.broadcast %540 : vector<24x1xf32> to vector<24x128xf32>
    %573 = arith.mulf %571, %572 : vector<24x128xf32>
    %c0_198 = arith.constant 0 : index
    %c0_199 = arith.constant 0 : index
    %c0_200 = arith.constant 0 : index
    %574 = vector.load %arg5[%c0_198, %c0_199, %c0_200] : memref<8x1x128xf32, #tpu.memory_space<vmem>>, vector<1x1x128xf32>
    %575 = vector.shape_cast %574 : vector<1x1x128xf32> to vector<1x128xf32>
    %c0_201 = arith.constant 0 : index
    %c0_202 = arith.constant 0 : index
    %c0_203 = arith.constant 0 : index
    %576 = vector.load %arg6[%c0_201, %c0_202, %c0_203] : memref<8x1x128xf32, #tpu.memory_space<vmem>>, vector<1x1x128xf32>
    %577 = vector.shape_cast %576 : vector<1x1x128xf32> to vector<1x128xf32>
    %cst_204 = arith.constant dense<0.000000e+00> : vector<128xf32>
    %578 = vector.multi_reduction <add>, %573, %cst_204 [0] : vector<24x128xf32> to vector<128xf32>
    %579 = vector.shape_cast %578 : vector<128xf32> to vector<1x128xf32>
    %cst_205 = arith.constant 6.250000e-02 : f32
    %580 = vector.broadcast %cst_205 : f32 to vector<1x128xf32>
    %581 = arith.mulf %579, %580 : vector<1x128xf32>
    %582 = vector.broadcast %581 : vector<1x128xf32> to vector<24x128xf32>
    %583 = arith.subf %573, %582 : vector<24x128xf32>
    %584 = vector.broadcast %540 : vector<24x1xf32> to vector<24x128xf32>
    %585 = arith.mulf %583, %584 : vector<24x128xf32>
    %586 = arith.mulf %585, %585 : vector<24x128xf32>
    %cst_206 = arith.constant dense<0.000000e+00> : vector<128xf32>
    %587 = vector.multi_reduction <add>, %586, %cst_206 [0] : vector<24x128xf32> to vector<128xf32>
    %588 = vector.shape_cast %587 : vector<128xf32> to vector<1x128xf32>
    %cst_207 = arith.constant 6.250000e-02 : f32
    %589 = vector.broadcast %cst_207 : f32 to vector<1x128xf32>
    %590 = arith.mulf %588, %589 : vector<1x128xf32>
    %cst_208 = arith.constant 9.99999974E-6 : f32
    %591 = vector.broadcast %cst_208 : f32 to vector<1x128xf32>
    %592 = arith.addf %590, %591 : vector<1x128xf32>
    %593 = math.rsqrt %592 : vector<1x128xf32>
    %594 = vector.broadcast %593 : vector<1x128xf32> to vector<24x128xf32>
    %595 = arith.mulf %583, %594 : vector<24x128xf32>
    %596 = vector.broadcast %575 : vector<1x128xf32> to vector<24x128xf32>
    %597 = arith.mulf %595, %596 : vector<24x128xf32>
    %598 = vector.broadcast %577 : vector<1x128xf32> to vector<24x128xf32>
    %599 = arith.addf %597, %598 : vector<24x128xf32>
    %cst_209 = arith.constant 0.000000e+00 : f32
    %600 = vector.broadcast %cst_209 : f32 to vector<24x128xf32>
    %601 = arith.maximumf %599, %600 : vector<24x128xf32>
    %602 = vector.broadcast %540 : vector<24x1xf32> to vector<24x128xf32>
    %603 = arith.mulf %601, %602 : vector<24x128xf32>
    %c1_210 = arith.constant 1 : index
    %c0_211 = arith.constant 0 : index
    %c0_212 = arith.constant 0 : index
    %604 = vector.load %arg4[%c1_210, %c0_211, %c0_212] : memref<8x1x128xf32, #tpu.memory_space<vmem>>, vector<1x1x128xf32>
    %605 = vector.shape_cast %604 : vector<1x1x128xf32> to vector<1x128xf32>
    %cst_213 = arith.constant dense<0.000000e+00> : vector<24x128xf32>
    %606 = tpu.matmul %548, %603, %cst_213 {dimension_numbers = #tpu.dot_dimension_numbers<[1], [0], [0], [1], [0, 0, 1, 1], [], []>} : vector<24x24xf32>, vector<24x128xf32>, vector<24x128xf32> -> vector<24x128xf32>
    %cst_214 = arith.constant dense<0.000000e+00> : vector<24x128xf32>
    %607 = tpu.matmul %554, %603, %cst_214 {dimension_numbers = #tpu.dot_dimension_numbers<[1], [0], [0], [1], [0, 0, 1, 1], [], []>} : vector<24x24xf32>, vector<24x128xf32>, vector<24x128xf32> -> vector<24x128xf32>
    %c3_215 = arith.constant 3 : index
    %c0_216 = arith.constant 0 : index
    %c0_217 = arith.constant 0 : index
    %608 = vector.load %arg3[%c3_215, %c0_216, %c0_217] : memref<24x128x128xf32, #tpu.memory_space<vmem>>, vector<1x128x128xf32>
    %609 = vector.shape_cast %608 : vector<1x128x128xf32> to vector<128x128xf32>
    %cst_218 = arith.constant dense<0.000000e+00> : vector<24x128xf32>
    %610 = tpu.matmul %606, %609, %cst_218 {dimension_numbers = #tpu.dot_dimension_numbers<[1], [0], [0], [1], [0, 0, 1, 1], [], []>} : vector<24x128xf32>, vector<128x128xf32>, vector<24x128xf32> -> vector<24x128xf32>
    %c4_219 = arith.constant 4 : index
    %c0_220 = arith.constant 0 : index
    %c0_221 = arith.constant 0 : index
    %611 = vector.load %arg3[%c4_219, %c0_220, %c0_221] : memref<24x128x128xf32, #tpu.memory_space<vmem>>, vector<1x128x128xf32>
    %612 = vector.shape_cast %611 : vector<1x128x128xf32> to vector<128x128xf32>
    %cst_222 = arith.constant dense<0.000000e+00> : vector<24x128xf32>
    %613 = tpu.matmul %603, %612, %cst_222 {dimension_numbers = #tpu.dot_dimension_numbers<[1], [0], [0], [1], [0, 0, 1, 1], [], []>} : vector<24x128xf32>, vector<128x128xf32>, vector<24x128xf32> -> vector<24x128xf32>
    %614 = arith.addf %610, %613 : vector<24x128xf32>
    %c5_223 = arith.constant 5 : index
    %c0_224 = arith.constant 0 : index
    %c0_225 = arith.constant 0 : index
    %615 = vector.load %arg3[%c5_223, %c0_224, %c0_225] : memref<24x128x128xf32, #tpu.memory_space<vmem>>, vector<1x128x128xf32>
    %616 = vector.shape_cast %615 : vector<1x128x128xf32> to vector<128x128xf32>
    %cst_226 = arith.constant dense<0.000000e+00> : vector<24x128xf32>
    %617 = tpu.matmul %607, %616, %cst_226 {dimension_numbers = #tpu.dot_dimension_numbers<[1], [0], [0], [1], [0, 0, 1, 1], [], []>} : vector<24x128xf32>, vector<128x128xf32>, vector<24x128xf32> -> vector<24x128xf32>
    %618 = arith.addf %614, %617 : vector<24x128xf32>
    %619 = vector.broadcast %605 : vector<1x128xf32> to vector<24x128xf32>
    %620 = arith.addf %618, %619 : vector<24x128xf32>
    %621 = vector.broadcast %540 : vector<24x1xf32> to vector<24x128xf32>
    %622 = arith.mulf %620, %621 : vector<24x128xf32>
    %c1_227 = arith.constant 1 : index
    %c0_228 = arith.constant 0 : index
    %c0_229 = arith.constant 0 : index
    %623 = vector.load %arg5[%c1_227, %c0_228, %c0_229] : memref<8x1x128xf32, #tpu.memory_space<vmem>>, vector<1x1x128xf32>
    %624 = vector.shape_cast %623 : vector<1x1x128xf32> to vector<1x128xf32>
    %c1_230 = arith.constant 1 : index
    %c0_231 = arith.constant 0 : index
    %c0_232 = arith.constant 0 : index
    %625 = vector.load %arg6[%c1_230, %c0_231, %c0_232] : memref<8x1x128xf32, #tpu.memory_space<vmem>>, vector<1x1x128xf32>
    %626 = vector.shape_cast %625 : vector<1x1x128xf32> to vector<1x128xf32>
    %cst_233 = arith.constant dense<0.000000e+00> : vector<128xf32>
    %627 = vector.multi_reduction <add>, %622, %cst_233 [0] : vector<24x128xf32> to vector<128xf32>
    %628 = vector.shape_cast %627 : vector<128xf32> to vector<1x128xf32>
    %cst_234 = arith.constant 6.250000e-02 : f32
    %629 = vector.broadcast %cst_234 : f32 to vector<1x128xf32>
    %630 = arith.mulf %628, %629 : vector<1x128xf32>
    %631 = vector.broadcast %630 : vector<1x128xf32> to vector<24x128xf32>
    %632 = arith.subf %622, %631 : vector<24x128xf32>
    %633 = vector.broadcast %540 : vector<24x1xf32> to vector<24x128xf32>
    %634 = arith.mulf %632, %633 : vector<24x128xf32>
    %635 = arith.mulf %634, %634 : vector<24x128xf32>
    %cst_235 = arith.constant dense<0.000000e+00> : vector<128xf32>
    %636 = vector.multi_reduction <add>, %635, %cst_235 [0] : vector<24x128xf32> to vector<128xf32>
    %637 = vector.shape_cast %636 : vector<128xf32> to vector<1x128xf32>
    %cst_236 = arith.constant 6.250000e-02 : f32
    %638 = vector.broadcast %cst_236 : f32 to vector<1x128xf32>
    %639 = arith.mulf %637, %638 : vector<1x128xf32>
    %cst_237 = arith.constant 9.99999974E-6 : f32
    %640 = vector.broadcast %cst_237 : f32 to vector<1x128xf32>
    %641 = arith.addf %639, %640 : vector<1x128xf32>
    %642 = math.rsqrt %641 : vector<1x128xf32>
    %643 = vector.broadcast %642 : vector<1x128xf32> to vector<24x128xf32>
    %644 = arith.mulf %632, %643 : vector<24x128xf32>
    %645 = vector.broadcast %624 : vector<1x128xf32> to vector<24x128xf32>
    %646 = arith.mulf %644, %645 : vector<24x128xf32>
    %647 = vector.broadcast %626 : vector<1x128xf32> to vector<24x128xf32>
    %648 = arith.addf %646, %647 : vector<24x128xf32>
    %649 = arith.addf %648, %513 : vector<24x128xf32>
    %cst_238 = arith.constant 0.000000e+00 : f32
    %650 = vector.broadcast %cst_238 : f32 to vector<24x128xf32>
    %651 = arith.maximumf %649, %650 : vector<24x128xf32>
    %652 = vector.broadcast %540 : vector<24x1xf32> to vector<24x128xf32>
    %653 = arith.mulf %651, %652 : vector<24x128xf32>
    %c2_239 = arith.constant 2 : index
    %c0_240 = arith.constant 0 : index
    %c0_241 = arith.constant 0 : index
    %654 = vector.load %arg4[%c2_239, %c0_240, %c0_241] : memref<8x1x128xf32, #tpu.memory_space<vmem>>, vector<1x1x128xf32>
    %655 = vector.shape_cast %654 : vector<1x1x128xf32> to vector<1x128xf32>
    %cst_242 = arith.constant dense<0.000000e+00> : vector<24x128xf32>
    %656 = tpu.matmul %548, %653, %cst_242 {dimension_numbers = #tpu.dot_dimension_numbers<[1], [0], [0], [1], [0, 0, 1, 1], [], []>} : vector<24x24xf32>, vector<24x128xf32>, vector<24x128xf32> -> vector<24x128xf32>
    %cst_243 = arith.constant dense<0.000000e+00> : vector<24x128xf32>
    %657 = tpu.matmul %554, %653, %cst_243 {dimension_numbers = #tpu.dot_dimension_numbers<[1], [0], [0], [1], [0, 0, 1, 1], [], []>} : vector<24x24xf32>, vector<24x128xf32>, vector<24x128xf32> -> vector<24x128xf32>
    %c6_244 = arith.constant 6 : index
    %c0_245 = arith.constant 0 : index
    %c0_246 = arith.constant 0 : index
    %658 = vector.load %arg3[%c6_244, %c0_245, %c0_246] : memref<24x128x128xf32, #tpu.memory_space<vmem>>, vector<1x128x128xf32>
    %659 = vector.shape_cast %658 : vector<1x128x128xf32> to vector<128x128xf32>
    %cst_247 = arith.constant dense<0.000000e+00> : vector<24x128xf32>
    %660 = tpu.matmul %656, %659, %cst_247 {dimension_numbers = #tpu.dot_dimension_numbers<[1], [0], [0], [1], [0, 0, 1, 1], [], []>} : vector<24x128xf32>, vector<128x128xf32>, vector<24x128xf32> -> vector<24x128xf32>
    %c7_248 = arith.constant 7 : index
    %c0_249 = arith.constant 0 : index
    %c0_250 = arith.constant 0 : index
    %661 = vector.load %arg3[%c7_248, %c0_249, %c0_250] : memref<24x128x128xf32, #tpu.memory_space<vmem>>, vector<1x128x128xf32>
    %662 = vector.shape_cast %661 : vector<1x128x128xf32> to vector<128x128xf32>
    %cst_251 = arith.constant dense<0.000000e+00> : vector<24x128xf32>
    %663 = tpu.matmul %653, %662, %cst_251 {dimension_numbers = #tpu.dot_dimension_numbers<[1], [0], [0], [1], [0, 0, 1, 1], [], []>} : vector<24x128xf32>, vector<128x128xf32>, vector<24x128xf32> -> vector<24x128xf32>
    %664 = arith.addf %660, %663 : vector<24x128xf32>
    %c8_252 = arith.constant 8 : index
    %c0_253 = arith.constant 0 : index
    %c0_254 = arith.constant 0 : index
    %665 = vector.load %arg3[%c8_252, %c0_253, %c0_254] : memref<24x128x128xf32, #tpu.memory_space<vmem>>, vector<1x128x128xf32>
    %666 = vector.shape_cast %665 : vector<1x128x128xf32> to vector<128x128xf32>
    %cst_255 = arith.constant dense<0.000000e+00> : vector<24x128xf32>
    %667 = tpu.matmul %657, %666, %cst_255 {dimension_numbers = #tpu.dot_dimension_numbers<[1], [0], [0], [1], [0, 0, 1, 1], [], []>} : vector<24x128xf32>, vector<128x128xf32>, vector<24x128xf32> -> vector<24x128xf32>
    %668 = arith.addf %664, %667 : vector<24x128xf32>
    %669 = vector.broadcast %655 : vector<1x128xf32> to vector<24x128xf32>
    %670 = arith.addf %668, %669 : vector<24x128xf32>
    %671 = vector.broadcast %540 : vector<24x1xf32> to vector<24x128xf32>
    %672 = arith.mulf %670, %671 : vector<24x128xf32>
    %c2_256 = arith.constant 2 : index
    %c0_257 = arith.constant 0 : index
    %c0_258 = arith.constant 0 : index
    %673 = vector.load %arg5[%c2_256, %c0_257, %c0_258] : memref<8x1x128xf32, #tpu.memory_space<vmem>>, vector<1x1x128xf32>
    %674 = vector.shape_cast %673 : vector<1x1x128xf32> to vector<1x128xf32>
    %c2_259 = arith.constant 2 : index
    %c0_260 = arith.constant 0 : index
    %c0_261 = arith.constant 0 : index
    %675 = vector.load %arg6[%c2_259, %c0_260, %c0_261] : memref<8x1x128xf32, #tpu.memory_space<vmem>>, vector<1x1x128xf32>
    %676 = vector.shape_cast %675 : vector<1x1x128xf32> to vector<1x128xf32>
    %cst_262 = arith.constant dense<0.000000e+00> : vector<128xf32>
    %677 = vector.multi_reduction <add>, %672, %cst_262 [0] : vector<24x128xf32> to vector<128xf32>
    %678 = vector.shape_cast %677 : vector<128xf32> to vector<1x128xf32>
    %cst_263 = arith.constant 6.250000e-02 : f32
    %679 = vector.broadcast %cst_263 : f32 to vector<1x128xf32>
    %680 = arith.mulf %678, %679 : vector<1x128xf32>
    %681 = vector.broadcast %680 : vector<1x128xf32> to vector<24x128xf32>
    %682 = arith.subf %672, %681 : vector<24x128xf32>
    %683 = vector.broadcast %540 : vector<24x1xf32> to vector<24x128xf32>
    %684 = arith.mulf %682, %683 : vector<24x128xf32>
    %685 = arith.mulf %684, %684 : vector<24x128xf32>
    %cst_264 = arith.constant dense<0.000000e+00> : vector<128xf32>
    %686 = vector.multi_reduction <add>, %685, %cst_264 [0] : vector<24x128xf32> to vector<128xf32>
    %687 = vector.shape_cast %686 : vector<128xf32> to vector<1x128xf32>
    %cst_265 = arith.constant 6.250000e-02 : f32
    %688 = vector.broadcast %cst_265 : f32 to vector<1x128xf32>
    %689 = arith.mulf %687, %688 : vector<1x128xf32>
    %cst_266 = arith.constant 9.99999974E-6 : f32
    %690 = vector.broadcast %cst_266 : f32 to vector<1x128xf32>
    %691 = arith.addf %689, %690 : vector<1x128xf32>
    %692 = math.rsqrt %691 : vector<1x128xf32>
    %693 = vector.broadcast %692 : vector<1x128xf32> to vector<24x128xf32>
    %694 = arith.mulf %682, %693 : vector<24x128xf32>
    %695 = vector.broadcast %674 : vector<1x128xf32> to vector<24x128xf32>
    %696 = arith.mulf %694, %695 : vector<24x128xf32>
    %697 = vector.broadcast %676 : vector<1x128xf32> to vector<24x128xf32>
    %698 = arith.addf %696, %697 : vector<24x128xf32>
    %cst_267 = arith.constant 0.000000e+00 : f32
    %699 = vector.broadcast %cst_267 : f32 to vector<24x128xf32>
    %700 = arith.maximumf %698, %699 : vector<24x128xf32>
    %701 = vector.broadcast %540 : vector<24x1xf32> to vector<24x128xf32>
    %702 = arith.mulf %700, %701 : vector<24x128xf32>
    %c3_268 = arith.constant 3 : index
    %c0_269 = arith.constant 0 : index
    %c0_270 = arith.constant 0 : index
    %703 = vector.load %arg4[%c3_268, %c0_269, %c0_270] : memref<8x1x128xf32, #tpu.memory_space<vmem>>, vector<1x1x128xf32>
    %704 = vector.shape_cast %703 : vector<1x1x128xf32> to vector<1x128xf32>
    %cst_271 = arith.constant dense<0.000000e+00> : vector<24x128xf32>
    %705 = tpu.matmul %548, %702, %cst_271 {dimension_numbers = #tpu.dot_dimension_numbers<[1], [0], [0], [1], [0, 0, 1, 1], [], []>} : vector<24x24xf32>, vector<24x128xf32>, vector<24x128xf32> -> vector<24x128xf32>
    %cst_272 = arith.constant dense<0.000000e+00> : vector<24x128xf32>
    %706 = tpu.matmul %554, %702, %cst_272 {dimension_numbers = #tpu.dot_dimension_numbers<[1], [0], [0], [1], [0, 0, 1, 1], [], []>} : vector<24x24xf32>, vector<24x128xf32>, vector<24x128xf32> -> vector<24x128xf32>
    %c9 = arith.constant 9 : index
    %c0_273 = arith.constant 0 : index
    %c0_274 = arith.constant 0 : index
    %707 = vector.load %arg3[%c9, %c0_273, %c0_274] : memref<24x128x128xf32, #tpu.memory_space<vmem>>, vector<1x128x128xf32>
    %708 = vector.shape_cast %707 : vector<1x128x128xf32> to vector<128x128xf32>
    %cst_275 = arith.constant dense<0.000000e+00> : vector<24x128xf32>
    %709 = tpu.matmul %705, %708, %cst_275 {dimension_numbers = #tpu.dot_dimension_numbers<[1], [0], [0], [1], [0, 0, 1, 1], [], []>} : vector<24x128xf32>, vector<128x128xf32>, vector<24x128xf32> -> vector<24x128xf32>
    %c10 = arith.constant 10 : index
    %c0_276 = arith.constant 0 : index
    %c0_277 = arith.constant 0 : index
    %710 = vector.load %arg3[%c10, %c0_276, %c0_277] : memref<24x128x128xf32, #tpu.memory_space<vmem>>, vector<1x128x128xf32>
    %711 = vector.shape_cast %710 : vector<1x128x128xf32> to vector<128x128xf32>
    %cst_278 = arith.constant dense<0.000000e+00> : vector<24x128xf32>
    %712 = tpu.matmul %702, %711, %cst_278 {dimension_numbers = #tpu.dot_dimension_numbers<[1], [0], [0], [1], [0, 0, 1, 1], [], []>} : vector<24x128xf32>, vector<128x128xf32>, vector<24x128xf32> -> vector<24x128xf32>
    %713 = arith.addf %709, %712 : vector<24x128xf32>
    %c11 = arith.constant 11 : index
    %c0_279 = arith.constant 0 : index
    %c0_280 = arith.constant 0 : index
    %714 = vector.load %arg3[%c11, %c0_279, %c0_280] : memref<24x128x128xf32, #tpu.memory_space<vmem>>, vector<1x128x128xf32>
    %715 = vector.shape_cast %714 : vector<1x128x128xf32> to vector<128x128xf32>
    %cst_281 = arith.constant dense<0.000000e+00> : vector<24x128xf32>
    %716 = tpu.matmul %706, %715, %cst_281 {dimension_numbers = #tpu.dot_dimension_numbers<[1], [0], [0], [1], [0, 0, 1, 1], [], []>} : vector<24x128xf32>, vector<128x128xf32>, vector<24x128xf32> -> vector<24x128xf32>
    %717 = arith.addf %713, %716 : vector<24x128xf32>
    %718 = vector.broadcast %704 : vector<1x128xf32> to vector<24x128xf32>
    %719 = arith.addf %717, %718 : vector<24x128xf32>
    %720 = vector.broadcast %540 : vector<24x1xf32> to vector<24x128xf32>
    %721 = arith.mulf %719, %720 : vector<24x128xf32>
    %c3_282 = arith.constant 3 : index
    %c0_283 = arith.constant 0 : index
    %c0_284 = arith.constant 0 : index
    %722 = vector.load %arg5[%c3_282, %c0_283, %c0_284] : memref<8x1x128xf32, #tpu.memory_space<vmem>>, vector<1x1x128xf32>
    %723 = vector.shape_cast %722 : vector<1x1x128xf32> to vector<1x128xf32>
    %c3_285 = arith.constant 3 : index
    %c0_286 = arith.constant 0 : index
    %c0_287 = arith.constant 0 : index
    %724 = vector.load %arg6[%c3_285, %c0_286, %c0_287] : memref<8x1x128xf32, #tpu.memory_space<vmem>>, vector<1x1x128xf32>
    %725 = vector.shape_cast %724 : vector<1x1x128xf32> to vector<1x128xf32>
    %cst_288 = arith.constant dense<0.000000e+00> : vector<128xf32>
    %726 = vector.multi_reduction <add>, %721, %cst_288 [0] : vector<24x128xf32> to vector<128xf32>
    %727 = vector.shape_cast %726 : vector<128xf32> to vector<1x128xf32>
    %cst_289 = arith.constant 6.250000e-02 : f32
    %728 = vector.broadcast %cst_289 : f32 to vector<1x128xf32>
    %729 = arith.mulf %727, %728 : vector<1x128xf32>
    %730 = vector.broadcast %729 : vector<1x128xf32> to vector<24x128xf32>
    %731 = arith.subf %721, %730 : vector<24x128xf32>
    %732 = vector.broadcast %540 : vector<24x1xf32> to vector<24x128xf32>
    %733 = arith.mulf %731, %732 : vector<24x128xf32>
    %734 = arith.mulf %733, %733 : vector<24x128xf32>
    %cst_290 = arith.constant dense<0.000000e+00> : vector<128xf32>
    %735 = vector.multi_reduction <add>, %734, %cst_290 [0] : vector<24x128xf32> to vector<128xf32>
    %736 = vector.shape_cast %735 : vector<128xf32> to vector<1x128xf32>
    %cst_291 = arith.constant 6.250000e-02 : f32
    %737 = vector.broadcast %cst_291 : f32 to vector<1x128xf32>
    %738 = arith.mulf %736, %737 : vector<1x128xf32>
    %cst_292 = arith.constant 9.99999974E-6 : f32
    %739 = vector.broadcast %cst_292 : f32 to vector<1x128xf32>
    %740 = arith.addf %738, %739 : vector<1x128xf32>
    %741 = math.rsqrt %740 : vector<1x128xf32>
    %742 = vector.broadcast %741 : vector<1x128xf32> to vector<24x128xf32>
    %743 = arith.mulf %731, %742 : vector<24x128xf32>
    %744 = vector.broadcast %723 : vector<1x128xf32> to vector<24x128xf32>
    %745 = arith.mulf %743, %744 : vector<24x128xf32>
    %746 = vector.broadcast %725 : vector<1x128xf32> to vector<24x128xf32>
    %747 = arith.addf %745, %746 : vector<24x128xf32>
    %748 = arith.addf %747, %653 : vector<24x128xf32>
    %cst_293 = arith.constant 0.000000e+00 : f32
    %749 = vector.broadcast %cst_293 : f32 to vector<24x128xf32>
    %750 = arith.maximumf %748, %749 : vector<24x128xf32>
    %751 = vector.broadcast %540 : vector<24x1xf32> to vector<24x128xf32>
    %752 = arith.mulf %750, %751 : vector<24x128xf32>
    %c4_294 = arith.constant 4 : index
    %c0_295 = arith.constant 0 : index
    %c0_296 = arith.constant 0 : index
    %753 = vector.load %arg4[%c4_294, %c0_295, %c0_296] : memref<8x1x128xf32, #tpu.memory_space<vmem>>, vector<1x1x128xf32>
    %754 = vector.shape_cast %753 : vector<1x1x128xf32> to vector<1x128xf32>
    %cst_297 = arith.constant dense<0.000000e+00> : vector<24x128xf32>
    %755 = tpu.matmul %548, %752, %cst_297 {dimension_numbers = #tpu.dot_dimension_numbers<[1], [0], [0], [1], [0, 0, 1, 1], [], []>} : vector<24x24xf32>, vector<24x128xf32>, vector<24x128xf32> -> vector<24x128xf32>
    %cst_298 = arith.constant dense<0.000000e+00> : vector<24x128xf32>
    %756 = tpu.matmul %554, %752, %cst_298 {dimension_numbers = #tpu.dot_dimension_numbers<[1], [0], [0], [1], [0, 0, 1, 1], [], []>} : vector<24x24xf32>, vector<24x128xf32>, vector<24x128xf32> -> vector<24x128xf32>
    %c12 = arith.constant 12 : index
    %c0_299 = arith.constant 0 : index
    %c0_300 = arith.constant 0 : index
    %757 = vector.load %arg3[%c12, %c0_299, %c0_300] : memref<24x128x128xf32, #tpu.memory_space<vmem>>, vector<1x128x128xf32>
    %758 = vector.shape_cast %757 : vector<1x128x128xf32> to vector<128x128xf32>
    %cst_301 = arith.constant dense<0.000000e+00> : vector<24x128xf32>
    %759 = tpu.matmul %755, %758, %cst_301 {dimension_numbers = #tpu.dot_dimension_numbers<[1], [0], [0], [1], [0, 0, 1, 1], [], []>} : vector<24x128xf32>, vector<128x128xf32>, vector<24x128xf32> -> vector<24x128xf32>
    %c13 = arith.constant 13 : index
    %c0_302 = arith.constant 0 : index
    %c0_303 = arith.constant 0 : index
    %760 = vector.load %arg3[%c13, %c0_302, %c0_303] : memref<24x128x128xf32, #tpu.memory_space<vmem>>, vector<1x128x128xf32>
    %761 = vector.shape_cast %760 : vector<1x128x128xf32> to vector<128x128xf32>
    %cst_304 = arith.constant dense<0.000000e+00> : vector<24x128xf32>
    %762 = tpu.matmul %752, %761, %cst_304 {dimension_numbers = #tpu.dot_dimension_numbers<[1], [0], [0], [1], [0, 0, 1, 1], [], []>} : vector<24x128xf32>, vector<128x128xf32>, vector<24x128xf32> -> vector<24x128xf32>
    %763 = arith.addf %759, %762 : vector<24x128xf32>
    %c14 = arith.constant 14 : index
    %c0_305 = arith.constant 0 : index
    %c0_306 = arith.constant 0 : index
    %764 = vector.load %arg3[%c14, %c0_305, %c0_306] : memref<24x128x128xf32, #tpu.memory_space<vmem>>, vector<1x128x128xf32>
    %765 = vector.shape_cast %764 : vector<1x128x128xf32> to vector<128x128xf32>
    %cst_307 = arith.constant dense<0.000000e+00> : vector<24x128xf32>
    %766 = tpu.matmul %756, %765, %cst_307 {dimension_numbers = #tpu.dot_dimension_numbers<[1], [0], [0], [1], [0, 0, 1, 1], [], []>} : vector<24x128xf32>, vector<128x128xf32>, vector<24x128xf32> -> vector<24x128xf32>
    %767 = arith.addf %763, %766 : vector<24x128xf32>
    %768 = vector.broadcast %754 : vector<1x128xf32> to vector<24x128xf32>
    %769 = arith.addf %767, %768 : vector<24x128xf32>
    %770 = vector.broadcast %540 : vector<24x1xf32> to vector<24x128xf32>
    %771 = arith.mulf %769, %770 : vector<24x128xf32>
    %c4_308 = arith.constant 4 : index
    %c0_309 = arith.constant 0 : index
    %c0_310 = arith.constant 0 : index
    %772 = vector.load %arg5[%c4_308, %c0_309, %c0_310] : memref<8x1x128xf32, #tpu.memory_space<vmem>>, vector<1x1x128xf32>
    %773 = vector.shape_cast %772 : vector<1x1x128xf32> to vector<1x128xf32>
    %c4_311 = arith.constant 4 : index
    %c0_312 = arith.constant 0 : index
    %c0_313 = arith.constant 0 : index
    %774 = vector.load %arg6[%c4_311, %c0_312, %c0_313] : memref<8x1x128xf32, #tpu.memory_space<vmem>>, vector<1x1x128xf32>
    %775 = vector.shape_cast %774 : vector<1x1x128xf32> to vector<1x128xf32>
    %cst_314 = arith.constant dense<0.000000e+00> : vector<128xf32>
    %776 = vector.multi_reduction <add>, %771, %cst_314 [0] : vector<24x128xf32> to vector<128xf32>
    %777 = vector.shape_cast %776 : vector<128xf32> to vector<1x128xf32>
    %cst_315 = arith.constant 6.250000e-02 : f32
    %778 = vector.broadcast %cst_315 : f32 to vector<1x128xf32>
    %779 = arith.mulf %777, %778 : vector<1x128xf32>
    %780 = vector.broadcast %779 : vector<1x128xf32> to vector<24x128xf32>
    %781 = arith.subf %771, %780 : vector<24x128xf32>
    %782 = vector.broadcast %540 : vector<24x1xf32> to vector<24x128xf32>
    %783 = arith.mulf %781, %782 : vector<24x128xf32>
    %784 = arith.mulf %783, %783 : vector<24x128xf32>
    %cst_316 = arith.constant dense<0.000000e+00> : vector<128xf32>
    %785 = vector.multi_reduction <add>, %784, %cst_316 [0] : vector<24x128xf32> to vector<128xf32>
    %786 = vector.shape_cast %785 : vector<128xf32> to vector<1x128xf32>
    %cst_317 = arith.constant 6.250000e-02 : f32
    %787 = vector.broadcast %cst_317 : f32 to vector<1x128xf32>
    %788 = arith.mulf %786, %787 : vector<1x128xf32>
    %cst_318 = arith.constant 9.99999974E-6 : f32
    %789 = vector.broadcast %cst_318 : f32 to vector<1x128xf32>
    %790 = arith.addf %788, %789 : vector<1x128xf32>
    %791 = math.rsqrt %790 : vector<1x128xf32>
    %792 = vector.broadcast %791 : vector<1x128xf32> to vector<24x128xf32>
    %793 = arith.mulf %781, %792 : vector<24x128xf32>
    %794 = vector.broadcast %773 : vector<1x128xf32> to vector<24x128xf32>
    %795 = arith.mulf %793, %794 : vector<24x128xf32>
    %796 = vector.broadcast %775 : vector<1x128xf32> to vector<24x128xf32>
    %797 = arith.addf %795, %796 : vector<24x128xf32>
    %cst_319 = arith.constant 0.000000e+00 : f32
    %798 = vector.broadcast %cst_319 : f32 to vector<24x128xf32>
    %799 = arith.maximumf %797, %798 : vector<24x128xf32>
    %800 = vector.broadcast %540 : vector<24x1xf32> to vector<24x128xf32>
    %801 = arith.mulf %799, %800 : vector<24x128xf32>
    %c5_320 = arith.constant 5 : index
    %c0_321 = arith.constant 0 : index
    %c0_322 = arith.constant 0 : index
    %802 = vector.load %arg4[%c5_320, %c0_321, %c0_322] : memref<8x1x128xf32, #tpu.memory_space<vmem>>, vector<1x1x128xf32>
    %803 = vector.shape_cast %802 : vector<1x1x128xf32> to vector<1x128xf32>
    %cst_323 = arith.constant dense<0.000000e+00> : vector<24x128xf32>
    %804 = tpu.matmul %548, %801, %cst_323 {dimension_numbers = #tpu.dot_dimension_numbers<[1], [0], [0], [1], [0, 0, 1, 1], [], []>} : vector<24x24xf32>, vector<24x128xf32>, vector<24x128xf32> -> vector<24x128xf32>
    %cst_324 = arith.constant dense<0.000000e+00> : vector<24x128xf32>
    %805 = tpu.matmul %554, %801, %cst_324 {dimension_numbers = #tpu.dot_dimension_numbers<[1], [0], [0], [1], [0, 0, 1, 1], [], []>} : vector<24x24xf32>, vector<24x128xf32>, vector<24x128xf32> -> vector<24x128xf32>
    %c15 = arith.constant 15 : index
    %c0_325 = arith.constant 0 : index
    %c0_326 = arith.constant 0 : index
    %806 = vector.load %arg3[%c15, %c0_325, %c0_326] : memref<24x128x128xf32, #tpu.memory_space<vmem>>, vector<1x128x128xf32>
    %807 = vector.shape_cast %806 : vector<1x128x128xf32> to vector<128x128xf32>
    %cst_327 = arith.constant dense<0.000000e+00> : vector<24x128xf32>
    %808 = tpu.matmul %804, %807, %cst_327 {dimension_numbers = #tpu.dot_dimension_numbers<[1], [0], [0], [1], [0, 0, 1, 1], [], []>} : vector<24x128xf32>, vector<128x128xf32>, vector<24x128xf32> -> vector<24x128xf32>
    %c16 = arith.constant 16 : index
    %c0_328 = arith.constant 0 : index
    %c0_329 = arith.constant 0 : index
    %809 = vector.load %arg3[%c16, %c0_328, %c0_329] : memref<24x128x128xf32, #tpu.memory_space<vmem>>, vector<1x128x128xf32>
    %810 = vector.shape_cast %809 : vector<1x128x128xf32> to vector<128x128xf32>
    %cst_330 = arith.constant dense<0.000000e+00> : vector<24x128xf32>
    %811 = tpu.matmul %801, %810, %cst_330 {dimension_numbers = #tpu.dot_dimension_numbers<[1], [0], [0], [1], [0, 0, 1, 1], [], []>} : vector<24x128xf32>, vector<128x128xf32>, vector<24x128xf32> -> vector<24x128xf32>
    %812 = arith.addf %808, %811 : vector<24x128xf32>
    %c17 = arith.constant 17 : index
    %c0_331 = arith.constant 0 : index
    %c0_332 = arith.constant 0 : index
    %813 = vector.load %arg3[%c17, %c0_331, %c0_332] : memref<24x128x128xf32, #tpu.memory_space<vmem>>, vector<1x128x128xf32>
    %814 = vector.shape_cast %813 : vector<1x128x128xf32> to vector<128x128xf32>
    %cst_333 = arith.constant dense<0.000000e+00> : vector<24x128xf32>
    %815 = tpu.matmul %805, %814, %cst_333 {dimension_numbers = #tpu.dot_dimension_numbers<[1], [0], [0], [1], [0, 0, 1, 1], [], []>} : vector<24x128xf32>, vector<128x128xf32>, vector<24x128xf32> -> vector<24x128xf32>
    %816 = arith.addf %812, %815 : vector<24x128xf32>
    %817 = vector.broadcast %803 : vector<1x128xf32> to vector<24x128xf32>
    %818 = arith.addf %816, %817 : vector<24x128xf32>
    %819 = vector.broadcast %540 : vector<24x1xf32> to vector<24x128xf32>
    %820 = arith.mulf %818, %819 : vector<24x128xf32>
    %c5_334 = arith.constant 5 : index
    %c0_335 = arith.constant 0 : index
    %c0_336 = arith.constant 0 : index
    %821 = vector.load %arg5[%c5_334, %c0_335, %c0_336] : memref<8x1x128xf32, #tpu.memory_space<vmem>>, vector<1x1x128xf32>
    %822 = vector.shape_cast %821 : vector<1x1x128xf32> to vector<1x128xf32>
    %c5_337 = arith.constant 5 : index
    %c0_338 = arith.constant 0 : index
    %c0_339 = arith.constant 0 : index
    %823 = vector.load %arg6[%c5_337, %c0_338, %c0_339] : memref<8x1x128xf32, #tpu.memory_space<vmem>>, vector<1x1x128xf32>
    %824 = vector.shape_cast %823 : vector<1x1x128xf32> to vector<1x128xf32>
    %cst_340 = arith.constant dense<0.000000e+00> : vector<128xf32>
    %825 = vector.multi_reduction <add>, %820, %cst_340 [0] : vector<24x128xf32> to vector<128xf32>
    %826 = vector.shape_cast %825 : vector<128xf32> to vector<1x128xf32>
    %cst_341 = arith.constant 6.250000e-02 : f32
    %827 = vector.broadcast %cst_341 : f32 to vector<1x128xf32>
    %828 = arith.mulf %826, %827 : vector<1x128xf32>
    %829 = vector.broadcast %828 : vector<1x128xf32> to vector<24x128xf32>
    %830 = arith.subf %820, %829 : vector<24x128xf32>
    %831 = vector.broadcast %540 : vector<24x1xf32> to vector<24x128xf32>
    %832 = arith.mulf %830, %831 : vector<24x128xf32>
    %833 = arith.mulf %832, %832 : vector<24x128xf32>
    %cst_342 = arith.constant dense<0.000000e+00> : vector<128xf32>
    %834 = vector.multi_reduction <add>, %833, %cst_342 [0] : vector<24x128xf32> to vector<128xf32>
    %835 = vector.shape_cast %834 : vector<128xf32> to vector<1x128xf32>
    %cst_343 = arith.constant 6.250000e-02 : f32
    %836 = vector.broadcast %cst_343 : f32 to vector<1x128xf32>
    %837 = arith.mulf %835, %836 : vector<1x128xf32>
    %cst_344 = arith.constant 9.99999974E-6 : f32
    %838 = vector.broadcast %cst_344 : f32 to vector<1x128xf32>
    %839 = arith.addf %837, %838 : vector<1x128xf32>
    %840 = math.rsqrt %839 : vector<1x128xf32>
    %841 = vector.broadcast %840 : vector<1x128xf32> to vector<24x128xf32>
    %842 = arith.mulf %830, %841 : vector<24x128xf32>
    %843 = vector.broadcast %822 : vector<1x128xf32> to vector<24x128xf32>
    %844 = arith.mulf %842, %843 : vector<24x128xf32>
    %845 = vector.broadcast %824 : vector<1x128xf32> to vector<24x128xf32>
    %846 = arith.addf %844, %845 : vector<24x128xf32>
    %847 = arith.addf %846, %752 : vector<24x128xf32>
    %cst_345 = arith.constant 0.000000e+00 : f32
    %848 = vector.broadcast %cst_345 : f32 to vector<24x128xf32>
    %849 = arith.maximumf %847, %848 : vector<24x128xf32>
    %850 = vector.broadcast %540 : vector<24x1xf32> to vector<24x128xf32>
    %851 = arith.mulf %849, %850 : vector<24x128xf32>
    %c6_346 = arith.constant 6 : index
    %c0_347 = arith.constant 0 : index
    %c0_348 = arith.constant 0 : index
    %852 = vector.load %arg4[%c6_346, %c0_347, %c0_348] : memref<8x1x128xf32, #tpu.memory_space<vmem>>, vector<1x1x128xf32>
    %853 = vector.shape_cast %852 : vector<1x1x128xf32> to vector<1x128xf32>
    %cst_349 = arith.constant dense<0.000000e+00> : vector<24x128xf32>
    %854 = tpu.matmul %548, %851, %cst_349 {dimension_numbers = #tpu.dot_dimension_numbers<[1], [0], [0], [1], [0, 0, 1, 1], [], []>} : vector<24x24xf32>, vector<24x128xf32>, vector<24x128xf32> -> vector<24x128xf32>
    %cst_350 = arith.constant dense<0.000000e+00> : vector<24x128xf32>
    %855 = tpu.matmul %554, %851, %cst_350 {dimension_numbers = #tpu.dot_dimension_numbers<[1], [0], [0], [1], [0, 0, 1, 1], [], []>} : vector<24x24xf32>, vector<24x128xf32>, vector<24x128xf32> -> vector<24x128xf32>
    %c18 = arith.constant 18 : index
    %c0_351 = arith.constant 0 : index
    %c0_352 = arith.constant 0 : index
    %856 = vector.load %arg3[%c18, %c0_351, %c0_352] : memref<24x128x128xf32, #tpu.memory_space<vmem>>, vector<1x128x128xf32>
    %857 = vector.shape_cast %856 : vector<1x128x128xf32> to vector<128x128xf32>
    %cst_353 = arith.constant dense<0.000000e+00> : vector<24x128xf32>
    %858 = tpu.matmul %854, %857, %cst_353 {dimension_numbers = #tpu.dot_dimension_numbers<[1], [0], [0], [1], [0, 0, 1, 1], [], []>} : vector<24x128xf32>, vector<128x128xf32>, vector<24x128xf32> -> vector<24x128xf32>
    %c19 = arith.constant 19 : index
    %c0_354 = arith.constant 0 : index
    %c0_355 = arith.constant 0 : index
    %859 = vector.load %arg3[%c19, %c0_354, %c0_355] : memref<24x128x128xf32, #tpu.memory_space<vmem>>, vector<1x128x128xf32>
    %860 = vector.shape_cast %859 : vector<1x128x128xf32> to vector<128x128xf32>
    %cst_356 = arith.constant dense<0.000000e+00> : vector<24x128xf32>
    %861 = tpu.matmul %851, %860, %cst_356 {dimension_numbers = #tpu.dot_dimension_numbers<[1], [0], [0], [1], [0, 0, 1, 1], [], []>} : vector<24x128xf32>, vector<128x128xf32>, vector<24x128xf32> -> vector<24x128xf32>
    %862 = arith.addf %858, %861 : vector<24x128xf32>
    %c20 = arith.constant 20 : index
    %c0_357 = arith.constant 0 : index
    %c0_358 = arith.constant 0 : index
    %863 = vector.load %arg3[%c20, %c0_357, %c0_358] : memref<24x128x128xf32, #tpu.memory_space<vmem>>, vector<1x128x128xf32>
    %864 = vector.shape_cast %863 : vector<1x128x128xf32> to vector<128x128xf32>
    %cst_359 = arith.constant dense<0.000000e+00> : vector<24x128xf32>
    %865 = tpu.matmul %855, %864, %cst_359 {dimension_numbers = #tpu.dot_dimension_numbers<[1], [0], [0], [1], [0, 0, 1, 1], [], []>} : vector<24x128xf32>, vector<128x128xf32>, vector<24x128xf32> -> vector<24x128xf32>
    %866 = arith.addf %862, %865 : vector<24x128xf32>
    %867 = vector.broadcast %853 : vector<1x128xf32> to vector<24x128xf32>
    %868 = arith.addf %866, %867 : vector<24x128xf32>
    %869 = vector.broadcast %540 : vector<24x1xf32> to vector<24x128xf32>
    %870 = arith.mulf %868, %869 : vector<24x128xf32>
    %c6_360 = arith.constant 6 : index
    %c0_361 = arith.constant 0 : index
    %c0_362 = arith.constant 0 : index
    %871 = vector.load %arg5[%c6_360, %c0_361, %c0_362] : memref<8x1x128xf32, #tpu.memory_space<vmem>>, vector<1x1x128xf32>
    %872 = vector.shape_cast %871 : vector<1x1x128xf32> to vector<1x128xf32>
    %c6_363 = arith.constant 6 : index
    %c0_364 = arith.constant 0 : index
    %c0_365 = arith.constant 0 : index
    %873 = vector.load %arg6[%c6_363, %c0_364, %c0_365] : memref<8x1x128xf32, #tpu.memory_space<vmem>>, vector<1x1x128xf32>
    %874 = vector.shape_cast %873 : vector<1x1x128xf32> to vector<1x128xf32>
    %cst_366 = arith.constant dense<0.000000e+00> : vector<128xf32>
    %875 = vector.multi_reduction <add>, %870, %cst_366 [0] : vector<24x128xf32> to vector<128xf32>
    %876 = vector.shape_cast %875 : vector<128xf32> to vector<1x128xf32>
    %cst_367 = arith.constant 6.250000e-02 : f32
    %877 = vector.broadcast %cst_367 : f32 to vector<1x128xf32>
    %878 = arith.mulf %876, %877 : vector<1x128xf32>
    %879 = vector.broadcast %878 : vector<1x128xf32> to vector<24x128xf32>
    %880 = arith.subf %870, %879 : vector<24x128xf32>
    %881 = vector.broadcast %540 : vector<24x1xf32> to vector<24x128xf32>
    %882 = arith.mulf %880, %881 : vector<24x128xf32>
    %883 = arith.mulf %882, %882 : vector<24x128xf32>
    %cst_368 = arith.constant dense<0.000000e+00> : vector<128xf32>
    %884 = vector.multi_reduction <add>, %883, %cst_368 [0] : vector<24x128xf32> to vector<128xf32>
    %885 = vector.shape_cast %884 : vector<128xf32> to vector<1x128xf32>
    %cst_369 = arith.constant 6.250000e-02 : f32
    %886 = vector.broadcast %cst_369 : f32 to vector<1x128xf32>
    %887 = arith.mulf %885, %886 : vector<1x128xf32>
    %cst_370 = arith.constant 9.99999974E-6 : f32
    %888 = vector.broadcast %cst_370 : f32 to vector<1x128xf32>
    %889 = arith.addf %887, %888 : vector<1x128xf32>
    %890 = math.rsqrt %889 : vector<1x128xf32>
    %891 = vector.broadcast %890 : vector<1x128xf32> to vector<24x128xf32>
    %892 = arith.mulf %880, %891 : vector<24x128xf32>
    %893 = vector.broadcast %872 : vector<1x128xf32> to vector<24x128xf32>
    %894 = arith.mulf %892, %893 : vector<24x128xf32>
    %895 = vector.broadcast %874 : vector<1x128xf32> to vector<24x128xf32>
    %896 = arith.addf %894, %895 : vector<24x128xf32>
    %cst_371 = arith.constant 0.000000e+00 : f32
    %897 = vector.broadcast %cst_371 : f32 to vector<24x128xf32>
    %898 = arith.maximumf %896, %897 : vector<24x128xf32>
    %899 = vector.broadcast %540 : vector<24x1xf32> to vector<24x128xf32>
    %900 = arith.mulf %898, %899 : vector<24x128xf32>
    %c7_372 = arith.constant 7 : index
    %c0_373 = arith.constant 0 : index
    %c0_374 = arith.constant 0 : index
    %901 = vector.load %arg4[%c7_372, %c0_373, %c0_374] : memref<8x1x128xf32, #tpu.memory_space<vmem>>, vector<1x1x128xf32>
    %902 = vector.shape_cast %901 : vector<1x1x128xf32> to vector<1x128xf32>
    %cst_375 = arith.constant dense<0.000000e+00> : vector<24x128xf32>
    %903 = tpu.matmul %548, %900, %cst_375 {dimension_numbers = #tpu.dot_dimension_numbers<[1], [0], [0], [1], [0, 0, 1, 1], [], []>} : vector<24x24xf32>, vector<24x128xf32>, vector<24x128xf32> -> vector<24x128xf32>
    %cst_376 = arith.constant dense<0.000000e+00> : vector<24x128xf32>
    %904 = tpu.matmul %554, %900, %cst_376 {dimension_numbers = #tpu.dot_dimension_numbers<[1], [0], [0], [1], [0, 0, 1, 1], [], []>} : vector<24x24xf32>, vector<24x128xf32>, vector<24x128xf32> -> vector<24x128xf32>
    %c21 = arith.constant 21 : index
    %c0_377 = arith.constant 0 : index
    %c0_378 = arith.constant 0 : index
    %905 = vector.load %arg3[%c21, %c0_377, %c0_378] : memref<24x128x128xf32, #tpu.memory_space<vmem>>, vector<1x128x128xf32>
    %906 = vector.shape_cast %905 : vector<1x128x128xf32> to vector<128x128xf32>
    %cst_379 = arith.constant dense<0.000000e+00> : vector<24x128xf32>
    %907 = tpu.matmul %903, %906, %cst_379 {dimension_numbers = #tpu.dot_dimension_numbers<[1], [0], [0], [1], [0, 0, 1, 1], [], []>} : vector<24x128xf32>, vector<128x128xf32>, vector<24x128xf32> -> vector<24x128xf32>
    %c22 = arith.constant 22 : index
    %c0_380 = arith.constant 0 : index
    %c0_381 = arith.constant 0 : index
    %908 = vector.load %arg3[%c22, %c0_380, %c0_381] : memref<24x128x128xf32, #tpu.memory_space<vmem>>, vector<1x128x128xf32>
    %909 = vector.shape_cast %908 : vector<1x128x128xf32> to vector<128x128xf32>
    %cst_382 = arith.constant dense<0.000000e+00> : vector<24x128xf32>
    %910 = tpu.matmul %900, %909, %cst_382 {dimension_numbers = #tpu.dot_dimension_numbers<[1], [0], [0], [1], [0, 0, 1, 1], [], []>} : vector<24x128xf32>, vector<128x128xf32>, vector<24x128xf32> -> vector<24x128xf32>
    %911 = arith.addf %907, %910 : vector<24x128xf32>
    %c23 = arith.constant 23 : index
    %c0_383 = arith.constant 0 : index
    %c0_384 = arith.constant 0 : index
    %912 = vector.load %arg3[%c23, %c0_383, %c0_384] : memref<24x128x128xf32, #tpu.memory_space<vmem>>, vector<1x128x128xf32>
    %913 = vector.shape_cast %912 : vector<1x128x128xf32> to vector<128x128xf32>
    %cst_385 = arith.constant dense<0.000000e+00> : vector<24x128xf32>
    %914 = tpu.matmul %904, %913, %cst_385 {dimension_numbers = #tpu.dot_dimension_numbers<[1], [0], [0], [1], [0, 0, 1, 1], [], []>} : vector<24x128xf32>, vector<128x128xf32>, vector<24x128xf32> -> vector<24x128xf32>
    %915 = arith.addf %911, %914 : vector<24x128xf32>
    %916 = vector.broadcast %902 : vector<1x128xf32> to vector<24x128xf32>
    %917 = arith.addf %915, %916 : vector<24x128xf32>
    %918 = vector.broadcast %540 : vector<24x1xf32> to vector<24x128xf32>
    %919 = arith.mulf %917, %918 : vector<24x128xf32>
    %c7_386 = arith.constant 7 : index
    %c0_387 = arith.constant 0 : index
    %c0_388 = arith.constant 0 : index
    %920 = vector.load %arg5[%c7_386, %c0_387, %c0_388] : memref<8x1x128xf32, #tpu.memory_space<vmem>>, vector<1x1x128xf32>
    %921 = vector.shape_cast %920 : vector<1x1x128xf32> to vector<1x128xf32>
    %c7_389 = arith.constant 7 : index
    %c0_390 = arith.constant 0 : index
    %c0_391 = arith.constant 0 : index
    %922 = vector.load %arg6[%c7_389, %c0_390, %c0_391] : memref<8x1x128xf32, #tpu.memory_space<vmem>>, vector<1x1x128xf32>
    %923 = vector.shape_cast %922 : vector<1x1x128xf32> to vector<1x128xf32>
    %cst_392 = arith.constant dense<0.000000e+00> : vector<128xf32>
    %924 = vector.multi_reduction <add>, %919, %cst_392 [0] : vector<24x128xf32> to vector<128xf32>
    %925 = vector.shape_cast %924 : vector<128xf32> to vector<1x128xf32>
    %cst_393 = arith.constant 6.250000e-02 : f32
    %926 = vector.broadcast %cst_393 : f32 to vector<1x128xf32>
    %927 = arith.mulf %925, %926 : vector<1x128xf32>
    %928 = vector.broadcast %927 : vector<1x128xf32> to vector<24x128xf32>
    %929 = arith.subf %919, %928 : vector<24x128xf32>
    %930 = vector.broadcast %540 : vector<24x1xf32> to vector<24x128xf32>
    %931 = arith.mulf %929, %930 : vector<24x128xf32>
    %932 = arith.mulf %931, %931 : vector<24x128xf32>
    %cst_394 = arith.constant dense<0.000000e+00> : vector<128xf32>
    %933 = vector.multi_reduction <add>, %932, %cst_394 [0] : vector<24x128xf32> to vector<128xf32>
    %934 = vector.shape_cast %933 : vector<128xf32> to vector<1x128xf32>
    %cst_395 = arith.constant 6.250000e-02 : f32
    %935 = vector.broadcast %cst_395 : f32 to vector<1x128xf32>
    %936 = arith.mulf %934, %935 : vector<1x128xf32>
    %cst_396 = arith.constant 9.99999974E-6 : f32
    %937 = vector.broadcast %cst_396 : f32 to vector<1x128xf32>
    %938 = arith.addf %936, %937 : vector<1x128xf32>
    %939 = math.rsqrt %938 : vector<1x128xf32>
    %940 = vector.broadcast %939 : vector<1x128xf32> to vector<24x128xf32>
    %941 = arith.mulf %929, %940 : vector<24x128xf32>
    %942 = vector.broadcast %921 : vector<1x128xf32> to vector<24x128xf32>
    %943 = arith.mulf %941, %942 : vector<24x128xf32>
    %944 = vector.broadcast %923 : vector<1x128xf32> to vector<24x128xf32>
    %945 = arith.addf %943, %944 : vector<24x128xf32>
    %946 = arith.addf %945, %851 : vector<24x128xf32>
    %cst_397 = arith.constant 0.000000e+00 : f32
    %947 = vector.broadcast %cst_397 : f32 to vector<24x128xf32>
    %948 = arith.maximumf %946, %947 : vector<24x128xf32>
    %949 = vector.broadcast %540 : vector<24x1xf32> to vector<24x128xf32>
    %950 = arith.mulf %948, %949 : vector<24x128xf32>
    %951 = tpu.iota {dimensions = array<i32: 0>} : vector<4x24xi32>
    %952 = tpu.iota {dimensions = array<i32: 1>} : vector<4x24xi32>
    %c6_i32_398 = arith.constant 6 : i32
    %953 = vector.broadcast %c6_i32_398 : i32 to vector<4x24xi32>
    %954 = arith.muli %951, %953 : vector<4x24xi32>
    %c1_i32_399 = arith.constant 1 : i32
    %955 = vector.broadcast %c1_i32_399 : i32 to vector<4x24xi32>
    %956 = arith.addi %954, %955 : vector<4x24xi32>
    %c0_i32_400 = arith.constant 0 : i32
    %957 = vector.broadcast %c0_i32_400 : i32 to vector<4x24xi32>
    %958 = arith.addi %956, %957 : vector<4x24xi32>
    %959 = arith.cmpi eq, %952, %958 : vector<4x24xi32>
    %cst_401 = arith.constant 1.000000e+00 : f32
    %cst_402 = arith.constant 0.000000e+00 : f32
    %960 = vector.broadcast %cst_401 : f32 to vector<4x24xf32>
    %961 = vector.broadcast %cst_402 : f32 to vector<4x24xf32>
    %962 = arith.select %959, %960, %961 : vector<4x24xi1>, vector<4x24xf32>
    %cst_403 = arith.constant dense<0.000000e+00> : vector<4x128xf32>
    %963 = tpu.matmul %962, %950, %cst_403 {dimension_numbers = #tpu.dot_dimension_numbers<[1], [0], [0], [1], [0, 0, 1, 1], [], []>} : vector<4x24xf32>, vector<24x128xf32>, vector<4x128xf32> -> vector<4x128xf32>
    %c0_404 = arith.constant 0 : index
    %c0_405 = arith.constant 0 : index
    %c0_406 = arith.constant 0 : index
    %964 = vector.load %arg7[%c0_404, %c0_405, %c0_406] : memref<4x128x32xf32, #tpu.memory_space<vmem>>, vector<1x128x32xf32>
    %965 = vector.shape_cast %964 : vector<1x128x32xf32> to vector<128x32xf32>
    %cst_407 = arith.constant dense<0.000000e+00> : vector<4x32xf32>
    %966 = tpu.matmul %963, %965, %cst_407 {dimension_numbers = #tpu.dot_dimension_numbers<[1], [0], [0], [1], [0, 0, 1, 1], [], []>} : vector<4x128xf32>, vector<128x32xf32>, vector<4x32xf32> -> vector<4x32xf32>
    %c6_i32_408 = arith.constant 6 : i32
    %967 = vector.broadcast %c6_i32_408 : i32 to vector<4x24xi32>
    %968 = arith.muli %951, %967 : vector<4x24xi32>
    %c1_i32_409 = arith.constant 1 : i32
    %969 = vector.broadcast %c1_i32_409 : i32 to vector<4x24xi32>
    %970 = arith.addi %968, %969 : vector<4x24xi32>
    %c1_i32_410 = arith.constant 1 : i32
    %971 = vector.broadcast %c1_i32_410 : i32 to vector<4x24xi32>
    %972 = arith.addi %970, %971 : vector<4x24xi32>
    %973 = arith.cmpi eq, %952, %972 : vector<4x24xi32>
    %cst_411 = arith.constant 1.000000e+00 : f32
    %cst_412 = arith.constant 0.000000e+00 : f32
    %974 = vector.broadcast %cst_411 : f32 to vector<4x24xf32>
    %975 = vector.broadcast %cst_412 : f32 to vector<4x24xf32>
    %976 = arith.select %973, %974, %975 : vector<4x24xi1>, vector<4x24xf32>
    %cst_413 = arith.constant dense<0.000000e+00> : vector<4x128xf32>
    %977 = tpu.matmul %976, %950, %cst_413 {dimension_numbers = #tpu.dot_dimension_numbers<[1], [0], [0], [1], [0, 0, 1, 1], [], []>} : vector<4x24xf32>, vector<24x128xf32>, vector<4x128xf32> -> vector<4x128xf32>
    %c1_414 = arith.constant 1 : index
    %c0_415 = arith.constant 0 : index
    %c0_416 = arith.constant 0 : index
    %978 = vector.load %arg7[%c1_414, %c0_415, %c0_416] : memref<4x128x32xf32, #tpu.memory_space<vmem>>, vector<1x128x32xf32>
    %979 = vector.shape_cast %978 : vector<1x128x32xf32> to vector<128x32xf32>
    %cst_417 = arith.constant dense<0.000000e+00> : vector<4x32xf32>
    %980 = tpu.matmul %977, %979, %cst_417 {dimension_numbers = #tpu.dot_dimension_numbers<[1], [0], [0], [1], [0, 0, 1, 1], [], []>} : vector<4x128xf32>, vector<128x32xf32>, vector<4x32xf32> -> vector<4x32xf32>
    %981 = arith.addf %966, %980 : vector<4x32xf32>
    %c6_i32_418 = arith.constant 6 : i32
    %982 = vector.broadcast %c6_i32_418 : i32 to vector<4x24xi32>
    %983 = arith.muli %951, %982 : vector<4x24xi32>
    %c1_i32_419 = arith.constant 1 : i32
    %984 = vector.broadcast %c1_i32_419 : i32 to vector<4x24xi32>
    %985 = arith.addi %983, %984 : vector<4x24xi32>
    %c2_i32_420 = arith.constant 2 : i32
    %986 = vector.broadcast %c2_i32_420 : i32 to vector<4x24xi32>
    %987 = arith.addi %985, %986 : vector<4x24xi32>
    %988 = arith.cmpi eq, %952, %987 : vector<4x24xi32>
    %cst_421 = arith.constant 1.000000e+00 : f32
    %cst_422 = arith.constant 0.000000e+00 : f32
    %989 = vector.broadcast %cst_421 : f32 to vector<4x24xf32>
    %990 = vector.broadcast %cst_422 : f32 to vector<4x24xf32>
    %991 = arith.select %988, %989, %990 : vector<4x24xi1>, vector<4x24xf32>
    %cst_423 = arith.constant dense<0.000000e+00> : vector<4x128xf32>
    %992 = tpu.matmul %991, %950, %cst_423 {dimension_numbers = #tpu.dot_dimension_numbers<[1], [0], [0], [1], [0, 0, 1, 1], [], []>} : vector<4x24xf32>, vector<24x128xf32>, vector<4x128xf32> -> vector<4x128xf32>
    %c2_424 = arith.constant 2 : index
    %c0_425 = arith.constant 0 : index
    %c0_426 = arith.constant 0 : index
    %993 = vector.load %arg7[%c2_424, %c0_425, %c0_426] : memref<4x128x32xf32, #tpu.memory_space<vmem>>, vector<1x128x32xf32>
    %994 = vector.shape_cast %993 : vector<1x128x32xf32> to vector<128x32xf32>
    %cst_427 = arith.constant dense<0.000000e+00> : vector<4x32xf32>
    %995 = tpu.matmul %992, %994, %cst_427 {dimension_numbers = #tpu.dot_dimension_numbers<[1], [0], [0], [1], [0, 0, 1, 1], [], []>} : vector<4x128xf32>, vector<128x32xf32>, vector<4x32xf32> -> vector<4x32xf32>
    %996 = arith.addf %981, %995 : vector<4x32xf32>
    %c6_i32_428 = arith.constant 6 : i32
    %997 = vector.broadcast %c6_i32_428 : i32 to vector<4x24xi32>
    %998 = arith.muli %951, %997 : vector<4x24xi32>
    %c1_i32_429 = arith.constant 1 : i32
    %999 = vector.broadcast %c1_i32_429 : i32 to vector<4x24xi32>
    %1000 = arith.addi %998, %999 : vector<4x24xi32>
    %c3_i32 = arith.constant 3 : i32
    %1001 = vector.broadcast %c3_i32 : i32 to vector<4x24xi32>
    %1002 = arith.addi %1000, %1001 : vector<4x24xi32>
    %1003 = arith.cmpi eq, %952, %1002 : vector<4x24xi32>
    %cst_430 = arith.constant 1.000000e+00 : f32
    %cst_431 = arith.constant 0.000000e+00 : f32
    %1004 = vector.broadcast %cst_430 : f32 to vector<4x24xf32>
    %1005 = vector.broadcast %cst_431 : f32 to vector<4x24xf32>
    %1006 = arith.select %1003, %1004, %1005 : vector<4x24xi1>, vector<4x24xf32>
    %cst_432 = arith.constant dense<0.000000e+00> : vector<4x128xf32>
    %1007 = tpu.matmul %1006, %950, %cst_432 {dimension_numbers = #tpu.dot_dimension_numbers<[1], [0], [0], [1], [0, 0, 1, 1], [], []>} : vector<4x24xf32>, vector<24x128xf32>, vector<4x128xf32> -> vector<4x128xf32>
    %c3_433 = arith.constant 3 : index
    %c0_434 = arith.constant 0 : index
    %c0_435 = arith.constant 0 : index
    %1008 = vector.load %arg7[%c3_433, %c0_434, %c0_435] : memref<4x128x32xf32, #tpu.memory_space<vmem>>, vector<1x128x32xf32>
    %1009 = vector.shape_cast %1008 : vector<1x128x32xf32> to vector<128x32xf32>
    %cst_436 = arith.constant dense<0.000000e+00> : vector<4x32xf32>
    %1010 = tpu.matmul %1007, %1009, %cst_436 {dimension_numbers = #tpu.dot_dimension_numbers<[1], [0], [0], [1], [0, 0, 1, 1], [], []>} : vector<4x128xf32>, vector<128x32xf32>, vector<4x32xf32> -> vector<4x32xf32>
    %1011 = arith.addf %996, %1010 : vector<4x32xf32>
    %c0_437 = arith.constant 0 : index
    %c0_438 = arith.constant 0 : index
    %1012 = vector.load %arg8[%c0_437, %c0_438] : memref<4x32xf32, #tpu.memory_space<vmem>>, vector<4x32xf32>
    tpu.vector_store %arg8[%c0_437, %c0_438], %1011 {strides = array<i32>} : memref<4x32xf32, #tpu.memory_space<vmem>>, vector<4x32xf32>,
    return
  }
  func.func @transform_0(%arg0: i32) -> (i32, i32) {
    %c0_i32 = arith.constant 0 : i32
    %c0_i32_0 = arith.constant 0 : i32
    %c0_i32_1 = arith.constant 0 : i32
    return %c0_i32, %c0_i32_0 : i32, i32
  }
  func.func @transform_1(%arg0: i32) -> (i32, i32, i32) {
    %c0_i32 = arith.constant 0 : i32
    %c0_i32_0 = arith.constant 0 : i32
    %c0_i32_1 = arith.constant 0 : i32
    %c0_i32_2 = arith.constant 0 : i32
    return %c0_i32, %c0_i32_0, %c0_i32_1 : i32, i32, i32
  }
  func.func @transform_2(%arg0: i32) -> (i32, i32, i32) {
    %c0_i32 = arith.constant 0 : i32
    %c0_i32_0 = arith.constant 0 : i32
    %c0_i32_1 = arith.constant 0 : i32
    %c0_i32_2 = arith.constant 0 : i32
    return %c0_i32, %c0_i32_0, %c0_i32_1 : i32, i32, i32
  }
  func.func @transform_3(%arg0: i32) -> (i32, i32, i32) {
    %c0_i32 = arith.constant 0 : i32
    %c0_i32_0 = arith.constant 0 : i32
    %c0_i32_1 = arith.constant 0 : i32
    %c0_i32_2 = arith.constant 0 : i32
    return %c0_i32, %c0_i32_0, %c0_i32_1 : i32, i32, i32
  }
  func.func @transform_4(%arg0: i32) -> (i32, i32, i32) {
    %c0_i32 = arith.constant 0 : i32
    %c0_i32_0 = arith.constant 0 : i32
    %c0_i32_1 = arith.constant 0 : i32
    %c0_i32_2 = arith.constant 0 : i32
    return %c0_i32, %c0_i32_0, %c0_i32_1 : i32, i32, i32
  }
  func.func @transform_5(%arg0: i32) -> (i32, i32, i32) {
    %c0_i32 = arith.constant 0 : i32
    %c0_i32_0 = arith.constant 0 : i32
    %c0_i32_1 = arith.constant 0 : i32
    %c0_i32_2 = arith.constant 0 : i32
    return %c0_i32, %c0_i32_0, %c0_i32_1 : i32, i32, i32
  }
  func.func @transform_6(%arg0: i32) -> (i32, i32, i32) {
    %c0_i32 = arith.constant 0 : i32
    %c0_i32_0 = arith.constant 0 : i32
    %c0_i32_1 = arith.constant 0 : i32
    %c0_i32_2 = arith.constant 0 : i32
    return %c0_i32, %c0_i32_0, %c0_i32_1 : i32, i32, i32
  }
  func.func @transform_7(%arg0: i32) -> (i32, i32) {
    %c0_i32 = arith.constant 0 : i32
    %c0_i32_0 = arith.constant 0 : i32
    %c0_i32_1 = arith.constant 0 : i32
    return %c0_i32, %c0_i32_0 : i32, i32
  }
}

</mosaic_0001>

<bundles_post_ra>
// kernel: swat_lenet_resnet_forward.1
= control target key start
LH: loop header
LB: loop body
LE: loop exit
PB: predicated region body
PF: predicated region fallthrough
CT: control target
= control target key end

     0   :  { %12 = vsyncpa [#allocation3], 0  ;;  %s17286_s0 = inlined_call_operand.vmem [shape: f32[136,128], index: 0, kind: input, shape index: {}]   ;;  %s17287_s1 = inlined_call_operand.hbm [shape: f32[9,128,128], index: 1, kind: input, shape index: {}]   ;;  %s17288_s2 = inlined_call_operand.hbm [shape: f32[24,128,128], index: 2, kind: input, shape index: {}]   ;;  %s17289_s3 = inlined_call_operand.hbm [shape: f32[8,1,128], index: 3, kind: input, shape index: {}]   ;;  %s17290_s4 = inlined_call_operand.hbm [shape: f32[8,1,128], index: 4, kind: input, shape index: {}]   ;;  %s17291_s5 = inlined_call_operand.hbm [shape: f32[8,1,128], index: 5, kind: input, shape index: {}]   ;;  %s17292_s6 = inlined_call_operand.vmem [shape: f32[4,128,32], index: 6, kind: input, shape index: {}]   ;;  %s17293_s7 = inlined_call_operand.hbm [shape: f32[4,32], index: 7, kind: output, shape index: {}]  }
   0x1   :  { %13 = vsyncpa [#allocation6], 0 }
   0x2   :  { %14 = vsyncpa [#allocation9], 0 }
   0x3   :  { %15 = vsyncpa [#allocation4], 0  ;;  %s13507_s24 = smov [#allocation5]  }
   0x4   :  { %s35_s25 = sshll.u32 %s13507_s24, 4  ;;  %s36_s25 = int_to_ptr.vmem [resolvable:$true] %s35_s25 }
   0x5   :  { %s13387_s26 = scalar_lea.vmem %s36_s25, 49152  ;;  %p13392_p1 = scmp.lt.s32.totalorder %s36_s25, %s36_s25 }
   0x6   :  { %p13388_p0 = scmp.ne.s32.totalorder %s36_s25, %s13387_s26  ;;  %p13393_p2 = scmp.lt.s32.totalorder %s13387_s26, %s13387_s26 }
   0x8   :  { %p13394_p3 = por %p13393_p2, %p13392_p1 }
   0xa   :  { %p13395_p4 = pnand %p13394_p3, %p13388_p0 }
   0xc   :  { %13398 = shalt.err (!%p13395_p4)
}
   0xd   :  { %s13508_s27 = smov 128   ;;  %s13509_s28 = smov 8  }
   0xe   :  { %41 = dma.hbm_to_vmem [thread:$0]  %s17288_s2, 49152, %s36_s25, [#allocation6], %s13508_s27, %s13508_s27, %s13509_s28  }
   0xf   :  { %s13510_s8 = smov [#allocation8]   ;;  %s13511_s10 = smov [#allocation2]  }
  0x10   :  { %s59_s9 = sshll.u32 %s13510_s8, 4  ;;  %s23_s11 = sshll.u32 %s13511_s10, 4  ;;  %s60_s9 = int_to_ptr.vmem [resolvable:$true] %s59_s9  ;;  %s24_s11 = int_to_ptr.vmem [resolvable:$true] %s23_s11 }
  0x11   :  { %s13407_s12 = scalar_lea.vmem %s60_s9, 128  ;;  %p13412_p6 = scmp.lt.s32.totalorder %s60_s9, %s60_s9 }
  0x12   :  { %p13408_p5 = scmp.ne.s32.totalorder %s60_s9, %s13407_s12  ;;  %p13413_p7 = scmp.lt.s32.totalorder %s13407_s12, %s13407_s12 }
  0x14   :  { %p13414_p8 = por %p13413_p7, %p13412_p6 }
  0x16   :  { %p13415_p9 = pnand %p13414_p8, %p13408_p5 }
  0x18   :  { %13418 = shalt.err (!%p13415_p9)
}
  0x19   :  { %s13512_s13 = smov 16   ;;  %s13513_s14 = smov 1  }
  0x1a   :  { %65 = dma.hbm_to_vmem [thread:$0]  %s17290_s4, 128, %s60_s9, [#allocation9], %s13512_s13, %s13512_s13, %s13513_s14  }
  0x1b   :  { %s13427_s2 = scalar_lea.vmem %s24_s11, 18432  ;;  %p13432_p11 = scmp.lt.s32.totalorder %s24_s11, %s24_s11 }
  0x1c   :  { %p13428_p10 = scmp.ne.s32.totalorder %s24_s11, %s13427_s2  ;;  %p13433_p12 = scmp.lt.s32.totalorder %s13427_s2, %s13427_s2 }
  0x1e   :  { %p13434_p13 = por %p13433_p12, %p13432_p11 }
  0x20   :  { %p13435_p0 = pnand %p13434_p13, %p13428_p10 }
  0x22   :  { %13438 = shalt.err (!%p13435_p0)
}
  0x23   :  { %29 = dma.hbm_to_vmem [thread:$0]  %s17287_s1, 18432, %s24_s11, [#allocation3], %s13508_s27, %s13508_s27, %s13509_s28  }
  0x24   :  { %s13514_s19 = smov [#allocation7]   ;;  %s13515_s21 = smov [#allocation10]  }
  0x25   :  { %s47_s20 = sshll.u32 %s13514_s19, 4  ;;  %s71_s22 = sshll.u32 %s13515_s21, 4  ;;  %s48_s20 = int_to_ptr.vmem [resolvable:$true] %s47_s20  ;;  %s72_s22 = int_to_ptr.vmem [resolvable:$true] %s71_s22 }
  0x26   :  { %s13447_s23 = scalar_lea.vmem %s48_s20, 128  ;;  %p13452_p2 = scmp.lt.s32.totalorder %s48_s20, %s48_s20 }
  0x27   :  { %p13448_p1 = scmp.ne.s32.totalorder %s48_s20, %s13447_s23  ;;  %p13453_p3 = scmp.lt.s32.totalorder %s13447_s23, %s13447_s23 }
  0x29   :  { %p13454_p4 = por %p13453_p3, %p13452_p2 }
  0x2b   :  { %p13455_p5 = pnand %p13454_p4, %p13448_p1 }
  0x2d   :  { %13458 = shalt.err (!%p13455_p5)
}
  0x2e   :  { %53 = dma.hbm_to_vmem [thread:$0]  %s17289_s3, 128, %s48_s20, [#allocation6], %s13512_s13, %s13512_s13, %s13513_s14  }
  0x2f   :  { %s13467_s1 = scalar_lea.vmem %s72_s22, 128  ;;  %p13472_p7 = scmp.lt.s32.totalorder %s72_s22, %s72_s22 }
  0x30   :  { %p13468_p6 = scmp.ne.s32.totalorder %s72_s22, %s13467_s1  ;;  %p13473_p8 = scmp.lt.s32.totalorder %s13467_s1, %s13467_s1 }
  0x32   :  { %p13474_p9 = por %p13473_p8, %p13472_p7 }
  0x34   :  { %p13475_p10 = pnand %p13474_p9, %p13468_p6 }
  0x36   :  { %13478 = shalt.err (!%p13475_p10)
}
  0x37   :  { %77 = dma.hbm_to_vmem [thread:$0]  %s17291_s5, 128, %s72_s22, [#allocation9], %s13512_s13, %s13512_s13, %s13513_s14  }
  0x38   :  { %13499 = dma.done.wait [#allocation3], 18432  }
  0x39   :  { %13500 = vsyncadd [#allocation3], 4294948864 }
  0x3a   :  { %13501 = dma.done.wait [#allocation6], 49280  }
  0x3b   :  { %13502 = vsyncadd [#allocation6], 4294918016 }
  0x3c   :  { %13503 = dma.done.wait [#allocation9], 256  }
  0x3d   :  { %13504 = vsyncadd [#allocation9], 4294967040  ;;  %v17305_v0 = vmov 0.0   ;;  %v13591_v1 = vld [vmem:[%s17286_s0 + $0x78] sm:$0xff]  ;;  %v13596_v2 = vld [vmem:[%s17286_s0 + $0x70] sm:$0xff]  ;;  %v112_v12 = vlaneseq  ;;  %v17303_v27 = vmov 1.0  }
  0x3e   :  { %627 = vmatprep.subr.mxu0 %v17305_v0  ;;  %828 = vmatprep.subr.mxu1 %v17305_v0  ;;  %v13605_v3 = vld [vmem:[%s17286_s0 + $0x68] sm:$0xff]  ;;  %v13614_v4 = vld [vmem:[%s17286_s0 + $0x60] sm:$0xff]  ;;  %v13623_v5 = vld [vmem:[%s17286_s0 + $0x58] sm:$0xff]  ;;  %s13519_s18 = smov [#allocation11]  }
  0x3f   :  { %691 = vmatprep.mubr.f32.mxu0 %v17305_v0  ;;  %892 = vmatprep.mubr.f32.mxu1 %v17305_v0  ;;  %v13632_v6 = vld [vmem:[%s17286_s0 + $0x50] sm:$0xff]  ;;  %v13641_v7 = vld [vmem:[%s17286_s0 + $0x48] sm:$0xff]  ;;  %v13650_v8 = vld [vmem:[%s17286_s0 + $0x40] sm:$0xff]  ;;  %v13699_v15 = vshrl.u32 %v112_v12, 7  ;;  %v13719_v18 = vand.u32 127, %v112_v12  ;;  %s9775_s19 = sshll.u32 %s13519_s18, 4  ;;  %s9776_s19 = int_to_ptr.vmem [resolvable:$true] %s9775_s19 }
  0x40   :  { %628 = vmatpush1.msra.mxu0 %v13591_v1  ;;  %829 = vmatpush1.msra.mxu1 %v13591_v1  ;;  %v13659_v9 = vld [vmem:[%s17286_s0 + $0x38] sm:$0xff]  ;;  %v13668_v10 = vld [vmem:[%s17286_s0 + $0x30] sm:$0xff]  ;;  %v13677_v11 = vld [vmem:[%s17286_s0 + $0x28] sm:$0xff]  ;;  %p13484_p12 = scmp.lt.s32.totalorder %s9776_s19, %s9776_s19 }
  0x41   :  { %629 = vmatprep.subr.mxu0 %v17305_v0  ;;  %830 = vmatprep.subr.mxu1 %v17305_v0  ;;  %v13686_v13 = vld [vmem:[%s17286_s0 + $0x20] sm:$0xff]  ;;  %v13695_v14 = vld [vmem:[%s17286_s0 + $0x18] sm:$0xff]  ;;  %v13706_v16 = vld [vmem:[%s17286_s0 + $0x10] sm:$0xff]  ;;  %v13722_v19 = vadd.s32 4294967295, %v13699_v15  ;;  %v13725_v20 = vadd.s32 1, %v13699_v15  ;;  %v13728_v21 = vadd.s32 8, %v13699_v15 }
  0x42   :  { %630 = vmatpush1.msra.mxu0 %v13596_v2  ;;  %831 = vmatpush1.msra.mxu1 %v13596_v2  ;;  %v13715_v17 = vld [vmem:[%s17286_s0 + $0x8] sm:$0xff]  ;;  %v13735_v22 = vld [vmem:[%s17286_s0] sm:$0xff]  ;;  %v13747_v24 = vadd.s32 16, %v13699_v15  ;;  %v13774_v28 = vadd.s32 24, %v13699_v15  ;;  %v1010_v29 = vld [vmem:[#allocation2 + $0xf8] sm:$0xff]  ;;  %v13799_v33 = vadd.s32 32, %v13699_v15 }
  0x43   :  { %631 = vmatprep.subr.mxu0 %v17305_v0  ;;  %832 = vmatprep.subr.mxu1 %v17305_v0  ;;  %17368 = vst [vmem:[#allocation16_spill] sm:$0xff] %v13728_v21  ;;  %v13744_v23 = vld [vmem:[%s17286_s0 + $0x80] sm:$0xff]  ;;  %vm17342_vm0 = vcmp.eq.s32.totalorder %v13719_v18, %v13722_v19  ;;  %vm17341_vm1 = vcmp.eq.s32.totalorder %v13719_v18, %v13725_v20  ;;  %v13756_v25 = vadd.s32 4294967295, %v13728_v21  ;;  %v13759_v26 = vadd.s32 1, %v13728_v21  ;;  %v993_v30 = vld [vmem:[#allocation2 + $0x78] sm:$0xff]  ;;  %v1009_v34 = vld [vmem:[#allocation2 + $0xf0] sm:$0xff] }
  0x44   :  { %632 = vmatpush1.msra.mxu0 %v13605_v3  ;;  %833 = vmatpush1.msra.mxu1 %v13605_v3  ;;  %17369 = vst [vmem:[#allocation17_spill] sm:$0xff] %v13774_v28  ;;  %v13783_v31 = vadd.s32 4294967295, %v13747_v24  ;;  %v13786_v32 = vadd.s32 1, %v13747_v24  ;;  %v992_v35 = vld [vmem:[#allocation2 + $0x70] sm:$0xff]  ;;  %v13808_v36 = vadd.s32 4294967295, %v13774_v28  ;;  %v13811_v37 = vadd.s32 1, %v13774_v28 }
  0x45   :  { %633 = vmatprep.subr.mxu0 %v17305_v0  ;;  %834 = vmatprep.subr.mxu1 %v17305_v0  ;;  %vm17340_vm2 = vcmp.eq.s32.totalorder %v13719_v18, %v13756_v25  ;;  %vm17337_vm3 = vcmp.eq.s32.totalorder %v13719_v18, %v13759_v26  ;;  %v13824_v38 = vadd.s32 40, %v13699_v15  ;;  %v1008_v39 = vld [vmem:[#allocation2 + $0xe8] sm:$0xff]  ;;  %v13833_v41 = vadd.s32 4294967295, %v13799_v33  ;;  %v1007_v44 = vld [vmem:[#allocation2 + $0xe0] sm:$0xff]  ;;  %v1006_v49 = vld [vmem:[#allocation2 + $0xd8] sm:$0xff] }
  0x46   :  { %634 = vmatpush1.msra.mxu0 %v13614_v4  ;;  %835 = vmatpush1.msra.mxu1 %v13614_v4  ;;  %vm17334_vm4 = vcmp.eq.s32.totalorder %v13719_v18, %v13783_v31  ;;  %vm17326_vm5 = vcmp.eq.s32.totalorder %v13719_v18, %v13786_v32  ;;  %17370 = vst [vmem:[#allocation18_spill] sm:$0xff] %v13811_v37  ;;  %v991_v40 = vld [vmem:[#allocation2 + $0x68] sm:$0xff]  ;;  %v13836_v42 = vadd.s32 1, %v13799_v33  ;;  %v13849_v43 = vadd.s32 48, %v13699_v15  ;;  %v990_v45 = vld [vmem:[#allocation2 + $0x60] sm:$0xff]  ;;  %v989_v50 = vld [vmem:[#allocation2 + $0x58] sm:$0xff] }
  0x47   :  { %635 = vmatprep.subr.mxu0 %v17305_v0  ;;  %836 = vmatprep.subr.mxu1 %v17305_v0  ;;  %vm17322_vm6 = vcmp.eq.s32.totalorder %v13719_v18, %v13808_v36  ;;  %vm17321_vm7 = vcmp.eq.s32.totalorder %v13719_v18, %v13811_v37  ;;  %17371 = vst [vmem:[#allocation19_spill] sm:$0xff] %v13833_v41  ;;  %v13858_v46 = vadd.s32 4294967295, %v13824_v38  ;;  %v13861_v47 = vadd.s32 1, %v13824_v38  ;;  %v1005_v54 = vld [vmem:[#allocation2 + $0xd0] sm:$0xff]  ;;  %v1004_v59 = vld [vmem:[#allocation2 + $0xc8] sm:$0xff]  ;;  %v1003_v12 = vld [vmem:[#allocation2 + $0xc0] sm:$0xff] }
  0x48   :  { %636 = vmatpush1.msra.mxu0 %v13623_v5  ;;  %837 = vmatpush1.msra.mxu1 %v13623_v5  ;;  %17372 = vst [vmem:[#allocation20_spill] sm:$0xff] %v13836_v42  ;;  %17373 = vst [vmem:[#allocation21_spill] sm:$0xff] %v13849_v43  ;;  %vm17320_vm8 = vcmp.eq.s32.totalorder %v13719_v18, %v13833_v41  ;;  %vm17302_vm9 = vcmp.eq.s32.totalorder %v13719_v18, %v13836_v42  ;;  %v13874_v48 = vadd.s32 4294967295, %v13849_v43  ;;  %v988_v55 = vld [vmem:[#allocation2 + $0x50] sm:$0xff]  ;;  %v987_v60 = vld [vmem:[#allocation2 + $0x48] sm:$0xff] }
  0x49   :  { %637 = vmatprep.subr.mxu0 %v17305_v0  ;;  %838 = vmatprep.subr.mxu1 %v17305_v0  ;;  %17374 = vst [vmem:[#allocation22_spill] sm:$0xff] %v13858_v46  ;;  %17375 = vst [vmem:[#allocation23_spill] sm:$0xff] %v13861_v47  ;;  %vm17301_vm10 = vcmp.eq.s32.totalorder %v13719_v18, %v13858_v46  ;;  %vm17300_vm11 = vcmp.eq.s32.totalorder %v13719_v18, %v13861_v47  ;;  %v13883_v51 = vadd.s32 1, %v13849_v43 }
  0x4a   :  { %638 = vmatpush1.msra.mxu0 %v13632_v6  ;;  %839 = vmatpush1.msra.mxu1 %v13632_v6  ;;  %17376 = vst [vmem:[#allocation24_spill] sm:$0xff] %v13874_v48  ;;  %v13886_v52 = vadd.s32 56, %v13699_v15  ;;  %v13899_v53 = vadd.s32 64, %v13699_v15  ;;  %vm17295_vm12 = vcmp.eq.s32.totalorder %v13719_v18, %v13874_v48  ;;  %v122_v62 = vadd.s32 72, %v13699_v15 }
  0x4b   :  { %639 = vmatprep.subr.mxu0 %v17305_v0  ;;  %840 = vmatprep.subr.mxu1 %v17305_v0  ;;  %17377 = vst [vmem:[#allocation25_spill] sm:$0xff] %v13883_v51  ;;  %vm17294_vm13 = vcmp.eq.s32.totalorder %v13719_v18, %v13883_v51  ;;  %v123_v63 = vadd.s32 80, %v13699_v15 }
  0x4c   :  { %640 = vmatpush1.msra.mxu0 %v13641_v7  ;;  %841 = vmatpush1.msra.mxu1 %v13641_v7  ;;  %v13908_v56 = vadd.s32 4294967295, %v13886_v52  ;;  %v13911_v57 = vadd.s32 1, %v13886_v52  ;;  %v13924_v58 = vadd.s32 4294967295, %v13899_v53  ;;  %v13933_v61 = vadd.s32 1, %v13899_v53 }
  0x4d   :  { %641 = vmatprep.subr.mxu0 %v17305_v0  ;;  %842 = vmatprep.subr.mxu1 %v17305_v0 }
  0x4e   :  { %642 = vmatpush1.msra.mxu0 %v13650_v8  ;;  %843 = vmatpush1.msra.mxu1 %v13650_v8  ;;  %17378 = vst [vmem:[#allocation26_spill] sm:$0xff] %v13908_v56  ;;  %17379 = vst [vmem:[#allocation27_spill] sm:$0xff] %v13911_v57  ;;  %vm17297_vm14 = vcmp.eq.s32.totalorder %v13719_v18, %v13908_v56  ;;  %vm17296_vm15 = vcmp.eq.s32.totalorder %v13719_v18, %v13911_v57 }
  0x4f   :  { %643 = vmatprep.subr.mxu0 %v17305_v0  ;;  %844 = vmatprep.subr.mxu1 %v17305_v0  ;;  %17380 = vst [vmem:[#allocation28_spill] sm:$0xff] %v13924_v58  ;;  %17381 = vst [vmem:[#allocation29_spill] sm:$0xff] %v13933_v61 }
  0x50   :  { %644 = vmatpush1.msra.mxu0 %v13659_v9  ;;  %845 = vmatpush1.msra.mxu1 %v13659_v9 }
  0x51   :  { %645 = vmatprep.subr.mxu0 %v17305_v0  ;;  %846 = vmatprep.subr.mxu1 %v17305_v0 }
  0x52   :  { %646 = vmatpush1.msra.mxu0 %v13668_v10  ;;  %847 = vmatpush1.msra.mxu1 %v13668_v10 }
  0x53   :  { %647 = vmatprep.subr.mxu0 %v17305_v0  ;;  %848 = vmatprep.subr.mxu1 %v17305_v0 }
  0x54   :  { %648 = vmatpush1.msra.mxu0 %v13677_v11  ;;  %849 = vmatpush1.msra.mxu1 %v13677_v11 }
  0x55   :  { %649 = vmatprep.subr.mxu0 %v17305_v0  ;;  %850 = vmatprep.subr.mxu1 %v17305_v0 }
  0x56   :  { %650 = vmatpush1.msra.mxu0 %v13686_v13  ;;  %851 = vmatpush1.msra.mxu1 %v13686_v13 }
  0x57   :  { %651 = vmatprep.subr.mxu0 %v17305_v0  ;;  %852 = vmatprep.subr.mxu1 %v17305_v0 }
  0x58   :  { %652 = vmatpush1.msra.mxu0 %v13695_v14  ;;  %853 = vmatpush1.msra.mxu1 %v13695_v14 }
  0x59   :  { %653 = vmatprep.subr.mxu0 %v17305_v0  ;;  %854 = vmatprep.subr.mxu1 %v17305_v0 }
  0x5a   :  { %654 = vmatpush1.msra.mxu0 %v13706_v16  ;;  %855 = vmatpush1.msra.mxu1 %v13706_v16 }
  0x5b   :  { %655 = vmatprep.subr.mxu0 %v17305_v0  ;;  %856 = vmatprep.subr.mxu1 %v17305_v0 }
  0x5c   :  { %656 = vmatpush1.msra.mxu0 %v13715_v17  ;;  %857 = vmatpush1.msra.mxu1 %v13715_v17 }
  0x5d   :  { %657 = vmatprep.subr.mxu0 %v17305_v0  ;;  %858 = vmatprep.subr.mxu1 %v17305_v0 }
  0x5e   :  { %658 = vmatpush1.msra.mxu0 %v13735_v22  ;;  %859 = vmatpush1.msra.mxu1 %v13735_v22 }
  0x5f   :  { %689 = vmatprep.subr.mxu0 %v17305_v0  ;;  %890 = vmatprep.subr.mxu1 %v17305_v0 }
  0x60   :  { %690 = vmatpush2.msra.mxu0 %v13744_v23  ;;  %891 = vmatpush2.msra.mxu1 %v13744_v23 }
  0x61   :  { %9803 = vmatmul.mubr.msk.f32.vlgmr.msra.gmra.mxu0 %vm17342_vm0, %v17303_v27  ;;  %9821 = vmatmul.mubr.msk.f32.vlgmr.msra.gmra.mxu1 %vm17341_vm1, %v17303_v27 }
  0x62   :  { %696 = vmatprep.mubr.f32.mxu0 %v17305_v0  ;;  %897 = vmatprep.mubr.f32.mxu1 %v17305_v0 }
  0x63   :  { %11133 = vmatprep.subr.mxu0 %v17305_v0  ;;  %11216 = vmatprep.subr.mxu1 %v17305_v0 }
  0x64   :  { %11134 = vmatpush3.msra.mxu0 %v1010_v29  ;;  %11217 = vmatpush3.msra.mxu1 %v993_v30  ;;  %v986_v29 = vld [vmem:[#allocation2 + $0x40] sm:$0xff]  ;;  %v9795_v30 = vadd.s32 4294967295, %v122_v62 }
  0x65   :  { %9804 = vmatmul.mubr.msk.f32.gmra.mxu0 %vm17340_vm2, %v17303_v27  ;;  %9822 = vmatmul.mubr.msk.f32.gmra.mxu1 %vm17337_vm3, %v17303_v27 }
  0x66   :  { %701 = vmatprep.mubr.f32.mxu0 %v17305_v0  ;;  %902 = vmatprep.mubr.f32.mxu1 %v17305_v0 }
  0x67   :  { %11135 = vmatprep.subr.mxu0 %v17305_v0  ;;  %11218 = vmatprep.subr.mxu1 %v17305_v0 }
  0x68   :  { %11136 = vmatpush3.msra.mxu0 %v1009_v34  ;;  %11219 = vmatpush3.msra.mxu1 %v992_v35  ;;  %v499_v34 = vadd.s32 1, %v122_v62  ;;  %v124_v35 = vadd.s32 88, %v13699_v15  ;;  %v1000_v62 = vld [vmem:[#allocation2 + $0xa8] sm:$0xff] }
  0x69   :  { %9805 = vmatmul.mubr.msk.f32.gmra.mxu0 %vm17334_vm4, %v17303_v27  ;;  %9823 = vmatmul.mubr.msk.f32.gmra.mxu1 %vm17326_vm5, %v17303_v27 }
  0x6a   :  { %706 = vmatprep.mubr.f32.mxu0 %v17305_v0  ;;  %907 = vmatprep.mubr.f32.mxu1 %v17305_v0 }
  0x6b   :  { %11137 = vmatprep.subr.mxu0 %v17305_v0  ;;  %11220 = vmatprep.subr.mxu1 %v17305_v0 }
  0x6c   :  { %11138 = vmatpush3.msra.mxu0 %v1008_v39  ;;  %11221 = vmatpush3.msra.mxu1 %v991_v40  ;;  %v1002_v39 = vld [vmem:[#allocation2 + $0xb8] sm:$0xff] }
  0x6d   :  { %9806 = vmatmul.mubr.msk.f32.gmra.mxu0 %vm17322_vm6, %v17303_v27  ;;  %9824 = vmatmul.mubr.msk.f32.gmra.mxu1 %vm17321_vm7, %v17303_v27  ;;  %v985_v40 = vld [vmem:[#allocation2 + $0x38] sm:$0xff] }
  0x6e   :  { %711 = vmatprep.mubr.f32.mxu0 %v17305_v0  ;;  %912 = vmatprep.mubr.f32.mxu1 %v17305_v0 }
  0x6f   :  { %11139 = vmatprep.subr.mxu0 %v17305_v0  ;;  %11222 = vmatprep.subr.mxu1 %v17305_v0 }
  0x70   :  { %11140 = vmatpush3.msra.mxu0 %v1007_v44  ;;  %11223 = vmatpush3.msra.mxu1 %v990_v45  ;;  %v9796_v44 = vadd.s32 4294967295, %v123_v63  ;;  %v500_v45 = vadd.s32 1, %v123_v63  ;;  %v983_v63 = vld [vmem:[#allocation2 + $0x28] sm:$0xff] }
  0x71   :  { %9807 = vmatmul.mubr.msk.f32.gmra.mxu0 %vm17320_vm8, %v17303_v27  ;;  %9825 = vmatmul.mubr.msk.f32.gmra.mxu1 %vm17302_vm9, %v17303_v27 }
  0x72   :  { %716 = vmatprep.mubr.f32.mxu0 %v17305_v0  ;;  %917 = vmatprep.mubr.f32.mxu1 %v17305_v0 }
  0x73   :  { %11141 = vmatprep.subr.mxu0 %v17305_v0  ;;  %11224 = vmatprep.subr.mxu1 %v17305_v0 }
  0x74   :  { %11142 = vmatpush3.msra.mxu0 %v1006_v49  ;;  %11225 = vmatpush3.msra.mxu1 %v989_v50  ;;  %v9797_v49 = vadd.s32 4294967295, %v124_v35  ;;  %v1001_v50 = vld [vmem:[#allocation2 + $0xb0] sm:$0xff] }
  0x75   :  { %9808 = vmatmul.mubr.msk.f32.gmra.mxu0 %vm17301_vm10, %v17303_v27  ;;  %9826 = vmatmul.mubr.msk.f32.gmra.mxu1 %vm17300_vm11, %v17303_v27  ;;  %vm17361_vm10 = vcmask 64512  }
  0x76   :  { %721 = vmatprep.mubr.f32.mxu0 %v17305_v0  ;;  %922 = vmatprep.mubr.f32.mxu1 %v17305_v0 }
  0x77   :  { %11143 = vmatprep.subr.mxu0 %v17305_v0  ;;  %11226 = vmatprep.subr.mxu1 %v17305_v0 }
  0x78   :  { %11144 = vmatpush3.msra.mxu0 %v1005_v54  ;;  %11227 = vmatpush3.msra.mxu1 %v988_v55  ;;  %v984_v54 = vld [vmem:[#allocation2 + $0x30] sm:$0xff]  ;;  %v501_v55 = vadd.s32 1, %v124_v35  ;;  %v999_v35 = vld [vmem:[#allocation2 + $0xa0] sm:$0xff] }
  0x79   :  { %9809 = vmatmul.mubr.msk.f32.gmra.mxu0 %vm17295_vm12, %v17303_v27  ;;  %9827 = vmatmul.mubr.msk.f32.gmra.mxu1 %vm17294_vm13, %v17303_v27  ;;  %vm17299_vm13 = vcmp.eq.s32.totalorder %v13719_v18, %v13924_v58  ;;  %vm17298_vm12 = vcmp.eq.s32.totalorder %v13719_v18, %v13933_v61 }
  0x7a   :  { %726 = vmatprep.mubr.f32.mxu0 %v17305_v0  ;;  %927 = vmatprep.mubr.f32.mxu1 %v17305_v0 }
  0x7b   :  { %11145 = vmatprep.subr.mxu0 %v17305_v0  ;;  %11228 = vmatprep.subr.mxu1 %v17305_v0 }
  0x7c   :  { %11146 = vmatpush3.msra.mxu0 %v1004_v59  ;;  %11229 = vmatpush3.msra.mxu1 %v987_v60  ;;  %v13977_v59 = vadd.s32 96, %v13699_v15  ;;  %v126_v60 = vadd.s32 104, %v13699_v15 }
  0x7d   :  { %9810 = vmatmul.mubr.msk.f32.gmra.mxu0 %vm17297_vm14, %v17303_v27  ;;  %9828 = vmatmul.mubr.msk.f32.gmra.mxu1 %vm17296_vm15, %v17303_v27  ;;  %vm440_vm15 = vcmp.eq.s32.totalorder %v13719_v18, %v9795_v30  ;;  %vm525_vm14 = vcmp.eq.s32.totalorder %v13719_v18, %v499_v34  ;;  %v128_v30 = vadd.s32 120, %v13699_v15  ;;  %v127_v34 = vadd.s32 112, %v13699_v15 }
  0x7e   :  { %731 = vmatprep.mubr.f32.mxu0 %v17305_v0  ;;  %932 = vmatprep.mubr.f32.mxu1 %v17305_v0 }
  0x7f   :  { %11147 = vmatprep.subr.mxu0 %v17305_v0  ;;  %11230 = vmatprep.subr.mxu1 %v17305_v0 }
  0x80   :  { %11148 = vmatpush3.msra.mxu0 %v1003_v12  ;;  %11231 = vmatpush3.msra.mxu1 %v986_v29  ;;  %v9798_v12 = vadd.s32 4294967295, %v13977_v59  ;;  %v502_v29 = vadd.s32 1, %v13977_v59 }
  0x81   :  { %9811 = vmatmul.mubr.msk.f32.gmra.mxu0 %vm17299_vm13, %v17303_v27  ;;  %9829 = vmatmul.mubr.msk.f32.gmra.mxu1 %vm17298_vm12, %v17303_v27  ;;  %vm442_vm12 = vcmp.eq.s32.totalorder %v13719_v18, %v9796_v44  ;;  %vm527_vm13 = vcmp.eq.s32.totalorder %v13719_v18, %v500_v45  ;;  %v503_v44 = vadd.s32 1, %v126_v60  ;;  %v14003_v45 = vadd.s32 128, %v13719_v18 }
  0x82   :  { %736 = vmatprep.mubr.f32.mxu0 %v17305_v0  ;;  %937 = vmatprep.mubr.f32.mxu1 %v17305_v0 }
  0x83   :  { %11149 = vmatprep.subr.mxu0 %v17305_v0  ;;  %11232 = vmatprep.subr.mxu1 %v17305_v0 }
  0x84   :  { %11150 = vmatpush3.msra.mxu0 %v1002_v39  ;;  %11233 = vmatpush3.msra.mxu1 %v985_v40  ;;  %v982_v39 = vld [vmem:[#allocation2 + $0x20] sm:$0xff]  ;;  %v9799_v40 = vadd.s32 4294967295, %v126_v60  ;;  %v9800_v60 = vadd.s32 4294967295, %v127_v34 }
  0x85   :  { %9812 = vmatmul.mubr.msk.f32.gmra.mxu0 %vm440_vm15, %v17303_v27  ;;  %9830 = vmatmul.mubr.msk.f32.gmra.mxu1 %vm525_vm14, %v17303_v27  ;;  %vm444_vm14 = vcmp.eq.s32.totalorder %v13719_v18, %v9797_v49  ;;  %vm529_vm15 = vcmp.eq.s32.totalorder %v13719_v18, %v501_v55  ;;  %v505_v49 = vadd.s32 1, %v128_v30  ;;  %v981_v55 = vld [vmem:[#allocation2 + $0x18] sm:$0xff] }
  0x86   :  { %741 = vmatprep.mubr.f32.mxu0 %v17305_v0  ;;  %942 = vmatprep.mubr.f32.mxu1 %v17305_v0 }
  0x87   :  { %11151 = vmatprep.subr.mxu0 %v17305_v0  ;;  %11234 = vmatprep.subr.mxu1 %v17305_v0  ;;  %vm537_vm9 = vcmp.eq.s32.totalorder %v13719_v18, %v505_v49 }
  0x88   :  { %11152 = vmatpush3.msra.mxu0 %v1001_v50  ;;  %11235 = vmatpush3.msra.mxu1 %v984_v54  ;;  %v14006_v50 = vadd.s32 128, %v13699_v15  ;;  %v998_v54 = vld [vmem:[#allocation2 + $0x98] sm:$0xff] }
  0x89   :  { %9813 = vmatmul.mubr.msk.f32.gmra.mxu0 %vm442_vm12, %v17303_v27  ;;  %9831 = vmatmul.mubr.msk.f32.gmra.mxu1 %vm527_vm13, %v17303_v27  ;;  %vm446_vm12 = vcmp.eq.s32.totalorder %v13719_v18, %v9798_v12  ;;  %vm531_vm13 = vcmp.eq.s32.totalorder %v13719_v18, %v502_v29  ;;  %v997_v29 = vld [vmem:[#allocation2 + $0x90] sm:$0xff] }
  0x8a   :  { %746 = vmatprep.mubr.f32.mxu0 %v17305_v0  ;;  %947 = vmatprep.mubr.f32.mxu1 %v17305_v0  ;;  %v506_v12 = vadd.s32 1, %v14006_v50 }
  0x8b   :  { %11153 = vmatprep.subr.mxu0 %v17305_v0  ;;  %11236 = vmatprep.subr.mxu1 %v17305_v0 }
  0x8c   :  { %11154 = vmatpush3.msra.mxu0 %v1000_v62  ;;  %11237 = vmatpush3.msra.mxu1 %v983_v63  ;;  %v504_v62 = vadd.s32 1, %v127_v34  ;;  %v9802_v63 = vadd.s32 4294967295, %v14006_v50  ;;  %v9801_v34 = vadd.s32 4294967295, %v128_v30 }
  0x8d   :  { %9814 = vmatmul.mubr.msk.f32.gmra.mxu0 %vm444_vm14, %v17303_v27  ;;  %9832 = vmatmul.mubr.msk.f32.gmra.mxu1 %vm529_vm15, %v17303_v27  ;;  %vm448_vm14 = vcmp.eq.s32.totalorder %v13719_v18, %v9799_v40  ;;  %vm533_vm15 = vcmp.eq.s32.totalorder %v13719_v18, %v503_v44  ;;  %v996_v40 = vld [vmem:[#allocation2 + $0x88] sm:$0xff] }
  0x8e   :  { %751 = vmatprep.mubr.f32.mxu0 %v17305_v0  ;;  %952 = vmatprep.mubr.f32.mxu1 %v17305_v0  ;;  %vm535_vm11 = vcmp.eq.s32.totalorder %v13719_v18, %v504_v62  ;;  %v979_v44 = vld [vmem:[#allocation2 + $0x8] sm:$0xff]  ;;  %v1326_v62 = vld [vmem:[#allocation2 + $0x170] sm:$0xff] }
  0x8f   :  { %11155 = vmatprep.subr.mxu0 %v17305_v0  ;;  %11238 = vmatprep.subr.mxu1 %v17305_v0 }
  0x90   :  { %11156 = vmatpush3.msra.mxu0 %v999_v35  ;;  %11239 = vmatpush3.msra.mxu1 %v982_v39  ;;  %v980_v35 = vld [vmem:[#allocation2 + $0x10] sm:$0xff] }
  0x91   :  { %9815 = vmatmul.mubr.msk.f32.gmra.mxu0 %vm446_vm12, %v17303_v27  ;;  %9833 = vmatmul.mubr.msk.f32.gmra.mxu1 %vm531_vm13, %v17303_v27  ;;  %vm538_vm12 = vcmp.eq.s32.totalorder %v14003_v45, %v505_v49  ;;  %vm450_vm13 = vcmp.eq.s32.totalorder %v13719_v18, %v9800_v60  ;;  %v978_v49 = vld [vmem:[#allocation2] sm:$0xff]  ;;  %v1327_v60 = vld [vmem:[#allocation2 + $0x178] sm:$0xff] }
  0x92   :  { %756 = vmatprep.mubr.f32.mxu0 %v17305_v0  ;;  %957 = vmatprep.mubr.f32.mxu1 %v17305_v0  ;;  %v572_v39 = vsel %vm538_vm12, 1.0, %v17305_v0  ;;  %vm452_vm12 = vcmp.eq.s32.totalorder %v13719_v18, %v9801_v34  ;;  %v1318_v34 = vld [vmem:[#allocation2 + $0x130] sm:$0xff] }
  0x93   :  { %11157 = vmatprep.subr.mxu0 %v17305_v0  ;;  %11240 = vmatprep.subr.mxu1 %v17305_v0 }
  0x94   :  { %11158 = vmatpush3.msra.mxu0 %v998_v54  ;;  %11241 = vmatpush3.msra.mxu1 %v981_v55  ;;  %v995_v55 = vld [vmem:[#allocation2 + $0x80] sm:$0xff] }
  0x95   :  { %9816 = vmatmul.mubr.msk.f32.gmra.mxu0 %vm448_vm14, %v17303_v27  ;;  %9834 = vmatmul.mubr.msk.f32.gmra.mxu1 %vm533_vm15, %v17303_v27  ;;  %vm455_vm14 = vcmp.eq.s32.totalorder %v14003_v45, %v9802_v63  ;;  %vm540_vm15 = vcmp.eq.s32.totalorder %v14003_v45, %v506_v12  ;;  %v1324_v12 = vld [vmem:[#allocation2 + $0x160] sm:$0xff] }
  0x96   :  { %761 = vmatprep.mubr.f32.mxu0 %v17305_v0  ;;  %962 = vmatprep.mubr.f32.mxu1 %v17305_v0  ;;  %v489_v30 = vsel %vm455_vm14, 1.0, %v17305_v0  ;;  %v574_v54 = vsel %vm540_vm15, 1.0, %v17305_v0  ;;  %vm151_vm14 = vcmp.le.s32.totalorder %v13799_v33, 32  ;;  %vm185_vm15 = vcmp.ge.s32.totalorder %v13799_v33, 35 }
  0x97   :  { %11159 = vmatprep.subr.mxu0 %v17305_v0  ;;  %11242 = vmatprep.subr.mxu1 %v17305_v0 }
  0x98   :  { %11160 = vmatpush3.msra.mxu0 %v997_v29  ;;  %11243 = vmatpush3.msra.mxu1 %v980_v35  ;;  %v1322_v29 = vld [vmem:[#allocation2 + $0x150] sm:$0xff]  ;;  %v1320_v35 = vld [vmem:[#allocation2 + $0x140] sm:$0xff] }
  0x99   :  { %9817 = vmatmul.mubr.msk.f32.gmra.mxu0 %vm450_vm13, %v17303_v27  ;;  %9835 = vmatmul.mubr.msk.f32.gmra.mxu1 %vm535_vm11, %v17303_v27  ;;  %vm454_vm11 = vcmp.eq.s32.totalorder %v13719_v18, %v9802_v63  ;;  %vm17343_vm13 = vmmov 0   ;;  %v1325_v63 = vld [vmem:[#allocation2 + $0x168] sm:$0xff] }
  0x9a   :  { %766 = vmatprep.mubr.f32.mxu0 %v17305_v0  ;;  %9836 = vmatprep.mubr.msk.f32.mxu1 %vm17361_vm10, %v572_v39  ;;  %v1316_v39 = vld [vmem:[#allocation2 + $0x120] sm:$0xff] }
  0x9b   :  { %11161 = vmatprep.subr.mxu0 %v17305_v0  ;;  %11244 = vmatprep.subr.mxu1 %v17305_v0 }
  0x9c   :  { %11162 = vmatpush3.msra.mxu0 %v996_v40  ;;  %11245 = vmatpush3.msra.mxu1 %v979_v44  ;;  %v1314_v40 = vld [vmem:[#allocation2 + $0x110] sm:$0xff]  ;;  %v1312_v44 = vld [vmem:[#allocation2 + $0x100] sm:$0xff] }
  0x9d   :  { %9818 = vmatmul.mubr.msk.f32.gmra.mxu0 %vm452_vm12, %v17303_v27  ;;  %9837 = vmatmul.mubr.msk.f32.gmra.mxu1 %vm537_vm9, %v17303_v27  ;;  %vm17347_vm9 = vcmp.ge.s32.totalorder %v13699_v15, 1  ;;  %vm236_vm12 = vmor %vm151_vm14, %vm185_vm15  ;;  %vm257_vm14 = vcmp.ge.s32.totalorder %v13899_v53, 69 }
  0x9e   :  { %9819 = vmatprep.mubr.msk.f32.mxu0 %vm17361_vm10, %v489_v30  ;;  %9838 = vmatprep.mubr.msk.f32.mxu1 %vm17361_vm10, %v574_v54 }
  0x9f   :  { %11163 = vmatprep.subr.mxu0 %v17305_v0  ;;  %11246 = vmatprep.subr.mxu1 %v17305_v0 }
  0xa0   :  { %11164 = vmatpush3.msra.mxu0 %v995_v55  ;;  %11247 = vmatpush3.msra.mxu1 %v978_v49 }
  0xa1   :  { %9820 = vmatmul.mubr.msk.f32.gmra.mxu0 %vm454_vm11, %v17303_v27  ;;  %973 = vmatmul.mubr.f32.gmra.mxu1 %v17305_v0  ;;  %vm206_vm11 = vcmp.le.s32.totalorder %v13899_v53, 66 }
  0xa2   :  { %11165 = vmatprep.mubr.msk.f32.mxu0 %vm17343_vm13, %v17305_v0  ;;  %11299 = vmatprep.subr.mxu0 %v17305_v0  ;;  %vm308_vm15 = vmor %vm206_vm11, %vm257_vm14  ;;  %vm329_vm11 = vcmp.ge.s32.totalorder %v13977_v59, 103 }
  0xa3   :  { %11248 = vmatprep.mubr.msk.f32.mxu1 %vm17343_vm13, %v17305_v0  ;;  %2325 = vmatprep.subr.mxu1 %v17305_v0 }
  0xa5   :  { %11166 = vmatmul.mubr.f32.vlgmr.msra.gmra.mxu0 %v13735_v22  ;;  %v1323_v22 = vld [vmem:[#allocation2 + $0x158] sm:$0xff] }
  0xa6   :  { %11168 = vmatprep.mubr.msk.f32.mxu0 %vm17343_vm13, %v17305_v0  ;;  %11300 = vmatpush3.msra.mxu0 %v1327_v60 }
  0xa7   :  { %11301 = vmatprep.subr.mxu0 %v17305_v0 }
  0xa8   :  { %11302 = vmatpush3.msra.mxu0 %v1326_v62 }
  0xa9   :  { %11169 = vmatmul.mubr.f32.gmra.mxu0 %v13715_v17  ;;  %11303 = vmatprep.subr.mxu0 %v17305_v0  ;;  %v1321_v17 = vld [vmem:[#allocation2 + $0x148] sm:$0xff] }
  0xaa   :  { %11171 = vmatprep.mubr.msk.f32.mxu0 %vm17343_vm13, %v17305_v0  ;;  %11304 = vmatpush3.msra.mxu0 %v1325_v63 }
  0xab   :  { %11305 = vmatprep.subr.mxu0 %v17305_v0 }
  0xac   :  { %11306 = vmatpush3.msra.mxu0 %v1324_v12 }
  0xad   :  { %11172 = vmatmul.mubr.f32.gmra.mxu0 %v13706_v16  ;;  %11307 = vmatprep.subr.mxu0 %v17305_v0  ;;  %v1319_v16 = vld [vmem:[#allocation2 + $0x138] sm:$0xff] }
  0xae   :  { %11174 = vmatprep.mubr.msk.f32.mxu0 %vm17343_vm13, %v17305_v0  ;;  %11308 = vmatpush3.msra.mxu0 %v1323_v22 }
  0xaf   :  { %11309 = vmatprep.subr.mxu0 %v17305_v0 }
  0xb0   :  { %11310 = vmatpush3.msra.mxu0 %v1322_v29 }
  0xb1   :  { %11175 = vmatmul.mubr.f32.gmra.mxu0 %v13695_v14  ;;  %11311 = vmatprep.subr.mxu0 %v17305_v0  ;;  %v1317_v14 = vld [vmem:[#allocation2 + $0x128] sm:$0xff] }
  0xb2   :  { %11177 = vmatprep.mubr.msk.f32.mxu0 %vm17343_vm13, %v17305_v0  ;;  %11312 = vmatpush3.msra.mxu0 %v1321_v17 }
  0xb3   :  { %11313 = vmatprep.subr.mxu0 %v17305_v0 }
  0xb4   :  { %11314 = vmatpush3.msra.mxu0 %v1320_v35 }
  0xb5   :  { %11178 = vmatmul.mubr.f32.gmra.mxu0 %v13686_v13  ;;  %11315 = vmatprep.subr.mxu0 %v17305_v0  ;;  %v1315_v13 = vld [vmem:[#allocation2 + $0x118] sm:$0xff] }
  0xb6   :  { %11180 = vmatprep.mubr.msk.f32.mxu0 %vm17343_vm13, %v17305_v0  ;;  %11316 = vmatpush3.msra.mxu0 %v1319_v16 }
  0xb7   :  { %11317 = vmatprep.subr.mxu0 %v17305_v0 }
  0xb8   :  { %11318 = vmatpush3.msra.mxu0 %v1318_v34 }
  0xb9   :  { %11181 = vmatmul.mubr.f32.gmra.mxu0 %v13677_v11  ;;  %11319 = vmatprep.subr.mxu0 %v17305_v0  ;;  %v1313_v11 = vld [vmem:[#allocation2 + $0x108] sm:$0xff] }
  0xba   :  { %11183 = vmatprep.mubr.msk.f32.mxu0 %vm17343_vm13, %v17305_v0  ;;  %11320 = vmatpush3.msra.mxu0 %v1317_v14 }
  0xbb   :  { %11321 = vmatprep.subr.mxu0 %v17305_v0 }
  0xbc   :  { %11322 = vmatpush3.msra.mxu0 %v1316_v39 }
  0xbd   :  { %11184 = vmatmul.mubr.f32.gmra.mxu0 %v13668_v10  ;;  %11323 = vmatprep.subr.mxu0 %v17305_v0 }
  0xbe   :  { %11186 = vmatprep.mubr.msk.f32.mxu0 %vm17343_vm13, %v17305_v0  ;;  %11324 = vmatpush3.msra.mxu0 %v1315_v13 }
  0xbf   :  { %11325 = vmatprep.subr.mxu0 %v17305_v0 }
  0xc0   :  { %11326 = vmatpush3.msra.mxu0 %v1314_v40 }
  0xc1   :  { %11187 = vmatmul.mubr.f32.gmra.mxu0 %v13659_v9  ;;  %11327 = vmatprep.subr.mxu0 %v17305_v0 }
  0xc2   :  { %11189 = vmatprep.mubr.msk.f32.mxu0 %vm17343_vm13, %v17305_v0  ;;  %11328 = vmatpush3.msra.mxu0 %v1313_v11 }
  0xc3   :  { %11329 = vmatprep.subr.mxu0 %v17305_v0 }
  0xc4   :  { %11330 = vmatpush3.msra.mxu0 %v1312_v44 }
  0xc5   :  { %11190 = vmatmul.mubr.f32.gmra.mxu0 %v13650_v8  ;;  %11382 = vmatprep.subr.mxu0 %v17305_v0 }
  0xc6   :  { %11192 = vmatprep.mubr.msk.f32.mxu0 %vm17343_vm13, %v17305_v0 }
  0xc9   :  { %11193 = vmatmul.mubr.f32.gmra.mxu0 %v13641_v7 }
  0xca   :  { %11195 = vmatprep.mubr.msk.f32.mxu0 %vm17343_vm13, %v17305_v0 }
  0xcd   :  { %11196 = vmatmul.mubr.f32.gmra.mxu0 %v13632_v6 }
  0xce   :  { %11198 = vmatprep.mubr.msk.f32.mxu0 %vm17343_vm13, %v17305_v0 }
  0xd1   :  { %11199 = vmatmul.mubr.f32.gmra.mxu0 %v13623_v5 }
  0xd2   :  { %11201 = vmatprep.mubr.msk.f32.mxu0 %vm17343_vm13, %v17305_v0 }
  0xd5   :  { %11202 = vmatmul.mubr.f32.gmra.mxu0 %v13614_v4 }
  0xd6   :  { %11204 = vmatprep.mubr.msk.f32.mxu0 %vm17343_vm13, %v17305_v0 }
  0xd9   :  { %11205 = vmatmul.mubr.f32.gmra.mxu0 %v13605_v3 }
  0xda   :  { %11207 = vmatprep.mubr.msk.f32.mxu0 %vm17343_vm13, %v17305_v0 }
  0xdd   :  { %11208 = vmatmul.mubr.f32.gmra.mxu0 %v13596_v2 }
  0xde   :  { %11210 = vmatprep.mubr.msk.f32.mxu0 %vm17343_vm13, %v17305_v0 }
  0xe1   :  { %11211 = vmatmul.mubr.f32.gmra.mxu0 %v13591_v1 }
  0xe2   :  { %11213 = vmatprep.mubr.msk.f32.mxu0 %vm17343_vm13, %v17305_v0 }
  0xe5   :  { %11214 = vmatmul.mubr.f32.gmra.mxu0 %v13744_v23 }
  0xe6   :  { %11331 = vmatprep.mubr.msk.f32.mxu0 %vm17343_vm13, %v17305_v0 }
 0x121   :  { %v693_v4 = vpop.f32.mrf.mxu0  ;;  %v894_v3 = vpop.f32.mrf.mxu1 }
 0x122   :  { %11249 = vmatmul.mubr.f32.vlgmr.msra.gmra.mxu1 %v693_v4  ;;  %11332 = vmatmul.mubr.f32.vlgmr.msra.gmra.mxu0 %v894_v3 }
 0x123   :  { %v695_v5 = vpop.f32.mrf.mxu0  ;;  %v896_v6 = vpop.f32.mrf.mxu1  ;;  %11251 = vmatprep.mubr.msk.f32.mxu1 %vm17343_vm13, %v17305_v0  ;;  %11334 = vmatprep.mubr.msk.f32.mxu0 %vm17343_vm13, %v17305_v0 }
 0x125   :  { %v698_v1 = vpop.f32.mrf.mxu0  ;;  %v899_v2 = vpop.f32.mrf.mxu1 }
 0x126   :  { %11252 = vmatmul.mubr.f32.gmra.mxu1 %v698_v1  ;;  %11335 = vmatmul.mubr.f32.gmra.mxu0 %v899_v2 }
 0x127   :  { %v700_v7 = vpop.f32.mrf.mxu0  ;;  %v901_v8 = vpop.f32.mrf.mxu1  ;;  %11254 = vmatprep.mubr.msk.f32.mxu1 %vm17343_vm13, %v17305_v0  ;;  %11337 = vmatprep.mubr.msk.f32.mxu0 %vm17343_vm13, %v17305_v0 }
 0x129   :  { %v703_v9 = vpop.f32.mrf.mxu0  ;;  %v904_v10 = vpop.f32.mrf.mxu1 }
 0x12a   :  { %11255 = vmatmul.mubr.f32.gmra.mxu1 %v703_v9  ;;  %11338 = vmatmul.mubr.f32.gmra.mxu0 %v904_v10 }
 0x12b   :  { %v705_v23 = vpop.f32.mrf.mxu0  ;;  %v906_v30 = vpop.f32.mrf.mxu1  ;;  %11257 = vmatprep.mubr.msk.f32.mxu1 %vm17343_vm13, %v17305_v0  ;;  %11340 = vmatprep.mubr.msk.f32.mxu0 %vm17343_vm13, %v17305_v0 }
 0x12d   :  { %v708_v54 = vpop.f32.mrf.mxu0  ;;  %v909_v55 = vpop.f32.mrf.mxu1 }
 0x12e   :  { %11258 = vmatmul.mubr.f32.gmra.mxu1 %v708_v54  ;;  %11341 = vmatmul.mubr.f32.gmra.mxu0 %v909_v55 }
 0x12f   :  { %v710_v49 = vpop.f32.mrf.mxu0  ;;  %v911_v60 = vpop.f32.mrf.mxu1  ;;  %11260 = vmatprep.mubr.msk.f32.mxu1 %vm17343_vm13, %v17305_v0  ;;  %11343 = vmatprep.mubr.msk.f32.mxu0 %vm17343_vm13, %v17305_v0 }
 0x131   :  { %v713_v62 = vpop.f32.mrf.mxu0  ;;  %v914_v63 = vpop.f32.mrf.mxu1 }
 0x132   :  { %11261 = vmatmul.mubr.f32.gmra.mxu1 %v713_v62  ;;  %11344 = vmatmul.mubr.f32.gmra.mxu0 %v914_v63 }
 0x133   :  { %v715_v12 = vpop.f32.mrf.mxu0  ;;  %v916_v22 = vpop.f32.mrf.mxu1  ;;  %11263 = vmatprep.mubr.msk.f32.mxu1 %vm17343_vm13, %v17305_v0  ;;  %11346 = vmatprep.mubr.msk.f32.mxu0 %vm17343_vm13, %v17305_v0 }
 0x135   :  { %v718_v29 = vpop.f32.mrf.mxu0  ;;  %v919_v17 = vpop.f32.mrf.mxu1 }
 0x136   :  { %11264 = vmatmul.mubr.f32.gmra.mxu1 %v718_v29  ;;  %11347 = vmatmul.mubr.f32.gmra.mxu0 %v919_v17 }
 0x137   :  { %v720_v35 = vpop.f32.mrf.mxu0  ;;  %v921_v16 = vpop.f32.mrf.mxu1  ;;  %11266 = vmatprep.mubr.msk.f32.mxu1 %vm17343_vm13, %v17305_v0  ;;  %11349 = vmatprep.mubr.msk.f32.mxu0 %vm17343_vm13, %v17305_v0 }
 0x139   :  { %v723_v34 = vpop.f32.mrf.mxu0  ;;  %v924_v14 = vpop.f32.mrf.mxu1 }
 0x13a   :  { %11267 = vmatmul.mubr.f32.gmra.mxu1 %v723_v34  ;;  %11350 = vmatmul.mubr.f32.gmra.mxu0 %v924_v14 }
 0x13b   :  { %v725_v39 = vpop.f32.mrf.mxu0  ;;  %v926_v13 = vpop.f32.mrf.mxu1  ;;  %11269 = vmatprep.mubr.msk.f32.mxu1 %vm17343_vm13, %v17305_v0  ;;  %11352 = vmatprep.mubr.msk.f32.mxu0 %vm17343_vm13, %v17305_v0 }
 0x13d   :  { %v728_v40 = vpop.f32.mrf.mxu0  ;;  %v929_v11 = vpop.f32.mrf.mxu1 }
 0x13e   :  { %11270 = vmatmul.mubr.f32.gmra.mxu1 %v728_v40  ;;  %11353 = vmatmul.mubr.f32.gmra.mxu0 %v929_v11 }
 0x13f   :  { %v730_v44 = vpop.f32.mrf.mxu0  ;;  %v931_v4 = vpop.f32.mrf.mxu1  ;;  %11272 = vmatprep.mubr.msk.f32.mxu1 %vm17343_vm13, %v17305_v0  ;;  %11355 = vmatprep.mubr.msk.f32.mxu0 %vm17343_vm13, %v17305_v0 }
 0x141   :  { %v733_v3 = vpop.f32.mrf.mxu0  ;;  %v934_v5 = vpop.f32.mrf.mxu1 }
 0x142   :  { %11273 = vmatmul.mubr.f32.gmra.mxu1 %v733_v3  ;;  %11356 = vmatmul.mubr.f32.gmra.mxu0 %v934_v5 }
 0x143   :  { %v735_v6 = vpop.f32.mrf.mxu0  ;;  %v936_v1 = vpop.f32.mrf.mxu1  ;;  %11275 = vmatprep.mubr.msk.f32.mxu1 %vm17343_vm13, %v17305_v0  ;;  %11358 = vmatprep.mubr.msk.f32.mxu0 %vm17343_vm13, %v17305_v0 }
 0x145   :  { %v738_v2 = vpop.f32.mrf.mxu0  ;;  %v939_v7 = vpop.f32.mrf.mxu1 }
 0x146   :  { %11276 = vmatmul.mubr.f32.gmra.mxu1 %v738_v2  ;;  %11359 = vmatmul.mubr.f32.gmra.mxu0 %v939_v7 }
 0x147   :  { %v740_v8 = vpop.f32.mrf.mxu0  ;;  %v941_v9 = vpop.f32.mrf.mxu1  ;;  %11278 = vmatprep.mubr.msk.f32.mxu1 %vm17343_vm13, %v17305_v0  ;;  %11361 = vmatprep.mubr.msk.f32.mxu0 %vm17343_vm13, %v17305_v0 }
 0x149   :  { %v743_v10 = vpop.f32.mrf.mxu0  ;;  %v944_v23 = vpop.f32.mrf.mxu1 }
 0x14a   :  { %11279 = vmatmul.mubr.f32.gmra.mxu1 %v743_v10  ;;  %11362 = vmatmul.mubr.f32.gmra.mxu0 %v944_v23 }
 0x14b   :  { %v745_v30 = vpop.f32.mrf.mxu0  ;;  %v946_v54 = vpop.f32.mrf.mxu1  ;;  %11281 = vmatprep.mubr.msk.f32.mxu1 %vm17343_vm13, %v17305_v0  ;;  %11364 = vmatprep.mubr.msk.f32.mxu0 %vm17343_vm13, %v17305_v0 }
 0x14d   :  { %v748_v55 = vpop.f32.mrf.mxu0  ;;  %v949_v49 = vpop.f32.mrf.mxu1 }
 0x14e   :  { %11282 = vmatmul.mubr.f32.gmra.mxu1 %v748_v55  ;;  %11365 = vmatmul.mubr.f32.gmra.mxu0 %v949_v49 }
 0x14f   :  { %v750_v60 = vpop.f32.mrf.mxu0  ;;  %v951_v62 = vpop.f32.mrf.mxu1  ;;  %11284 = vmatprep.mubr.msk.f32.mxu1 %vm17343_vm13, %v17305_v0  ;;  %11367 = vmatprep.mubr.msk.f32.mxu0 %vm17343_vm13, %v17305_v0 }
 0x151   :  { %v753_v63 = vpop.f32.mrf.mxu0  ;;  %v954_v12 = vpop.f32.mrf.mxu1 }
 0x152   :  { %11285 = vmatmul.mubr.f32.gmra.mxu1 %v753_v63  ;;  %11368 = vmatmul.mubr.f32.gmra.mxu0 %v954_v12 }
 0x153   :  { %v755_v22 = vpop.f32.mrf.mxu0  ;;  %v956_v29 = vpop.f32.mrf.mxu1  ;;  %11287 = vmatprep.mubr.msk.f32.mxu1 %vm17343_vm13, %v17305_v0  ;;  %11370 = vmatprep.mubr.msk.f32.mxu0 %vm17343_vm13, %v17305_v0 }
 0x155   :  { %v758_v17 = vpop.f32.mrf.mxu0  ;;  %v959_v35 = vpop.f32.mrf.mxu1 }
 0x156   :  { %11288 = vmatmul.mubr.f32.gmra.mxu1 %v758_v17  ;;  %11371 = vmatmul.mubr.f32.gmra.mxu0 %v959_v35 }
 0x157   :  { %v760_v16 = vpop.f32.mrf.mxu0  ;;  %v961_v34 = vpop.f32.mrf.mxu1  ;;  %11290 = vmatprep.mubr.msk.f32.mxu1 %vm17343_vm13, %v17305_v0  ;;  %11373 = vmatprep.mubr.msk.f32.mxu0 %vm17343_vm13, %v17305_v0 }
 0x159   :  { %v763_v14 = vpop.f32.mrf.mxu0  ;;  %v964_v39 = vpop.f32.mrf.mxu1 }
 0x15a   :  { %11291 = vmatmul.mubr.f32.gmra.mxu1 %v763_v14  ;;  %11374 = vmatmul.mubr.f32.gmra.mxu0 %v964_v39 }
 0x15b   :  { %v765_v13 = vpop.f32.mrf.mxu0  ;;  %v966_v40 = vpop.f32.mrf.mxu1  ;;  %11293 = vmatprep.mubr.msk.f32.mxu1 %vm17343_vm13, %v17305_v0  ;;  %11376 = vmatprep.mubr.msk.f32.mxu0 %vm17343_vm13, %v17305_v0 }
 0x15d   :  { %v768_v11 = vpop.f32.mrf.mxu0  ;;  %v969_v44 = vpop.f32.mrf.mxu1 }
 0x15e   :  { %11294 = vmatmul.mubr.f32.gmra.mxu1 %v768_v11  ;;  %11377 = vmatmul.mubr.f32.gmra.mxu0 %v969_v44 }
 0x15f   :  { %v770_v4 = vpop.f32.mrf.mxu0  ;;  %v971_v3 = vpop.f32.mrf.mxu1  ;;  %11296 = vmatprep.mubr.msk.f32.mxu1 %vm17343_vm13, %v17305_v0  ;;  %11379 = vmatprep.mubr.msk.f32.mxu0 %vm17343_vm13, %v17305_v0 }
 0x161   :  { %v773_v5 = vpop.f32.mrf.mxu0  ;;  %v974_v6 = vpop.f32.mrf.mxu1 }
 0x162   :  { %11297 = vmatmul.mubr.f32.gmra.mxu1 %v773_v5  ;;  %11380 = vmatmul.mubr.f32.gmra.mxu0 %v974_v6 }
 0x163   :  { %v775_v1 = vpop.f32.mrf.mxu0  ;;  %v976_v2 = vpop.f32.mrf.mxu1  ;;  %11400 = vmatprep.mubr.msk.f32.mxu0 %vm17343_vm13, %v17305_v0 }
 0x165   :  { %v1077_v7 = vpop.f32.mrf.mxu0 }
 0x167   :  { %v11167_v8 = vpop.f32.mrf.mxu0 }
 0x169   :  { %v1082_v9 = vpop.f32.mrf.mxu0 }
 0x16b   :  { %v11170_v10 = vpop.f32.mrf.mxu0 }
 0x16d   :  { %v14188_v23 = vpop.f32.mrf.mxu0 }
 0x16f   :  { %v11173_v30 = vpop.f32.mrf.mxu0 }
 0x171   :  { %v14190_v54 = vpop.f32.mrf.mxu0 }
 0x173   :  { %v11176_v55 = vpop.f32.mrf.mxu0 }
 0x175   :  { %v14192_v49 = vpop.f32.mrf.mxu0 }
 0x177   :  { %v11179_v60 = vpop.f32.mrf.mxu0 }
 0x179   :  { %v14194_v62 = vpop.f32.mrf.mxu0 }
 0x17b   :  { %v11182_v63 = vpop.f32.mrf.mxu0 }
 0x17d   :  { %v14196_v12 = vpop.f32.mrf.mxu0 }
 0x17f   :  { %v11185_v22 = vpop.f32.mrf.mxu0 }
 0x181   :  { %v14198_v29 = vpop.f32.mrf.mxu0 }
 0x183   :  { %v11188_v17 = vpop.f32.mrf.mxu0 }
 0x185   :  { %v14200_v35 = vpop.f32.mrf.mxu0 }
 0x187   :  { %v11191_v16 = vpop.f32.mrf.mxu0 }
 0x189   :  { %v14202_v34 = vpop.f32.mrf.mxu0 }
 0x18b   :  { %v11194_v14 = vpop.f32.mrf.mxu0 }
 0x18d   :  { %v14204_v39 = vpop.f32.mrf.mxu0 }
 0x18f   :  { %v11197_v13 = vpop.f32.mrf.mxu0 }
 0x191   :  { %v14206_v40 = vpop.f32.mrf.mxu0 }
 0x193   :  { %v11200_v11 = vpop.f32.mrf.mxu0 }
 0x195   :  { %v14208_v44 = vpop.f32.mrf.mxu0 }
 0x197   :  { %v11203_v4 = vpop.f32.mrf.mxu0 }
 0x199   :  { %v14210_v3 = vpop.f32.mrf.mxu0 }
 0x19b   :  { %v11206_v5 = vpop.f32.mrf.mxu0 }
 0x19d   :  { %v14212_v6 = vpop.f32.mrf.mxu0 }
 0x19f   :  { %v11209_v1 = vpop.f32.mrf.mxu0 }
 0x1a1   :  { %v14214_v2 = vpop.f32.mrf.mxu0 }
 0x1a3   :  { %v11212_v8 = vpop.f32.mrf.mxu0 }
 0x1a5   :  { %v14216_v10 = vpop.f32.mrf.mxu0 }
 0x1a7   :  { %v11215_v30 = vpop.f32.mrf.mxu0 }
 0x1e2   :  { %v1227_v55 = vpop.f32.mrf.mxu1  ;;  %v1394_v60 = vpop.f32.mrf.mxu0 }
 0x1e4   :  { %v11250_v63 = vpop.f32.mrf.mxu1  ;;  %v11333_v22 = vpop.f32.mrf.mxu0 }
 0x1e6   :  { %v1232_v17 = vpop.f32.mrf.mxu1  ;;  %v1399_v16 = vpop.f32.mrf.mxu0 }
 0x1e8   :  { %v11253_v14 = vpop.f32.mrf.mxu1  ;;  %v11336_v13 = vpop.f32.mrf.mxu0 }
 0x1e9   :  { %v1228_v14 = vadd.f32 %v1227_v55, %v1077_v7 }
 0x1ea   :  { %v1237_v11 = vpop.f32.mrf.mxu1  ;;  %v1404_v4 = vpop.f32.mrf.mxu0 }
 0x1ec   :  { %v11256_v5 = vpop.f32.mrf.mxu1  ;;  %v11339_v27 = vpop.f32.mrf.mxu0 }
 0x1ed   :  { %v1233_v27 = vadd.f32 %v1232_v17, %v1082_v9  ;;  %v1238_v5 = vadd.f32 %v1237_v11, %v14188_v23 }
 0x1ee   :  { %v1242_v0 = vpop.f32.mrf.mxu1  ;;  %v1409_v1 = vpop.f32.mrf.mxu0 }
 0x1ef   :  { %v1243_v9 = vadd.f32 %v1242_v0, %v14190_v54  ;;  %v14234_v23 = vadd.f32 %v1404_v4, %v1238_v5 }
 0x1f0   :  { %v11259_v61 = vpop.f32.mrf.mxu1  ;;  %v11342_v58 = vpop.f32.mrf.mxu0 }
 0x1f2   :  { %v1247_v8 = vpop.f32.mrf.mxu1  ;;  %v1414_v57 = vpop.f32.mrf.mxu0 }
 0x1f4   :  { %v11262_v56 = vpop.f32.mrf.mxu1  ;;  %v11345_v30 = vpop.f32.mrf.mxu0 }
 0x1f5   :  { %v1478_v56 = vadd.f32 %v1394_v60, %v1228_v14  ;;  %v1248_v30 = vadd.f32 %v1247_v8, %v14192_v49 }
 0x1f6   :  { %v1252_v51 = vpop.f32.mrf.mxu1  ;;  %v1419_v48 = vpop.f32.mrf.mxu0 }
 0x1f7   :  { %v1482_v49 = vadd.f32 %v1414_v57, %v1248_v30  ;;  %v1253_v4 = vadd.f32 %v1252_v51, %v14194_v62 }
 0x1f8   :  { %v11265_v63 = vpop.f32.mrf.mxu1  ;;  %v11348_v22 = vpop.f32.mrf.mxu0 }
 0x1f9   :  { %v17382_v63 = vmov 0.0   ;;  %v14228_v22 = vadd.f32 %v1399_v16, %v1233_v27  ;;  %v14241_v27 = vadd.f32 %v1409_v1, %v1243_v9 }
 0x1fa   :  { %v1257_v47 = vpop.f32.mrf.mxu1  ;;  %v1424_v46 = vpop.f32.mrf.mxu0  ;;  %v14226_v7 = vsel %vm17347_vm9, 1.0, %v17382_v63  ;;  %v14237_v11 = vsel %vm236_vm12, 1.0, %v17382_v63  ;;  %vm278_vm12 = vcmp.le.s32.totalorder %v13977_v59, 100 }
 0x1fb   :  { %v14232_v60 = vmul.f32 %v1478_v56, %v14226_v7  ;;  %v14245_v56 = vmul.f32 %v1482_v49, %v14237_v11  ;;  %v1258_v1 = vadd.f32 %v1257_v47, %v14196_v12  ;;  %vm380_vm14 = vmor %vm278_vm12, %vm329_vm11 }
 0x1fc   :  { %v11268_v13 = vpop.f32.mrf.mxu1  ;;  %v11351_v42 = vpop.f32.mrf.mxu0 }
 0x1fd   :  { %v1512_v16 = vadd.f32 %v14232_v60, %v14228_v22  ;;  %v14257_v41 = vadd.f32 %v1424_v46, %v1258_v1 }
 0x1fe   :  { %v1262_v58 = vpop.f32.mrf.mxu1  ;;  %v1429_v61 = vpop.f32.mrf.mxu0 }
 0x1ff   :  { %v1263_v51 = vadd.f32 %v1262_v58, %v14198_v29 }
 0x200   :  { %v11271_v42 = vpop.f32.mrf.mxu1  ;;  %v11354_v55 = vpop.f32.mrf.mxu0 }
 0x201   :  { %v1513_v42 = vadd.f32 %v1512_v16, %v14234_v23 }
 0x202   :  { %v1267_v17 = vpop.f32.mrf.mxu1  ;;  %v1434_v13 = vpop.f32.mrf.mxu0 }
 0x203   :  { %v1514_v30 = vadd.f32 %v1513_v42, %v14241_v27  ;;  %v1268_v55 = vadd.f32 %v1267_v17, %v14200_v35  ;;  %v14260_v42 = vsel %vm308_vm15, 1.0, %v17382_v63  ;;  %v14263_v17 = vadd.f32 %v1429_v61, %v1263_v51 }
 0x204   :  { %v11274_v8 = vpop.f32.mrf.mxu1  ;;  %v11357_v14 = vpop.f32.mrf.mxu0  ;;  %vm350_vm15 = vcmp.le.s32.totalorder %v14006_v50, 134 }
 0x205   :  { %v14253_v14 = vadd.f32 %v1419_v48, %v1253_v4  ;;  %v1515_v49 = vadd.f32 %v1514_v30, %v14245_v56 }
 0x206   :  { %v1272_v0 = vpop.f32.mrf.mxu1  ;;  %v1439_v54 = vpop.f32.mrf.mxu0 }
 0x207   :  { %v1516_v35 = vadd.f32 %v1515_v49, %v14253_v14  ;;  %v1273_v46 = vadd.f32 %v1272_v0, %v14202_v34 }
 0x208   :  { %v11277_v57 = vpop.f32.mrf.mxu1  ;;  %v11360_v5 = vpop.f32.mrf.mxu0 }
 0x209   :  { %v1486_v57 = vadd.f32 %v1434_v13, %v1268_v55  ;;  %v1517_v5 = vadd.f32 %v1516_v35, %v14257_v41  ;;  %v14275_v51 = vadd.f32 %v1439_v54, %v1273_v46  ;;  %v14282_v35 = vsel %vm380_vm14, 1.0, %v17382_v63 }
 0x20a   :  { %v1277_v9 = vpop.f32.mrf.mxu1  ;;  %v1444_v8 = vpop.f32.mrf.mxu0  ;;  %vm17346_vm14 = vcmp.le.s32.totalorder %v13747_v24, 16 }
 0x20b   :  { %v14267_v29 = vmul.f32 %v1486_v57, %v14260_v42  ;;  %v1518_v30 = vadd.f32 %v1517_v5, %v14263_v17  ;;  %v1278_v61 = vadd.f32 %v1277_v9, %v14204_v39 }
 0x20c   :  { %v11280_v62 = vpop.f32.mrf.mxu1  ;;  %v11363_v16 = vpop.f32.mrf.mxu0 }
 0x20d   :  { %v1519_v62 = vadd.f32 %v1518_v30, %v14267_v29  ;;  %v14279_v57 = vadd.f32 %v1444_v8, %v1278_v61 }
 0x20e   :  { %v1282_v47 = vpop.f32.mrf.mxu1  ;;  %v1449_v12 = vpop.f32.mrf.mxu0 }
 0x20f   :  { %v1283_v34 = vadd.f32 %v1282_v47, %v14206_v40 }
 0x210   :  { %v11283_v48 = vpop.f32.mrf.mxu1  ;;  %v11366_v4 = vpop.f32.mrf.mxu0 }
 0x211   :  { %v14285_v48 = vadd.f32 %v1449_v12, %v1283_v34 }
 0x212   :  { %v1287_v58 = vpop.f32.mrf.mxu1  ;;  %v1454_v13 = vpop.f32.mrf.mxu0 }
 0x213   :  { %v1288_v1 = vadd.f32 %v1287_v58, %v14208_v44  ;;  %v1520_v44 = vadd.f32 %v1519_v62, %v14275_v51 }
 0x214   :  { %v11286_v55 = vpop.f32.mrf.mxu1  ;;  %v11369_v49 = vpop.f32.mrf.mxu0 }
 0x215   :  { %v1490_v59 = vadd.f32 %v1454_v13, %v1288_v1  ;;  %v1521_v5 = vadd.f32 %v1520_v44, %v14279_v57 }
 0x216   :  { %v1292_v0 = vpop.f32.mrf.mxu1  ;;  %v1459_v16 = vpop.f32.mrf.mxu0 }
 0x217   :  { %v14289_v40 = vmul.f32 %v1490_v59, %v14282_v35  ;;  %v1293_v8 = vadd.f32 %v1292_v0, %v14210_v3  ;;  %v1522_v58 = vadd.f32 %v1521_v5, %v14285_v48 }
 0x218   :  { %v11289_v39 = vpop.f32.mrf.mxu1  ;;  %v11372_v9 = vpop.f32.mrf.mxu0 }
 0x219   :  { %v14294_v1 = vadd.f32 %v1459_v16, %v1293_v8  ;;  %v1523_v12 = vadd.f32 %v1522_v58, %v14289_v40  ;;  %v14306_v16 = vsel %vm350_vm15, 1.0, %v17382_v63 }
 0x21a   :  { %v1297_v54 = vpop.f32.mrf.mxu1  ;;  %v1464_v4 = vpop.f32.mrf.mxu0 }
 0x21b   :  { %v1298_v13 = vadd.f32 %v1297_v54, %v14212_v6  ;;  %v1524_v59 = vadd.f32 %v1523_v12, %v14294_v1 }
 0x21c   :  { %v11292_v47 = vpop.f32.mrf.mxu1  ;;  %v11375_v46 = vpop.f32.mrf.mxu0 }
 0x21d   :  { %v14298_v34 = vadd.f32 %v1464_v4, %v1298_v13 }
 0x21e   :  { %v1302_v30 = vpop.f32.mrf.mxu1  ;;  %v1469_v61 = vpop.f32.mrf.mxu0 }
 0x21f   :  { %v1303_v55 = vadd.f32 %v1302_v30, %v14214_v2  ;;  %v14309_v2 = vmul.u32 2, %v13699_v15  ;;  %v1525_v54 = vadd.f32 %v1524_v59, %v14298_v34 }
 0x220   :  { %v11295_v49 = vpop.f32.mrf.mxu1  ;;  %v11378_v62 = vpop.f32.mrf.mxu0 }
 0x221   :  { %v14302_v39 = vadd.f32 %v1469_v61, %v1303_v55  ;;  %v14313_v50 = vadd.s32 4294967295, %v14309_v2 }
 0x222   :  { %v1307_v3 = vpop.f32.mrf.mxu1  ;;  %v1474_v0 = vpop.f32.mrf.mxu0 }
 0x223   :  { %v1308_v6 = vadd.f32 %v1307_v3, %v14216_v10  ;;  %17383 = vst [vmem:[#allocation30_spill] sm:$0xff] %v14313_v50  ;;  %v1526_v5 = vadd.f32 %v1525_v54, %v14302_v39  ;;  %vm1699_vm12 = vcmp.eq.s32.totalorder %v14003_v45, %v14313_v50  ;;  %vm17333_vm8 = vcmp.eq.s32.totalorder %v13719_v18, %v14313_v50 }
 0x224   :  { %v11298_v9 = vpop.f32.mrf.mxu1  ;;  %v11381_v44 = vpop.f32.mrf.mxu0  ;;  %vm1717_vm11 = vmand %vm17347_vm9, %vm1699_vm12  ;;  %v17393_v50 = vmov 1.0  }
 0x225   :  { %v1494_v4 = vadd.f32 %v1474_v0, %v1308_v6  ;;  %v2263_v47 = vsel %vm1717_vm11, 1.0, %v17382_v63 }
 0x226   :  { %9908 = vmatprep.mubr.msk.f32.mxu1 %vm17361_vm10, %v2263_v47 }
 0x227   :  { %v1511_v8 = vmul.f32 %v1494_v4, %v14306_v16 }
 0x229   :  { %v1527_v10 = vadd.f32 %v1526_v5, %v1511_v8 }
 0x22b   :  { %v1528_v46 = vrot.slane %v1527_v10, 4 }
 0x22d   :  { %v1529_v58 = vadd.f32 %v1528_v46, %v1527_v10 }
 0x22f   :  { %v1530_v13 = vrot.slane %v1529_v58, 2 }
 0x231   :  { %v1531_v30 = vadd.f32 %v1530_v13, %v1529_v58 }
 0x233   :  { %v1532_v61 = vrot.slane %v1531_v30, 1 }
 0x235   :  { %v1533_v12 = vadd.f32 %v1532_v61, %v1531_v30 }
 0x237   :  { %v1534_v55 = vmul.f32 0.0078125, %v1533_v12 }
 0x239   :  { %v14324_v49 = vsub.f32 %v14232_v60, %v1534_v55  ;;  %v14327_v62 = vsub.f32 %v14228_v22, %v1534_v55  ;;  %v14332_v0 = vsub.f32 %v14234_v23, %v1534_v55  ;;  %v14335_v59 = vsub.f32 %v14245_v56, %v1534_v55 }
 0x23a   :  { %v14338_v9 = vsub.f32 %v14241_v27, %v1534_v55  ;;  %v14347_v23 = vsub.f32 %v14253_v14, %v1534_v55  ;;  %v14352_v27 = vsub.f32 %v14257_v41, %v1534_v55  ;;  %v14355_v5 = vsub.f32 %v14267_v29, %v1534_v55 }
 0x23b   :  { %v1552_v3 = vmul.f32 %v14324_v49, %v14226_v7  ;;  %v1570_v60 = vmul.f32 %v14327_v62, %v14327_v62  ;;  %v1556_v22 = vmul.f32 %v14335_v59, %v14237_v11  ;;  %v1571_v44 = vmul.f32 %v14332_v0, %v14332_v0 }
 0x23c   :  { %v1572_v56 = vmul.f32 %v14338_v9, %v14338_v9  ;;  %v14358_v46 = vsub.f32 %v14263_v17, %v1534_v55  ;;  %v1574_v58 = vmul.f32 %v14347_v23, %v14347_v23  ;;  %v1560_v13 = vmul.f32 %v14355_v5, %v14260_v42 }
 0x23d   :  { %v1569_v6 = vmul.f32 %v1552_v3, %v1552_v3  ;;  %v1573_v10 = vmul.f32 %v1556_v22, %v1556_v22  ;;  %v1575_v30 = vmul.f32 %v14352_v27, %v14352_v27  ;;  %v1544_v61 = vsub.f32 %v14275_v51, %v1534_v55 }
 0x23e   :  { %v1576_v29 = vmul.f32 %v14358_v46, %v14358_v46  ;;  %v1545_v17 = vsub.f32 %v14279_v57, %v1534_v55  ;;  %v1547_v3 = vsub.f32 %v14289_v40, %v1534_v55  ;;  %v1546_v22 = vsub.f32 %v14285_v48, %v1534_v55 }
 0x23f   :  { %v1586_v54 = vadd.f32 %v1570_v60, %v1569_v6  ;;  %v1577_v6 = vmul.f32 %v1560_v13, %v1560_v13  ;;  %v1548_v51 = vsub.f32 %v14294_v1, %v1534_v55  ;;  %v1550_v13 = vsub.f32 %v14302_v39, %v1534_v55 }
 0x241   :  { %v1587_v4 = vadd.f32 %v1586_v54, %v1571_v44  ;;  %v1578_v44 = vmul.f32 %v1544_v61, %v1544_v61 }
 0x243   :  { %v1588_v47 = vadd.f32 %v1587_v4, %v1572_v56  ;;  %v1564_v56 = vmul.f32 %v1547_v3, %v14282_v35  ;;  %v1579_v4 = vmul.f32 %v1545_v17, %v1545_v17 }
 0x245   :  { %v1589_v14 = vadd.f32 %v1588_v47, %v1573_v10  ;;  %v1580_v47 = vmul.f32 %v1546_v22, %v1546_v22  ;;  %v1581_v57 = vmul.f32 %v1564_v56, %v1564_v56 }
 0x247   :  { %v1590_v41 = vadd.f32 %v1589_v14, %v1574_v58  ;;  %v1549_v14 = vsub.f32 %v14298_v34, %v1534_v55 }
 0x249   :  { %v1591_v12 = vadd.f32 %v1590_v41, %v1575_v30  ;;  %v14375_v30 = vsub.f32 %v1511_v8, %v1534_v55  ;;  %v1582_v41 = vmul.f32 %v1548_v51, %v1548_v51 }
 0x24b   :  { %v1592_v60 = vadd.f32 %v1591_v12, %v1576_v29  ;;  %v1568_v29 = vmul.f32 %v14375_v30, %v14306_v16  ;;  %v1583_v12 = vmul.f32 %v1549_v14, %v1549_v14 }
 0x24d   :  { %v1593_v54 = vadd.f32 %v1592_v60, %v1577_v6  ;;  %v1584_v60 = vmul.f32 %v1550_v13, %v1550_v13  ;;  %v1585_v1 = vmul.f32 %v1568_v29, %v1568_v29 }
 0x24f   :  { %v1594_v10 = vadd.f32 %v1593_v54, %v1578_v44 }
 0x251   :  { %v1595_v58 = vadd.f32 %v1594_v10, %v1579_v4 }
 0x253   :  { %v1596_v40 = vadd.f32 %v1595_v58, %v1580_v47 }
 0x255   :  { %v1597_v48 = vadd.f32 %v1596_v40, %v1581_v57 }
 0x257   :  { %v1598_v6 = vadd.f32 %v1597_v48, %v1582_v41 }
 0x259   :  { %v1599_v44 = vadd.f32 %v1598_v6, %v1583_v12 }
 0x25b   :  { %v1600_v54 = vadd.f32 %v1599_v44, %v1584_v60 }
 0x25d   :  { %v1601_v4 = vadd.f32 %v1600_v54, %v1585_v1 }
 0x25f   :  { %v1602_v10 = vrot.slane %v1601_v4, 4 }
 0x261   :  { %v1603_v34 = vadd.f32 %v1602_v10, %v1601_v4  ;;  %v14460_v10 = vmul.u32 2, %v13747_v24 }
 0x263   :  { %v1604_v8 = vrot.slane %v1603_v34, 2 }
 0x265   :  { %v1605_v37 = vadd.f32 %v1604_v8, %v1603_v34 }
 0x267   :  { %v1606_v56 = vrot.slane %v1605_v37, 1 }
 0x269   :  { %v1607_v47 = vadd.f32 %v1606_v56, %v1605_v37 }
 0x26b   :  { %v1608_v58 = vmul.f32 0.0078125, %v1607_v47 }
 0x26d   :  { %v1609_v39 = vadd.f32 0.0001, %v1608_v58 }
 0x26f   :  { %13357 = vrsqrt.f32 %v1609_v39  ;;  %v14485_v39 = vmul.u32 2, %v13728_v21 }
 0x27c   :  { %v14380_v55 = vpop.eup %13357 }
 0x27d   :  { %v14383_v57 = vmul.f32 %v14380_v55, %v1550_v13  ;;  %v14386_v40 = vmul.f32 %v14380_v55, %v1549_v14  ;;  %v1623_v41 = vmul.f32 %v14380_v55, %v1547_v3  ;;  %v14391_v29 = vmul.f32 %v14380_v55, %v1548_v51 }
 0x27e   :  { %v14401_v3 = vmul.f32 %v14380_v55, %v1546_v22  ;;  %v14410_v13 = vmul.f32 %v14380_v55, %v1545_v17  ;;  %v1619_v6 = vmul.f32 %v14380_v55, %v14355_v5  ;;  %v14418_v60 = vmul.f32 %v14380_v55, %v1544_v61 }
 0x27f   :  { %v17335_v48 = vmax.f32 %v14383_v57, 0.0  ;;  %v17332_v37 = vmax.f32 %v14386_v40, 0.0  ;;  %v1640_v12 = vmax.f32 %v1623_v41, 0.0  ;;  %v17331_v14 = vmax.f32 %v14391_v29, 0.0 }
 0x280   :  { %v17330_v22 = vmax.f32 %v14401_v3, 0.0  ;;  %v1636_v17 = vmax.f32 %v1619_v6, 0.0  ;;  %v17328_v5 = vmax.f32 %v14418_v60, 0.0  ;;  %v14430_v44 = vmul.f32 %v14380_v55, %v14358_v46 }
 0x281   :  { %2326 = vmatpush1.msra.mxu1 %v17335_v48  ;;  %v14407_v51 = vmul.f32 %v1640_v12, %v14282_v35  ;;  %v17329_v35 = vmax.f32 %v14410_v13, 0.0  ;;  %v14440_v1 = vmul.f32 %v14380_v55, %v14352_v27  ;;  %v1615_v54 = vmul.f32 %v14380_v55, %v14335_v59 }
 0x282   :  { %2327 = vmatprep.subr.mxu1 %v17382_v63  ;;  %v14436_v61 = vmul.f32 %v1636_v17, %v14260_v42  ;;  %v14446_v46 = vadd.s32 4294967278, %v13747_v24  ;;  %v17325_v4 = vmax.f32 %v14430_v44, 0.0  ;;  %v14452_v42 = vmul.f32 %v14380_v55, %v14347_v23 }
 0x283   :  { %2328 = vmatpush1.msra.mxu1 %v17332_v37  ;;  %v17324_v59 = vmax.f32 %v14440_v1, 0.0  ;;  %v1632_v27 = vmax.f32 %v1615_v54, 0.0  ;;  %v14470_v8 = vmul.f32 %v14380_v55, %v14338_v9  ;;  %v14480_v47 = vmul.f32 %v14380_v55, %v14332_v0 }
 0x284   :  { %2329 = vmatprep.subr.mxu1 %v17382_v63  ;;  %v14463_v34 = vmul.u32 2, %v14446_v46  ;;  %v17318_v23 = vmax.f32 %v14452_v42, 0.0  ;;  %v1611_v58 = vmul.f32 %v14380_v55, %v14324_v49  ;;  %v9841_v9 = vadd.s32 4294967295, %v14460_v10 }
 0x285   :  { %2330 = vmatpush1.msra.mxu1 %v17331_v14  ;;  %v14476_v56 = vmul.f32 %v1632_v27, %v14237_v11  ;;  %v14490_v41 = vadd.s32 4294967262, %v14003_v45  ;;  %v14496_v12 = vadd.s32 4294967278, %v13799_v33  ;;  %v1627_v0 = vmul.f32 %v14380_v55, %v14375_v30 }
 0x286   :  { %2331 = vmatprep.subr.mxu1 %v17382_v63  ;;  %v14493_v11 = vadd.s32 4294967295, %v14463_v34  ;;  %v17319_v49 = vmax.f32 %v14470_v8, 0.0  ;;  %v14504_v6 = vmul.f32 %v14380_v55, %v14327_v62  ;;  %v14507_v17 = vadd.s32 4294967260, %v13799_v33 }
 0x287   :  { %2332 = vmatpush1.msra.mxu1 %v14407_v51  ;;  %v17323_v54 = vmax.f32 %v14480_v47, 0.0  ;;  %v1628_v27 = vmax.f32 %v1611_v58, 0.0  ;;  %v14514_v30 = vadd.s32 4294967295, %v14485_v39  ;;  %vm1703_vm15 = vcmp.eq.s32.totalorder %v14003_v45, %v9841_v9 }
 0x288   :  { %2333 = vmatprep.subr.mxu1 %v17382_v63  ;;  %17384 = vst [vmem:[#allocation31_spill] sm:$0xff] %v14493_v11  ;;  %vm17356_vm12 = vcmp.ge.s32.totalorder %v14446_v46, 1  ;;  %v14522_v62 = vmul.u32 2, %v14496_v12  ;;  %v1644_v55 = vmax.f32 %v1627_v0, 0.0  ;;  %v17327_v58 = vmax.f32 %v14504_v6, 0.0  ;;  %vm14544_vm6 = vmand %vm17346_vm14, %vm1703_vm15 }
 0x289   :  { %2334 = vmatpush1.msra.mxu1 %v17330_v22  ;;  %17385 = vst [vmem:[#allocation32_spill] sm:$0xff] %v14514_v30  ;;  %vm1831_vm11 = vcmp.eq.s32.totalorder %v14490_v41, %v14493_v11  ;;  %v14538_v0 = vmul.f32 %v1628_v27, %v14226_v7  ;;  %vm1701_vm7 = vcmp.eq.s32.totalorder %v14003_v45, %v14514_v30  ;;  %vm14573_vm15 = vmand %vm17347_vm9, %vm17333_vm8  ;;  %v14578_v22 = vadd.s32 4294967228, %v14003_v45 }
 0x28a   :  { %2335 = vmatprep.subr.mxu1 %v17382_v63  ;;  %vm14556_vm5 = vmand %vm17356_vm12, %vm1831_vm11  ;;  %v14582_v37 = vadd.s32 4294967242, %v13849_v43  ;;  %vm1702_vm11 = vcmp.eq.s32.totalorder %v13719_v18, %v9841_v9  ;;  %v9873_v48 = vadd.s32 4294967260, %v13824_v38  ;;  %vm17354_vm2 = vcmp.eq.s32.totalorder %v13719_v18, %v14514_v30 }
 0x28b   :  { %2336 = vmatpush1.msra.mxu1 %v17329_v35  ;;  %v14565_v35 = vmul.f32 %v1644_v55, %v14306_v16  ;;  %v2265_v16 = vsel %vm1701_vm7, 1.0, %v17382_v63  ;;  %vm1903_vm8 = vmor %vm14544_vm6, %vm14556_vm5  ;;  %vm17355_vm7 = vcmp.le.s32.totalorder %v14496_v12, 16  ;;  %vm1949_vm0 = vcmp.ge.s32.totalorder %v14507_v17, 1 }
 0x28c   :  { %2337 = vmatprep.subr.mxu1 %v17382_v63  ;;  %vm14612_vm1 = vmand %vm17346_vm14, %vm1702_vm11  ;;  %v14647_v27 = vadd.s32 4294967228, %v13719_v18  ;;  %v17404_v21 = vmax.f32 %v14391_v29, 0.0  ;;  %v9895_v29 = vadd.s32 4294967242, %v13886_v52 }
 0x28d   :  { %2338 = vmatpush1.msra.mxu1 %v17328_v5  ;;  %v14562_v5 = vadd.s32 4294967260, %v13849_v43 }
 0x28e   :  { %2339 = vmatprep.subr.mxu1 %v17382_v63 }
 0x28f   :  { %2340 = vmatpush1.msra.mxu1 %v14436_v61  ;;  %v14603_v9 = vmul.u32 2, %v14562_v5 }
 0x290   :  { %2341 = vmatprep.subr.mxu1 %v17382_v63 }
 0x291   :  { %2342 = vmatpush1.msra.mxu1 %v17325_v4 }
 0x292   :  { %2343 = vmatprep.subr.mxu1 %v17382_v63 }
 0x293   :  { %2344 = vmatpush1.msra.mxu1 %v17324_v59  ;;  %v14549_v59 = vadd.s32 4294967262, %v13719_v18 }
 0x294   :  { %2345 = vmatprep.subr.mxu1 %v17382_v63 }
 0x295   :  { %2346 = vmatpush1.msra.mxu1 %v17318_v23  ;;  %v9851_v23 = vadd.s32 4294967278, %v13774_v28  ;;  %vm1830_vm4 = vcmp.eq.s32.totalorder %v14549_v59, %v14493_v11  ;;  %v17394_v28 = vmax.f32 %v14383_v57, 0.0  ;;  %v14649_v11 = vmul.u32 2, %v9873_v48 }
 0x296   :  { %2347 = vmatprep.subr.mxu1 %v17382_v63  ;;  %vm14633_vm11 = vmand %vm17356_vm12, %vm1830_vm4  ;;  %v14671_v48 = vadd.s32 4294967194, %v14003_v45 }
 0x297   :  { %2348 = vmatpush1.msra.mxu1 %v14476_v56  ;;  %v14551_v4 = vmul.u32 2, %v9851_v23  ;;  %v17390_v23 = vmov 0 }
 0x298   :  { %2349 = vmatprep.subr.mxu1 %v17382_v63  ;;  %v17391_v23 = vsel %vm14573_vm15, 4294967295, %v17390_v23 }
 0x299   :  { %2350 = vmatpush1.msra.mxu1 %v17319_v49  ;;  %v14530_v49 = vmul.u32 2, %v14507_v17  ;;  %17392 = vst [vmem:[#allocation33_spill] sm:$0xff] %v17391_v23  ;;  %v9862_v55 = vadd.s32 4294967295, %v14551_v4  ;;  %v14619_v23 = vmul.u32 2, %v14582_v37 }
 0x29a   :  { %2351 = vmatprep.subr.mxu1 %v17382_v63 }
 0x29b   :  { %2352 = vmatpush1.msra.mxu1 %v17323_v54  ;;  %v9883_v14 = vadd.s32 4294967295, %v14530_v49  ;;  %vm1833_vm14 = vcmp.eq.s32.totalorder %v14490_v41, %v9862_v55  ;;  %v9905_v30 = vadd.s32 4294967295, %v14619_v23  ;;  %v17415_v54 = vmax.f32 %v14418_v60, 0.0 }
 0x29c   :  { %2353 = vmatprep.subr.mxu1 %v17382_v63  ;;  %v2269_v43 = vsel %vm1833_vm14, 1.0, %v17382_v63  ;;  %vm1832_vm14 = vcmp.eq.s32.totalorder %v14549_v59, %v9862_v55  ;;  %v17410_v55 = vmax.f32 %v14410_v13, 0.0 }
 0x29d   :  { %2354 = vmatpush1.msra.mxu1 %v17327_v58  ;;  %v9863_v58 = vadd.s32 4294967295, %v14522_v62  ;;  %vm1999_vm13 = vcmp.eq.s32.totalorder %v14578_v22, %v9883_v14 }
 0x29e   :  { %2355 = vmatprep.subr.mxu1 %v17382_v63  ;;  %vm14658_vm4 = vmand %vm1949_vm0, %vm1999_vm13 }
 0x29f   :  { %2356 = vmatpush1.msra.mxu1 %v14538_v0  ;;  %vm1835_vm3 = vcmp.eq.s32.totalorder %v14490_v41, %v9863_v58  ;;  %vm1834_vm5 = vcmp.eq.s32.totalorder %v14549_v59, %v9863_v58  ;;  %v17405_v58 = vmax.f32 %v14401_v3, 0.0 }
 0x2a0   :  { %2387 = vmatprep.subr.mxu1 %v17382_v63  ;;  %vm14642_vm9 = vmand %vm17355_vm7, %vm1835_vm3 }
 0x2a1   :  { %2388 = vmatpush2.msra.mxu1 %v14565_v35  ;;  %vm1902_vm3 = vmor %vm14612_vm1, %vm14633_vm11  ;;  %vm1998_vm1 = vcmp.eq.s32.totalorder %v14647_v27, %v9883_v14  ;;  %v14731_v14 = vmul.u32 2, %v9895_v29 }
 0x2a2   :  { %9909 = vmatmul.mubr.msk.f32.vlgmr.msra.gmra.mxu1 %vm14573_vm15, %v17393_v50  ;;  %2462 = vmatprep.subr.mxu1 %v17382_v63  ;;  %vm2071_vm6 = vmor %vm14642_vm9, %vm14658_vm4 }
 0x2a3   :  { %2463 = vmatpush1.msra.mxu1 %v17394_v28  ;;  %9910 = vmatprep.mubr.msk.f32.mxu1 %vm17361_vm10, %v2265_v16  ;;  %v2267_v28 = vsel %vm1903_vm8, 1.0, %v17382_v63  ;;  %v17399_v16 = vmax.f32 %v14386_v40, 0.0  ;;  %vm17360_vm8 = vcmp.le.s32.totalorder %v14562_v5, 16  ;;  %vm14698_vm11 = vmand %vm17355_vm7, %vm1834_vm5  ;;  %v9906_v60 = vadd.s32 4294967295, %v14731_v14 }
 0x2a4   :  { %2464 = vmatprep.subr.mxu1 %v17382_v63  ;;  %vm14715_vm5 = vmand %vm1949_vm0, %vm1998_vm1 }
 0x2a5   :  { %2465 = vmatpush1.msra.mxu1 %v17399_v16  ;;  %v9885_v16 = vadd.s32 4294967295, %v14603_v9  ;;  %vm2070_vm4 = vmor %vm14698_vm11, %vm14715_vm5 }
 0x2a6   :  { %9911 = vmatmul.mubr.msk.f32.gmra.mxu1 %vm17354_vm2, %v17393_v50  ;;  %2466 = vmatprep.subr.mxu1 %v17382_v63  ;;  %vm2167_vm2 = vcmp.eq.s32.totalorder %v14671_v48, %v9905_v30 }
 0x2a7   :  { %2467 = vmatpush1.msra.mxu1 %v17404_v21  ;;  %9912 = vmatprep.mubr.msk.f32.mxu1 %vm17361_vm10, %v2267_v28  ;;  %v9884_v21 = vadd.s32 4294967295, %v14649_v11  ;;  %vm2003_vm13 = vcmp.eq.s32.totalorder %v14578_v22, %v9885_v16  ;;  %v14729_v28 = vadd.s32 4294967194, %v13719_v18 }
 0x2a8   :  { %2468 = vmatprep.subr.mxu1 %v17382_v63  ;;  %vm14724_vm12 = vmand %vm17360_vm8, %vm2003_vm13 }
 0x2a9   :  { %2469 = vmatpush1.msra.mxu1 %v14407_v51  ;;  %v14690_v51 = vadd.s32 4294967242, %v13899_v53  ;;  %vm2001_vm7 = vcmp.eq.s32.totalorder %v14578_v22, %v9884_v21  ;;  %vm2166_vm1 = vcmp.eq.s32.totalorder %v14729_v28, %v9905_v30 }
 0x2aa   :  { %9913 = vmatmul.mubr.msk.f32.gmra.mxu1 %vm1902_vm3, %v17393_v50  ;;  %2470 = vmatprep.subr.mxu1 %v17382_v63  ;;  %vm17359_vm3 = vcmp.ge.s32.totalorder %v14582_v37, 1  ;;  %v2273_v40 = vsel %vm2001_vm7, 1.0, %v17382_v63  ;;  %vm2000_vm7 = vcmp.eq.s32.totalorder %v14647_v27, %v9884_v21  ;;  %v17422_v21 = vmax.f32 %v14480_v47, 0.0 }
 0x2ab   :  { %2471 = vmatpush1.msra.mxu1 %v17405_v58  ;;  %9914 = vmatprep.mubr.msk.f32.mxu1 %vm17361_vm10, %v2269_v43  ;;  %v2271_v43 = vsel %vm2071_vm6, 1.0, %v17382_v63  ;;  %vm14737_vm9 = vmand %vm17359_vm3, %vm2167_vm2  ;;  %v14742_v57 = vmul.u32 2, %v14690_v51  ;;  %vm2002_vm2 = vcmp.eq.s32.totalorder %v14647_v27, %v9885_v16  ;;  %v17416_v58 = vmax.f32 %v14430_v44, 0.0 }
 0x2ac   :  { %2472 = vmatprep.subr.mxu1 %v17382_v63  ;;  %vm2239_vm6 = vmor %vm14724_vm12, %vm14737_vm9  ;;  %v17419_v44 = vmax.f32 %v14440_v1, 0.0  ;;  %vm17358_vm11 = vcmp.le.s32.totalorder %v14690_v51, 16  ;;  %v17420_v16 = vmax.f32 %v14452_v42, 0.0  ;;  %v17421_v42 = vmax.f32 %v14470_v8, 0.0 }
 0x2ad   :  { %2473 = vmatpush1.msra.mxu1 %v17410_v55  ;;  %v9907_v29 = vadd.s32 4294967295, %v14742_v57  ;;  %vm14770_vm12 = vmand %vm17360_vm8, %vm2002_vm2  ;;  %v2275_v30 = vsel %vm2239_vm6, 1.0, %v17382_v63  ;;  %vm1735_vm2 = vcmp.eq.s32.totalorder %v14003_v45, %v14309_v2  ;;  %vm2168_vm6 = vcmp.eq.s32.totalorder %v14729_v28, %v9906_v60 }
 0x2ae   :  { %9915 = vmatmul.mubr.msk.f32.gmra.mxu1 %vm1832_vm14, %v17393_v50  ;;  %2474 = vmatprep.subr.mxu1 %v17382_v63  ;;  %vm2184_vm13 = vmand %vm17359_vm3, %vm2166_vm1  ;;  %vm2169_vm14 = vcmp.eq.s32.totalorder %v14671_v48, %v9906_v60  ;;  %v17424_v8 = vmax.f32 %v14504_v6, 0.0  ;;  %vm1869_vm3 = vcmp.eq.s32.totalorder %v14490_v41, %v14551_v4  ;;  %vm17436_vm8 = vcmp.le.s32.totalorder %v14496_v12, 16 }
 0x2af   :  { %2475 = vmatpush1.msra.mxu1 %v17415_v54  ;;  %9916 = vmatprep.mubr.msk.f32.mxu1 %vm17361_vm10, %v2271_v43  ;;  %vm2171_vm5 = vcmp.eq.s32.totalorder %v14671_v48, %v9907_v29  ;;  %vm2238_vm9 = vmor %vm14770_vm12, %vm2184_vm13  ;;  %v2277_v1 = vsel %vm2169_vm14, 1.0, %v17382_v63  ;;  %vm2170_vm1 = vcmp.eq.s32.totalorder %v14729_v28, %v9907_v29  ;;  %vm1739_vm13 = vcmp.eq.s32.totalorder %v14003_v45, %v14460_v10 }
 0x2b0   :  { %2476 = vmatprep.subr.mxu1 %v17382_v63  ;;  %vm2188_vm14 = vmand %vm17358_vm11, %vm2170_vm1  ;;  %vm17428_vm1 = vcmp.ge.s32.totalorder %v14446_v46, 1  ;;  %v2287_v43 = vsel %vm1869_vm3, 1.0, %v17382_v63  ;;  %vm17441_vm3 = vcmp.le.s32.totalorder %v14496_v12, 16 }
 0x2b1   :  { %2477 = vmatpush1.msra.mxu1 %v14436_v61 }
 0x2b2   :  { %9917 = vmatmul.mubr.msk.f32.gmra.mxu1 %vm2070_vm4, %v17393_v50  ;;  %2478 = vmatprep.subr.mxu1 %v17382_v63  ;;  %vm2189_vm4 = vmand %vm17358_vm11, %vm2171_vm5  ;;  %vm1867_vm5 = vcmp.eq.s32.totalorder %v14490_v41, %v14463_v34 }
 0x2b3   :  { %2479 = vmatpush1.msra.mxu1 %v17416_v58  ;;  %9918 = vmatprep.mubr.msk.f32.mxu1 %vm17361_vm10, %v2273_v40 }
 0x2b4   :  { %2480 = vmatprep.subr.mxu1 %v17382_v63 }
 0x2b5   :  { %2481 = vmatpush1.msra.mxu1 %v17419_v44 }
 0x2b6   :  { %9919 = vmatmul.mubr.msk.f32.gmra.mxu1 %vm2000_vm7, %v17393_v50  ;;  %2482 = vmatprep.subr.mxu1 %v17382_v63  ;;  %vm17423_vm7 = vcmp.ge.s32.totalorder %v13699_v15, 1 }
 0x2b7   :  { %2483 = vmatpush1.msra.mxu1 %v17420_v16  ;;  %9920 = vmatprep.mubr.msk.f32.mxu1 %vm17361_vm10, %v2275_v30  ;;  %vm1753_vm12 = vmand %vm17423_vm7, %vm1735_vm2  ;;  %vm17425_vm2 = vcmp.le.s32.totalorder %v13747_v24, 16 }
 0x2b8   :  { %2484 = vmatprep.subr.mxu1 %v17382_v63  ;;  %v2281_v47 = vsel %vm1753_vm12, 1.0, %v17382_v63  ;;  %vm14838_vm7 = vmand %vm17428_vm1, %vm1867_vm5  ;;  %vm17431_vm12 = vcmp.ge.s32.totalorder %v13699_v15, 1  ;;  %vm17362_vm1 = vcmp.eq.s32.totalorder %v13719_v18, %v14485_v39 }
 0x2b9   :  { %2485 = vmatpush1.msra.mxu1 %v14476_v56  ;;  %v2279_v56 = vsel %vm2189_vm4, 1.0, %v17382_v63  ;;  %vm1737_vm4 = vcmp.eq.s32.totalorder %v14003_v45, %v14485_v39  ;;  %v17432_v45 = vmov 0 }
 0x2ba   :  { %9921 = vmatmul.mubr.msk.f32.gmra.mxu1 %vm2238_vm9, %v17393_v50  ;;  %2486 = vmatprep.subr.mxu1 %v17382_v63  ;;  %vm17357_vm9 = vcmp.eq.s32.totalorder %v13719_v18, %v14309_v2 }
 0x2bb   :  { %2487 = vmatpush1.msra.mxu1 %v17421_v42  ;;  %9922 = vmatprep.mubr.msk.f32.mxu1 %vm17361_vm10, %v2277_v1 }
 0x2bc   :  { %2488 = vmatprep.subr.mxu1 %v17382_v63 }
 0x2bd   :  { %2489 = vmatpush1.msra.mxu1 %v17422_v21 }
 0x2be   :  { %9923 = vmatmul.mubr.msk.f32.gmra.mxu1 %vm2168_vm6, %v17393_v50  ;;  %2490 = vmatprep.subr.mxu1 %v17382_v63  ;;  %vm14830_vm6 = vmand %vm17425_vm2, %vm1739_vm13  ;;  %vm1866_vm2 = vcmp.eq.s32.totalorder %v14549_v59, %v14463_v34 }
 0x2bf   :  { %2491 = vmatpush1.msra.mxu1 %v17424_v8  ;;  %9924 = vmatprep.mubr.msk.f32.mxu1 %vm17361_vm10, %v2279_v56  ;;  %vm14849_vm13 = vmand %vm17431_vm12, %vm17357_vm9  ;;  %vm17434_vm12 = vcmp.le.s32.totalorder %v13747_v24, 16 }
 0x2c0   :  { %2492 = vmatprep.subr.mxu1 %v17382_v63  ;;  %v17433_v45 = vsel %vm14849_vm13, 4294967295, %v17432_v45  ;;  %vm1921_vm5 = vmor %vm14830_vm6, %vm14838_vm7  ;;  %vm2035_vm6 = vcmp.eq.s32.totalorder %v14578_v22, %v14530_v49  ;;  %vm17435_vm7 = vcmp.ge.s32.totalorder %v14446_v46, 1 }
 0x2c1   :  { %2493 = vmatpush1.msra.mxu1 %v14538_v0  ;;  %v2283_v0 = vsel %vm1737_vm4, 1.0, %v17382_v63  ;;  %vm1871_vm4 = vcmp.eq.s32.totalorder %v14490_v41, %v14522_v62  ;;  %vm1884_vm11 = vmand %vm17435_vm7, %vm1866_vm2  ;;  %vm2039_vm7 = vcmp.eq.s32.totalorder %v14578_v22, %v14603_v9 }
 0x2c2   :  { %9925 = vmatmul.mubr.msk.f32.gmra.mxu1 %vm2188_vm14, %v17393_v50  ;;  %2524 = vmatprep.subr.mxu1 %v17382_v63  ;;  %vm1738_vm14 = vcmp.eq.s32.totalorder %v13719_v18, %v14460_v10 }
 0x2c3   :  { %2525 = vmatpush2.msra.mxu1 %v14565_v35  ;;  %9926 = vmatprep.mubr.msk.f32.mxu1 %vm17361_vm10, %v2281_v47  ;;  %vm1756_vm9 = vmand %vm17434_vm12, %vm1738_vm14  ;;  %v2285_v35 = vsel %vm1921_vm5, 1.0, %v17382_v63  ;;  %vm17439_vm5 = vcmask 64512   ;;  %vm1870_vm12 = vcmp.eq.s32.totalorder %v14549_v59, %v14522_v62 }
 0x2c4   :  { %11427 = vmatprep.subr.mxu1 %v17382_v63  ;;  %vm2053_vm14 = vmand %vm1949_vm0, %vm2035_vm6 }
 0x2c5   :  { %vm1920_vm2 = vmor %vm1756_vm9, %vm1884_vm11  ;;  %vm1868_vm11 = vcmp.eq.s32.totalorder %v14549_v59, %v14551_v4 }
 0x2c6   :  { %9927 = vmatmul.mubr.msk.f32.vlgmr.msra.gmra.mxu1 %vm14849_vm13, %v17393_v50  ;;  %vm17440_vm6 = vmmov %vm17439_vm5 }
 0x2c7   :  { %9928 = vmatprep.mubr.msk.f32.mxu1 %vm17361_vm10, %v2283_v0  ;;  %vm14882_vm10 = vmand %vm17436_vm8, %vm1871_vm4  ;;  %vm2034_vm4 = vcmp.eq.s32.totalorder %v14647_v27, %v14530_v49 }
 0x2c8   :  { %vm2089_vm8 = vmor %vm14882_vm10, %vm2053_vm14  ;;  %vm2037_vm14 = vcmp.eq.s32.totalorder %v14578_v22, %v14649_v11 }
 0x2c9   :  { %vm1888_vm9 = vmand %vm17441_vm3, %vm1870_vm12  ;;  %v2289_v41 = vsel %vm2089_vm8, 1.0, %v17382_v63  ;;  %vm17444_vm12 = vcmask 64512   ;;  %v2291_v4 = vsel %vm2037_vm14, 1.0, %v17382_v63  ;;  %vm2038_vm8 = vcmp.eq.s32.totalorder %v14647_v27, %v14603_v9 }
 0x2ca   :  { %9929 = vmatmul.mubr.msk.f32.gmra.mxu1 %vm17362_vm1, %v17393_v50  ;;  %vm2052_vm10 = vmand %vm1949_vm0, %vm2034_vm4  ;;  %vm17443_vm1 = vcmp.ge.s32.totalorder %v14582_v37, 1  ;;  %vm2202_vm4 = vcmp.eq.s32.totalorder %v14729_v28, %v14619_v23  ;;  %vm2207_vm14 = vcmp.eq.s32.totalorder %v14671_v48, %v14742_v57 }
 0x2cb   :  { %9930 = vmatprep.mubr.msk.f32.mxu1 %vm17439_vm5, %v2285_v35  ;;  %vm2203_vm5 = vcmp.eq.s32.totalorder %v14671_v48, %v14619_v23  ;;  %vm2088_vm3 = vmor %vm1888_vm9, %vm2052_vm10  ;;  %vm17447_vm9 = vcmp.ge.s32.totalorder %v14582_v37, 1 }
 0x2cc   :  { %vm2221_vm13 = vmand %vm17443_vm1, %vm2203_vm5 }
 0x2cd   :  { %vm2220_vm10 = vmand %vm17447_vm9, %vm2202_vm4  ;;  %vm2206_vm4 = vcmp.eq.s32.totalorder %v14729_v28, %v14742_v57  ;;  %vm17454_vm9 = vcmp.eq.s32.totalorder %v13719_v18, %v13722_v19  ;;  %v3006_v19 = vld [vmem:[#allocation2 + $0x278] sm:$0xff] }
 0x2ce   :  { %9931 = vmatmul.mubr.msk.f32.gmra.mxu1 %vm1920_vm2, %v17393_v50  ;;  %vm17442_vm2 = vcmp.le.s32.totalorder %v14562_v5, 16 }
 0x2cf   :  { %9932 = vmatprep.mubr.msk.f32.mxu1 %vm17440_vm6, %v2287_v43  ;;  %vm2057_vm6 = vmand %vm17442_vm2, %vm2039_vm7 }
 0x2d0   :  { %vm2257_vm0 = vmor %vm2057_vm6, %vm2221_vm13  ;;  %vm2205_vm13 = vcmp.eq.s32.totalorder %v14671_v48, %v14731_v14 }
 0x2d1   :  { %vm17445_vm7 = vmmov %vm17444_vm12  ;;  %v2293_v22 = vsel %vm2257_vm0, 1.0, %v17382_v63  ;;  %v2295_v59 = vsel %vm2205_vm13, 1.0, %v17382_v63  ;;  %vm2204_vm0 = vcmp.eq.s32.totalorder %v14729_v28, %v14731_v14  ;;  %vm2698_vm13 = vcmask 588800  }
 0x2d2   :  { %9933 = vmatmul.mubr.msk.f32.gmra.mxu1 %vm1868_vm11, %v17393_v50  ;;  %vm2036_vm11 = vcmp.eq.s32.totalorder %v14647_v27, %v14649_v11  ;;  %vm17446_vm1 = vmmov %vm17442_vm2 }
 0x2d3   :  { %9934 = vmatprep.mubr.msk.f32.mxu1 %vm17444_vm12, %v2289_v41  ;;  %vm2056_vm5 = vmand %vm17446_vm1, %vm2038_vm8  ;;  %vm17449_vm12 = vcmp.le.s32.totalorder %v14690_v51, 16 }
 0x2d4   :  { %vm17448_vm2 = vmmov %vm17445_vm7 }
 0x2d5   :  { %vm2256_vm6 = vmor %vm2056_vm5, %vm2220_vm10  ;;  %vm17453_vm5 = vmmov 0   ;;  %vm17455_vm10 = vcmp.eq.s32.totalorder %v13719_v18, %v13725_v20 }
 0x2d6   :  { %9935 = vmatmul.mubr.msk.f32.gmra.mxu1 %vm2088_vm3, %v17393_v50  ;;  %vm2225_vm3 = vmand %vm17449_vm12, %vm2207_vm14  ;;  %vm17456_vm14 = vcmp.eq.s32.totalorder %v13719_v18, %v13756_v25  ;;  %v3004_v25 = vld [vmem:[#allocation2 + $0x268] sm:$0xff] }
 0x2d7   :  { %9936 = vmatprep.mubr.msk.f32.mxu1 %vm17445_vm7, %v2291_v4  ;;  %vm17450_vm8 = vmmov %vm17448_vm2  ;;  %v2297_v37 = vsel %vm2225_vm3, 1.0, %v17382_v63  ;;  %v15036_v20 = vsel %vm17456_vm14, 1.0, %v17382_v63  ;;  %vm17460_vm3 = vcmp.eq.s32.totalorder %v13719_v18, %v13808_v36  ;;  %v3001_v36 = vld [vmem:[#allocation2 + $0x250] sm:$0xff] }
 0x2d8   :  { %vm17451_vm7 = vmmov %vm17448_vm2 }
 0x2da   :  { %9937 = vmatmul.mubr.msk.f32.gmra.mxu1 %vm2036_vm11, %v17393_v50  ;;  %vm17452_vm11 = vmmov %vm17449_vm12  ;;  %vm17459_vm12 = vcmp.eq.s32.totalorder %v13719_v18, %v13786_v32  ;;  %v17461_v32 = vld [vmem:[#allocation18_spill] sm:$0xff] }
 0x2db   :  { %9938 = vmatprep.mubr.msk.f32.mxu1 %vm17448_vm2, %v2293_v22  ;;  %vm2224_vm1 = vmand %vm17452_vm11, %vm2206_vm4  ;;  %vm17457_vm2 = vcmp.eq.s32.totalorder %v13719_v18, %v13759_v26  ;;  %v2989_v26 = vld [vmem:[#allocation2 + $0x1f8] sm:$0xff] }
 0x2de   :  { %9939 = vmatmul.mubr.msk.f32.gmra.mxu1 %vm2256_vm6, %v17393_v50  ;;  %vm17458_vm6 = vcmp.eq.s32.totalorder %v13719_v18, %v13783_v31  ;;  %v15083_v31 = vsel %vm17460_vm3, 1.0, %v17382_v63  ;;  %vm17483_vm3 = vcmp.le.s32.totalorder %v13747_v24, 16 }
 0x2df   :  { %9940 = vmatprep.mubr.msk.f32.mxu1 %vm17450_vm8, %v2295_v59  ;;  %vm17462_vm8 = vcmp.eq.s32.totalorder %v13719_v18, %v17461_v32  ;;  %v2987_v32 = vld [vmem:[#allocation2 + $0x1e8] sm:$0xff] }
 0x2e2   :  { %9941 = vmatmul.mubr.msk.f32.gmra.mxu1 %vm2204_vm0, %v17393_v50 }
 0x2e3   :  { %9942 = vmatprep.mubr.msk.f32.mxu1 %vm17451_vm7, %v2297_v37  ;;  %v15011_v37 = vsel %vm17454_vm9, 1.0, %v17382_v63 }
 0x2e6   :  { %9943 = vmatmul.mubr.msk.f32.gmra.mxu1 %vm2224_vm1, %v17393_v50 }
 0x2e7   :  { %11445 = vmatprep.mubr.msk.f32.mxu1 %vm17453_vm5, %v17382_v63 }
 0x362   :  { %v14958_v5 = vpop.f32.mrf.mxu1 }
 0x364   :  { %v2393_v11 = vpop.f32.mrf.mxu1 }
 0x365   :  { %v15017_v11 = vsel %vm17455_vm10, 1.0, %v17382_v63 }
 0x366   :  { %v14960_v12 = vpop.f32.mrf.mxu1 }
 0x368   :  { %v2398_v49 = vpop.f32.mrf.mxu1 }
 0x369   :  { %v3005_v49 = vld [vmem:[#allocation2 + $0x270] sm:$0xff] }
 0x36a   :  { %v2401_v17 = vpop.f32.mrf.mxu1 }
 0x36c   :  { %v2403_v62 = vpop.f32.mrf.mxu1 }
 0x36d   :  { %v15065_v62 = vsel %vm17459_vm12, 1.0, %v17382_v63  ;;  %vm17364_vm12 = vcmp.ge.s32.totalorder %v13747_v24, 19 }
 0x36e   :  { %v2406_v23 = vpop.f32.mrf.mxu1 }
 0x370   :  { %v2408_v9 = vpop.f32.mrf.mxu1 }
 0x371   :  { %v15089_v9 = vsel %vm17462_vm8, 1.0, %v17382_v63  ;;  %vm2610_vm8 = vmor %vm17483_vm3, %vm17364_vm12 }
 0x372   :  { %v2411_v27 = vpop.f32.mrf.mxu1 }
 0x374   :  { %v2413_v48 = vpop.f32.mrf.mxu1 }
 0x375   :  { %v2988_v48 = vld [vmem:[#allocation2 + $0x1f0] sm:$0xff] }
 0x376   :  { %v2416_v3 = vpop.f32.mrf.mxu1 }
 0x378   :  { %v2418_v51 = vpop.f32.mrf.mxu1 }
 0x37a   :  { %v2421_v55 = vpop.f32.mrf.mxu1 }
 0x37c   :  { %v2423_v38 = vpop.f32.mrf.mxu1 }
 0x37e   :  { %v2426_v50 = vpop.f32.mrf.mxu1 }
 0x380   :  { %v2428_v28 = vpop.f32.mrf.mxu1 }
 0x381   :  { %v2999_v28 = vld [vmem:[#allocation2 + $0x240] sm:$0xff] }
 0x382   :  { %v2431_v14 = vpop.f32.mrf.mxu1 }
 0x384   :  { %v2433_v13 = vpop.f32.mrf.mxu1 }
 0x386   :  { %v2528_v57 = vpop.f32.mrf.mxu1 }
 0x388   :  { %v2530_v54 = vpop.f32.mrf.mxu1 }
 0x38a   :  { %v2533_v40 = vpop.f32.mrf.mxu1 }
 0x38b   :  { %v15001_v59 = vmax.f32 %v14960_v12, %v2533_v40  ;;  %v15020_v12 = vmax.f32 %v14958_v5, %v2528_v57  ;;  %v15042_v5 = vsel %vm17457_vm2, 1.0, %v17382_v63  ;;  %v17469_v57 = vld [vmem:[#allocation23_spill] sm:$0xff] }
 0x38c   :  { %v2535_v60 = vpop.f32.mrf.mxu1  ;;  %vm17470_vm11 = vcmp.eq.s32.totalorder %v13719_v18, %v17469_v57  ;;  %v2998_v40 = vld [vmem:[#allocation2 + $0x238] sm:$0xff]  ;;  %v2980_v57 = vld [vmem:[#allocation2 + $0x1b0] sm:$0xff] }
 0x38d   :  { %v551_v54 = vsel %vm17470_vm11, 1.0, %v17382_v63  ;;  %v2997_v60 = vld [vmem:[#allocation2 + $0x230] sm:$0xff] }
 0x38e   :  { %v2538_v29 = vpop.f32.mrf.mxu1 }
 0x38f   :  { %v14994_v22 = vmax.f32 %v2401_v17, %v2538_v29  ;;  %v15059_v17 = vsel %vm17458_vm6, 1.0, %v17382_v63  ;;  %v17471_v29 = vld [vmem:[#allocation24_spill] sm:$0xff] }
 0x390   :  { %v2540_v58 = vpop.f32.mrf.mxu1  ;;  %vm17472_vm1 = vcmp.eq.s32.totalorder %v13719_v18, %v17471_v29  ;;  %v2977_v29 = vld [vmem:[#allocation2 + $0x198] sm:$0xff] }
 0x391   :  { %v468_v58 = vsel %vm17472_vm1, 1.0, %v17382_v63 }
 0x392   :  { %v2543_v61 = vpop.f32.mrf.mxu1 }
 0x393   :  { %v14988_v4 = vmax.f32 %v2406_v23, %v2543_v61  ;;  %v3003_v23 = vld [vmem:[#allocation2 + $0x260] sm:$0xff] }
 0x394   :  { %v2545_v30 = vpop.f32.mrf.mxu1  ;;  %v17473_v61 = vld [vmem:[#allocation25_spill] sm:$0xff] }
 0x395   :  { %vm17474_vm9 = vcmp.eq.s32.totalorder %v13719_v18, %v17473_v61  ;;  %v3231_v61 = vld [vmem:[#allocation2 + $0x298] sm:$0xff] }
 0x396   :  { %v2548_v44 = vpop.f32.mrf.mxu1  ;;  %v553_v30 = vsel %vm17474_vm9, 1.0, %v17382_v63 }
 0x397   :  { %v14982_v41 = vmax.f32 %v2411_v27, %v2548_v44  ;;  %v3002_v27 = vld [vmem:[#allocation2 + $0x258] sm:$0xff]  ;;  %v2996_v44 = vld [vmem:[#allocation2 + $0x228] sm:$0xff] }
 0x398   :  { %v2550_v16 = vpop.f32.mrf.mxu1 }
 0x399   :  { %v2995_v16 = vld [vmem:[#allocation2 + $0x220] sm:$0xff] }
 0x39a   :  { %v2553_v1 = vpop.f32.mrf.mxu1 }
 0x39b   :  { %v14976_v43 = vmax.f32 %v2416_v3, %v2553_v1  ;;  %v17463_v3 = vld [vmem:[#allocation19_spill] sm:$0xff]  ;;  %v17475_v1 = vld [vmem:[#allocation26_spill] sm:$0xff] }
 0x39c   :  { %v2555_v42 = vpop.f32.mrf.mxu1  ;;  %vm17464_vm0 = vcmp.eq.s32.totalorder %v13719_v18, %v17463_v3  ;;  %vm17476_vm10 = vcmp.eq.s32.totalorder %v13719_v18, %v17475_v1  ;;  %v3240_v3 = vld [vmem:[#allocation2 + $0x2e0] sm:$0xff] }
 0x39d   :  { %v15105_v51 = vsel %vm17464_vm0, 1.0, %v17382_v63  ;;  %v470_v42 = vsel %vm17476_vm10, 1.0, %v17382_v63  ;;  %v3228_v1 = vld [vmem:[#allocation2 + $0x280] sm:$0xff]  ;;  %vm2594_vm0 = vcmp.le.s32.totalorder %v13799_v33, 34  ;;  %vm2670_vm10 = vcmp.le.s32.totalorder %v13899_v53, 70 }
 0x39e   :  { %v2558_v56 = vpop.f32.mrf.mxu1 }
 0x39f   :  { %v14970_v10 = vmax.f32 %v2421_v55, %v2558_v56  ;;  %v17465_v55 = vld [vmem:[#allocation20_spill] sm:$0xff]  ;;  %v17477_v56 = vld [vmem:[#allocation27_spill] sm:$0xff] }
 0x3a0   :  { %v2560_v21 = vpop.f32.mrf.mxu1  ;;  %vm17466_vm4 = vcmp.eq.s32.totalorder %v13719_v18, %v17465_v55  ;;  %vm17478_vm14 = vcmp.eq.s32.totalorder %v13719_v18, %v17477_v56  ;;  %v2984_v55 = vld [vmem:[#allocation2 + $0x1d0] sm:$0xff] }
 0x3a1   :  { %v15111_v38 = vsel %vm17466_vm4, 1.0, %v17382_v63  ;;  %v555_v21 = vsel %vm17478_vm14, 1.0, %v17382_v63  ;;  %vm2621_vm4 = vcmp.ge.s32.totalorder %v13799_v33, 37 }
 0x3a2   :  { %v2563_v8 = vpop.f32.mrf.mxu1 }
 0x3a3   :  { %v14964_v35 = vmax.f32 %v2426_v50, %v2563_v8  ;;  %v3000_v50 = vld [vmem:[#allocation2 + $0x248] sm:$0xff]  ;;  %v2994_v8 = vld [vmem:[#allocation2 + $0x218] sm:$0xff] }
 0x3a4   :  { %v2565_v47 = vpop.f32.mrf.mxu1 }
 0x3a5   :  { %v2993_v47 = vld [vmem:[#allocation2 + $0x210] sm:$0xff] }
 0x3a6   :  { %v2568_v6 = vpop.f32.mrf.mxu1 }
 0x3a7   :  { %v14962_v52 = vmax.f32 %v2431_v14, %v2568_v6  ;;  %v17467_v14 = vld [vmem:[#allocation22_spill] sm:$0xff]  ;;  %v17479_v6 = vld [vmem:[#allocation28_spill] sm:$0xff] }
 0x3a8   :  { %v2570_v0 = vpop.f32.mrf.mxu1  ;;  %vm17468_vm7 = vcmp.eq.s32.totalorder %v13719_v18, %v17467_v14  ;;  %vm17480_vm2 = vcmp.eq.s32.totalorder %v13719_v18, %v17479_v6  ;;  %v3237_v14 = vld [vmem:[#allocation2 + $0x2c8] sm:$0xff] }
 0x3a9   :  { %11383 = vmatpush3.msra.mxu0 %v14962_v52  ;;  %11428 = vmatpush3.msra.mxu1 %v14962_v52  ;;  %v466_v13 = vsel %vm17468_vm7, 1.0, %v17382_v63  ;;  %v472_v0 = vsel %vm17480_vm2, 1.0, %v17382_v63  ;;  %vm2648_vm7 = vmor %vm2594_vm0, %vm2621_vm4 }
 0x3aa   :  { %11384 = vmatprep.subr.mxu0 %v17382_v63  ;;  %11429 = vmatprep.subr.mxu1 %v17382_v63 }
 0x3ab   :  { %11385 = vmatpush3.msra.mxu0 %v14964_v35  ;;  %11430 = vmatpush3.msra.mxu1 %v14964_v35 }
 0x3ac   :  { %11386 = vmatprep.subr.mxu0 %v17382_v63  ;;  %11431 = vmatprep.subr.mxu1 %v17382_v63 }
 0x3ad   :  { %11387 = vmatpush3.msra.mxu0 %v14970_v10  ;;  %11432 = vmatpush3.msra.mxu1 %v14970_v10 }
 0x3ae   :  { %11388 = vmatprep.subr.mxu0 %v17382_v63  ;;  %11433 = vmatprep.subr.mxu1 %v17382_v63 }
 0x3af   :  { %11389 = vmatpush3.msra.mxu0 %v14976_v43  ;;  %11434 = vmatpush3.msra.mxu1 %v14976_v43 }
 0x3b0   :  { %11390 = vmatprep.subr.mxu0 %v17382_v63  ;;  %11435 = vmatprep.subr.mxu1 %v17382_v63 }
 0x3b1   :  { %11391 = vmatpush3.msra.mxu0 %v14982_v41  ;;  %11436 = vmatpush3.msra.mxu1 %v14982_v41 }
 0x3b2   :  { %11392 = vmatprep.subr.mxu0 %v17382_v63  ;;  %11437 = vmatprep.subr.mxu1 %v17382_v63 }
 0x3b3   :  { %11393 = vmatpush3.msra.mxu0 %v14988_v4  ;;  %11438 = vmatpush3.msra.mxu1 %v14988_v4 }
 0x3b4   :  { %11394 = vmatprep.subr.mxu0 %v17382_v63  ;;  %11439 = vmatprep.subr.mxu1 %v17382_v63 }
 0x3b5   :  { %11395 = vmatpush3.msra.mxu0 %v14994_v22  ;;  %11440 = vmatpush3.msra.mxu1 %v14994_v22 }
 0x3b6   :  { %11396 = vmatprep.subr.mxu0 %v17382_v63  ;;  %11441 = vmatprep.subr.mxu1 %v17382_v63 }
 0x3b7   :  { %11397 = vmatpush3.msra.mxu0 %v15001_v59  ;;  %11442 = vmatpush3.msra.mxu1 %v15001_v59 }
 0x3b8   :  { %11398 = vmatprep.subr.mxu0 %v17382_v63  ;;  %11443 = vmatprep.subr.mxu1 %v17382_v63 }
 0x3b9   :  { %11399 = vmatpush3.msra.mxu0 %v15020_v12  ;;  %11444 = vmatpush3.msra.mxu1 %v15020_v12 }
 0x3ba   :  { %11401 = vmatmul.mubr.msk.f32.vlgmr.msra.gmra.mxu0 %vm2698_vm13, %v15011_v37  ;;  %11446 = vmatmul.mubr.msk.f32.vlgmr.msra.gmra.mxu1 %vm2698_vm13, %v15017_v11 }
 0x3bb   :  { %11403 = vmatprep.mubr.msk.f32.mxu0 %vm17453_vm5, %v17382_v63  ;;  %11472 = vmatprep.subr.mxu0 %v17382_v63 }
 0x3bc   :  { %11448 = vmatprep.mubr.msk.f32.mxu1 %vm17453_vm5, %v17382_v63  ;;  %11473 = vmatpush3.msra.mxu0 %v3006_v19  ;;  %v17481_v19 = vld [vmem:[#allocation29_spill] sm:$0xff] }
 0x3bd   :  { %11474 = vmatprep.subr.mxu0 %v17382_v63  ;;  %11531 = vmatprep.subr.mxu1 %v17382_v63  ;;  %vm17482_vm6 = vcmp.eq.s32.totalorder %v13719_v18, %v17481_v19 }
 0x3be   :  { %11404 = vmatmul.mubr.msk.f32.gmra.mxu0 %vm2698_vm13, %v15036_v20  ;;  %11449 = vmatmul.mubr.msk.f32.gmra.mxu1 %vm2698_vm13, %v15042_v5 }
 0x3bf   :  { %11406 = vmatprep.mubr.msk.f32.mxu0 %vm17453_vm5, %v17382_v63  ;;  %11475 = vmatpush3.msra.mxu0 %v3005_v49  ;;  %v557_v49 = vsel %vm17482_vm6, 1.0, %v17382_v63 }
 0x3c0   :  { %11476 = vmatprep.subr.mxu0 %v17382_v63  ;;  %11451 = vmatprep.mubr.msk.f32.mxu1 %vm17453_vm5, %v17382_v63 }
 0x3c1   :  { %11477 = vmatpush3.msra.mxu0 %v3004_v25  ;;  %11532 = vmatpush3.msra.mxu1 %v2989_v26  ;;  %v2992_v25 = vld [vmem:[#allocation2 + $0x208] sm:$0xff]  ;;  %v2991_v26 = vld [vmem:[#allocation2 + $0x200] sm:$0xff] }
 0x3c2   :  { %11407 = vmatmul.mubr.msk.f32.gmra.mxu0 %vm2698_vm13, %v15059_v17  ;;  %11452 = vmatmul.mubr.msk.f32.gmra.mxu1 %vm2698_vm13, %v15065_v62 }
 0x3c3   :  { %11478 = vmatprep.subr.mxu0 %v17382_v63  ;;  %11409 = vmatprep.mubr.msk.f32.mxu0 %vm17453_vm5, %v17382_v63 }
 0x3c4   :  { %11479 = vmatpush3.msra.mxu0 %v3003_v23  ;;  %11454 = vmatprep.mubr.msk.f32.mxu1 %vm17453_vm5, %v17382_v63  ;;  %v3243_v23 = vld [vmem:[#allocation2 + $0x2f8] sm:$0xff] }
 0x3c5   :  { %11480 = vmatprep.subr.mxu0 %v17382_v63  ;;  %11533 = vmatprep.subr.mxu1 %v17382_v63 }
 0x3c6   :  { %11410 = vmatmul.mubr.msk.f32.gmra.mxu0 %vm2698_vm13, %v15083_v31  ;;  %11455 = vmatmul.mubr.msk.f32.gmra.mxu1 %vm2698_vm13, %v15089_v9 }
 0x3c7   :  { %11481 = vmatpush3.msra.mxu0 %v3002_v27  ;;  %11412 = vmatprep.mubr.msk.f32.mxu0 %vm17453_vm5, %v17382_v63  ;;  %v3242_v27 = vld [vmem:[#allocation2 + $0x2f0] sm:$0xff] }
 0x3c8   :  { %11482 = vmatprep.subr.mxu0 %v17382_v63  ;;  %11457 = vmatprep.mubr.msk.f32.mxu1 %vm17453_vm5, %v17382_v63 }
 0x3c9   :  { %11483 = vmatpush3.msra.mxu0 %v3001_v36  ;;  %11534 = vmatpush3.msra.mxu1 %v2988_v48  ;;  %v2986_v36 = vld [vmem:[#allocation2 + $0x1e0] sm:$0xff]  ;;  %v3241_v48 = vld [vmem:[#allocation2 + $0x2e8] sm:$0xff] }
 0x3ca   :  { %11413 = vmatmul.mubr.msk.f32.gmra.mxu0 %vm2698_vm13, %v15105_v51  ;;  %11484 = vmatprep.subr.mxu0 %v17382_v63 }
 0x3cb   :  { %11485 = vmatpush3.msra.mxu0 %v3000_v50  ;;  %11458 = vmatmul.mubr.msk.f32.gmra.mxu1 %vm2698_vm13, %v15111_v38  ;;  %v2983_v50 = vld [vmem:[#allocation2 + $0x1c8] sm:$0xff] }
 0x3cc   :  { %11486 = vmatprep.subr.mxu0 %v17382_v63  ;;  %11415 = vmatprep.mubr.msk.f32.mxu0 %vm17453_vm5, %v17382_v63 }
 0x3cd   :  { %11487 = vmatpush3.msra.mxu0 %v2999_v28  ;;  %11460 = vmatprep.mubr.msk.f32.mxu1 %vm17453_vm5, %v17382_v63  ;;  %v3238_v28 = vld [vmem:[#allocation2 + $0x2d0] sm:$0xff] }
 0x3ce   :  { %11416 = vmatmul.mubr.msk.f32.gmra.mxu0 %vm2698_vm13, %v466_v13  ;;  %11488 = vmatprep.subr.mxu0 %v17382_v63  ;;  %v2981_v13 = vld [vmem:[#allocation2 + $0x1b8] sm:$0xff] }
 0x3cf   :  { %11489 = vmatpush3.msra.mxu0 %v2998_v40  ;;  %11461 = vmatmul.mubr.msk.f32.gmra.mxu1 %vm2698_vm13, %v551_v54  ;;  %v3235_v54 = vld [vmem:[#allocation2 + $0x2b8] sm:$0xff]  ;;  %v3234_v40 = vld [vmem:[#allocation2 + $0x2b0] sm:$0xff] }
 0x3d0   :  { %11490 = vmatprep.subr.mxu0 %v17382_v63  ;;  %11418 = vmatprep.mubr.msk.f32.mxu0 %vm17453_vm5, %v17382_v63 }
 0x3d1   :  { %11491 = vmatpush3.msra.mxu0 %v2997_v60  ;;  %11463 = vmatprep.mubr.msk.f32.mxu1 %vm17453_vm5, %v17382_v63  ;;  %v2978_v60 = vld [vmem:[#allocation2 + $0x1a0] sm:$0xff] }
 0x3d2   :  { %11419 = vmatmul.mubr.msk.f32.gmra.mxu0 %vm2698_vm13, %v468_v58  ;;  %11492 = vmatprep.subr.mxu0 %v17382_v63  ;;  %v3232_v58 = vld [vmem:[#allocation2 + $0x2a0] sm:$0xff] }
 0x3d3   :  { %11493 = vmatpush3.msra.mxu0 %v2996_v44  ;;  %11464 = vmatmul.mubr.msk.f32.gmra.mxu1 %vm2698_vm13, %v553_v30  ;;  %v2975_v30 = vld [vmem:[#allocation2 + $0x188] sm:$0xff]  ;;  %v2974_v44 = vld [vmem:[#allocation2 + $0x180] sm:$0xff] }
 0x3d4   :  { %11494 = vmatprep.subr.mxu0 %v17382_v63  ;;  %11421 = vmatprep.mubr.msk.f32.mxu0 %vm17453_vm5, %v17382_v63 }
 0x3d5   :  { %11495 = vmatpush3.msra.mxu0 %v2995_v16  ;;  %11466 = vmatprep.mubr.msk.f32.mxu1 %vm17453_vm5, %v17382_v63  ;;  %v3229_v16 = vld [vmem:[#allocation2 + $0x288] sm:$0xff] }
 0x3d6   :  { %11422 = vmatmul.mubr.msk.f32.gmra.mxu0 %vm2698_vm13, %v470_v42  ;;  %11496 = vmatprep.subr.mxu0 %v17382_v63 }
 0x3d7   :  { %11497 = vmatpush3.msra.mxu0 %v2994_v8  ;;  %11467 = vmatmul.mubr.msk.f32.gmra.mxu1 %vm2698_vm13, %v555_v21 }
 0x3d8   :  { %11498 = vmatprep.subr.mxu0 %v17382_v63  ;;  %11424 = vmatprep.mubr.msk.f32.mxu0 %vm17453_vm5, %v17382_v63 }
 0x3d9   :  { %11499 = vmatpush3.msra.mxu0 %v2993_v47  ;;  %11469 = vmatprep.mubr.msk.f32.mxu1 %vm17453_vm5, %v17382_v63 }
 0x3da   :  { %11425 = vmatmul.mubr.msk.f32.gmra.mxu0 %vm2698_vm13, %v472_v0  ;;  %11500 = vmatprep.subr.mxu0 %v17382_v63 }
 0x3db   :  { %11501 = vmatpush3.msra.mxu0 %v2992_v25  ;;  %11470 = vmatmul.mubr.msk.f32.gmra.mxu1 %vm2698_vm13, %v557_v49 }
 0x3dc   :  { %11502 = vmatprep.subr.mxu0 %v17382_v63  ;;  %11504 = vmatprep.mubr.msk.f32.mxu0 %vm17453_vm5, %v17382_v63 }
 0x3dd   :  { %11503 = vmatpush3.msra.mxu0 %v2991_v26  ;;  %11535 = vmatprep.subr.mxu1 %v17382_v63 }
 0x3de   :  { %11505 = vmatmul.mubr.f32.vlgmr.msra.gmra.mxu0 %v15020_v12  ;;  %11590 = vmatprep.subr.mxu0 %v17382_v63  ;;  %v2985_v12 = vld [vmem:[#allocation2 + $0x1d8] sm:$0xff] }
 0x3df   :  { %11507 = vmatprep.mubr.msk.f32.mxu0 %vm17453_vm5, %v17382_v63  ;;  %11591 = vmatpush3.msra.mxu0 %v3243_v23 }
 0x3e0   :  { %11592 = vmatprep.subr.mxu0 %v17382_v63  ;;  %11536 = vmatpush3.msra.mxu1 %v2987_v32 }
 0x3e1   :  { %11593 = vmatpush3.msra.mxu0 %v3242_v27  ;;  %11537 = vmatprep.subr.mxu1 %v17382_v63 }
 0x3e2   :  { %11508 = vmatmul.mubr.f32.gmra.mxu0 %v15001_v59  ;;  %11594 = vmatprep.subr.mxu0 %v17382_v63  ;;  %v3239_v59 = vld [vmem:[#allocation2 + $0x2d8] sm:$0xff] }
 0x3e3   :  { %11510 = vmatprep.mubr.msk.f32.mxu0 %vm17453_vm5, %v17382_v63  ;;  %11538 = vmatpush3.msra.mxu1 %v2986_v36 }
 0x3e4   :  { %11595 = vmatpush3.msra.mxu0 %v3241_v48  ;;  %11539 = vmatprep.subr.mxu1 %v17382_v63 }
 0x3e5   :  { %11596 = vmatprep.subr.mxu0 %v17382_v63  ;;  %11540 = vmatpush3.msra.mxu1 %v2985_v12 }
 0x3e6   :  { %11511 = vmatmul.mubr.f32.gmra.mxu0 %v14994_v22  ;;  %11541 = vmatprep.subr.mxu1 %v17382_v63  ;;  %v2982_v22 = vld [vmem:[#allocation2 + $0x1c0] sm:$0xff] }
 0x3e7   :  { %11513 = vmatprep.mubr.msk.f32.mxu0 %vm17453_vm5, %v17382_v63  ;;  %11597 = vmatpush3.msra.mxu0 %v3240_v3 }
 0x3e8   :  { %11598 = vmatprep.subr.mxu0 %v17382_v63  ;;  %11542 = vmatpush3.msra.mxu1 %v2984_v55 }
 0x3e9   :  { %11599 = vmatpush3.msra.mxu0 %v3239_v59  ;;  %11543 = vmatprep.subr.mxu1 %v17382_v63 }
 0x3ea   :  { %11514 = vmatmul.mubr.f32.gmra.mxu0 %v14988_v4  ;;  %11600 = vmatprep.subr.mxu0 %v17382_v63  ;;  %v3236_v4 = vld [vmem:[#allocation2 + $0x2c0] sm:$0xff] }
 0x3eb   :  { %11516 = vmatprep.mubr.msk.f32.mxu0 %vm17453_vm5, %v17382_v63  ;;  %11544 = vmatpush3.msra.mxu1 %v2983_v50 }
 0x3ec   :  { %11601 = vmatpush3.msra.mxu0 %v3238_v28  ;;  %11545 = vmatprep.subr.mxu1 %v17382_v63 }
 0x3ed   :  { %11602 = vmatprep.subr.mxu0 %v17382_v63  ;;  %11546 = vmatpush3.msra.mxu1 %v2982_v22 }
 0x3ee   :  { %11517 = vmatmul.mubr.f32.gmra.mxu0 %v14982_v41  ;;  %11547 = vmatprep.subr.mxu1 %v17382_v63  ;;  %v2979_v41 = vld [vmem:[#allocation2 + $0x1a8] sm:$0xff] }
 0x3ef   :  { %11519 = vmatprep.mubr.msk.f32.mxu0 %vm17453_vm5, %v17382_v63  ;;  %11603 = vmatpush3.msra.mxu0 %v3237_v14 }
 0x3f0   :  { %11604 = vmatprep.subr.mxu0 %v17382_v63  ;;  %11548 = vmatpush3.msra.mxu1 %v2981_v13 }
 0x3f1   :  { %11605 = vmatpush3.msra.mxu0 %v3236_v4  ;;  %11549 = vmatprep.subr.mxu1 %v17382_v63 }
 0x3f2   :  { %11520 = vmatmul.mubr.f32.gmra.mxu0 %v14976_v43  ;;  %11606 = vmatprep.subr.mxu0 %v17382_v63  ;;  %v3233_v43 = vld [vmem:[#allocation2 + $0x2a8] sm:$0xff] }
 0x3f3   :  { %11522 = vmatprep.mubr.msk.f32.mxu0 %vm17453_vm5, %v17382_v63  ;;  %11550 = vmatpush3.msra.mxu1 %v2980_v57 }
 0x3f4   :  { %11607 = vmatpush3.msra.mxu0 %v3235_v54  ;;  %11551 = vmatprep.subr.mxu1 %v17382_v63 }
 0x3f5   :  { %11608 = vmatprep.subr.mxu0 %v17382_v63  ;;  %11552 = vmatpush3.msra.mxu1 %v2979_v41 }
 0x3f6   :  { %11523 = vmatmul.mubr.f32.gmra.mxu0 %v14970_v10  ;;  %11553 = vmatprep.subr.mxu1 %v17382_v63  ;;  %v2976_v10 = vld [vmem:[#allocation2 + $0x190] sm:$0xff] }
 0x3f7   :  { %11525 = vmatprep.mubr.msk.f32.mxu0 %vm17453_vm5, %v17382_v63  ;;  %11609 = vmatpush3.msra.mxu0 %v3234_v40 }
 0x3f8   :  { %11610 = vmatprep.subr.mxu0 %v17382_v63  ;;  %11554 = vmatpush3.msra.mxu1 %v2978_v60 }
 0x3f9   :  { %11611 = vmatpush3.msra.mxu0 %v3233_v43  ;;  %11555 = vmatprep.subr.mxu1 %v17382_v63 }
 0x3fa   :  { %11526 = vmatmul.mubr.f32.gmra.mxu0 %v14964_v35  ;;  %11612 = vmatprep.subr.mxu0 %v17382_v63  ;;  %v3230_v35 = vld [vmem:[#allocation2 + $0x290] sm:$0xff] }
 0x3fb   :  { %11528 = vmatprep.mubr.msk.f32.mxu0 %vm17453_vm5, %v17382_v63  ;;  %11556 = vmatpush3.msra.mxu1 %v2977_v29 }
 0x3fc   :  { %11613 = vmatpush3.msra.mxu0 %v3232_v58  ;;  %11557 = vmatprep.subr.mxu1 %v17382_v63 }
 0x3fd   :  { %11614 = vmatprep.subr.mxu0 %v17382_v63  ;;  %11558 = vmatpush3.msra.mxu1 %v2976_v10 }
 0x3fe   :  { %11529 = vmatmul.mubr.f32.gmra.mxu0 %v14962_v52  ;;  %11559 = vmatprep.subr.mxu1 %v17382_v63 }
 0x3ff   :  { %11615 = vmatpush3.msra.mxu0 %v3231_v61  ;;  %11560 = vmatpush3.msra.mxu1 %v2975_v30 }
 0x400   :  { %11616 = vmatprep.subr.mxu0 %v17382_v63  ;;  %11561 = vmatprep.subr.mxu1 %v17382_v63 }
 0x401   :  { %11617 = vmatpush3.msra.mxu0 %v3230_v35  ;;  %11562 = vmatpush3.msra.mxu1 %v2974_v44 }
 0x402   :  { %11618 = vmatprep.subr.mxu0 %v17382_v63  ;;  %11563 = vmatprep.mubr.msk.f32.mxu1 %vm17453_vm5, %v17382_v63 }
 0x403   :  { %11619 = vmatpush3.msra.mxu0 %v3229_v16  ;;  %11622 = vmatprep.mubr.msk.f32.mxu0 %vm17453_vm5, %v17382_v63 }
 0x404   :  { %11620 = vmatprep.subr.mxu0 %v17382_v63  ;;  %11649 = vmatprep.subr.mxu1 %v17382_v63 }
 0x405   :  { %11621 = vmatpush3.msra.mxu0 %v3228_v1 }
 0x406   :  { %11715 = vmatprep.subr.mxu0 %v17382_v63 }
 0x47a   :  { %v2792_v52 = vpop.f32.mrf.mxu0  ;;  %v2929_v42 = vpop.f32.mrf.mxu1 }
 0x47b   :  { %11564 = vmatmul.mubr.f32.vlgmr.msra.gmra.mxu1 %v2792_v52  ;;  %11623 = vmatmul.mubr.f32.vlgmr.msra.gmra.mxu0 %v2929_v42 }
 0x47c   :  { %v11402_v56 = vpop.f32.mrf.mxu0  ;;  %v11447_v21 = vpop.f32.mrf.mxu1  ;;  %11566 = vmatprep.mubr.msk.f32.mxu1 %vm17453_vm5, %v17382_v63  ;;  %11625 = vmatprep.mubr.msk.f32.mxu0 %vm17453_vm5, %v17382_v63 }
 0x47e   :  { %v2797_v8 = vpop.f32.mrf.mxu0  ;;  %v2934_v47 = vpop.f32.mrf.mxu1 }
 0x47f   :  { %11567 = vmatmul.mubr.f32.gmra.mxu1 %v2797_v8  ;;  %11626 = vmatmul.mubr.f32.gmra.mxu0 %v2934_v47 }
 0x480   :  { %v11405_v6 = vpop.f32.mrf.mxu0  ;;  %v11450_v0 = vpop.f32.mrf.mxu1  ;;  %11569 = vmatprep.mubr.msk.f32.mxu1 %vm17453_vm5, %v17382_v63  ;;  %11628 = vmatprep.mubr.msk.f32.mxu0 %vm17453_vm5, %v17382_v63 }
 0x482   :  { %v2802_v19 = vpop.f32.mrf.mxu0  ;;  %v2939_v49 = vpop.f32.mrf.mxu1 }
 0x483   :  { %11570 = vmatmul.mubr.f32.gmra.mxu1 %v2802_v19  ;;  %11629 = vmatmul.mubr.f32.gmra.mxu0 %v2939_v49 }
 0x484   :  { %v11408_v25 = vpop.f32.mrf.mxu0  ;;  %v11453_v26 = vpop.f32.mrf.mxu1  ;;  %11572 = vmatprep.mubr.msk.f32.mxu1 %vm17453_vm5, %v17382_v63  ;;  %11631 = vmatprep.mubr.msk.f32.mxu0 %vm17453_vm5, %v17382_v63 }
 0x486   :  { %v2807_v23 = vpop.f32.mrf.mxu0  ;;  %v2944_v32 = vpop.f32.mrf.mxu1 }
 0x487   :  { %11573 = vmatmul.mubr.f32.gmra.mxu1 %v2807_v23  ;;  %11632 = vmatmul.mubr.f32.gmra.mxu0 %v2944_v32 }
 0x488   :  { %v11411_v27 = vpop.f32.mrf.mxu0  ;;  %v11456_v36 = vpop.f32.mrf.mxu1  ;;  %11575 = vmatprep.mubr.msk.f32.mxu1 %vm17453_vm5, %v17382_v63  ;;  %11634 = vmatprep.mubr.msk.f32.mxu0 %vm17453_vm5, %v17382_v63 }
 0x48a   :  { %v2812_v48 = vpop.f32.mrf.mxu0 }
 0x48b   :  { %11576 = vmatmul.mubr.f32.gmra.mxu1 %v2812_v48  ;;  %v2949_v12 = vpop.f32.mrf.mxu1 }
 0x48c   :  { %v11414_v3 = vpop.f32.mrf.mxu0  ;;  %11635 = vmatmul.mubr.f32.gmra.mxu0 %v2949_v12  ;;  %11578 = vmatprep.mubr.msk.f32.mxu1 %vm17453_vm5, %v17382_v63 }
 0x48d   :  { %v11459_v55 = vpop.f32.mrf.mxu1  ;;  %11637 = vmatprep.mubr.msk.f32.mxu0 %vm17453_vm5, %v17382_v63 }
 0x48e   :  { %v2817_v59 = vpop.f32.mrf.mxu0 }
 0x48f   :  { %11579 = vmatmul.mubr.f32.gmra.mxu1 %v2817_v59  ;;  %v2954_v50 = vpop.f32.mrf.mxu1 }
 0x490   :  { %v11417_v28 = vpop.f32.mrf.mxu0  ;;  %11638 = vmatmul.mubr.f32.gmra.mxu0 %v2954_v50  ;;  %11581 = vmatprep.mubr.msk.f32.mxu1 %vm17453_vm5, %v17382_v63 }
 0x491   :  { %v11462_v22 = vpop.f32.mrf.mxu1  ;;  %11640 = vmatprep.mubr.msk.f32.mxu0 %vm17453_vm5, %v17382_v63 }
 0x492   :  { %v2822_v14 = vpop.f32.mrf.mxu0 }
 0x493   :  { %11582 = vmatmul.mubr.f32.gmra.mxu1 %v2822_v14  ;;  %v2959_v13 = vpop.f32.mrf.mxu1 }
 0x494   :  { %v11420_v4 = vpop.f32.mrf.mxu0  ;;  %11641 = vmatmul.mubr.f32.gmra.mxu0 %v2959_v13  ;;  %11584 = vmatprep.mubr.msk.f32.mxu1 %vm17453_vm5, %v17382_v63 }
 0x495   :  { %v11465_v57 = vpop.f32.mrf.mxu1  ;;  %11643 = vmatprep.mubr.msk.f32.mxu0 %vm17453_vm5, %v17382_v63 }
 0x496   :  { %v2827_v54 = vpop.f32.mrf.mxu0 }
 0x497   :  { %11585 = vmatmul.mubr.f32.gmra.mxu1 %v2827_v54  ;;  %v2964_v41 = vpop.f32.mrf.mxu1 }
 0x498   :  { %v11423_v40 = vpop.f32.mrf.mxu0  ;;  %11644 = vmatmul.mubr.f32.gmra.mxu0 %v2964_v41  ;;  %11587 = vmatprep.mubr.msk.f32.mxu1 %vm17453_vm5, %v17382_v63 }
 0x499   :  { %v11468_v60 = vpop.f32.mrf.mxu1  ;;  %11646 = vmatprep.mubr.msk.f32.mxu0 %vm17453_vm5, %v17382_v63 }
 0x49a   :  { %v2832_v43 = vpop.f32.mrf.mxu0  ;;  %v15295_v60 = vsel %vm2610_vm8, 1.0, %v17382_v63 }
 0x49b   :  { %11588 = vmatmul.mubr.f32.gmra.mxu1 %v2832_v43  ;;  %v2969_v29 = vpop.f32.mrf.mxu1 }
 0x49c   :  { %v11426_v58 = vpop.f32.mrf.mxu0  ;;  %11647 = vmatmul.mubr.f32.gmra.mxu0 %v2969_v29  ;;  %11667 = vmatprep.mubr.msk.f32.mxu1 %vm17453_vm5, %v17382_v63 }
 0x49d   :  { %v11471_v10 = vpop.f32.mrf.mxu1  ;;  %11725 = vmatprep.mubr.msk.f32.mxu0 %vm17453_vm5, %v17382_v63 }
 0x49e   :  { %v3073_v61 = vpop.f32.mrf.mxu0 }
 0x4a0   :  { %v11506_v30 = vpop.f32.mrf.mxu0 }
 0x4a2   :  { %v3078_v35 = vpop.f32.mrf.mxu0 }
 0x4a4   :  { %v11509_v44 = vpop.f32.mrf.mxu0 }
 0x4a6   :  { %v3083_v16 = vpop.f32.mrf.mxu0 }
 0x4a8   :  { %v11512_v1 = vpop.f32.mrf.mxu0 }
 0x4aa   :  { %v3088_v52 = vpop.f32.mrf.mxu0 }
 0x4ac   :  { %v11515_v42 = vpop.f32.mrf.mxu0 }
 0x4ae   :  { %v3093_v56 = vpop.f32.mrf.mxu0 }
 0x4b0   :  { %v11518_v21 = vpop.f32.mrf.mxu0 }
 0x4b2   :  { %v3098_v8 = vpop.f32.mrf.mxu0 }
 0x4b4   :  { %v11521_v47 = vpop.f32.mrf.mxu0 }
 0x4b6   :  { %v3103_v6 = vpop.f32.mrf.mxu0 }
 0x4b8   :  { %v11524_v0 = vpop.f32.mrf.mxu0 }
 0x4b9   :  { %v15302_v0 = vsel %vm2648_vm7, 1.0, %v17382_v63 }
 0x4ba   :  { %v15285_v19 = vpop.f32.mrf.mxu0 }
 0x4bc   :  { %v11527_v49 = vpop.f32.mrf.mxu0 }
 0x4be   :  { %v15287_v25 = vpop.f32.mrf.mxu0 }
 0x4c0   :  { %v11530_v26 = vpop.f32.mrf.mxu0 }
 0x4c1   :  { %v17484_v26 = vld [vmem:[#allocation21_spill] sm:$0xff] }
 0x4c2   :  { %vm2632_vm11 = vcmp.le.s32.totalorder %v17484_v26, 52  ;;  %vm2659_vm1 = vcmp.ge.s32.totalorder %v17484_v26, 55 }
 0x4c3   :  { %vm2686_vm9 = vmor %vm2632_vm11, %vm2659_vm1 }
 0x53b   :  { %v3183_v23 = vpop.f32.mrf.mxu1  ;;  %v3310_v32 = vpop.f32.mrf.mxu0 }
 0x53c   :  { %v3184_v28 = vadd.f32 %v3183_v23, %v3073_v61 }
 0x53d   :  { %v11565_v27 = vpop.f32.mrf.mxu1  ;;  %v11624_v36 = vpop.f32.mrf.mxu0 }
 0x53e   :  { %v3354_v41 = vadd.f32 %v3310_v32, %v3184_v28  ;;  %v15308_v28 = vsel %vm2686_vm9, 1.0, %v17382_v63 }
 0x53f   :  { %v3188_v48 = vpop.f32.mrf.mxu1  ;;  %v3315_v12 = vpop.f32.mrf.mxu0 }
 0x540   :  { %v3189_v4 = vadd.f32 %v3188_v48, %v3078_v35  ;;  %v3363_v61 = vmul.f32 %v3354_v41, %v14226_v7 }
 0x541   :  { %v11568_v3 = vpop.f32.mrf.mxu1  ;;  %v11627_v55 = vpop.f32.mrf.mxu0 }
 0x542   :  { %v3355_v58 = vadd.f32 %v3315_v12, %v3189_v4 }
 0x543   :  { %v3193_v59 = vpop.f32.mrf.mxu1  ;;  %v3320_v50 = vpop.f32.mrf.mxu0 }
 0x544   :  { %v3194_v22 = vadd.f32 %v3193_v59, %v3083_v16  ;;  %v3372_v42 = vadd.f32 %v3363_v61, %v3355_v58 }
 0x545   :  { %v11571_v14 = vpop.f32.mrf.mxu1  ;;  %v11630_v13 = vpop.f32.mrf.mxu0 }
 0x546   :  { %v3356_v40 = vadd.f32 %v3320_v50, %v3194_v22 }
 0x547   :  { %v3198_v57 = vpop.f32.mrf.mxu1  ;;  %v3325_v54 = vpop.f32.mrf.mxu0 }
 0x548   :  { %v3365_v30 = vmul.f32 %v3356_v40, %v15295_v60  ;;  %v3199_v35 = vadd.f32 %v3198_v57, %v3088_v52 }
 0x549   :  { %v11574_v43 = vpop.f32.mrf.mxu1  ;;  %v11633_v29 = vpop.f32.mrf.mxu0 }
 0x54a   :  { %v3357_v23 = vadd.f32 %v3325_v54, %v3199_v35  ;;  %v3373_v32 = vadd.f32 %v3372_v42, %v3365_v30 }
 0x54b   :  { %v3203_v10 = vpop.f32.mrf.mxu1 }
 0x54c   :  { %v3204_v44 = vadd.f32 %v3203_v10, %v3093_v56  ;;  %v3330_v16 = vpop.f32.mrf.mxu0  ;;  %v3374_v3 = vadd.f32 %v3373_v32, %v3357_v23 }
 0x54d   :  { %v11577_v1 = vpop.f32.mrf.mxu1 }
 0x54e   :  { %v3358_v21 = vadd.f32 %v3330_v16, %v3204_v44  ;;  %v11636_v47 = vpop.f32.mrf.mxu0  ;;  %v2697_v1 = vsel %vm2670_vm10, 1.0, %v17382_v63 }
 0x54f   :  { %v3208_v49 = vpop.f32.mrf.mxu1 }
 0x550   :  { %v3335_v27 = vpop.f32.mrf.mxu0  ;;  %v3367_v52 = vmul.f32 %v3358_v21, %v15302_v0  ;;  %v3209_v56 = vadd.f32 %v3208_v49, %v3098_v8 }
 0x551   :  { %v11580_v36 = vpop.f32.mrf.mxu1 }
 0x552   :  { %v11639_v48 = vpop.f32.mrf.mxu0  ;;  %v3359_v22 = vadd.f32 %v3335_v27, %v3209_v56  ;;  %v3375_v14 = vadd.f32 %v3374_v3, %v3367_v52 }
 0x553   :  { %v3213_v12 = vpop.f32.mrf.mxu1 }
 0x554   :  { %v3214_v55 = vadd.f32 %v3213_v12, %v3103_v6  ;;  %v3340_v59 = vpop.f32.mrf.mxu0  ;;  %v3376_v43 = vadd.f32 %v3375_v14, %v3359_v22 }
 0x555   :  { %v11583_v50 = vpop.f32.mrf.mxu1 }
 0x556   :  { %v3360_v13 = vadd.f32 %v3340_v59, %v3214_v55  ;;  %v11642_v4 = vpop.f32.mrf.mxu0 }
 0x557   :  { %v3218_v57 = vpop.f32.mrf.mxu1 }
 0x558   :  { %v3369_v54 = vmul.f32 %v3360_v13, %v15308_v28  ;;  %v3219_v41 = vadd.f32 %v3218_v57, %v15285_v19  ;;  %v3345_v8 = vpop.f32.mrf.mxu0 }
 0x559   :  { %v11586_v40 = vpop.f32.mrf.mxu1 }
 0x55a   :  { %v11645_v29 = vpop.f32.mrf.mxu0  ;;  %v3361_v10 = vadd.f32 %v3345_v8, %v3219_v41  ;;  %v3377_v35 = vadd.f32 %v3376_v43, %v3369_v54 }
 0x55b   :  { %v3223_v6 = vpop.f32.mrf.mxu1 }
 0x55c   :  { %v3224_v44 = vadd.f32 %v3223_v6, %v15287_v25  ;;  %v3350_v16 = vpop.f32.mrf.mxu0  ;;  %v3378_v49 = vadd.f32 %v3377_v35, %v3361_v10 }
 0x55d   :  { %v11589_v42 = vpop.f32.mrf.mxu1 }
 0x55e   :  { %v3362_v21 = vadd.f32 %v3350_v16, %v3224_v44  ;;  %v11648_v47 = vpop.f32.mrf.mxu0 }
 0x560   :  { %v3371_v26 = vmul.f32 %v3362_v21, %v2697_v1 }
 0x562   :  { %v3379_v19 = vadd.f32 %v3378_v49, %v3371_v26 }
 0x564   :  { %v3380_v32 = vrot.slane %v3379_v19, 4 }
 0x566   :  { %v3381_v27 = vadd.f32 %v3380_v32, %v3379_v19 }
 0x568   :  { %v3382_v36 = vrot.slane %v3381_v27, 2 }
 0x56a   :  { %v3383_v56 = vadd.f32 %v3382_v36, %v3381_v27 }
 0x56c   :  { %v3384_v48 = vrot.slane %v3383_v56, 1 }
 0x56e   :  { %v3385_v53 = vadd.f32 %v3384_v48, %v3383_v56 }
 0x570   :  { %v3386_v12 = vmul.f32 0.015625, %v3385_v53 }
 0x572   :  { %v15315_v3 = vsub.f32 %v3363_v61, %v3386_v12  ;;  %v15317_v55 = vsub.f32 %v3355_v58, %v3386_v12  ;;  %v3389_v25 = vsub.f32 %v3365_v30, %v3386_v12  ;;  %v3391_v59 = vsub.f32 %v3367_v52, %v3386_v12 }
 0x573   :  { %v3390_v13 = vsub.f32 %v3357_v23, %v3386_v12  ;;  %v3393_v41 = vsub.f32 %v3369_v54, %v3386_v12  ;;  %v3392_v43 = vsub.f32 %v3359_v22, %v3386_v12  ;;  %v3395_v30 = vsub.f32 %v3371_v26, %v3386_v12 }
 0x574   :  { %v3396_v50 = vmul.f32 %v15315_v3, %v14226_v7  ;;  %v3398_v14 = vmul.f32 %v3389_v25, %v15295_v60  ;;  %v3406_v57 = vmul.f32 %v15317_v55, %v15317_v55  ;;  %v3400_v8 = vmul.f32 %v3391_v59, %v15302_v0 }
 0x575   :  { %v3408_v58 = vmul.f32 %v3390_v13, %v3390_v13  ;;  %v3402_v52 = vmul.f32 %v3393_v41, %v15308_v28  ;;  %v3394_v44 = vsub.f32 %v3361_v10, %v3386_v12  ;;  %v3410_v16 = vmul.f32 %v3392_v43, %v3392_v43 }
 0x576   :  { %v3405_v4 = vmul.f32 %v3396_v50, %v3396_v50  ;;  %v3407_v40 = vmul.f32 %v3398_v14, %v3398_v14  ;;  %v3409_v6 = vmul.f32 %v3400_v8, %v3400_v8  ;;  %v3404_v42 = vmul.f32 %v3395_v30, %v2697_v1 }
 0x577   :  { %v3411_v21 = vmul.f32 %v3402_v52, %v3402_v52  ;;  %v3412_v49 = vmul.f32 %v3394_v44, %v3394_v44 }
 0x578   :  { %v3414_v61 = vadd.f32 %v3406_v57, %v3405_v4  ;;  %v3413_v19 = vmul.f32 %v3404_v42, %v3404_v42  ;;  %v17485_v57 = vld [vmem:[#allocation16_spill] sm:$0xff] }
 0x579   :  { %v15327_v8 = vadd.s32 4294967286, %v17485_v57  ;;  %vm3459_vm14 = vcmp.le.s32.totalorder %v17485_v57, 8 }
 0x57a   :  { %v3415_v29 = vadd.f32 %v3414_v61, %v3407_v40 }
 0x57b   :  { %vm3485_vm2 = vcmp.ge.s32.totalorder %v15327_v8, 1 }
 0x57c   :  { %v3416_v35 = vadd.f32 %v3415_v29, %v3408_v58 }
 0x57e   :  { %v3417_v23 = vadd.f32 %v3416_v35, %v3409_v6  ;;  %v3500_v6 = vmul.u32 2, %v15327_v8  ;;  %v15335_v35 = vadd.s32 4294967286, %v13747_v24 }
 0x580   :  { %v3418_v47 = vadd.f32 %v3417_v23, %v3410_v16  ;;  %v15342_v16 = vadd.s32 4294967276, %v13747_v24  ;;  %v15351_v23 = vadd.s32 4294967278, %v13719_v18  ;;  %v3501_v42 = vmul.u32 2, %v15335_v35 }
 0x581   :  { %vm3491_vm4 = vcmp.le.s32.totalorder %v15335_v35, 8 }
 0x582   :  { %v3419_v54 = vadd.f32 %v3418_v47, %v3411_v21  ;;  %vm17365_vm11 = vcmp.ge.s32.totalorder %v15342_v16, 1 }
 0x584   :  { %v3420_v32 = vadd.f32 %v3419_v54, %v3412_v49  ;;  %v17486_v49 = vld [vmem:[#allocation17_spill] sm:$0xff] }
 0x585   :  { %v15367_v54 = vadd.s32 4294967266, %v17486_v49 }
 0x586   :  { %v3421_v27 = vadd.f32 %v3420_v32, %v3413_v19 }
 0x588   :  { %v3422_v36 = vrot.slane %v3421_v27, 4 }
 0x58a   :  { %v3423_v22 = vadd.f32 %v3422_v36, %v3421_v27  ;;  %v9970_v27 = vadd.s32 4294967295, %v3501_v42  ;;  %v15382_v36 = vadd.s32 4294967260, %v13719_v18 }
 0x58c   :  { %v3424_v56 = vrot.slane %v3423_v22, 2  ;;  %vm3511_vm7 = vcmp.eq.s32.totalorder %v15351_v23, %v9970_v27  ;;  %v4179_v27 = vld [vmem:[#allocation2 + $0x3c8] sm:$0xff] }
 0x58d   :  { %vm15439_vm10 = vmand %vm3491_vm4, %vm3511_vm7  ;;  %vm3609_vm7 = vcmp.ge.s32.totalorder %v15367_v54, 1 }
 0x58e   :  { %v3425_v48 = vadd.f32 %v3424_v56, %v3423_v22 }
 0x590   :  { %v3426_v26 = vrot.slane %v3425_v48, 1 }
 0x592   :  { %v3427_v53 = vadd.f32 %v3426_v26, %v3425_v48  ;;  %v17487_v48 = vld [vmem:[#allocation32_spill] sm:$0xff] }
 0x593   :  { %vm17488_vm3 = vcmp.eq.s32.totalorder %v13719_v18, %v17487_v48 }
 0x594   :  { %v3428_v50 = vmul.f32 0.015625, %v3427_v53  ;;  %vm15397_vm8 = vmand %vm3459_vm14, %vm17488_vm3  ;;  %v3624_v53 = vmul.u32 2, %v15367_v54 }
 0x596   :  { %v3429_v14 = vadd.f32 0.0001, %v3428_v50 }
 0x598   :  { %13359 = vrsqrt.f32 %v3429_v14 }
 0x5a5   :  { %v13360_v10 = vpop.eup %13359 }
 0x5a6   :  { %v3439_v12 = vmul.f32 %v13360_v10, %v3395_v30  ;;  %v3437_v4 = vmul.f32 %v13360_v10, %v3393_v41  ;;  %v15329_v61 = vmul.f32 %v13360_v10, %v3394_v44  ;;  %v3435_v52 = vmul.f32 %v13360_v10, %v3391_v59 }
 0x5a7   :  { %v15339_v41 = vmul.f32 %v13360_v10, %v3392_v43  ;;  %v3433_v44 = vmul.f32 %v13360_v10, %v3389_v25  ;;  %v9969_v43 = vadd.s32 4294967295, %v3500_v6  ;;  %v15359_v47 = vmul.f32 %v13360_v10, %v3390_v13 }
 0x5a8   :  { %v3448_v40 = vmax.f32 %v3439_v12, 0.0  ;;  %v3446_v29 = vmax.f32 %v3437_v4, 0.0  ;;  %v3447_v30 = vmax.f32 %v15329_v61, 0.0  ;;  %v3444_v59 = vmax.f32 %v3435_v52, 0.0 }
 0x5a9   :  { %v3445_v21 = vmax.f32 %v15339_v41, 0.0  ;;  %v15363_v25 = vadd.s32 4294967276, %v17486_v49  ;;  %v3442_v13 = vmax.f32 %v3433_v44, 0.0  ;;  %v3431_v32 = vmul.f32 %v13360_v10, %v15315_v3  ;;  %v4184_v44 = vld [vmem:[#allocation2 + $0x3f0] sm:$0xff] }
 0x5aa   :  { %v15331_v58 = vmul.f32 %v3448_v40, %v2697_v1  ;;  %v15348_v1 = vmul.f32 %v3446_v29, %v15308_v28  ;;  %v3562_v28 = vmul.u32 2, %v15342_v16  ;;  %v15373_v19 = vmul.f32 %v3444_v59, %v15302_v0  ;;  %v4167_v41 = vld [vmem:[#allocation2 + $0x370] sm:$0xff] }
 0x5ab   :  { %vm3510_vm6 = vcmp.eq.s32.totalorder %v15351_v23, %v9969_v43  ;;  %v3443_v0 = vmax.f32 %v15359_v47, 0.0  ;;  %v15387_v22 = vmul.f32 %v13360_v10, %v15317_v55  ;;  %v3563_v56 = vmul.u32 2, %v15363_v25  ;;  %v4183_v43 = vld [vmem:[#allocation2 + $0x3e8] sm:$0xff] }
 0x5ac   :  { %11650 = vmatpush3.msra.mxu1 %v15331_v58  ;;  %v9981_v3 = vadd.s32 4294967295, %v3562_v28  ;;  %vm15405_vm0 = vmand %vm3485_vm2, %vm3510_vm6  ;;  %v3451_v50 = vmul.f32 %v3442_v13, %v15295_v60  ;;  %v3440_v14 = vmax.f32 %v3431_v32, 0.0  ;;  %v15421_v4 = vadd.s32 4294967266, %v13799_v33 }
 0x5ad   :  { %11651 = vmatprep.subr.mxu1 %v17382_v63  ;;  %v3441_v10 = vmax.f32 %v15387_v22, 0.0  ;;  %v9982_v12 = vadd.s32 4294967295, %v3563_v56  ;;  %vm3530_vm9 = vmor %vm15397_vm8, %vm15405_vm0  ;;  %v15429_v60 = vadd.s32 4294967242, %v13719_v18  ;;  %v9993_v40 = vadd.s32 4294967295, %v3624_v53 }
 0x5ae   :  { %11652 = vmatpush3.msra.mxu1 %v3447_v30  ;;  %vm3572_vm1 = vcmp.eq.s32.totalorder %v15382_v36, %v9981_v3  ;;  %v3661_v52 = vsel %vm14573_vm15, 1.0, %v17382_v63  ;;  %v3449_v59 = vmul.f32 %v3440_v14, %v14226_v7  ;;  %vm3553_vm15 = vcmp.le.s32.totalorder %v15363_v25, 8 }
 0x5af   :  { %11653 = vmatprep.subr.mxu1 %v17382_v63  ;;  %vm15446_vm6 = vmand %vm17365_vm11, %vm3572_vm1  ;;  %vm3573_vm3 = vcmp.eq.s32.totalorder %v15382_v36, %v9982_v12  ;;  %v3625_v13 = vmul.u32 2, %v15421_v4  ;;  %vm3634_vm12 = vcmp.eq.s32.totalorder %v15429_v60, %v9993_v40  ;;  %v3662_v32 = vsel %vm3530_vm9, 1.0, %v17382_v63 }
 0x5b0   :  { %11654 = vmatpush3.msra.mxu1 %v15348_v1  ;;  %vm3592_vm1 = vmor %vm15439_vm10, %vm15446_vm6  ;;  %vm3615_vm0 = vcmp.le.s32.totalorder %v15421_v4, 8  ;;  %vm17502_vm6 = vcmp.eq.s32.totalorder %v13719_v18, %v14485_v39 }
 0x5b1   :  { %11655 = vmatprep.subr.mxu1 %v17382_v63  ;;  %vm15473_vm11 = vmand %vm3553_vm15, %vm3573_vm3  ;;  %v9994_v22 = vadd.s32 4294967295, %v3625_v13  ;;  %v3663_v61 = vsel %vm3592_vm1, 1.0, %v17382_v63 }
 0x5b2   :  { %11656 = vmatpush3.msra.mxu1 %v3445_v21  ;;  %vm15481_vm8 = vmand %vm3609_vm7, %vm3634_vm12 }
 0x5b3   :  { %11657 = vmatprep.subr.mxu1 %v17382_v63  ;;  %vm3654_vm12 = vmor %vm15473_vm11, %vm15481_vm8  ;;  %vm3635_vm9 = vcmp.eq.s32.totalorder %v15429_v60, %v9994_v22  ;;  %vm3520_vm11 = vcmp.eq.s32.totalorder %v15351_v23, %v3500_v6  ;;  %vm3521_vm8 = vcmp.eq.s32.totalorder %v15351_v23, %v3501_v42  ;;  %v4178_v22 = vld [vmem:[#allocation2 + $0x3c0] sm:$0xff]  ;;  %v4166_v6 = vld [vmem:[#allocation2 + $0x368] sm:$0xff] }
 0x5b4   :  { %11658 = vmatpush3.msra.mxu1 %v15373_v19  ;;  %vm3640_vm10 = vmand %vm3615_vm0, %vm3635_vm9  ;;  %vm17507_vm9 = vnez %v17433_v45 }
 0x5b5   :  { %11659 = vmatprep.subr.mxu1 %v17382_v63  ;;  %vm15521_vm3 = vmand %vm3459_vm14, %vm17502_vm6  ;;  %v3665_v39 = vsel %vm3640_vm10, 1.0, %v17382_v63  ;;  %v3666_v8 = vsel %vm17507_vm9, 1.0, %v17382_v63  ;;  %vm17508_vm10 = vcmp.ge.s32.totalorder %v15342_v16, 1 }
 0x5b6   :  { %11660 = vmatpush3.msra.mxu1 %v3443_v0  ;;  %vm15529_vm1 = vmand %vm3485_vm2, %vm3520_vm11  ;;  %vm3582_vm2 = vcmp.eq.s32.totalorder %v15382_v36, %v3562_v28 }
 0x5b7   :  { %11661 = vmatprep.subr.mxu1 %v17382_v63  ;;  %vm3526_vm11 = vmand %vm3491_vm4, %vm3521_vm8 }
 0x5b8   :  { %11662 = vmatpush3.msra.mxu1 %v3451_v50  ;;  %vm3587_vm6 = vmand %vm17508_vm10, %vm3582_vm2  ;;  %vm3645_vm10 = vcmp.eq.s32.totalorder %v15429_v60, %v3625_v13  ;;  %v4182_v13 = vld [vmem:[#allocation2 + $0x3e0] sm:$0xff] }
 0x5b9   :  { %11663 = vmatprep.subr.mxu1 %v17382_v63  ;;  %vm3597_vm4 = vmor %vm3526_vm11, %vm3587_vm6  ;;  %vm3914_vm6 = vcmp.le.s32.totalorder %v17486_v49, 28 }
 0x5ba   :  { %11664 = vmatpush3.msra.mxu1 %v3441_v10  ;;  %v3668_v35 = vsel %vm3597_vm4, 1.0, %v17382_v63 }
 0x5bb   :  { %11665 = vmatprep.subr.mxu1 %v17382_v63 }
 0x5bc   :  { %11666 = vmatpush3.msra.mxu1 %v3449_v59 }
 0x5bd   :  { %11668 = vmatmul.mubr.msk.f32.vlgmr.msra.gmra.mxu1 %vm2698_vm13, %v3661_v52  ;;  %11682 = vmatprep.subr.mxu1 %v17382_v63 }
 0x5be   :  { %11683 = vmatpush3.msra.mxu1 %v15331_v58  ;;  %11670 = vmatprep.mubr.msk.f32.mxu1 %vm17453_vm5, %v17382_v63  ;;  %v4180_v58 = vld [vmem:[#allocation2 + $0x3d0] sm:$0xff] }
 0x5bf   :  { %11684 = vmatprep.subr.mxu1 %v17382_v63 }
 0x5c0   :  { %11685 = vmatpush3.msra.mxu1 %v3447_v30  ;;  %v3664_v30 = vsel %vm3654_vm12, 1.0, %v17382_v63  ;;  %vm3535_vm12 = vmor %vm15521_vm3, %vm15529_vm1  ;;  %vm3583_vm3 = vcmp.eq.s32.totalorder %v15382_v36, %v3563_v56  ;;  %vm3644_vm1 = vcmp.eq.s32.totalorder %v15429_v60, %v3624_v53 }
 0x5c1   :  { %11671 = vmatmul.mubr.msk.f32.gmra.mxu1 %vm2698_vm13, %v3662_v32  ;;  %11686 = vmatprep.subr.mxu1 %v17382_v63  ;;  %v3667_v45 = vsel %vm3535_vm12, 1.0, %v17382_v63  ;;  %vm3588_vm8 = vmand %vm3553_vm15, %vm3583_vm3  ;;  %v4181_v32 = vld [vmem:[#allocation2 + $0x3d8] sm:$0xff]  ;;  %vm3908_vm12 = vcmp.ge.s32.totalorder %v13747_v24, 21  ;;  %vm3929_vm3 = vcmp.ge.s32.totalorder %v17486_v49, 31 }
 0x5c2   :  { %11687 = vmatpush3.msra.mxu1 %v15348_v1  ;;  %11673 = vmatprep.mubr.msk.f32.mxu1 %vm17453_vm5, %v17382_v63  ;;  %vm3649_vm2 = vmand %vm3609_vm7, %vm3644_vm1  ;;  %vm3887_vm7 = vcmp.ge.s32.totalorder %v17485_v57, 11 }
 0x5c3   :  { %11688 = vmatprep.subr.mxu1 %v17382_v63  ;;  %vm3659_vm9 = vmor %vm3588_vm8, %vm3649_vm2  ;;  %vm4537_vm8 = vcmp.le.s32.totalorder %v13699_v15, 4  ;;  %vm17509_vm2 = vcmp.ge.s32.totalorder %v13699_v15, 1 }
 0x5c4   :  { %11689 = vmatpush3.msra.mxu1 %v3445_v21  ;;  %v3669_v16 = vsel %vm3659_vm9, 1.0, %v17382_v63  ;;  %vm3650_vm15 = vmand %vm3615_vm0, %vm3645_vm10  ;;  %vm3893_vm0 = vcmp.le.s32.totalorder %v13747_v24, 18 }
 0x5c5   :  { %11674 = vmatmul.mubr.msk.f32.gmra.mxu1 %vm2698_vm13, %v3663_v61  ;;  %11690 = vmatprep.subr.mxu1 %v17382_v63  ;;  %v3670_v1 = vsel %vm3650_vm15, 1.0, %v17382_v63  ;;  %v4177_v61 = vld [vmem:[#allocation2 + $0x3b8] sm:$0xff]  ;;  %vm3902_vm11 = vmor %vm3459_vm14, %vm3887_vm7  ;;  %vm3935_vm14 = vcmp.le.s32.totalorder %v13799_v33, 38 }
 0x5c6   :  { %11691 = vmatpush3.msra.mxu1 %v15373_v19  ;;  %11676 = vmatprep.mubr.msk.f32.mxu1 %vm17453_vm5, %v17382_v63  ;;  %vm3923_vm1 = vmor %vm3893_vm0, %vm3908_vm12 }
 0x5c7   :  { %11692 = vmatprep.subr.mxu1 %v17382_v63  ;;  %vm3944_vm4 = vmor %vm3914_vm6, %vm3929_vm3 }
 0x5c8   :  { %11693 = vmatpush3.msra.mxu1 %v3443_v0  ;;  %vm15797_vm9 = vmand %vm17509_vm2, %vm4537_vm8 }
 0x5c9   :  { %11677 = vmatmul.mubr.msk.f32.gmra.mxu1 %vm2698_vm13, %v3664_v30  ;;  %11694 = vmatprep.subr.mxu1 %v17382_v63  ;;  %v4175_v30 = vld [vmem:[#allocation2 + $0x3a8] sm:$0xff] }
 0x5ca   :  { %11695 = vmatpush3.msra.mxu1 %v3451_v50  ;;  %11679 = vmatprep.mubr.msk.f32.mxu1 %vm17453_vm5, %v17382_v63 }
 0x5cb   :  { %11696 = vmatprep.subr.mxu1 %v17382_v63 }
 0x5cc   :  { %11697 = vmatpush3.msra.mxu1 %v3441_v10 }
 0x5cd   :  { %11680 = vmatmul.mubr.msk.f32.gmra.mxu1 %vm2698_vm13, %v3665_v39  ;;  %11698 = vmatprep.subr.mxu1 %v17382_v63  ;;  %v4165_v39 = vld [vmem:[#allocation2 + $0x360] sm:$0xff] }
 0x5ce   :  { %11699 = vmatpush3.msra.mxu1 %v3449_v59  ;;  %11700 = vmatprep.mubr.msk.f32.mxu1 %vm17453_vm5, %v17382_v63  ;;  %v4185_v59 = vld [vmem:[#allocation2 + $0x3f8] sm:$0xff] }
 0x5cf   :  { %11740 = vmatprep.subr.mxu1 %v17382_v63 }
 0x5d1   :  { %11701 = vmatmul.mubr.msk.f32.vlgmr.msra.gmra.mxu1 %vm2698_vm13, %v3666_v8  ;;  %v4172_v8 = vld [vmem:[#allocation2 + $0x390] sm:$0xff] }
 0x5d2   :  { %11703 = vmatprep.mubr.msk.f32.mxu1 %vm17453_vm5, %v17382_v63 }
 0x5d5   :  { %11704 = vmatmul.mubr.msk.f32.gmra.mxu1 %vm2698_vm13, %v3667_v45  ;;  %v4164_v45 = vld [vmem:[#allocation2 + $0x358] sm:$0xff] }
 0x5d6   :  { %11706 = vmatprep.mubr.msk.f32.mxu1 %vm17453_vm5, %v17382_v63 }
 0x5d9   :  { %11707 = vmatmul.mubr.msk.f32.gmra.mxu1 %vm2698_vm13, %v3668_v35  ;;  %v4171_v35 = vld [vmem:[#allocation2 + $0x388] sm:$0xff] }
 0x5da   :  { %11709 = vmatprep.mubr.msk.f32.mxu1 %vm17453_vm5, %v17382_v63 }
 0x5dd   :  { %11710 = vmatmul.mubr.msk.f32.gmra.mxu1 %vm2698_vm13, %v3669_v16  ;;  %v4163_v16 = vld [vmem:[#allocation2 + $0x350] sm:$0xff] }
 0x5de   :  { %11712 = vmatprep.mubr.msk.f32.mxu1 %vm17453_vm5, %v17382_v63 }
 0x5e1   :  { %11713 = vmatmul.mubr.msk.f32.gmra.mxu1 %vm2698_vm13, %v3670_v1  ;;  %vm3951_vm13 = vcmask 326656   ;;  %v4170_v1 = vld [vmem:[#allocation2 + $0x380] sm:$0xff] }
 0x5e2   :  { %11750 = vmatprep.mubr.msk.f32.mxu1 %vm17453_vm5, %v17382_v63 }
 0x67d   :  { %v3752_v23 = vpop.f32.mrf.mxu1 }
 0x67f   :  { %v11669_v42 = vpop.f32.mrf.mxu1 }
 0x680   :  { %v4162_v42 = vld [vmem:[#allocation2 + $0x348] sm:$0xff] }
 0x681   :  { %v3757_v21 = vpop.f32.mrf.mxu1 }
 0x683   :  { %v11672_v47 = vpop.f32.mrf.mxu1 }
 0x684   :  { %v4380_v47 = vld [vmem:[#allocation2 + $0x468] sm:$0xff] }
 0x685   :  { %v3762_v28 = vpop.f32.mrf.mxu1 }
 0x687   :  { %v11675_v25 = vpop.f32.mrf.mxu1 }
 0x688   :  { %v4379_v25 = vld [vmem:[#allocation2 + $0x460] sm:$0xff] }
 0x689   :  { %v3767_v54 = vpop.f32.mrf.mxu1 }
 0x68b   :  { %v11678_v19 = vpop.f32.mrf.mxu1 }
 0x68c   :  { %v4160_v19 = vld [vmem:[#allocation2 + $0x338] sm:$0xff] }
 0x68d   :  { %v3772_v36 = vpop.f32.mrf.mxu1 }
 0x68f   :  { %v11681_v0 = vpop.f32.mrf.mxu1 }
 0x690   :  { %v4376_v0 = vld [vmem:[#allocation2 + $0x448] sm:$0xff] }
 0x691   :  { %v3857_v3 = vpop.f32.mrf.mxu1 }
 0x692   :  { %v15613_v52 = vmax.f32 %v3752_v23, %v3857_v3  ;;  %v4382_v23 = vld [vmem:[#allocation2 + $0x478] sm:$0xff]  ;;  %v4159_v3 = vld [vmem:[#allocation2 + $0x330] sm:$0xff] }
 0x693   :  { %v11702_v56 = vpop.f32.mrf.mxu1 }
 0x694   :  { %v4375_v56 = vld [vmem:[#allocation2 + $0x440] sm:$0xff] }
 0x695   :  { %v3862_v48 = vpop.f32.mrf.mxu1 }
 0x696   :  { %v15607_v29 = vmax.f32 %v3757_v21, %v3862_v48  ;;  %v4381_v21 = vld [vmem:[#allocation2 + $0x470] sm:$0xff]  ;;  %v4374_v48 = vld [vmem:[#allocation2 + $0x438] sm:$0xff] }
 0x697   :  { %v11705_v26 = vpop.f32.mrf.mxu1 }
 0x698   :  { %v4158_v26 = vld [vmem:[#allocation2 + $0x328] sm:$0xff] }
 0x699   :  { %v3867_v53 = vpop.f32.mrf.mxu1 }
 0x69a   :  { %v15601_v40 = vmax.f32 %v3762_v28, %v3867_v53  ;;  %v4161_v28 = vld [vmem:[#allocation2 + $0x340] sm:$0xff]  ;;  %v4373_v53 = vld [vmem:[#allocation2 + $0x430] sm:$0xff] }
 0x69b   :  { %v11708_v55 = vpop.f32.mrf.mxu1 }
 0x69c   :  { %v4157_v55 = vld [vmem:[#allocation2 + $0x320] sm:$0xff] }
 0x69d   :  { %v3872_v50 = vpop.f32.mrf.mxu1 }
 0x69e   :  { %v15595_v60 = vmax.f32 %v3767_v54, %v3872_v50  ;;  %v4378_v54 = vld [vmem:[#allocation2 + $0x458] sm:$0xff]  ;;  %v4372_v50 = vld [vmem:[#allocation2 + $0x428] sm:$0xff] }
 0x69f   :  { %v11711_v14 = vpop.f32.mrf.mxu1 }
 0x6a0   :  { %v4156_v14 = vld [vmem:[#allocation2 + $0x318] sm:$0xff] }
 0x6a1   :  { %v3877_v10 = vpop.f32.mrf.mxu1 }
 0x6a2   :  { %v15593_v12 = vmax.f32 %v3772_v36, %v3877_v10  ;;  %v4377_v36 = vld [vmem:[#allocation2 + $0x450] sm:$0xff]  ;;  %v4371_v10 = vld [vmem:[#allocation2 + $0x420] sm:$0xff] }
 0x6a3   :  { %v11714_v4 = vpop.f32.mrf.mxu1 }
 0x6a4   :  { %11716 = vmatpush3.msra.mxu0 %v15593_v12  ;;  %11741 = vmatpush3.msra.mxu1 %v15593_v12  ;;  %v4370_v4 = vld [vmem:[#allocation2 + $0x418] sm:$0xff] }
 0x6a5   :  { %11717 = vmatprep.subr.mxu0 %v17382_v63  ;;  %11742 = vmatprep.subr.mxu1 %v17382_v63 }
 0x6a6   :  { %11718 = vmatpush3.msra.mxu0 %v15595_v60  ;;  %11743 = vmatpush3.msra.mxu1 %v15595_v60 }
 0x6a7   :  { %11719 = vmatprep.subr.mxu0 %v17382_v63  ;;  %11744 = vmatprep.subr.mxu1 %v17382_v63 }
 0x6a8   :  { %11720 = vmatpush3.msra.mxu0 %v15601_v40  ;;  %11745 = vmatpush3.msra.mxu1 %v15601_v40 }
 0x6a9   :  { %11721 = vmatprep.subr.mxu0 %v17382_v63  ;;  %11746 = vmatprep.subr.mxu1 %v17382_v63 }
 0x6aa   :  { %11722 = vmatpush3.msra.mxu0 %v15607_v29  ;;  %11747 = vmatpush3.msra.mxu1 %v15607_v29 }
 0x6ab   :  { %11723 = vmatprep.subr.mxu0 %v17382_v63  ;;  %11748 = vmatprep.subr.mxu1 %v17382_v63 }
 0x6ac   :  { %11724 = vmatpush3.msra.mxu0 %v15613_v52  ;;  %11749 = vmatpush3.msra.mxu1 %v15613_v52 }
 0x6ad   :  { %11726 = vmatmul.mubr.msk.f32.vlgmr.msra.gmra.mxu0 %vm3951_vm13, %v15011_v37  ;;  %11765 = vmatprep.subr.mxu0 %v17382_v63 }
 0x6ae   :  { %11766 = vmatpush3.msra.mxu0 %v4185_v59  ;;  %11751 = vmatmul.mubr.msk.f32.vlgmr.msra.gmra.mxu1 %vm3951_vm13, %v15017_v11  ;;  %v4367_v59 = vld [vmem:[#allocation2 + $0x400] sm:$0xff] }
 0x6af   :  { %11767 = vmatprep.subr.mxu0 %v17382_v63  ;;  %11728 = vmatprep.mubr.msk.f32.mxu0 %vm17453_vm5, %v17382_v63 }
 0x6b0   :  { %11768 = vmatpush3.msra.mxu0 %v4184_v44  ;;  %11753 = vmatprep.mubr.msk.f32.mxu1 %vm17453_vm5, %v17382_v63 }
 0x6b1   :  { %11729 = vmatmul.mubr.msk.f32.gmra.mxu0 %vm3951_vm13, %v15036_v20  ;;  %11769 = vmatprep.subr.mxu0 %v17382_v63 }
 0x6b2   :  { %11770 = vmatpush3.msra.mxu0 %v4183_v43  ;;  %11754 = vmatmul.mubr.msk.f32.gmra.mxu1 %vm3951_vm13, %v15042_v5 }
 0x6b3   :  { %11771 = vmatprep.subr.mxu0 %v17382_v63  ;;  %11731 = vmatprep.mubr.msk.f32.mxu0 %vm17453_vm5, %v17382_v63 }
 0x6b4   :  { %11772 = vmatpush3.msra.mxu0 %v4182_v13  ;;  %11756 = vmatprep.mubr.msk.f32.mxu1 %vm17453_vm5, %v17382_v63 }
 0x6b5   :  { %11732 = vmatmul.mubr.msk.f32.gmra.mxu0 %vm3951_vm13, %v15059_v17  ;;  %11773 = vmatprep.subr.mxu0 %v17382_v63 }
 0x6b6   :  { %11774 = vmatpush3.msra.mxu0 %v4181_v32  ;;  %11757 = vmatmul.mubr.msk.f32.gmra.mxu1 %vm3951_vm13, %v15065_v62 }
 0x6b7   :  { %11775 = vmatprep.subr.mxu0 %v17382_v63  ;;  %11734 = vmatprep.mubr.msk.f32.mxu0 %vm17453_vm5, %v17382_v63 }
 0x6b8   :  { %11776 = vmatpush3.msra.mxu0 %v4180_v58  ;;  %11759 = vmatprep.mubr.msk.f32.mxu1 %vm17453_vm5, %v17382_v63 }
 0x6b9   :  { %11735 = vmatmul.mubr.msk.f32.gmra.mxu0 %vm3951_vm13, %v15083_v31  ;;  %11777 = vmatprep.subr.mxu0 %v17382_v63  ;;  %v4176_v31 = vld [vmem:[#allocation2 + $0x3b0] sm:$0xff] }
 0x6ba   :  { %11778 = vmatpush3.msra.mxu0 %v4179_v27  ;;  %11760 = vmatmul.mubr.msk.f32.gmra.mxu1 %vm3951_vm13, %v15089_v9  ;;  %v4168_v9 = vld [vmem:[#allocation2 + $0x378] sm:$0xff] }
 0x6bb   :  { %11779 = vmatprep.subr.mxu0 %v17382_v63  ;;  %11737 = vmatprep.mubr.msk.f32.mxu0 %vm17453_vm5, %v17382_v63 }
 0x6bc   :  { %11780 = vmatpush3.msra.mxu0 %v4178_v22  ;;  %11762 = vmatprep.mubr.msk.f32.mxu1 %vm17453_vm5, %v17382_v63 }
 0x6bd   :  { %11738 = vmatmul.mubr.msk.f32.gmra.mxu0 %vm3951_vm13, %v15105_v51  ;;  %11781 = vmatprep.subr.mxu0 %v17382_v63  ;;  %v4174_v51 = vld [vmem:[#allocation2 + $0x3a0] sm:$0xff] }
 0x6be   :  { %11782 = vmatpush3.msra.mxu0 %v4177_v61  ;;  %11763 = vmatmul.mubr.msk.f32.gmra.mxu1 %vm3951_vm13, %v15111_v38  ;;  %v4173_v38 = vld [vmem:[#allocation2 + $0x398] sm:$0xff] }
 0x6bf   :  { %11783 = vmatprep.subr.mxu0 %v17382_v63  ;;  %11797 = vmatprep.mubr.msk.f32.mxu0 %vm17453_vm5, %v17382_v63 }
 0x6c0   :  { %11784 = vmatpush3.msra.mxu0 %v4176_v31  ;;  %11812 = vmatprep.subr.mxu1 %v17382_v63 }
 0x6c1   :  { %11785 = vmatprep.subr.mxu0 %v17382_v63  ;;  %11813 = vmatpush3.msra.mxu1 %v4168_v9 }
 0x6c2   :  { %11786 = vmatpush3.msra.mxu0 %v4175_v30  ;;  %11814 = vmatprep.subr.mxu1 %v17382_v63 }
 0x6c3   :  { %11787 = vmatprep.subr.mxu0 %v17382_v63  ;;  %11815 = vmatpush3.msra.mxu1 %v4167_v41 }
 0x6c4   :  { %11788 = vmatpush3.msra.mxu0 %v4174_v51  ;;  %11816 = vmatprep.subr.mxu1 %v17382_v63 }
 0x6c5   :  { %11789 = vmatprep.subr.mxu0 %v17382_v63  ;;  %11817 = vmatpush3.msra.mxu1 %v4166_v6 }
 0x6c6   :  { %11790 = vmatpush3.msra.mxu0 %v4173_v38  ;;  %11818 = vmatprep.subr.mxu1 %v17382_v63 }
 0x6c7   :  { %11791 = vmatprep.subr.mxu0 %v17382_v63  ;;  %11819 = vmatpush3.msra.mxu1 %v4165_v39 }
 0x6c8   :  { %11792 = vmatpush3.msra.mxu0 %v4172_v8  ;;  %11820 = vmatprep.subr.mxu1 %v17382_v63 }
 0x6c9   :  { %11793 = vmatprep.subr.mxu0 %v17382_v63  ;;  %11821 = vmatpush3.msra.mxu1 %v4164_v45 }
 0x6ca   :  { %11794 = vmatpush3.msra.mxu0 %v4171_v35  ;;  %11822 = vmatprep.subr.mxu1 %v17382_v63 }
 0x6cb   :  { %11795 = vmatprep.subr.mxu0 %v17382_v63  ;;  %11823 = vmatpush3.msra.mxu1 %v4163_v16 }
 0x6cc   :  { %11796 = vmatpush3.msra.mxu0 %v4170_v1  ;;  %11824 = vmatprep.subr.mxu1 %v17382_v63 }
 0x6cd   :  { %11798 = vmatmul.mubr.f32.vlgmr.msra.gmra.mxu0 %v15613_v52  ;;  %11859 = vmatprep.subr.mxu0 %v17382_v63  ;;  %v4368_v52 = vld [vmem:[#allocation2 + $0x408] sm:$0xff] }
 0x6ce   :  { %11800 = vmatprep.mubr.msk.f32.mxu0 %vm17453_vm5, %v17382_v63  ;;  %11860 = vmatpush3.msra.mxu0 %v4382_v23 }
 0x6cf   :  { %11861 = vmatprep.subr.mxu0 %v17382_v63  ;;  %11825 = vmatpush3.msra.mxu1 %v4162_v42 }
 0x6d0   :  { %11862 = vmatpush3.msra.mxu0 %v4381_v21  ;;  %11826 = vmatprep.subr.mxu1 %v17382_v63 }
 0x6d1   :  { %11801 = vmatmul.mubr.f32.gmra.mxu0 %v15607_v29  ;;  %11863 = vmatprep.subr.mxu0 %v17382_v63  ;;  %v4153_v29 = vld [vmem:[#allocation2 + $0x300] sm:$0xff] }
 0x6d2   :  { %11803 = vmatprep.mubr.msk.f32.mxu0 %vm17453_vm5, %v17382_v63  ;;  %11864 = vmatpush3.msra.mxu0 %v4380_v47 }
 0x6d3   :  { %11865 = vmatprep.subr.mxu0 %v17382_v63  ;;  %11827 = vmatpush3.msra.mxu1 %v4161_v28 }
 0x6d4   :  { %11866 = vmatpush3.msra.mxu0 %v4379_v25  ;;  %11828 = vmatprep.subr.mxu1 %v17382_v63 }
 0x6d5   :  { %11804 = vmatmul.mubr.f32.gmra.mxu0 %v15601_v40  ;;  %11867 = vmatprep.subr.mxu0 %v17382_v63  ;;  %v4369_v40 = vld [vmem:[#allocation2 + $0x410] sm:$0xff] }
 0x6d6   :  { %11806 = vmatprep.mubr.msk.f32.mxu0 %vm17453_vm5, %v17382_v63  ;;  %11868 = vmatpush3.msra.mxu0 %v4378_v54 }
 0x6d7   :  { %11869 = vmatprep.subr.mxu0 %v17382_v63  ;;  %11829 = vmatpush3.msra.mxu1 %v4160_v19 }
 0x6d8   :  { %11870 = vmatpush3.msra.mxu0 %v4377_v36  ;;  %11830 = vmatprep.subr.mxu1 %v17382_v63 }
 0x6d9   :  { %11807 = vmatmul.mubr.f32.gmra.mxu0 %v15595_v60  ;;  %11871 = vmatprep.subr.mxu0 %v17382_v63  ;;  %v4154_v60 = vld [vmem:[#allocation2 + $0x308] sm:$0xff] }
 0x6da   :  { %11809 = vmatprep.mubr.msk.f32.mxu0 %vm17453_vm5, %v17382_v63  ;;  %11872 = vmatpush3.msra.mxu0 %v4376_v0 }
 0x6db   :  { %11873 = vmatprep.subr.mxu0 %v17382_v63  ;;  %11831 = vmatpush3.msra.mxu1 %v4159_v3 }
 0x6dc   :  { %11874 = vmatpush3.msra.mxu0 %v4375_v56  ;;  %11832 = vmatprep.subr.mxu1 %v17382_v63 }
 0x6dd   :  { %11810 = vmatmul.mubr.f32.gmra.mxu0 %v15593_v12  ;;  %11875 = vmatprep.subr.mxu0 %v17382_v63  ;;  %v4155_v12 = vld [vmem:[#allocation2 + $0x310] sm:$0xff] }
 0x6de   :  { %11876 = vmatpush3.msra.mxu0 %v4374_v48  ;;  %11833 = vmatpush3.msra.mxu1 %v4158_v26 }
 0x6df   :  { %11877 = vmatprep.subr.mxu0 %v17382_v63  ;;  %11834 = vmatprep.subr.mxu1 %v17382_v63 }
 0x6e0   :  { %11878 = vmatpush3.msra.mxu0 %v4373_v53  ;;  %11835 = vmatpush3.msra.mxu1 %v4157_v55 }
 0x6e1   :  { %11879 = vmatprep.subr.mxu0 %v17382_v63  ;;  %11836 = vmatprep.subr.mxu1 %v17382_v63 }
 0x6e2   :  { %11880 = vmatpush3.msra.mxu0 %v4372_v50  ;;  %11837 = vmatpush3.msra.mxu1 %v4156_v14 }
 0x6e3   :  { %11881 = vmatprep.subr.mxu0 %v17382_v63  ;;  %11838 = vmatprep.subr.mxu1 %v17382_v63 }
 0x6e4   :  { %11882 = vmatpush3.msra.mxu0 %v4371_v10  ;;  %11839 = vmatpush3.msra.mxu1 %v4155_v12 }
 0x6e5   :  { %11883 = vmatprep.subr.mxu0 %v17382_v63  ;;  %11840 = vmatprep.subr.mxu1 %v17382_v63 }
 0x6e6   :  { %11884 = vmatpush3.msra.mxu0 %v4370_v4  ;;  %11841 = vmatpush3.msra.mxu1 %v4154_v60 }
 0x6e7   :  { %11885 = vmatprep.subr.mxu0 %v17382_v63  ;;  %11842 = vmatprep.subr.mxu1 %v17382_v63 }
 0x6e8   :  { %11886 = vmatpush3.msra.mxu0 %v4369_v40  ;;  %11844 = vmatprep.mubr.msk.f32.mxu1 %vm17453_vm5, %v17382_v63 }
 0x6e9   :  { %11887 = vmatprep.subr.mxu0 %v17382_v63  ;;  %11891 = vmatprep.mubr.msk.f32.mxu0 %vm17453_vm5, %v17382_v63 }
 0x6ea   :  { %11843 = vmatpush3.msra.mxu1 %v4153_v29  ;;  %11888 = vmatpush3.msra.mxu0 %v4368_v52  ;;  %v15754_v29 = vsel %vm3902_vm11, 1.0, %v17382_v63 }
 0x6eb   :  { %11889 = vmatprep.subr.mxu0 %v17382_v63  ;;  %11906 = vmatprep.subr.mxu1 %v17382_v63 }
 0x6ec   :  { %11890 = vmatpush3.msra.mxu0 %v4367_v59 }
 0x6ed   :  { %11944 = vmatprep.subr.mxu0 %v17382_v63 }
 0x76d   :  { %v4028_v44 = vpop.f32.mrf.mxu0 }
 0x76e   :  { %11845 = vmatmul.mubr.f32.vlgmr.msra.gmra.mxu1 %v4028_v44  ;;  %v4128_v43 = vpop.f32.mrf.mxu1 }
 0x76f   :  { %v11727_v13 = vpop.f32.mrf.mxu0  ;;  %11892 = vmatmul.mubr.f32.vlgmr.msra.gmra.mxu0 %v4128_v43  ;;  %11847 = vmatprep.mubr.msk.f32.mxu1 %vm17453_vm5, %v17382_v63 }
 0x770   :  { %v11752_v32 = vpop.f32.mrf.mxu1  ;;  %11894 = vmatprep.mubr.msk.f32.mxu0 %vm17453_vm5, %v17382_v63  ;;  %v15757_v13 = vsel %vm3923_vm1, 1.0, %v17382_v63 }
 0x771   :  { %v4033_v58 = vpop.f32.mrf.mxu0 }
 0x772   :  { %11848 = vmatmul.mubr.f32.gmra.mxu1 %v4033_v58  ;;  %v4133_v27 = vpop.f32.mrf.mxu1 }
 0x773   :  { %v11730_v22 = vpop.f32.mrf.mxu0  ;;  %11895 = vmatmul.mubr.f32.gmra.mxu0 %v4133_v27  ;;  %11850 = vmatprep.mubr.msk.f32.mxu1 %vm17453_vm5, %v17382_v63 }
 0x774   :  { %v11755_v61 = vpop.f32.mrf.mxu1  ;;  %11897 = vmatprep.mubr.msk.f32.mxu0 %vm17453_vm5, %v17382_v63 }
 0x775   :  { %v4038_v31 = vpop.f32.mrf.mxu0  ;;  %v15761_v61 = vsel %vm3944_vm4, 1.0, %v17382_v63 }
 0x776   :  { %11851 = vmatmul.mubr.f32.gmra.mxu1 %v4038_v31  ;;  %v4138_v9 = vpop.f32.mrf.mxu1 }
 0x777   :  { %v11733_v30 = vpop.f32.mrf.mxu0  ;;  %11898 = vmatmul.mubr.f32.gmra.mxu0 %v4138_v9  ;;  %11853 = vmatprep.mubr.msk.f32.mxu1 %vm17453_vm5, %v17382_v63 }
 0x778   :  { %v11758_v41 = vpop.f32.mrf.mxu1  ;;  %11900 = vmatprep.mubr.msk.f32.mxu0 %vm17453_vm5, %v17382_v63 }
 0x779   :  { %v4043_v51 = vpop.f32.mrf.mxu0 }
 0x77a   :  { %11854 = vmatmul.mubr.f32.gmra.mxu1 %v4043_v51  ;;  %v4143_v6 = vpop.f32.mrf.mxu1 }
 0x77b   :  { %v11736_v38 = vpop.f32.mrf.mxu0  ;;  %11901 = vmatmul.mubr.f32.gmra.mxu0 %v4143_v6  ;;  %11856 = vmatprep.mubr.msk.f32.mxu1 %vm17453_vm5, %v17382_v63 }
 0x77c   :  { %v11761_v39 = vpop.f32.mrf.mxu1  ;;  %11903 = vmatprep.mubr.msk.f32.mxu0 %vm17453_vm5, %v17382_v63 }
 0x77d   :  { %v4048_v8 = vpop.f32.mrf.mxu0 }
 0x77e   :  { %11857 = vmatmul.mubr.f32.gmra.mxu1 %v4048_v8  ;;  %v4148_v45 = vpop.f32.mrf.mxu1 }
 0x77f   :  { %11904 = vmatmul.mubr.f32.gmra.mxu0 %v4148_v45  ;;  %v11739_v35 = vpop.f32.mrf.mxu0  ;;  %11916 = vmatprep.mubr.msk.f32.mxu1 %vm17453_vm5, %v17382_v63  ;;  %v15768_v45 = vsel %vm3935_vm14, 1.0, %v17382_v63  ;;  %vm4626_vm14 = vcmp.le.s32.totalorder %v14446_v46, 4 }
 0x780   :  { %v11764_v16 = vpop.f32.mrf.mxu1  ;;  %11950 = vmatprep.mubr.msk.f32.mxu0 %vm17453_vm5, %v17382_v63 }
 0x78d   :  { %v4252_v1 = vpop.f32.mrf.mxu0 }
 0x78f   :  { %v11799_v23 = vpop.f32.mrf.mxu0 }
 0x791   :  { %v4257_v42 = vpop.f32.mrf.mxu0 }
 0x793   :  { %v11802_v21 = vpop.f32.mrf.mxu0 }
 0x795   :  { %v4262_v47 = vpop.f32.mrf.mxu0 }
 0x797   :  { %v11805_v28 = vpop.f32.mrf.mxu0 }
 0x799   :  { %v4267_v25 = vpop.f32.mrf.mxu0 }
 0x79b   :  { %v11808_v54 = vpop.f32.mrf.mxu0 }
 0x79d   :  { %v4272_v19 = vpop.f32.mrf.mxu0 }
 0x79f   :  { %v11811_v36 = vpop.f32.mrf.mxu0 }
 0x82e   :  { %v4342_v0 = vpop.f32.mrf.mxu1 }
 0x82f   :  { %v4449_v3 = vpop.f32.mrf.mxu0  ;;  %v4343_v14 = vadd.f32 %v4342_v0, %v4252_v1 }
 0x830   :  { %v11846_v56 = vpop.f32.mrf.mxu1 }
 0x831   :  { %v11893_v48 = vpop.f32.mrf.mxu0  ;;  %v4473_v59 = vadd.f32 %v4449_v3, %v4343_v14 }
 0x832   :  { %v4347_v26 = vpop.f32.mrf.mxu1 }
 0x833   :  { %v4348_v53 = vadd.f32 %v4347_v26, %v4257_v42  ;;  %v4454_v55 = vpop.f32.mrf.mxu0  ;;  %v4478_v31 = vmul.f32 %v4473_v59, %v14226_v7 }
 0x834   :  { %v11849_v50 = vpop.f32.mrf.mxu1 }
 0x835   :  { %v11896_v10 = vpop.f32.mrf.mxu0  ;;  %v4474_v4 = vadd.f32 %v4454_v55, %v4348_v53 }
 0x836   :  { %v4352_v12 = vpop.f32.mrf.mxu1 }
 0x837   :  { %v4353_v60 = vadd.f32 %v4352_v12, %v4262_v47  ;;  %v4459_v40 = vpop.f32.mrf.mxu0  ;;  %v4479_v58 = vmul.f32 %v4474_v4, %v15754_v29 }
 0x838   :  { %v11852_v52 = vpop.f32.mrf.mxu1 }
 0x839   :  { %v4475_v44 = vadd.f32 %v4459_v40, %v4353_v60  ;;  %v11899_v43 = vpop.f32.mrf.mxu0  ;;  %v4483_v6 = vadd.f32 %v4479_v58, %v4478_v31 }
 0x83a   :  { %v4357_v32 = vpop.f32.mrf.mxu1 }
 0x83b   :  { %v4358_v27 = vadd.f32 %v4357_v32, %v4267_v25  ;;  %v4464_v49 = vpop.f32.mrf.mxu0  ;;  %v4480_v9 = vmul.f32 %v4475_v44, %v15757_v13 }
 0x83c   :  { %v11855_v22 = vpop.f32.mrf.mxu1 }
 0x83d   :  { %v4476_v30 = vadd.f32 %v4464_v49, %v4358_v27  ;;  %v11902_v41 = vpop.f32.mrf.mxu0  ;;  %v4484_v16 = vadd.f32 %v4483_v6, %v4480_v9  ;;  %v15777_v6 = vadd.s32 4294967290, %v13699_v15 }
 0x83e   :  { %v4362_v51 = vpop.f32.mrf.mxu1 }
 0x83f   :  { %v4481_v38 = vmul.f32 %v4476_v30, %v15761_v61  ;;  %v4363_v39 = vadd.f32 %v4362_v51, %v4272_v19  ;;  %v4469_v8 = vpop.f32.mrf.mxu0  ;;  %vm4553_vm10 = vcmp.ge.s32.totalorder %v15777_v6, 1 }
 0x840   :  { %v11858_v35 = vpop.f32.mrf.mxu1 }
 0x841   :  { %v4477_v1 = vadd.f32 %v4469_v8, %v4363_v39  ;;  %v11905_v23 = vpop.f32.mrf.mxu0  ;;  %v4485_v42 = vadd.f32 %v4484_v16, %v4481_v38  ;;  %v15781_v39 = vadd.s32 4294967290, %v17485_v57  ;;  %v15784_v8 = vadd.s32 4294967284, %v17485_v57 }
 0x842   :  { %v15788_v35 = vadd.s32 4294967286, %v13719_v18 }
 0x843   :  { %v4482_v21 = vmul.f32 %v4477_v1, %v15768_v45  ;;  %v4563_v1 = vmul.u32 2, %v15781_v39  ;;  %v4600_v23 = vmul.u32 2, %v15784_v8  ;;  %vm17366_vm11 = vcmp.le.s32.totalorder %v15781_v39, 4 }
 0x844   :  { %vm17367_vm3 = vcmp.ge.s32.totalorder %v15784_v8, 1 }
 0x845   :  { %v4486_v47 = vadd.f32 %v4485_v42, %v4482_v21 }
 0x847   :  { %v4487_v28 = vrot.slane %v4486_v47, 4 }
 0x849   :  { %v4488_v25 = vadd.f32 %v4487_v28, %v4486_v47 }
 0x84b   :  { %v4489_v33 = vrot.slane %v4488_v25, 2 }
 0x84d   :  { %v4490_v54 = vadd.f32 %v4489_v33, %v4488_v25 }
 0x84f   :  { %v4491_v36 = vrot.slane %v4490_v54, 1 }
 0x851   :  { %v4492_v0 = vadd.f32 %v4491_v36, %v4490_v54  ;;  %v10020_v54 = vadd.s32 4294967295, %v4563_v1  ;;  %v15806_v36 = vadd.s32 4294967276, %v13719_v18 }
 0x853   :  { %v4493_v3 = vmul.f32 0.03125, %v4492_v0  ;;  %vm4569_vm6 = vcmp.eq.s32.totalorder %v15788_v35, %v10020_v54  ;;  %v5074_v54 = vld [vmem:[#allocation5 + $0xf8] sm:$0xff] }
 0x854   :  { %vm15842_vm8 = vmand %vm17366_vm11, %vm4569_vm6 }
 0x855   :  { %v4494_v19 = vsub.f32 %v4478_v31, %v4493_v3  ;;  %v4495_v56 = vsub.f32 %v4479_v58, %v4493_v3  ;;  %v4496_v48 = vsub.f32 %v4480_v9, %v4493_v3  ;;  %v4497_v26 = vsub.f32 %v4481_v38, %v4493_v3 }
 0x856   :  { %v4498_v53 = vsub.f32 %v4482_v21, %v4493_v3  ;;  %v4562_v38 = vmul.u32 2, %v15777_v6  ;;  %v15793_v21 = vadd.s32 4294967284, %v13747_v24 }
 0x857   :  { %v4499_v55 = vmul.f32 %v4494_v19, %v14226_v7  ;;  %v4500_v50 = vmul.f32 %v4495_v56, %v15754_v29  ;;  %v4501_v14 = vmul.f32 %v4496_v48, %v15757_v13  ;;  %v4502_v10 = vmul.f32 %v4497_v26, %v15761_v61 }
 0x858   :  { %v4503_v60 = vmul.f32 %v4498_v53, %v15768_v45  ;;  %v10019_v16 = vadd.s32 4294967295, %v4562_v38  ;;  %vm4595_vm11 = vcmp.le.s32.totalorder %v15793_v21, 4 }
 0x859   :  { %v4504_v12 = vmul.f32 %v4499_v55, %v4499_v55  ;;  %v4505_v4 = vmul.f32 %v4500_v50, %v4500_v50  ;;  %v4506_v40 = vmul.f32 %v4501_v14, %v4501_v14  ;;  %v4507_v59 = vmul.f32 %v4502_v10, %v4502_v10  ;;  %v5067_v14 = vld [vmem:[#allocation5 + $0xc0] sm:$0xff] }
 0x85a   :  { %v4508_v43 = vmul.f32 %v4503_v60, %v4503_v60  ;;  %vm4568_vm15 = vcmp.eq.s32.totalorder %v15788_v35, %v10019_v16  ;;  %v10027_v50 = vadd.s32 4294967295, %v4600_v23 }
 0x85b   :  { %v4509_v52 = vadd.f32 %v4505_v4, %v4504_v12  ;;  %vm15822_vm12 = vmand %vm4553_vm10, %vm4568_vm15  ;;  %vm17522_vm15 = vcmp.ge.s32.totalorder %v14446_v46, 1 }
 0x85c   :  { %vm4606_vm1 = vcmp.eq.s32.totalorder %v15806_v36, %v10027_v50  ;;  %v5069_v50 = vld [vmem:[#allocation5 + $0xd0] sm:$0xff] }
 0x85d   :  { %v4510_v44 = vadd.f32 %v4509_v52, %v4506_v40  ;;  %v10029_v40 = vadd.s32 4294967266, %v13719_v18  ;;  %vm15849_vm2 = vmand %vm17367_vm3, %vm4606_vm1 }
 0x85f   :  { %v4511_v32 = vadd.f32 %v4510_v44, %v4507_v59  ;;  %v5050_v59 = vld [vmem:[#allocation5 + $0x40] sm:$0xff] }
 0x861   :  { %v4512_v58 = vadd.f32 %v4511_v32, %v4508_v43  ;;  %v17525_v43 = vld [vmem:[#allocation31_spill] sm:$0xff] }
 0x862   :  { %vm4632_vm6 = vcmp.eq.s32.totalorder %v10029_v40, %v17525_v43  ;;  %v5060_v43 = vld [vmem:[#allocation5 + $0x88] sm:$0xff] }
 0x863   :  { %v4513_v27 = vrot.slane %v4512_v58, 4 }
 0x865   :  { %v4514_v49 = vadd.f32 %v4513_v27, %v4512_v58  ;;  %v5250_v58 = vld [vmem:[#allocation5 + $0x170] sm:$0xff]  ;;  %v5249_v27 = vld [vmem:[#allocation5 + $0x168] sm:$0xff] }
 0x867   :  { %v4515_v22 = vrot.slane %v4514_v49, 2 }
 0x869   :  { %v4516_v31 = vadd.f32 %v4515_v22, %v4514_v49  ;;  %v5247_v22 = vld [vmem:[#allocation5 + $0x158] sm:$0xff] }
 0x86b   :  { %v4517_v9 = vrot.slane %v4516_v31, 1 }
 0x86d   :  { %v4518_v30 = vadd.f32 %v4517_v9, %v4516_v31  ;;  %v5045_v31 = vld [vmem:[#allocation5 + $0x18] sm:$0xff] }
 0x86f   :  { %v4519_v41 = vmul.f32 0.03125, %v4518_v30 }
 0x871   :  { %v4520_v51 = vadd.f32 0.0001, %v4519_v41 }
 0x873   :  { %13361 = vrsqrt.f32 %v4520_v51 }
 0x880   :  { %v13362_v42 = vpop.eup %13361 }
 0x881   :  { %v4526_v28 = vmul.f32 %v13362_v42, %v4498_v53  ;;  %v4525_v25 = vmul.f32 %v13362_v42, %v4497_v26  ;;  %v4524_v33 = vmul.f32 %v13362_v42, %v4496_v48  ;;  %v4523_v55 = vmul.f32 %v13362_v42, %v4495_v56  ;;  %v17512_v53 = vld [vmem:[#allocation30_spill] sm:$0xff] }
 0x882   :  { %vm17513_vm7 = vcmp.eq.s32.totalorder %v13719_v18, %v17512_v53  ;;  %v4601_v26 = vmul.u32 2, %v15793_v21  ;;  %v4522_v12 = vmul.f32 %v13362_v42, %v4494_v19  ;;  %v5057_v53 = vld [vmem:[#allocation5 + $0x78] sm:$0xff]  ;;  %v5068_v48 = vld [vmem:[#allocation5 + $0xc8] sm:$0xff] }
 0x883   :  { %v4531_v0 = vmax.f32 %v4526_v28, 0.0  ;;  %v4530_v3 = vmax.f32 %v4525_v25, 0.0  ;;  %vm15815_vm0 = vmand %vm15797_vm9, %vm17513_vm7  ;;  %v4529_v10 = vmax.f32 %v4524_v33, 0.0  ;;  %v4528_v60 = vmax.f32 %v4523_v55, 0.0  ;;  %v5070_v55 = vld [vmem:[#allocation5 + $0xd8] sm:$0xff] }
 0x884   :  { %vm4580_vm4 = vmor %vm15815_vm0, %vm15822_vm12  ;;  %v4527_v52 = vmax.f32 %v4522_v12, 0.0  ;;  %vm17530_vm12 = vcmp.eq.s32.totalorder %v13719_v18, %v14309_v2  ;;  %v5054_v12 = vld [vmem:[#allocation5 + $0x60] sm:$0xff] }
 0x885   :  { %v4536_v56 = vmul.f32 %v4531_v0, %v15768_v45  ;;  %v4535_v4 = vmul.f32 %v4530_v3, %v15761_v61  ;;  %v10028_v45 = vadd.s32 4294967295, %v4601_v26  ;;  %v4534_v19 = vmul.f32 %v4529_v10, %v15757_v13  ;;  %vm15856_vm7 = vmand %vm17522_vm15, %vm4626_vm14  ;;  %v5072_v0 = vld [vmem:[#allocation5 + $0xe8] sm:$0xff]  ;;  %v5071_v3 = vld [vmem:[#allocation5 + $0xe0] sm:$0xff] }
 0x886   :  { %v4533_v44 = vmul.f32 %v4528_v60, %v15754_v29  ;;  %v4532_v32 = vmul.f32 %v4527_v52, %v14226_v7  ;;  %v4648_v46 = vsel %vm4580_vm4, 1.0, %v17382_v63  ;;  %vm4618_vm14 = vmor %vm15842_vm8, %vm15849_vm2  ;;  %vm4574_vm15 = vcmp.eq.s32.totalorder %v15788_v35, %v4562_v38  ;;  %v5066_v10 = vld [vmem:[#allocation5 + $0xb8] sm:$0xff]  ;;  %v5051_v52 = vld [vmem:[#allocation5 + $0x48] sm:$0xff] }
 0x887   :  { %11907 = vmatpush3.msra.mxu1 %v4536_v56  ;;  %vm4607_vm1 = vcmp.eq.s32.totalorder %v15806_v36, %v10028_v45  ;;  %vm15879_vm3 = vmand %vm15856_vm7, %vm4632_vm6  ;;  %v4649_v2 = vsel %vm4618_vm14, 1.0, %v17382_v63  ;;  %vm4612_vm6 = vcmp.eq.s32.totalorder %v15806_v36, %v4600_v23  ;;  %v5053_v60 = vld [vmem:[#allocation5 + $0x58] sm:$0xff]  ;;  %v5052_v45 = vld [vmem:[#allocation5 + $0x50] sm:$0xff] }
 0x888   :  { %11908 = vmatprep.subr.mxu1 %v17382_v63  ;;  %vm15885_vm0 = vmand %vm4595_vm11, %vm4607_vm1  ;;  %v5062_v61 = vld [vmem:[#allocation5 + $0x98] sm:$0xff]  ;;  %v5047_v29 = vld [vmem:[#allocation5 + $0x28] sm:$0xff] }
 0x889   :  { %11909 = vmatpush3.msra.mxu1 %v4535_v4  ;;  %vm15894_vm4 = vmand %vm15797_vm9, %vm17530_vm12  ;;  %vm4613_vm12 = vcmp.eq.s32.totalorder %v15806_v36, %v4601_v26  ;;  %v5073_v36 = vld [vmem:[#allocation5 + $0xf0] sm:$0xff]  ;;  %v5049_v13 = vld [vmem:[#allocation5 + $0x38] sm:$0xff] }
 0x88a   :  { %11910 = vmatprep.subr.mxu1 %v17382_v63  ;;  %vm15902_vm8 = vmand %vm4553_vm10, %vm4574_vm15  ;;  %vm4575_vm10 = vcmp.eq.s32.totalorder %v15788_v35, %v4563_v1  ;;  %vm17538_vm15 = vcmp.ge.s32.totalorder %v15784_v8, 1  ;;  %v5056_v26 = vld [vmem:[#allocation5 + $0x70] sm:$0xff]  ;;  %v5251_v7 = vld [vmem:[#allocation5 + $0x178] sm:$0xff] }
 0x88b   :  { %11911 = vmatpush3.msra.mxu1 %v4534_v19  ;;  %vm4644_vm2 = vmor %vm15885_vm0, %vm15879_vm3  ;;  %vm17535_vm3 = vcmp.le.s32.totalorder %v15781_v39, 4 }
 0x88c   :  { %11912 = vmatprep.subr.mxu1 %v17382_v63  ;;  %vm4583_vm1 = vmor %vm15894_vm4, %vm15902_vm8  ;;  %v4650_v49 = vsel %vm4644_vm2, 1.0, %v17382_v63  ;;  %vm4638_vm2 = vcmp.eq.s32.totalorder %v10029_v40, %v14463_v34  ;;  %v5064_v40 = vld [vmem:[#allocation5 + $0xa8] sm:$0xff]  ;;  %vm4858_vm8 = vcmp.le.s32.totalorder %v13747_v24, 22 }
 0x88d   :  { %11913 = vmatpush3.msra.mxu1 %v4533_v44  ;;  %vm15931_vm14 = vmand %vm17535_vm3, %vm4575_vm10  ;;  %v4651_v9 = vsel %vm4583_vm1, 1.0, %v17382_v63  ;;  %vm4835_vm1 = vcmp.ge.s32.totalorder %v13699_v15, 7 }
 0x88e   :  { %11914 = vmatprep.subr.mxu1 %v17382_v63  ;;  %vm15938_vm0 = vmand %vm17538_vm15, %vm4612_vm6  ;;  %vm17541_vm15 = vcmp.ge.s32.totalorder %v13747_v24, 19 }
 0x88f   :  { %11915 = vmatpush3.msra.mxu1 %v4532_v32  ;;  %vm4621_vm10 = vmor %vm15931_vm14, %vm15938_vm0 }
 0x890   :  { %11917 = vmatmul.mubr.msk.f32.vlgmr.msra.gmra.mxu1 %vm3951_vm13, %v4648_v46  ;;  %11925 = vmatprep.subr.mxu1 %v17382_v63  ;;  %vm4616_vm6 = vmand %vm4595_vm11, %vm4613_vm12  ;;  %v4652_v34 = vsel %vm4621_vm10, 1.0, %v17382_v63  ;;  %v5059_v46 = vld [vmem:[#allocation5 + $0x80] sm:$0xff]  ;;  %vm4839_vm11 = vcmp.le.s32.totalorder %v17485_v57, 10 }
 0x891   :  { %11926 = vmatpush3.msra.mxu1 %v4536_v56  ;;  %11919 = vmatprep.mubr.msk.f32.mxu1 %vm17453_vm5, %v17382_v63  ;;  %vm4641_vm3 = vmand %vm15856_vm7, %vm4638_vm2  ;;  %v5055_v56 = vld [vmem:[#allocation5 + $0x68] sm:$0xff]  ;;  %vm4848_vm7 = vcmp.ge.s32.totalorder %v17485_v57, 13  ;;  %vm17542_vm2 = vcmp.le.s32.totalorder %v13747_v24, 16 }
 0x892   :  { %11927 = vmatprep.subr.mxu1 %v17382_v63  ;;  %vm4647_vm4 = vmor %vm4616_vm6, %vm4641_vm3 }
 0x893   :  { %11928 = vmatpush3.msra.mxu1 %v4535_v4  ;;  %v4653_v30 = vsel %vm4647_vm4, 1.0, %v17382_v63  ;;  %v5065_v4 = vld [vmem:[#allocation5 + $0xb0] sm:$0xff]  ;;  %vm4854_vm14 = vmor %vm4839_vm11, %vm4848_vm7 }
 0x894   :  { %11920 = vmatmul.mubr.msk.f32.gmra.mxu1 %vm3951_vm13, %v4649_v2  ;;  %11929 = vmatprep.subr.mxu1 %v17382_v63  ;;  %v5046_v2 = vld [vmem:[#allocation5 + $0x20] sm:$0xff]  ;;  %vm4861_vm0 = vmand %vm17541_vm15, %vm4858_vm8 }
 0x895   :  { %11930 = vmatpush3.msra.mxu1 %v4534_v19  ;;  %11922 = vmatprep.mubr.msk.f32.mxu1 %vm17453_vm5, %v17382_v63  ;;  %v5063_v19 = vld [vmem:[#allocation5 + $0xa0] sm:$0xff]  ;;  %vm4844_vm12 = vmor %vm15797_vm9, %vm4835_vm1 }
 0x896   :  { %11931 = vmatprep.subr.mxu1 %v17382_v63  ;;  %vm4864_vm10 = vmor %vm17542_vm2, %vm4861_vm0 }
 0x897   :  { %11932 = vmatpush3.msra.mxu1 %v4533_v44  ;;  %v5061_v44 = vld [vmem:[#allocation5 + $0x90] sm:$0xff] }
 0x898   :  { %11923 = vmatmul.mubr.msk.f32.gmra.mxu1 %vm3951_vm13, %v4650_v49  ;;  %11933 = vmatprep.subr.mxu1 %v17382_v63  ;;  %v5248_v49 = vld [vmem:[#allocation5 + $0x160] sm:$0xff] }
 0x899   :  { %11934 = vmatpush3.msra.mxu1 %v4532_v32  ;;  %11935 = vmatprep.mubr.msk.f32.mxu1 %vm17453_vm5, %v17382_v63  ;;  %v5048_v32 = vld [vmem:[#allocation5 + $0x30] sm:$0xff] }
 0x89a   :  { %11959 = vmatprep.subr.mxu1 %v17382_v63 }
 0x89c   :  { %11936 = vmatmul.mubr.msk.f32.vlgmr.msra.gmra.mxu1 %vm3951_vm13, %v4651_v9  ;;  %v5246_v9 = vld [vmem:[#allocation5 + $0x150] sm:$0xff] }
 0x89d   :  { %11938 = vmatprep.mubr.msk.f32.mxu1 %vm17453_vm5, %v17382_v63 }
 0x8a0   :  { %11939 = vmatmul.mubr.msk.f32.gmra.mxu1 %vm3951_vm13, %v4652_v34  ;;  %v5044_v34 = vld [vmem:[#allocation5 + $0x10] sm:$0xff] }
 0x8a1   :  { %11941 = vmatprep.mubr.msk.f32.mxu1 %vm17453_vm5, %v17382_v63 }
 0x8a4   :  { %11942 = vmatmul.mubr.msk.f32.gmra.mxu1 %vm3951_vm13, %v4653_v30  ;;  %vm4869_vm13 = vcmask 195584   ;;  %v5245_v30 = vld [vmem:[#allocation5 + $0x148] sm:$0xff] }
 0x8a5   :  { %11965 = vmatprep.mubr.msk.f32.mxu1 %vm17453_vm5, %v17382_v63 }
 0x950   :  { %v4729_v41 = vpop.f32.mrf.mxu1 }
 0x952   :  { %v11918_v51 = vpop.f32.mrf.mxu1 }
 0x953   :  { %v5244_v51 = vld [vmem:[#allocation5 + $0x140] sm:$0xff] }
 0x954   :  { %v4734_v6 = vpop.f32.mrf.mxu1 }
 0x956   :  { %v11921_v38 = vpop.f32.mrf.mxu1 }
 0x957   :  { %v5242_v38 = vld [vmem:[#allocation5 + $0x130] sm:$0xff] }
 0x958   :  { %v4739_v39 = vpop.f32.mrf.mxu1 }
 0x95a   :  { %v11924_v8 = vpop.f32.mrf.mxu1 }
 0x95b   :  { %v5240_v8 = vld [vmem:[#allocation5 + $0x120] sm:$0xff] }
 0x95c   :  { %v4818_v35 = vpop.f32.mrf.mxu1 }
 0x95d   :  { %v15982_v33 = vmax.f32 %v4729_v41, %v4818_v35  ;;  %v5043_v41 = vld [vmem:[#allocation5 + $0x8] sm:$0xff]  ;;  %v5239_v35 = vld [vmem:[#allocation5 + $0x118] sm:$0xff] }
 0x95e   :  { %v11937_v16 = vpop.f32.mrf.mxu1 }
 0x95f   :  { %v5238_v16 = vld [vmem:[#allocation5 + $0x110] sm:$0xff] }
 0x960   :  { %v4823_v1 = vpop.f32.mrf.mxu1 }
 0x961   :  { %v15976_v25 = vmax.f32 %v4734_v6, %v4823_v1  ;;  %v5243_v6 = vld [vmem:[#allocation5 + $0x138] sm:$0xff]  ;;  %v5042_v1 = vld [vmem:[#allocation5] sm:$0xff] }
 0x962   :  { %v11940_v23 = vpop.f32.mrf.mxu1 }
 0x963   :  { %v5237_v23 = vld [vmem:[#allocation5 + $0x108] sm:$0xff] }
 0x964   :  { %v4828_v42 = vpop.f32.mrf.mxu1 }
 0x965   :  { %v15974_v21 = vmax.f32 %v4739_v39, %v4828_v42  ;;  %v5241_v39 = vld [vmem:[#allocation5 + $0x128] sm:$0xff]  ;;  %v5236_v42 = vld [vmem:[#allocation5 + $0x100] sm:$0xff] }
 0x966   :  { %v11943_v28 = vpop.f32.mrf.mxu1 }
 0x967   :  { %11945 = vmatpush3.msra.mxu0 %v15974_v21  ;;  %11960 = vmatpush3.msra.mxu1 %v15974_v21 }
 0x968   :  { %11946 = vmatprep.subr.mxu0 %v17382_v63  ;;  %11961 = vmatprep.subr.mxu1 %v17382_v63 }
 0x969   :  { %11947 = vmatpush3.msra.mxu0 %v15976_v25  ;;  %11962 = vmatpush3.msra.mxu1 %v15976_v25 }
 0x96a   :  { %11948 = vmatprep.subr.mxu0 %v17382_v63  ;;  %11963 = vmatprep.subr.mxu1 %v17382_v63 }
 0x96b   :  { %11949 = vmatpush3.msra.mxu0 %v15982_v33  ;;  %11964 = vmatpush3.msra.mxu1 %v15982_v33 }
 0x96c   :  { %11951 = vmatmul.mubr.msk.f32.vlgmr.msra.gmra.mxu0 %vm4869_vm13, %v15011_v37  ;;  %11974 = vmatprep.subr.mxu0 %v17382_v63 }
 0x96d   :  { %11975 = vmatpush3.msra.mxu0 %v5074_v54  ;;  %11966 = vmatmul.mubr.msk.f32.vlgmr.msra.gmra.mxu1 %vm4869_vm13, %v15017_v11 }
 0x96e   :  { %11976 = vmatprep.subr.mxu0 %v17382_v63  ;;  %11953 = vmatprep.mubr.msk.f32.mxu0 %vm17453_vm5, %v17382_v63 }
 0x96f   :  { %11977 = vmatpush3.msra.mxu0 %v5073_v36  ;;  %11968 = vmatprep.mubr.msk.f32.mxu1 %vm17453_vm5, %v17382_v63 }
 0x970   :  { %11954 = vmatmul.mubr.msk.f32.gmra.mxu0 %vm4869_vm13, %v15036_v20  ;;  %11978 = vmatprep.subr.mxu0 %v17382_v63 }
 0x971   :  { %11979 = vmatpush3.msra.mxu0 %v5072_v0  ;;  %11969 = vmatmul.mubr.msk.f32.gmra.mxu1 %vm4869_vm13, %v15042_v5 }
 0x972   :  { %11980 = vmatprep.subr.mxu0 %v17382_v63  ;;  %11956 = vmatprep.mubr.msk.f32.mxu0 %vm17453_vm5, %v17382_v63 }
 0x973   :  { %11981 = vmatpush3.msra.mxu0 %v5071_v3  ;;  %11971 = vmatprep.mubr.msk.f32.mxu1 %vm17453_vm5, %v17382_v63 }
 0x974   :  { %11957 = vmatmul.mubr.msk.f32.gmra.mxu0 %vm4869_vm13, %v15059_v17  ;;  %11982 = vmatprep.subr.mxu0 %v17382_v63 }
 0x975   :  { %11983 = vmatpush3.msra.mxu0 %v5070_v55  ;;  %11972 = vmatmul.mubr.msk.f32.gmra.mxu1 %vm4869_vm13, %v15065_v62 }
 0x976   :  { %11984 = vmatprep.subr.mxu0 %v17382_v63  ;;  %12006 = vmatprep.mubr.msk.f32.mxu0 %vm17453_vm5, %v17382_v63 }
 0x977   :  { %11985 = vmatpush3.msra.mxu0 %v5069_v50  ;;  %12015 = vmatprep.subr.mxu1 %v17382_v63 }
 0x978   :  { %11986 = vmatprep.subr.mxu0 %v17382_v63  ;;  %12016 = vmatpush3.msra.mxu1 %v5057_v53 }
 0x979   :  { %11987 = vmatpush3.msra.mxu0 %v5068_v48  ;;  %12017 = vmatprep.subr.mxu1 %v17382_v63 }
 0x97a   :  { %11988 = vmatprep.subr.mxu0 %v17382_v63  ;;  %12018 = vmatpush3.msra.mxu1 %v5056_v26 }
 0x97b   :  { %11989 = vmatpush3.msra.mxu0 %v5067_v14  ;;  %12019 = vmatprep.subr.mxu1 %v17382_v63 }
 0x97c   :  { %11990 = vmatprep.subr.mxu0 %v17382_v63  ;;  %12020 = vmatpush3.msra.mxu1 %v5055_v56 }
 0x97d   :  { %11991 = vmatpush3.msra.mxu0 %v5066_v10  ;;  %12021 = vmatprep.subr.mxu1 %v17382_v63 }
 0x97e   :  { %11992 = vmatprep.subr.mxu0 %v17382_v63  ;;  %12022 = vmatpush3.msra.mxu1 %v5054_v12 }
 0x97f   :  { %11993 = vmatpush3.msra.mxu0 %v5065_v4  ;;  %12023 = vmatprep.subr.mxu1 %v17382_v63 }
 0x980   :  { %11994 = vmatprep.subr.mxu0 %v17382_v63  ;;  %12024 = vmatpush3.msra.mxu1 %v5053_v60 }
 0x981   :  { %11995 = vmatpush3.msra.mxu0 %v5064_v40  ;;  %12025 = vmatprep.subr.mxu1 %v17382_v63 }
 0x982   :  { %11996 = vmatprep.subr.mxu0 %v17382_v63  ;;  %12026 = vmatpush3.msra.mxu1 %v5052_v45 }
 0x983   :  { %11997 = vmatpush3.msra.mxu0 %v5063_v19  ;;  %12027 = vmatprep.subr.mxu1 %v17382_v63 }
 0x984   :  { %11998 = vmatprep.subr.mxu0 %v17382_v63  ;;  %12028 = vmatpush3.msra.mxu1 %v5051_v52 }
 0x985   :  { %11999 = vmatpush3.msra.mxu0 %v5062_v61  ;;  %12029 = vmatprep.subr.mxu1 %v17382_v63 }
 0x986   :  { %12000 = vmatprep.subr.mxu0 %v17382_v63  ;;  %12030 = vmatpush3.msra.mxu1 %v5050_v59 }
 0x987   :  { %12001 = vmatpush3.msra.mxu0 %v5061_v44  ;;  %12031 = vmatprep.subr.mxu1 %v17382_v63 }
 0x988   :  { %12002 = vmatprep.subr.mxu0 %v17382_v63  ;;  %12032 = vmatpush3.msra.mxu1 %v5049_v13 }
 0x989   :  { %12003 = vmatpush3.msra.mxu0 %v5060_v43  ;;  %12033 = vmatprep.subr.mxu1 %v17382_v63 }
 0x98a   :  { %12004 = vmatprep.subr.mxu0 %v17382_v63  ;;  %12034 = vmatpush3.msra.mxu1 %v5048_v32 }
 0x98b   :  { %12005 = vmatpush3.msra.mxu0 %v5059_v46  ;;  %12035 = vmatprep.subr.mxu1 %v17382_v63 }
 0x98c   :  { %12007 = vmatmul.mubr.f32.vlgmr.msra.gmra.mxu0 %v15982_v33  ;;  %12056 = vmatprep.subr.mxu0 %v17382_v63 }
 0x98d   :  { %12009 = vmatprep.mubr.msk.f32.mxu0 %vm17453_vm5, %v17382_v63  ;;  %12057 = vmatpush3.msra.mxu0 %v5251_v7  ;;  %v10042_v7 = vld [vmem:[#allocation7] ss:$0 sm:$0xff] }
 0x98e   :  { %12058 = vmatprep.subr.mxu0 %v17382_v63  ;;  %12036 = vmatpush3.msra.mxu1 %v5047_v29 }
 0x98f   :  { %12059 = vmatpush3.msra.mxu0 %v5250_v58  ;;  %12037 = vmatprep.subr.mxu1 %v17382_v63 }
 0x990   :  { %12010 = vmatmul.mubr.f32.gmra.mxu0 %v15976_v25  ;;  %12060 = vmatprep.subr.mxu0 %v17382_v63 }
 0x991   :  { %12012 = vmatprep.mubr.msk.f32.mxu0 %vm17453_vm5, %v17382_v63  ;;  %12061 = vmatpush3.msra.mxu0 %v5249_v27  ;;  %v16094_v27 = vsel %vm4854_vm14, 1.0, %v17382_v63 }
 0x992   :  { %12062 = vmatprep.subr.mxu0 %v17382_v63  ;;  %12038 = vmatpush3.msra.mxu1 %v5046_v2 }
 0x993   :  { %12063 = vmatpush3.msra.mxu0 %v5248_v49  ;;  %12039 = vmatprep.subr.mxu1 %v17382_v63 }
 0x994   :  { %12013 = vmatmul.mubr.f32.gmra.mxu0 %v15974_v21  ;;  %12064 = vmatprep.subr.mxu0 %v17382_v63 }
 0x995   :  { %12065 = vmatpush3.msra.mxu0 %v5247_v22  ;;  %12040 = vmatpush3.msra.mxu1 %v5045_v31 }
 0x996   :  { %12066 = vmatprep.subr.mxu0 %v17382_v63  ;;  %12041 = vmatprep.subr.mxu1 %v17382_v63 }
 0x997   :  { %12067 = vmatpush3.msra.mxu0 %v5246_v9  ;;  %12042 = vmatpush3.msra.mxu1 %v5044_v34  ;;  %v16099_v34 = vsel %vm4844_vm12, 1.0, %v17382_v63 }
 0x998   :  { %12068 = vmatprep.subr.mxu0 %v17382_v63  ;;  %12043 = vmatprep.subr.mxu1 %v17382_v63 }
 0x999   :  { %12069 = vmatpush3.msra.mxu0 %v5245_v30  ;;  %12044 = vmatpush3.msra.mxu1 %v5043_v41 }
 0x99a   :  { %12070 = vmatprep.subr.mxu0 %v17382_v63  ;;  %12045 = vmatprep.subr.mxu1 %v17382_v63 }
 0x99b   :  { %12071 = vmatpush3.msra.mxu0 %v5244_v51  ;;  %12047 = vmatprep.mubr.msk.f32.mxu1 %vm17453_vm5, %v17382_v63 }
 0x99c   :  { %12072 = vmatprep.subr.mxu0 %v17382_v63  ;;  %12088 = vmatprep.mubr.msk.f32.mxu0 %vm17453_vm5, %v17382_v63 }
 0x99d   :  { %12073 = vmatpush3.msra.mxu0 %v5243_v6  ;;  %12046 = vmatpush3.msra.mxu1 %v5042_v1  ;;  %v16103_v6 = vsel %vm4864_vm10, 1.0, %v17382_v63 }
 0x99e   :  { %12074 = vmatprep.subr.mxu0 %v17382_v63  ;;  %12097 = vmatprep.subr.mxu1 %v17382_v63 }
 0x99f   :  { %12075 = vmatpush3.msra.mxu0 %v5242_v38  ;;  %v5583_v38 = vld [vmem:[#allocation5 + $0x1f8] sm:$0xff] }
 0x9a0   :  { %12076 = vmatprep.subr.mxu0 %v17382_v63 }
 0x9a1   :  { %12077 = vmatpush3.msra.mxu0 %v5241_v39  ;;  %v5582_v39 = vld [vmem:[#allocation5 + $0x1f0] sm:$0xff] }
 0x9a2   :  { %12078 = vmatprep.subr.mxu0 %v17382_v63 }
 0x9a3   :  { %12079 = vmatpush3.msra.mxu0 %v5240_v8 }
 0x9a4   :  { %12080 = vmatprep.subr.mxu0 %v17382_v63 }
 0x9a5   :  { %12081 = vmatpush3.msra.mxu0 %v5239_v35  ;;  %v5581_v35 = vld [vmem:[#allocation5 + $0x1e8] sm:$0xff] }
 0x9a6   :  { %12082 = vmatprep.subr.mxu0 %v17382_v63 }
 0x9a7   :  { %12083 = vmatpush3.msra.mxu0 %v5238_v16 }
 0x9a8   :  { %12084 = vmatprep.subr.mxu0 %v17382_v63 }
 0x9a9   :  { %12085 = vmatpush3.msra.mxu0 %v5237_v23  ;;  %v5580_v23 = vld [vmem:[#allocation5 + $0x1e0] sm:$0xff] }
 0x9aa   :  { %12086 = vmatprep.subr.mxu0 %v17382_v63 }
 0x9ab   :  { %12087 = vmatpush3.msra.mxu0 %v5236_v42 }
 0x9ac   :  { %12168 = vmatprep.subr.mxu0 %v17382_v63 }
 0xa2c   :  { %v4942_v28 = vpop.f32.mrf.mxu0 }
 0xa2d   :  { %12048 = vmatmul.mubr.f32.vlgmr.msra.gmra.mxu1 %v4942_v28  ;;  %v5028_v54 = vpop.f32.mrf.mxu1  ;;  %v5579_v28 = vld [vmem:[#allocation5 + $0x1d8] sm:$0xff] }
 0xa2e   :  { %v11952_v36 = vpop.f32.mrf.mxu0  ;;  %12089 = vmatmul.mubr.f32.vlgmr.msra.gmra.mxu0 %v5028_v54  ;;  %12050 = vmatprep.mubr.msk.f32.mxu1 %vm17453_vm5, %v17382_v63 }
 0xa2f   :  { %v11967_v0 = vpop.f32.mrf.mxu1  ;;  %12091 = vmatprep.mubr.msk.f32.mxu0 %vm17453_vm5, %v17382_v63  ;;  %12169 = vmatpush3.msra.mxu0 %v5583_v38  ;;  %v5578_v36 = vld [vmem:[#allocation5 + $0x1d0] sm:$0xff] }
 0xa30   :  { %v4947_v3 = vpop.f32.mrf.mxu0  ;;  %12170 = vmatprep.subr.mxu0 %v17382_v63 }
 0xa31   :  { %12051 = vmatmul.mubr.f32.gmra.mxu1 %v4947_v3  ;;  %v5033_v55 = vpop.f32.mrf.mxu1  ;;  %12171 = vmatpush3.msra.mxu0 %v5582_v39  ;;  %v5577_v3 = vld [vmem:[#allocation5 + $0x1c8] sm:$0xff] }
 0xa32   :  { %v11955_v50 = vpop.f32.mrf.mxu0  ;;  %12092 = vmatmul.mubr.f32.gmra.mxu0 %v5033_v55  ;;  %12053 = vmatprep.mubr.msk.f32.mxu1 %vm17453_vm5, %v17382_v63 }
 0xa33   :  { %v11970_v53 = vpop.f32.mrf.mxu1  ;;  %12094 = vmatprep.mubr.msk.f32.mxu0 %vm17453_vm5, %v17382_v63  ;;  %12172 = vmatprep.subr.mxu0 %v17382_v63  ;;  %v5576_v50 = vld [vmem:[#allocation5 + $0x1c0] sm:$0xff] }
 0xa34   :  { %v4952_v48 = vpop.f32.mrf.mxu0  ;;  %12173 = vmatpush3.msra.mxu0 %v5581_v35 }
 0xa35   :  { %12054 = vmatmul.mubr.f32.gmra.mxu1 %v4952_v48  ;;  %v5038_v26 = vpop.f32.mrf.mxu1  ;;  %12174 = vmatprep.subr.mxu0 %v17382_v63  ;;  %v5575_v48 = vld [vmem:[#allocation5 + $0x1b8] sm:$0xff] }
 0xa36   :  { %12095 = vmatmul.mubr.f32.gmra.mxu0 %v5038_v26  ;;  %v11958_v14 = vpop.f32.mrf.mxu0  ;;  %12103 = vmatprep.mubr.msk.f32.mxu1 %vm17453_vm5, %v17382_v63 }
 0xa37   :  { %v11973_v56 = vpop.f32.mrf.mxu1  ;;  %12200 = vmatprep.mubr.msk.f32.mxu0 %vm17453_vm5, %v17382_v63  ;;  %12175 = vmatpush3.msra.mxu0 %v5580_v23  ;;  %v5574_v14 = vld [vmem:[#allocation5 + $0x1b0] sm:$0xff] }
 0xa38   :  { %12176 = vmatprep.subr.mxu0 %v17382_v63 }
 0xa39   :  { %12177 = vmatpush3.msra.mxu0 %v5579_v28 }
 0xa3a   :  { %12178 = vmatprep.subr.mxu0 %v17382_v63 }
 0xa3b   :  { %12179 = vmatpush3.msra.mxu0 %v5578_v36 }
 0xa3c   :  { %12180 = vmatprep.subr.mxu0 %v17382_v63 }
 0xa3d   :  { %12181 = vmatpush3.msra.mxu0 %v5577_v3 }
 0xa3e   :  { %12182 = vmatprep.subr.mxu0 %v17382_v63 }
 0xa3f   :  { %12183 = vmatpush3.msra.mxu0 %v5576_v50  ;;  %v5600_v50 = vld [vmem:[#allocation5 + $0x278] sm:$0xff] }
 0xa40   :  { %12184 = vmatprep.subr.mxu0 %v17382_v63 }
 0xa41   :  { %12185 = vmatpush3.msra.mxu0 %v5575_v48  ;;  %v5598_v48 = vld [vmem:[#allocation5 + $0x268] sm:$0xff] }
 0xa42   :  { %12186 = vmatprep.subr.mxu0 %v17382_v63 }
 0xa43   :  { %12187 = vmatpush3.msra.mxu0 %v5574_v14  ;;  %v5596_v14 = vld [vmem:[#allocation5 + $0x258] sm:$0xff] }
 0xa44   :  { %12188 = vmatprep.subr.mxu0 %v17382_v63 }
 0xa4c   :  { %v5141_v10 = vpop.f32.mrf.mxu0 }
 0xa4e   :  { %v12008_v12 = vpop.f32.mrf.mxu0 }
 0xa50   :  { %v5146_v4 = vpop.f32.mrf.mxu0 }
 0xa52   :  { %v12011_v60 = vpop.f32.mrf.mxu0 }
 0xa54   :  { %v5151_v40 = vpop.f32.mrf.mxu0 }
 0xa56   :  { %v12014_v45 = vpop.f32.mrf.mxu0 }
 0xaed   :  { %v5221_v19 = vpop.f32.mrf.mxu1 }
 0xaee   :  { %v5222_v52 = vadd.f32 %v5221_v19, %v5141_v10  ;;  %v5318_v61 = vpop.f32.mrf.mxu0  ;;  %v5573_v10 = vld [vmem:[#allocation5 + $0x1a8] sm:$0xff]  ;;  %v5571_v19 = vld [vmem:[#allocation5 + $0x198] sm:$0xff] }
 0xaef   :  { %v12049_v59 = vpop.f32.mrf.mxu1  ;;  %12189 = vmatpush3.msra.mxu0 %v5573_v10  ;;  %v5594_v10 = vld [vmem:[#allocation5 + $0x248] sm:$0xff] }
 0xaf0   :  { %v12090_v44 = vpop.f32.mrf.mxu0  ;;  %v5332_v43 = vadd.f32 %v5318_v61, %v5222_v52  ;;  %12190 = vmatprep.subr.mxu0 %v17382_v63 }
 0xaf1   :  { %v5226_v13 = vpop.f32.mrf.mxu1  ;;  %v5570_v44 = vld [vmem:[#allocation5 + $0x190] sm:$0xff] }
 0xaf2   :  { %v5227_v32 = vadd.f32 %v5226_v13, %v5146_v4  ;;  %v5323_v46 = vpop.f32.mrf.mxu0  ;;  %v5341_v49 = vadd.f32 %v10042_v7, %v5332_v43  ;;  %v5572_v4 = vld [vmem:[#allocation5 + $0x1a0] sm:$0xff] }
 0xaf3   :  { %v12052_v29 = vpop.f32.mrf.mxu1  ;;  %12191 = vmatpush3.msra.mxu0 %v5572_v4  ;;  %v5592_v4 = vld [vmem:[#allocation5 + $0x238] sm:$0xff] }
 0xaf4   :  { %v5333_v57 = vadd.f32 %v5323_v46, %v5227_v32  ;;  %v12093_v58 = vpop.f32.mrf.mxu0  ;;  %v5344_v24 = vmul.f32 %v5341_v49, %v16099_v34  ;;  %12192 = vmatprep.subr.mxu0 %v17382_v63  ;;  %v5569_v32 = vld [vmem:[#allocation5 + $0x188] sm:$0xff] }
 0xaf5   :  { %v5231_v2 = vpop.f32.mrf.mxu1  ;;  %12193 = vmatpush3.msra.mxu0 %v5571_v19  ;;  %v5588_v19 = vld [vmem:[#allocation5 + $0x218] sm:$0xff] }
 0xaf6   :  { %v5342_v22 = vadd.f32 %v10042_v7, %v5333_v57  ;;  %v5232_v31 = vadd.f32 %v5231_v2, %v5151_v40  ;;  %v5328_v9 = vpop.f32.mrf.mxu0  ;;  %12194 = vmatprep.subr.mxu0 %v17382_v63 }
 0xaf7   :  { %v12055_v30 = vpop.f32.mrf.mxu1  ;;  %12195 = vmatpush3.msra.mxu0 %v5570_v44  ;;  %v5777_v44 = vld [vmem:[#allocation5 + $0x2f8] sm:$0xff] }
 0xaf8   :  { %v5345_v47 = vmul.f32 %v5342_v22, %v16094_v27  ;;  %v5334_v41 = vadd.f32 %v5328_v9, %v5232_v31  ;;  %v12096_v51 = vpop.f32.mrf.mxu0  ;;  %12196 = vmatprep.subr.mxu0 %v17382_v63 }
 0xaf9   :  { %12197 = vmatpush3.msra.mxu0 %v5569_v32  ;;  %v5774_v32 = vld [vmem:[#allocation5 + $0x2e0] sm:$0xff] }
 0xafa   :  { %v5343_v8 = vadd.f32 %v10042_v7, %v5334_v41  ;;  %v5349_v16 = vadd.f32 %v5345_v47, %v5344_v24  ;;  %12198 = vmatprep.subr.mxu0 %v17382_v63  ;;  %v10043_v41 = vld [vmem:[#allocation8] ss:$0 sm:$0xff] }
 0xafc   :  { %v5346_v1 = vmul.f32 %v5343_v8, %v16103_v6 }
 0xafe   :  { %v5350_v42 = vadd.f32 %v5349_v16, %v5346_v1 }
 0xb00   :  { %v5351_v54 = vrot.slane %v5350_v42, 4 }
 0xb02   :  { %v5352_v0 = vadd.f32 %v5351_v54, %v5350_v42 }
 0xb04   :  { %v5353_v55 = vrot.slane %v5352_v0, 2 }
 0xb06   :  { %v5354_v53 = vadd.f32 %v5353_v55, %v5352_v0 }
 0xb08   :  { %v5355_v26 = vrot.slane %v5354_v53, 1 }
 0xb0a   :  { %v5356_v56 = vadd.f32 %v5355_v26, %v5354_v53  ;;  %v5599_v53 = vld [vmem:[#allocation5 + $0x270] sm:$0xff]  ;;  %v5597_v26 = vld [vmem:[#allocation5 + $0x260] sm:$0xff] }
 0xb0c   :  { %v5357_v12 = vmul.f32 0.0625, %v5356_v56  ;;  %v5595_v56 = vld [vmem:[#allocation5 + $0x250] sm:$0xff] }
 0xb0e   :  { %v5358_v60 = vsub.f32 %v5344_v24, %v5357_v12  ;;  %v5359_v40 = vsub.f32 %v5345_v47, %v5357_v12  ;;  %v5360_v45 = vsub.f32 %v5346_v1, %v5357_v12  ;;  %v10044_v24 = vld [vmem:[#allocation10] ss:$0 sm:$0xff]  ;;  %v5593_v12 = vld [vmem:[#allocation5 + $0x240] sm:$0xff] }
 0xb10   :  { %v5361_v52 = vmul.f32 %v5358_v60, %v16099_v34  ;;  %v5362_v61 = vmul.f32 %v5359_v40, %v16094_v27  ;;  %v5363_v59 = vmul.f32 %v5360_v45, %v16103_v6 }
 0xb12   :  { %v5364_v13 = vmul.f32 %v5361_v52, %v5361_v52  ;;  %v5365_v43 = vmul.f32 %v5362_v61, %v5362_v61  ;;  %v5366_v46 = vmul.f32 %v5363_v59, %v5363_v59  ;;  %v5587_v52 = vld [vmem:[#allocation5 + $0x210] sm:$0xff]  ;;  %v5586_v61 = vld [vmem:[#allocation5 + $0x208] sm:$0xff]  ;;  %v5585_v59 = vld [vmem:[#allocation5 + $0x200] sm:$0xff] }
 0xb14   :  { %v5367_v7 = vadd.f32 %v5365_v43, %v5364_v13  ;;  %v5776_v13 = vld [vmem:[#allocation5 + $0x2f0] sm:$0xff]  ;;  %v5775_v43 = vld [vmem:[#allocation5 + $0x2e8] sm:$0xff] }
 0xb16   :  { %v5368_v29 = vadd.f32 %v5367_v7, %v5366_v46  ;;  %v5773_v46 = vld [vmem:[#allocation5 + $0x2d8] sm:$0xff]  ;;  %v5772_v7 = vld [vmem:[#allocation5 + $0x2d0] sm:$0xff] }
 0xb18   :  { %v5369_v57 = vrot.slane %v5368_v29, 4 }
 0xb1a   :  { %v5370_v58 = vadd.f32 %v5369_v57, %v5368_v29  ;;  %v5771_v29 = vld [vmem:[#allocation5 + $0x2c8] sm:$0xff]  ;;  %v5770_v57 = vld [vmem:[#allocation5 + $0x2c0] sm:$0xff] }
 0xb1c   :  { %v5371_v2 = vrot.slane %v5370_v58, 2 }
 0xb1e   :  { %v5372_v49 = vadd.f32 %v5371_v2, %v5370_v58  ;;  %v5769_v58 = vld [vmem:[#allocation5 + $0x2b8] sm:$0xff]  ;;  %v5568_v2 = vld [vmem:[#allocation5 + $0x180] sm:$0xff] }
 0xb1f   :  { %12199 = vmatpush3.msra.mxu0 %v5568_v2 }
 0xb20   :  { %v5373_v22 = vrot.slane %v5372_v49, 1  ;;  %12250 = vmatprep.subr.mxu0 %v17382_v63 }
 0xb22   :  { %v5374_v31 = vadd.f32 %v5373_v22, %v5372_v49  ;;  %v5768_v49 = vld [vmem:[#allocation5 + $0x2b0] sm:$0xff]  ;;  %v5767_v22 = vld [vmem:[#allocation5 + $0x2a8] sm:$0xff] }
 0xb24   :  { %v5375_v9 = vmul.f32 0.0625, %v5374_v31  ;;  %v5766_v31 = vld [vmem:[#allocation5 + $0x2a0] sm:$0xff] }
 0xb26   :  { %v5376_v30 = vadd.f32 1e-05, %v5375_v9  ;;  %v5765_v9 = vld [vmem:[#allocation5 + $0x298] sm:$0xff] }
 0xb28   :  { %13363 = vrsqrt.f32 %v5376_v30  ;;  %v5764_v30 = vld [vmem:[#allocation5 + $0x290] sm:$0xff] }
 0xb35   :  { %v13364_v47 = vpop.eup %13363 }
 0xb36   :  { %v5380_v51 = vmul.f32 %v13364_v47, %v5360_v45  ;;  %v5379_v38 = vmul.f32 %v13364_v47, %v5359_v40  ;;  %v5378_v39 = vmul.f32 %v13364_v47, %v5358_v60  ;;  %v5591_v60 = vld [vmem:[#allocation5 + $0x230] sm:$0xff]  ;;  %v5590_v40 = vld [vmem:[#allocation5 + $0x228] sm:$0xff]  ;;  %v5589_v45 = vld [vmem:[#allocation5 + $0x220] sm:$0xff] }
 0xb37   :  { %v5763_v47 = vld [vmem:[#allocation5 + $0x288] sm:$0xff] }
 0xb38   :  { %v5389_v8 = vmul.f32 %v10043_v41, %v5380_v51  ;;  %v5388_v35 = vmul.f32 %v10043_v41, %v5379_v38  ;;  %v5387_v16 = vmul.f32 %v10043_v41, %v5378_v39  ;;  %v5762_v41 = vld [vmem:[#allocation5 + $0x280] sm:$0xff] }
 0xb3a   :  { %v5398_v1 = vadd.f32 %v10044_v24, %v5389_v8  ;;  %v5397_v23 = vadd.f32 %v10044_v24, %v5388_v35  ;;  %v5396_v42 = vadd.f32 %v10044_v24, %v5387_v16 }
 0xb3c   :  { %v5401_v28 = vmax.f32 %v5398_v1, 0.0  ;;  %v5400_v54 = vmax.f32 %v5397_v23, 0.0  ;;  %v5399_v0 = vmax.f32 %v5396_v42, 0.0 }
 0xb3e   :  { %v16126_v36 = vmul.f32 %v5401_v28, %v16103_v6  ;;  %v16130_v3 = vmul.f32 %v5400_v54, %v16094_v27  ;;  %v16135_v55 = vmul.f32 %v5399_v0, %v16099_v34 }
 0xb40   :  { %12098 = vmatpush3.msra.mxu1 %v16126_v36 }
 0xb41   :  { %12099 = vmatprep.subr.mxu1 %v17382_v63 }
 0xb42   :  { %12100 = vmatpush3.msra.mxu1 %v16130_v3 }
 0xb43   :  { %12101 = vmatprep.subr.mxu1 %v17382_v63 }
 0xb44   :  { %12102 = vmatpush3.msra.mxu1 %v16135_v55 }
 0xb45   :  { %12104 = vmatmul.mubr.msk.f32.vlgmr.msra.gmra.mxu1 %vm4869_vm13, %v15011_v37  ;;  %12112 = vmatprep.subr.mxu1 %v17382_v63 }
 0xb46   :  { %12113 = vmatpush3.msra.mxu1 %v16126_v36  ;;  %12106 = vmatprep.mubr.msk.f32.mxu1 %vm17453_vm5, %v17382_v63 }
 0xb47   :  { %12114 = vmatprep.subr.mxu1 %v17382_v63 }
 0xb48   :  { %12115 = vmatpush3.msra.mxu1 %v16130_v3 }
 0xb49   :  { %12107 = vmatmul.mubr.msk.f32.gmra.mxu1 %vm4869_vm13, %v15036_v20  ;;  %12116 = vmatprep.subr.mxu1 %v17382_v63 }
 0xb4a   :  { %12117 = vmatpush3.msra.mxu1 %v16135_v55  ;;  %12109 = vmatprep.mubr.msk.f32.mxu1 %vm17453_vm5, %v17382_v63 }
 0xb4b   :  { %12127 = vmatprep.subr.mxu1 %v17382_v63 }
 0xb4d   :  { %12110 = vmatmul.mubr.msk.f32.gmra.mxu1 %vm4869_vm13, %v15059_v17 }
 0xb4e   :  { %12118 = vmatprep.mubr.msk.f32.mxu1 %vm17453_vm5, %v17382_v63 }
 0xb51   :  { %12119 = vmatmul.mubr.msk.f32.vlgmr.msra.gmra.mxu1 %vm4869_vm13, %v15017_v11 }
 0xb52   :  { %12128 = vmatpush3.msra.mxu1 %v5600_v50  ;;  %12121 = vmatprep.mubr.msk.f32.mxu1 %vm17453_vm5, %v17382_v63 }
 0xb53   :  { %12129 = vmatprep.subr.mxu1 %v17382_v63 }
 0xb54   :  { %12130 = vmatpush3.msra.mxu1 %v5599_v53 }
 0xb55   :  { %12131 = vmatprep.subr.mxu1 %v17382_v63  ;;  %12122 = vmatmul.mubr.msk.f32.gmra.mxu1 %vm4869_vm13, %v15042_v5 }
 0xb56   :  { %12132 = vmatpush3.msra.mxu1 %v5598_v48  ;;  %12124 = vmatprep.mubr.msk.f32.mxu1 %vm17453_vm5, %v17382_v63 }
 0xb57   :  { %12133 = vmatprep.subr.mxu1 %v17382_v63 }
 0xb58   :  { %12134 = vmatpush3.msra.mxu1 %v5597_v26 }
 0xb59   :  { %12135 = vmatprep.subr.mxu1 %v17382_v63  ;;  %12125 = vmatmul.mubr.msk.f32.gmra.mxu1 %vm4869_vm13, %v15065_v62 }
 0xb5a   :  { %12136 = vmatpush3.msra.mxu1 %v5596_v14  ;;  %12159 = vmatprep.mubr.msk.f32.mxu1 %vm17453_vm5, %v17382_v63 }
 0xb5b   :  { %12137 = vmatprep.subr.mxu1 %v17382_v63 }
 0xb5c   :  { %12138 = vmatpush3.msra.mxu1 %v5595_v56 }
 0xb5d   :  { %12139 = vmatprep.subr.mxu1 %v17382_v63 }
 0xb5e   :  { %12140 = vmatpush3.msra.mxu1 %v5594_v10 }
 0xb5f   :  { %12141 = vmatprep.subr.mxu1 %v17382_v63 }
 0xb60   :  { %12142 = vmatpush3.msra.mxu1 %v5593_v12 }
 0xb61   :  { %12143 = vmatprep.subr.mxu1 %v17382_v63 }
 0xb62   :  { %12144 = vmatpush3.msra.mxu1 %v5592_v4 }
 0xb63   :  { %12145 = vmatprep.subr.mxu1 %v17382_v63 }
 0xb64   :  { %12146 = vmatpush3.msra.mxu1 %v5591_v60 }
 0xb65   :  { %12147 = vmatprep.subr.mxu1 %v17382_v63 }
 0xb66   :  { %12148 = vmatpush3.msra.mxu1 %v5590_v40 }
 0xb67   :  { %12149 = vmatprep.subr.mxu1 %v17382_v63 }
 0xb68   :  { %12150 = vmatpush3.msra.mxu1 %v5589_v45 }
 0xb69   :  { %12151 = vmatprep.subr.mxu1 %v17382_v63 }
 0xb6a   :  { %12152 = vmatpush3.msra.mxu1 %v5588_v19 }
 0xb6b   :  { %12153 = vmatprep.subr.mxu1 %v17382_v63 }
 0xb6c   :  { %12154 = vmatpush3.msra.mxu1 %v5587_v52  ;;  %v10051_v52 = vld [vmem:[#allocation7 + $0x1] ss:$0 sm:$0xff] }
 0xb6d   :  { %12155 = vmatprep.subr.mxu1 %v17382_v63 }
 0xb6e   :  { %12156 = vmatpush3.msra.mxu1 %v5586_v61 }
 0xb6f   :  { %12157 = vmatprep.subr.mxu1 %v17382_v63 }
 0xb70   :  { %12158 = vmatpush3.msra.mxu1 %v5585_v59 }
 0xb71   :  { %12160 = vmatmul.mubr.f32.vlgmr.msra.gmra.mxu1 %v16135_v55  ;;  %12209 = vmatprep.subr.mxu1 %v17382_v63 }
 0xb72   :  { %12162 = vmatprep.mubr.msk.f32.mxu1 %vm17453_vm5, %v17382_v63  ;;  %12210 = vmatpush3.msra.mxu1 %v5777_v44 }
 0xb73   :  { %12211 = vmatprep.subr.mxu1 %v17382_v63 }
 0xb74   :  { %12212 = vmatpush3.msra.mxu1 %v5776_v13 }
 0xb75   :  { %12163 = vmatmul.mubr.f32.gmra.mxu1 %v16130_v3  ;;  %12213 = vmatprep.subr.mxu1 %v17382_v63 }
 0xb76   :  { %12165 = vmatprep.mubr.msk.f32.mxu1 %vm17453_vm5, %v17382_v63  ;;  %12214 = vmatpush3.msra.mxu1 %v5775_v43 }
 0xb77   :  { %12215 = vmatprep.subr.mxu1 %v17382_v63 }
 0xb78   :  { %12216 = vmatpush3.msra.mxu1 %v5774_v32 }
 0xb79   :  { %12166 = vmatmul.mubr.f32.gmra.mxu1 %v16126_v36  ;;  %12217 = vmatprep.subr.mxu1 %v17382_v63 }
 0xb7a   :  { %12218 = vmatpush3.msra.mxu1 %v5773_v46  ;;  %12241 = vmatprep.mubr.msk.f32.mxu1 %vm17453_vm5, %v17382_v63 }
 0xb7b   :  { %12219 = vmatprep.subr.mxu1 %v17382_v63 }
 0xb7c   :  { %12220 = vmatpush3.msra.mxu1 %v5772_v7 }
 0xb7d   :  { %12221 = vmatprep.subr.mxu1 %v17382_v63 }
 0xb7e   :  { %12222 = vmatpush3.msra.mxu1 %v5771_v29 }
 0xb7f   :  { %12223 = vmatprep.subr.mxu1 %v17382_v63 }
 0xb80   :  { %12224 = vmatpush3.msra.mxu1 %v5770_v57 }
 0xb81   :  { %12225 = vmatprep.subr.mxu1 %v17382_v63 }
 0xb82   :  { %12226 = vmatpush3.msra.mxu1 %v5769_v58 }
 0xb83   :  { %12227 = vmatprep.subr.mxu1 %v17382_v63 }
 0xb84   :  { %12228 = vmatpush3.msra.mxu1 %v5768_v49  ;;  %v6114_v49 = vld [vmem:[#allocation5 + $0x378] sm:$0xff] }
 0xb85   :  { %12229 = vmatprep.subr.mxu1 %v17382_v63 }
 0xb86   :  { %12230 = vmatpush3.msra.mxu1 %v5767_v22  ;;  %v6113_v22 = vld [vmem:[#allocation5 + $0x370] sm:$0xff] }
 0xb87   :  { %12231 = vmatprep.subr.mxu1 %v17382_v63 }
 0xb88   :  { %12232 = vmatpush3.msra.mxu1 %v5766_v31 }
 0xb89   :  { %12233 = vmatprep.subr.mxu1 %v17382_v63 }
 0xb8a   :  { %12234 = vmatpush3.msra.mxu1 %v5765_v9 }
 0xb8b   :  { %12235 = vmatprep.subr.mxu1 %v17382_v63 }
 0xb8c   :  { %12236 = vmatpush3.msra.mxu1 %v5764_v30  ;;  %v6112_v30 = vld [vmem:[#allocation5 + $0x368] sm:$0xff] }
 0xb8d   :  { %12237 = vmatprep.subr.mxu1 %v17382_v63 }
 0xb8e   :  { %12238 = vmatpush3.msra.mxu1 %v5763_v47 }
 0xb8f   :  { %12239 = vmatprep.subr.mxu1 %v17382_v63 }
 0xb90   :  { %12240 = vmatpush3.msra.mxu1 %v5762_v41  ;;  %v6111_v41 = vld [vmem:[#allocation5 + $0x360] sm:$0xff] }
 0xb91   :  { %12321 = vmatprep.subr.mxu1 %v17382_v63 }
 0xc05   :  { %v5473_v51 = vpop.f32.mrf.mxu1 }
 0xc06   :  { %12201 = vmatmul.mubr.f32.vlgmr.msra.gmra.mxu0 %v5473_v51 }
 0xc07   :  { %v12105_v38 = vpop.f32.mrf.mxu1  ;;  %12203 = vmatprep.mubr.msk.f32.mxu0 %vm17453_vm5, %v17382_v63 }
 0xc08   :  { %v6110_v38 = vld [vmem:[#allocation5 + $0x358] sm:$0xff] }
 0xc09   :  { %v5478_v39 = vpop.f32.mrf.mxu1 }
 0xc0a   :  { %12204 = vmatmul.mubr.f32.gmra.mxu0 %v5478_v39 }
 0xc0b   :  { %v12108_v24 = vpop.f32.mrf.mxu1  ;;  %12206 = vmatprep.mubr.msk.f32.mxu0 %vm17453_vm5, %v17382_v63 }
 0xc0c   :  { %v6109_v24 = vld [vmem:[#allocation5 + $0x350] sm:$0xff] }
 0xc0d   :  { %v5483_v8 = vpop.f32.mrf.mxu1 }
 0xc0e   :  { %12207 = vmatmul.mubr.f32.gmra.mxu0 %v5483_v8 }
 0xc0f   :  { %v12111_v35 = vpop.f32.mrf.mxu1  ;;  %12256 = vmatprep.mubr.msk.f32.mxu0 %vm17453_vm5, %v17382_v63 }
 0xc10   :  { %v6108_v35 = vld [vmem:[#allocation5 + $0x348] sm:$0xff] }
 0xc11   :  { %v5553_v16 = vpop.f32.mrf.mxu1 }
 0xc12   :  { %12242 = vmatmul.mubr.f32.vlgmr.msra.gmra.mxu1 %v5553_v16 }
 0xc13   :  { %v12120_v1 = vpop.f32.mrf.mxu1  ;;  %12244 = vmatprep.mubr.msk.f32.mxu1 %vm17453_vm5, %v17382_v63  ;;  %12322 = vmatpush3.msra.mxu1 %v6114_v49  ;;  %v10053_v49 = vld [vmem:[#allocation10 + $0x1] ss:$0 sm:$0xff] }
 0xc14   :  { %12323 = vmatprep.subr.mxu1 %v17382_v63  ;;  %v6107_v1 = vld [vmem:[#allocation5 + $0x340] sm:$0xff] }
 0xc15   :  { %v5558_v23 = vpop.f32.mrf.mxu1  ;;  %12324 = vmatpush3.msra.mxu1 %v6113_v22 }
 0xc16   :  { %12245 = vmatmul.mubr.f32.gmra.mxu1 %v5558_v23  ;;  %12325 = vmatprep.subr.mxu1 %v17382_v63 }
 0xc17   :  { %v12123_v42 = vpop.f32.mrf.mxu1  ;;  %12247 = vmatprep.mubr.msk.f32.mxu1 %vm17453_vm5, %v17382_v63  ;;  %12326 = vmatpush3.msra.mxu1 %v6112_v30 }
 0xc18   :  { %12327 = vmatprep.subr.mxu1 %v17382_v63  ;;  %v6106_v42 = vld [vmem:[#allocation5 + $0x338] sm:$0xff] }
 0xc19   :  { %v5563_v28 = vpop.f32.mrf.mxu1  ;;  %12328 = vmatpush3.msra.mxu1 %v6111_v41 }
 0xc1a   :  { %12248 = vmatmul.mubr.f32.gmra.mxu1 %v5563_v28  ;;  %12329 = vmatprep.subr.mxu1 %v17382_v63 }
 0xc1b   :  { %v12126_v54 = vpop.f32.mrf.mxu1  ;;  %12353 = vmatprep.mubr.msk.f32.mxu1 %vm17453_vm5, %v17382_v63  ;;  %12330 = vmatpush3.msra.mxu1 %v6110_v38 }
 0xc1c   :  { %12331 = vmatprep.subr.mxu1 %v17382_v63  ;;  %v6105_v54 = vld [vmem:[#allocation5 + $0x330] sm:$0xff] }
 0xc1d   :  { %12332 = vmatpush3.msra.mxu1 %v6109_v24 }
 0xc1e   :  { %12333 = vmatprep.subr.mxu1 %v17382_v63 }
 0xc1f   :  { %12334 = vmatpush3.msra.mxu1 %v6108_v35 }
 0xc20   :  { %12335 = vmatprep.subr.mxu1 %v17382_v63 }
 0xc21   :  { %12336 = vmatpush3.msra.mxu1 %v6107_v1 }
 0xc22   :  { %12337 = vmatprep.subr.mxu1 %v17382_v63 }
 0xc23   :  { %12338 = vmatpush3.msra.mxu1 %v6106_v42  ;;  %v6128_v42 = vld [vmem:[#allocation5 + $0x3e0] sm:$0xff] }
 0xc24   :  { %12339 = vmatprep.subr.mxu1 %v17382_v63 }
 0xc25   :  { %12340 = vmatpush3.msra.mxu1 %v6105_v54  ;;  %v6126_v54 = vld [vmem:[#allocation5 + $0x3d0] sm:$0xff] }
 0xc26   :  { %12341 = vmatprep.subr.mxu1 %v17382_v63 }
 0xc31   :  { %v5667_v36 = vpop.f32.mrf.mxu1 }
 0xc33   :  { %v12161_v0 = vpop.f32.mrf.mxu1 }
 0xc34   :  { %v6104_v0 = vld [vmem:[#allocation5 + $0x328] sm:$0xff] }
 0xc35   :  { %v5672_v3 = vpop.f32.mrf.mxu1  ;;  %12342 = vmatpush3.msra.mxu1 %v6104_v0  ;;  %v6124_v0 = vld [vmem:[#allocation5 + $0x3c0] sm:$0xff] }
 0xc36   :  { %12343 = vmatprep.subr.mxu1 %v17382_v63 }
 0xc37   :  { %v12164_v55 = vpop.f32.mrf.mxu1 }
 0xc39   :  { %v5677_v50 = vpop.f32.mrf.mxu1 }
 0xc3b   :  { %v12167_v53 = vpop.f32.mrf.mxu1 }
 0xc3c   :  { %v6103_v53 = vld [vmem:[#allocation5 + $0x320] sm:$0xff] }
 0xc3d   :  { %12344 = vmatpush3.msra.mxu1 %v6103_v53  ;;  %v6120_v53 = vld [vmem:[#allocation5 + $0x3a0] sm:$0xff] }
 0xc3e   :  { %12345 = vmatprep.subr.mxu1 %v17382_v63 }
 0xcc6   :  { %v5747_v48 = vpop.f32.mrf.mxu0 }
 0xcc7   :  { %v5748_v60 = vadd.f32 %v5747_v48, %v5667_v36 }
 0xcc8   :  { %v12202_v26 = vpop.f32.mrf.mxu0 }
 0xcca   :  { %v5752_v14 = vpop.f32.mrf.mxu0 }
 0xccb   :  { %v5753_v45 = vadd.f32 %v5752_v14, %v5672_v3 }
 0xccc   :  { %v12205_v56 = vpop.f32.mrf.mxu0 }
 0xccd   :  { %v6102_v56 = vld [vmem:[#allocation5 + $0x318] sm:$0xff] }
 0xcce   :  { %v5757_v10 = vpop.f32.mrf.mxu0  ;;  %12346 = vmatpush3.msra.mxu1 %v6102_v56  ;;  %v6116_v56 = vld [vmem:[#allocation5 + $0x380] sm:$0xff] }
 0xccf   :  { %v5758_v13 = vadd.f32 %v5757_v10, %v5677_v50  ;;  %12347 = vmatprep.subr.mxu1 %v17382_v63 }
 0xcd0   :  { %v12208_v12 = vpop.f32.mrf.mxu0 }
 0xcd2   :  { %v5844_v4 = vpop.f32.mrf.mxu1 }
 0xcd3   :  { %v5858_v19 = vadd.f32 %v5844_v4, %v5748_v60  ;;  %v6101_v4 = vld [vmem:[#allocation5 + $0x310] sm:$0xff] }
 0xcd4   :  { %v12243_v40 = vpop.f32.mrf.mxu1  ;;  %12348 = vmatpush3.msra.mxu1 %v6101_v4  ;;  %v6306_v4 = vld [vmem:[#allocation5 + $0x468] sm:$0xff] }
 0xcd5   :  { %v5867_v43 = vadd.f32 %v10051_v52, %v5858_v19  ;;  %12349 = vmatprep.subr.mxu1 %v17382_v63 }
 0xcd6   :  { %v5849_v61 = vpop.f32.mrf.mxu1 }
 0xcd7   :  { %v5859_v59 = vadd.f32 %v5849_v61, %v5753_v45  ;;  %v5870_v58 = vmul.f32 %v5867_v43, %v16099_v34  ;;  %v6100_v45 = vld [vmem:[#allocation5 + $0x308] sm:$0xff] }
 0xcd8   :  { %v12246_v44 = vpop.f32.mrf.mxu1  ;;  %12350 = vmatpush3.msra.mxu1 %v6100_v45  ;;  %v6303_v45 = vld [vmem:[#allocation5 + $0x450] sm:$0xff] }
 0xcd9   :  { %v5868_v32 = vadd.f32 %v10051_v52, %v5859_v59  ;;  %12351 = vmatprep.subr.mxu1 %v17382_v63 }
 0xcda   :  { %v5854_v46 = vpop.f32.mrf.mxu1 }
 0xcdb   :  { %v5871_v7 = vmul.f32 %v5868_v32, %v16094_v27  ;;  %v5860_v29 = vadd.f32 %v5854_v46, %v5758_v13 }
 0xcdc   :  { %v12249_v57 = vpop.f32.mrf.mxu1 }
 0xcdd   :  { %v5869_v2 = vadd.f32 %v10051_v52, %v5860_v29  ;;  %v5877_v31 = vadd.f32 %v5871_v7, %v5870_v58  ;;  %v10052_v29 = vld [vmem:[#allocation8 + $0x1] ss:$0 sm:$0xff] }
 0xcdf   :  { %v5872_v9 = vmul.f32 %v5869_v2, %v16103_v6 }
 0xce1   :  { %v5878_v47 = vadd.f32 %v5877_v31, %v5872_v9 }
 0xce3   :  { %v5879_v51 = vrot.slane %v5878_v47, 4 }
 0xce5   :  { %v5880_v39 = vadd.f32 %v5879_v51, %v5878_v47 }
 0xce7   :  { %v5881_v8 = vrot.slane %v5880_v39, 2 }
 0xce9   :  { %v5882_v16 = vadd.f32 %v5881_v8, %v5880_v39 }
 0xceb   :  { %v5883_v23 = vrot.slane %v5882_v16, 1 }
 0xced   :  { %v5884_v28 = vadd.f32 %v5883_v23, %v5882_v16  ;;  %v6129_v23 = vld [vmem:[#allocation5 + $0x3e8] sm:$0xff] }
 0xcef   :  { %v5885_v36 = vmul.f32 0.0625, %v5884_v28  ;;  %v6127_v28 = vld [vmem:[#allocation5 + $0x3d8] sm:$0xff] }
 0xcf1   :  { %v5886_v3 = vsub.f32 %v5870_v58, %v5885_v36  ;;  %v5887_v55 = vsub.f32 %v5871_v7, %v5885_v36  ;;  %v5888_v50 = vsub.f32 %v5872_v9, %v5885_v36  ;;  %v6125_v36 = vld [vmem:[#allocation5 + $0x3c8] sm:$0xff] }
 0xcf3   :  { %v5889_v48 = vmul.f32 %v5886_v3, %v16099_v34  ;;  %v5890_v26 = vmul.f32 %v5887_v55, %v16094_v27  ;;  %v5891_v14 = vmul.f32 %v5888_v50, %v16103_v6 }
 0xcf5   :  { %v5892_v10 = vmul.f32 %v5889_v48, %v5889_v48  ;;  %v5893_v12 = vmul.f32 %v5890_v26, %v5890_v26  ;;  %v5894_v60 = vmul.f32 %v5891_v14, %v5891_v14  ;;  %v6119_v48 = vld [vmem:[#allocation5 + $0x398] sm:$0xff]  ;;  %v6118_v26 = vld [vmem:[#allocation5 + $0x390] sm:$0xff]  ;;  %v6117_v14 = vld [vmem:[#allocation5 + $0x388] sm:$0xff] }
 0xcf7   :  { %v5895_v40 = vadd.f32 %v5893_v12, %v5892_v10  ;;  %v6308_v10 = vld [vmem:[#allocation5 + $0x478] sm:$0xff]  ;;  %v6307_v12 = vld [vmem:[#allocation5 + $0x470] sm:$0xff] }
 0xcf9   :  { %v5896_v19 = vadd.f32 %v5895_v40, %v5894_v60  ;;  %v6305_v60 = vld [vmem:[#allocation5 + $0x460] sm:$0xff]  ;;  %v6304_v40 = vld [vmem:[#allocation5 + $0x458] sm:$0xff] }
 0xcfb   :  { %v5897_v52 = vrot.slane %v5896_v19, 4 }
 0xcfd   :  { %v5898_v61 = vadd.f32 %v5897_v52, %v5896_v19  ;;  %v6302_v19 = vld [vmem:[#allocation5 + $0x448] sm:$0xff]  ;;  %v6301_v52 = vld [vmem:[#allocation5 + $0x440] sm:$0xff] }
 0xcff   :  { %v5899_v59 = vrot.slane %v5898_v61, 2 }
 0xd01   :  { %v5900_v44 = vadd.f32 %v5899_v59, %v5898_v61  ;;  %v6300_v61 = vld [vmem:[#allocation5 + $0x438] sm:$0xff]  ;;  %v6099_v59 = vld [vmem:[#allocation5 + $0x300] sm:$0xff] }
 0xd02   :  { %12352 = vmatpush3.msra.mxu1 %v6099_v59  ;;  %v6641_v59 = vld [vmem:[#allocation5 + $0x4f0] sm:$0xff] }
 0xd03   :  { %v5901_v13 = vrot.slane %v5900_v44, 1  ;;  %12403 = vmatprep.subr.mxu1 %v17382_v63 }
 0xd05   :  { %v5902_v43 = vadd.f32 %v5901_v13, %v5900_v44  ;;  %v6299_v44 = vld [vmem:[#allocation5 + $0x430] sm:$0xff]  ;;  %v6298_v13 = vld [vmem:[#allocation5 + $0x428] sm:$0xff] }
 0xd07   :  { %v5903_v32 = vmul.f32 0.0625, %v5902_v43  ;;  %v6297_v43 = vld [vmem:[#allocation5 + $0x420] sm:$0xff] }
 0xd09   :  { %v5904_v46 = vadd.f32 1e-05, %v5903_v32  ;;  %v6296_v32 = vld [vmem:[#allocation5 + $0x418] sm:$0xff] }
 0xd0b   :  { %13365 = vrsqrt.f32 %v5904_v46  ;;  %v6295_v46 = vld [vmem:[#allocation5 + $0x410] sm:$0xff] }
 0xd18   :  { %v13366_v7 = vpop.eup %13365 }
 0xd19   :  { %v5908_v57 = vmul.f32 %v13366_v7, %v5888_v50  ;;  %v5907_v58 = vmul.f32 %v13366_v7, %v5887_v55  ;;  %v5906_v2 = vmul.f32 %v13366_v7, %v5886_v3  ;;  %v6123_v3 = vld [vmem:[#allocation5 + $0x3b8] sm:$0xff]  ;;  %v6122_v55 = vld [vmem:[#allocation5 + $0x3b0] sm:$0xff]  ;;  %v6121_v50 = vld [vmem:[#allocation5 + $0x3a8] sm:$0xff] }
 0xd1a   :  { %v6294_v7 = vld [vmem:[#allocation5 + $0x408] sm:$0xff] }
 0xd1b   :  { %v5917_v22 = vmul.f32 %v10052_v29, %v5908_v57  ;;  %v5916_v31 = vmul.f32 %v10052_v29, %v5907_v58  ;;  %v5915_v9 = vmul.f32 %v10052_v29, %v5906_v2  ;;  %v6293_v29 = vld [vmem:[#allocation5 + $0x400] sm:$0xff] }
 0xd1d   :  { %v5926_v30 = vadd.f32 %v10053_v49, %v5917_v22  ;;  %v5925_v47 = vadd.f32 %v10053_v49, %v5916_v31  ;;  %v5924_v41 = vadd.f32 %v10053_v49, %v5915_v9 }
 0xd1f   :  { %v5929_v51 = vadd.f32 %v5926_v30, %v15974_v21  ;;  %v5928_v38 = vadd.f32 %v5925_v47, %v15976_v25  ;;  %v5927_v39 = vadd.f32 %v5924_v41, %v15982_v33  ;;  %v6131_v25 = vld [vmem:[#allocation5 + $0x3f8] sm:$0xff]  ;;  %v6130_v33 = vld [vmem:[#allocation5 + $0x3f0] sm:$0xff] }
 0xd21   :  { %v5932_v24 = vmax.f32 %v5929_v51, 0.0  ;;  %v5931_v8 = vmax.f32 %v5928_v38, 0.0  ;;  %v5930_v16 = vmax.f32 %v5927_v39, 0.0 }
 0xd23   :  { %v16249_v35 = vmul.f32 %v5932_v24, %v16103_v6  ;;  %v16253_v1 = vmul.f32 %v5931_v8, %v16094_v27  ;;  %v16258_v21 = vmul.f32 %v5930_v16, %v16099_v34 }
 0xd25   :  { %12251 = vmatpush3.msra.mxu0 %v16249_v35 }
 0xd26   :  { %12252 = vmatprep.subr.mxu0 %v17382_v63 }
 0xd27   :  { %12253 = vmatpush3.msra.mxu0 %v16253_v1 }
 0xd28   :  { %12254 = vmatprep.subr.mxu0 %v17382_v63 }
 0xd29   :  { %12255 = vmatpush3.msra.mxu0 %v16258_v21 }
 0xd2a   :  { %12257 = vmatmul.mubr.msk.f32.vlgmr.msra.gmra.mxu0 %vm4869_vm13, %v15011_v37  ;;  %12265 = vmatprep.subr.mxu0 %v17382_v63 }
 0xd2b   :  { %12266 = vmatpush3.msra.mxu0 %v16249_v35  ;;  %12259 = vmatprep.mubr.msk.f32.mxu0 %vm17453_vm5, %v17382_v63 }
 0xd2c   :  { %12267 = vmatprep.subr.mxu0 %v17382_v63 }
 0xd2d   :  { %12268 = vmatpush3.msra.mxu0 %v16253_v1 }
 0xd2e   :  { %12260 = vmatmul.mubr.msk.f32.gmra.mxu0 %vm4869_vm13, %v15036_v20  ;;  %12269 = vmatprep.subr.mxu0 %v17382_v63 }
 0xd2f   :  { %12270 = vmatpush3.msra.mxu0 %v16258_v21  ;;  %12262 = vmatprep.mubr.msk.f32.mxu0 %vm17453_vm5, %v17382_v63 }
 0xd30   :  { %12280 = vmatprep.subr.mxu0 %v17382_v63 }
 0xd32   :  { %12263 = vmatmul.mubr.msk.f32.gmra.mxu0 %vm4869_vm13, %v15059_v17 }
 0xd33   :  { %12271 = vmatprep.mubr.msk.f32.mxu0 %vm17453_vm5, %v17382_v63 }
 0xd36   :  { %12272 = vmatmul.mubr.msk.f32.vlgmr.msra.gmra.mxu0 %vm4869_vm13, %v15017_v11 }
 0xd37   :  { %12281 = vmatpush3.msra.mxu0 %v6131_v25  ;;  %12274 = vmatprep.mubr.msk.f32.mxu0 %vm17453_vm5, %v17382_v63 }
 0xd38   :  { %12282 = vmatprep.subr.mxu0 %v17382_v63 }
 0xd39   :  { %12283 = vmatpush3.msra.mxu0 %v6130_v33 }
 0xd3a   :  { %12284 = vmatprep.subr.mxu0 %v17382_v63  ;;  %12275 = vmatmul.mubr.msk.f32.gmra.mxu0 %vm4869_vm13, %v15042_v5 }
 0xd3b   :  { %12285 = vmatpush3.msra.mxu0 %v6129_v23  ;;  %12277 = vmatprep.mubr.msk.f32.mxu0 %vm17453_vm5, %v17382_v63 }
 0xd3c   :  { %12286 = vmatprep.subr.mxu0 %v17382_v63 }
 0xd3d   :  { %12287 = vmatpush3.msra.mxu0 %v6128_v42 }
 0xd3e   :  { %12288 = vmatprep.subr.mxu0 %v17382_v63  ;;  %12278 = vmatmul.mubr.msk.f32.gmra.mxu0 %vm4869_vm13, %v15065_v62 }
 0xd3f   :  { %12289 = vmatpush3.msra.mxu0 %v6127_v28  ;;  %12312 = vmatprep.mubr.msk.f32.mxu0 %vm17453_vm5, %v17382_v63 }
 0xd40   :  { %12290 = vmatprep.subr.mxu0 %v17382_v63 }
 0xd41   :  { %12291 = vmatpush3.msra.mxu0 %v6126_v54 }
 0xd42   :  { %12292 = vmatprep.subr.mxu0 %v17382_v63 }
 0xd43   :  { %12293 = vmatpush3.msra.mxu0 %v6125_v36 }
 0xd44   :  { %12294 = vmatprep.subr.mxu0 %v17382_v63 }
 0xd45   :  { %12295 = vmatpush3.msra.mxu0 %v6124_v0 }
 0xd46   :  { %12296 = vmatprep.subr.mxu0 %v17382_v63 }
 0xd47   :  { %12297 = vmatpush3.msra.mxu0 %v6123_v3 }
 0xd48   :  { %12298 = vmatprep.subr.mxu0 %v17382_v63 }
 0xd49   :  { %12299 = vmatpush3.msra.mxu0 %v6122_v55 }
 0xd4a   :  { %12300 = vmatprep.subr.mxu0 %v17382_v63 }
 0xd4b   :  { %12301 = vmatpush3.msra.mxu0 %v6121_v50 }
 0xd4c   :  { %12302 = vmatprep.subr.mxu0 %v17382_v63 }
 0xd4d   :  { %12303 = vmatpush3.msra.mxu0 %v6120_v53 }
 0xd4e   :  { %12304 = vmatprep.subr.mxu0 %v17382_v63 }
 0xd4f   :  { %12305 = vmatpush3.msra.mxu0 %v6119_v48 }
 0xd50   :  { %12306 = vmatprep.subr.mxu0 %v17382_v63 }
 0xd51   :  { %12307 = vmatpush3.msra.mxu0 %v6118_v26  ;;  %v10060_v26 = vld [vmem:[#allocation7 + $0x2] ss:$0 sm:$0xff] }
 0xd52   :  { %12308 = vmatprep.subr.mxu0 %v17382_v63 }
 0xd53   :  { %12309 = vmatpush3.msra.mxu0 %v6117_v14 }
 0xd54   :  { %12310 = vmatprep.subr.mxu0 %v17382_v63 }
 0xd55   :  { %12311 = vmatpush3.msra.mxu0 %v6116_v56 }
 0xd56   :  { %12313 = vmatmul.mubr.f32.vlgmr.msra.gmra.mxu0 %v16258_v21  ;;  %12362 = vmatprep.subr.mxu0 %v17382_v63 }
 0xd57   :  { %12315 = vmatprep.mubr.msk.f32.mxu0 %vm17453_vm5, %v17382_v63  ;;  %12363 = vmatpush3.msra.mxu0 %v6308_v10 }
 0xd58   :  { %12364 = vmatprep.subr.mxu0 %v17382_v63 }
 0xd59   :  { %12365 = vmatpush3.msra.mxu0 %v6307_v12 }
 0xd5a   :  { %12316 = vmatmul.mubr.f32.gmra.mxu0 %v16253_v1  ;;  %12366 = vmatprep.subr.mxu0 %v17382_v63 }
 0xd5b   :  { %12318 = vmatprep.mubr.msk.f32.mxu0 %vm17453_vm5, %v17382_v63  ;;  %12367 = vmatpush3.msra.mxu0 %v6306_v4 }
 0xd5c   :  { %12368 = vmatprep.subr.mxu0 %v17382_v63 }
 0xd5d   :  { %12369 = vmatpush3.msra.mxu0 %v6305_v60 }
 0xd5e   :  { %12319 = vmatmul.mubr.f32.gmra.mxu0 %v16249_v35  ;;  %12370 = vmatprep.subr.mxu0 %v17382_v63 }
 0xd5f   :  { %12371 = vmatpush3.msra.mxu0 %v6304_v40  ;;  %12394 = vmatprep.mubr.msk.f32.mxu0 %vm17453_vm5, %v17382_v63 }
 0xd60   :  { %12372 = vmatprep.subr.mxu0 %v17382_v63 }
 0xd61   :  { %12373 = vmatpush3.msra.mxu0 %v6303_v45 }
 0xd62   :  { %12374 = vmatprep.subr.mxu0 %v17382_v63 }
 0xd63   :  { %12375 = vmatpush3.msra.mxu0 %v6302_v19 }
 0xd64   :  { %12376 = vmatprep.subr.mxu0 %v17382_v63 }
 0xd65   :  { %12377 = vmatpush3.msra.mxu0 %v6301_v52 }
 0xd66   :  { %12378 = vmatprep.subr.mxu0 %v17382_v63 }
 0xd67   :  { %12379 = vmatpush3.msra.mxu0 %v6300_v61  ;;  %v6642_v61 = vld [vmem:[#allocation5 + $0x4f8] sm:$0xff] }
 0xd68   :  { %12380 = vmatprep.subr.mxu0 %v17382_v63 }
 0xd69   :  { %12381 = vmatpush3.msra.mxu0 %v6299_v44 }
 0xd6a   :  { %12382 = vmatprep.subr.mxu0 %v17382_v63 }
 0xd6b   :  { %12383 = vmatpush3.msra.mxu0 %v6298_v13 }
 0xd6c   :  { %12384 = vmatprep.subr.mxu0 %v17382_v63 }
 0xd6d   :  { %12385 = vmatpush3.msra.mxu0 %v6297_v43  ;;  %v6640_v43 = vld [vmem:[#allocation5 + $0x4e8] sm:$0xff] }
 0xd6e   :  { %12386 = vmatprep.subr.mxu0 %v17382_v63 }
 0xd6f   :  { %12387 = vmatpush3.msra.mxu0 %v6296_v32 }
 0xd70   :  { %12388 = vmatprep.subr.mxu0 %v17382_v63 }
 0xd71   :  { %12389 = vmatpush3.msra.mxu0 %v6295_v46 }
 0xd72   :  { %12390 = vmatprep.subr.mxu0 %v17382_v63 }
 0xd73   :  { %12391 = vmatpush3.msra.mxu0 %v6294_v7  ;;  %v6639_v7 = vld [vmem:[#allocation5 + $0x4e0] sm:$0xff] }
 0xd74   :  { %12392 = vmatprep.subr.mxu0 %v17382_v63 }
 0xd75   :  { %12393 = vmatpush3.msra.mxu0 %v6293_v29 }
 0xd76   :  { %12474 = vmatprep.subr.mxu0 %v17382_v63 }
 0xdea   :  { %v6004_v57 = vpop.f32.mrf.mxu0 }
 0xdeb   :  { %12354 = vmatmul.mubr.f32.vlgmr.msra.gmra.mxu1 %v6004_v57  ;;  %v6638_v57 = vld [vmem:[#allocation5 + $0x4d8] sm:$0xff] }
 0xdec   :  { %v12258_v58 = vpop.f32.mrf.mxu0  ;;  %12356 = vmatprep.mubr.msk.f32.mxu1 %vm17453_vm5, %v17382_v63 }
 0xdee   :  { %v6009_v2 = vpop.f32.mrf.mxu0 }
 0xdef   :  { %12357 = vmatmul.mubr.f32.gmra.mxu1 %v6009_v2  ;;  %v6637_v2 = vld [vmem:[#allocation5 + $0x4d0] sm:$0xff] }
 0xdf0   :  { %v12261_v49 = vpop.f32.mrf.mxu0  ;;  %12359 = vmatprep.mubr.msk.f32.mxu1 %vm17453_vm5, %v17382_v63 }
 0xdf2   :  { %v6014_v22 = vpop.f32.mrf.mxu0 }
 0xdf3   :  { %12360 = vmatmul.mubr.f32.gmra.mxu1 %v6014_v22  ;;  %v6636_v22 = vld [vmem:[#allocation5 + $0x4c8] sm:$0xff] }
 0xdf4   :  { %v12264_v31 = vpop.f32.mrf.mxu0  ;;  %12409 = vmatprep.mubr.msk.f32.mxu1 %vm17453_vm5, %v17382_v63 }
 0xdf6   :  { %v6084_v9 = vpop.f32.mrf.mxu0 }
 0xdf7   :  { %12395 = vmatmul.mubr.f32.vlgmr.msra.gmra.mxu0 %v6084_v9  ;;  %v6635_v9 = vld [vmem:[#allocation5 + $0x4c0] sm:$0xff] }
 0xdf8   :  { %v12273_v30 = vpop.f32.mrf.mxu0  ;;  %12397 = vmatprep.mubr.msk.f32.mxu0 %vm17453_vm5, %v17382_v63  ;;  %12475 = vmatpush3.msra.mxu0 %v6642_v61 }
 0xdf9   :  { %12476 = vmatprep.subr.mxu0 %v17382_v63 }
 0xdfa   :  { %v6089_v47 = vpop.f32.mrf.mxu0  ;;  %12477 = vmatpush3.msra.mxu0 %v6641_v59 }
 0xdfb   :  { %12398 = vmatmul.mubr.f32.gmra.mxu0 %v6089_v47  ;;  %12478 = vmatprep.subr.mxu0 %v17382_v63  ;;  %v6634_v47 = vld [vmem:[#allocation5 + $0x4b8] sm:$0xff] }
 0xdfc   :  { %v12276_v41 = vpop.f32.mrf.mxu0  ;;  %12400 = vmatprep.mubr.msk.f32.mxu0 %vm17453_vm5, %v17382_v63  ;;  %12479 = vmatpush3.msra.mxu0 %v6640_v43 }
 0xdfd   :  { %12480 = vmatprep.subr.mxu0 %v17382_v63 }
 0xdfe   :  { %v6094_v51 = vpop.f32.mrf.mxu0  ;;  %12481 = vmatpush3.msra.mxu0 %v6639_v7 }
 0xdff   :  { %12401 = vmatmul.mubr.f32.gmra.mxu0 %v6094_v51  ;;  %12482 = vmatprep.subr.mxu0 %v17382_v63  ;;  %v6633_v51 = vld [vmem:[#allocation5 + $0x4b0] sm:$0xff] }
 0xe00   :  { %v12279_v38 = vpop.f32.mrf.mxu0  ;;  %12506 = vmatprep.mubr.msk.f32.mxu0 %vm17453_vm5, %v17382_v63  ;;  %12483 = vmatpush3.msra.mxu0 %v6638_v57 }
 0xe01   :  { %12484 = vmatprep.subr.mxu0 %v17382_v63 }
 0xe02   :  { %12485 = vmatpush3.msra.mxu0 %v6637_v2 }
 0xe03   :  { %12486 = vmatprep.subr.mxu0 %v17382_v63 }
 0xe04   :  { %12487 = vmatpush3.msra.mxu0 %v6636_v22 }
 0xe05   :  { %12488 = vmatprep.subr.mxu0 %v17382_v63 }
 0xe06   :  { %12489 = vmatpush3.msra.mxu0 %v6635_v9  ;;  %v6659_v9 = vld [vmem:[#allocation5 + $0x578] sm:$0xff] }
 0xe07   :  { %12490 = vmatprep.subr.mxu0 %v17382_v63 }
 0xe08   :  { %12491 = vmatpush3.msra.mxu0 %v6634_v47  ;;  %v6657_v47 = vld [vmem:[#allocation5 + $0x568] sm:$0xff] }
 0xe09   :  { %12492 = vmatprep.subr.mxu0 %v17382_v63 }
 0xe0a   :  { %12493 = vmatpush3.msra.mxu0 %v6633_v51  ;;  %v6655_v51 = vld [vmem:[#allocation5 + $0x558] sm:$0xff] }
 0xe0b   :  { %12494 = vmatprep.subr.mxu0 %v17382_v63 }
 0xe16   :  { %v6198_v39 = vpop.f32.mrf.mxu0 }
 0xe18   :  { %v12314_v24 = vpop.f32.mrf.mxu0 }
 0xe1a   :  { %v6203_v8 = vpop.f32.mrf.mxu0 }
 0xe1c   :  { %v12317_v16 = vpop.f32.mrf.mxu0 }
 0xe1e   :  { %v6208_v25 = vpop.f32.mrf.mxu0 }
 0xe20   :  { %v12320_v33 = vpop.f32.mrf.mxu0 }
 0xeab   :  { %v6278_v23 = vpop.f32.mrf.mxu1 }
 0xeac   :  { %v6279_v55 = vadd.f32 %v6278_v23, %v6198_v39  ;;  %v6632_v39 = vld [vmem:[#allocation5 + $0x4a8] sm:$0xff]  ;;  %v6630_v23 = vld [vmem:[#allocation5 + $0x498] sm:$0xff] }
 0xead   :  { %v12355_v42 = vpop.f32.mrf.mxu1  ;;  %12495 = vmatpush3.msra.mxu0 %v6632_v39  ;;  %v6653_v39 = vld [vmem:[#allocation5 + $0x548] sm:$0xff] }
 0xeae   :  { %12496 = vmatprep.subr.mxu0 %v17382_v63 }
 0xeaf   :  { %v6283_v28 = vpop.f32.mrf.mxu1 }
 0xeb0   :  { %v6284_v53 = vadd.f32 %v6283_v28, %v6203_v8  ;;  %v6631_v8 = vld [vmem:[#allocation5 + $0x4a0] sm:$0xff] }
 0xeb1   :  { %v12358_v54 = vpop.f32.mrf.mxu1  ;;  %12497 = vmatpush3.msra.mxu0 %v6631_v8  ;;  %v6651_v8 = vld [vmem:[#allocation5 + $0x538] sm:$0xff] }
 0xeb2   :  { %12498 = vmatprep.subr.mxu0 %v17382_v63 }
 0xeb3   :  { %v6288_v36 = vpop.f32.mrf.mxu1  ;;  %12499 = vmatpush3.msra.mxu0 %v6630_v23  ;;  %v6647_v23 = vld [vmem:[#allocation5 + $0x518] sm:$0xff] }
 0xeb4   :  { %v6289_v12 = vadd.f32 %v6288_v36, %v6208_v25  ;;  %v6629_v36 = vld [vmem:[#allocation5 + $0x490] sm:$0xff]  ;;  %12500 = vmatprep.subr.mxu0 %v17382_v63 }
 0xeb5   :  { %v12361_v0 = vpop.f32.mrf.mxu1  ;;  %12501 = vmatpush3.msra.mxu0 %v6629_v36  ;;  %v6836_v36 = vld [vmem:[#allocation5 + $0x5f8] sm:$0xff] }
 0xeb6   :  { %12502 = vmatprep.subr.mxu0 %v17382_v63 }
 0xeb7   :  { %v6375_v3 = vpop.f32.mrf.mxu0 }
 0xeb8   :  { %v6389_v48 = vadd.f32 %v6375_v3, %v6279_v55  ;;  %v6628_v55 = vld [vmem:[#allocation5 + $0x488] sm:$0xff] }
 0xeb9   :  { %v12396_v50 = vpop.f32.mrf.mxu0  ;;  %12503 = vmatpush3.msra.mxu0 %v6628_v55  ;;  %v6833_v55 = vld [vmem:[#allocation5 + $0x5e0] sm:$0xff] }
 0xeba   :  { %v6398_v4 = vadd.f32 %v10060_v26, %v6389_v48  ;;  %12504 = vmatprep.subr.mxu0 %v17382_v63 }
 0xebb   :  { %v6380_v14 = vpop.f32.mrf.mxu0 }
 0xebc   :  { %v6390_v56 = vadd.f32 %v6380_v14, %v6284_v53  ;;  %v6401_v44 = vmul.f32 %v6398_v4, %v16099_v34 }
 0xebd   :  { %v12399_v10 = vpop.f32.mrf.mxu0 }
 0xebe   :  { %v6399_v60 = vadd.f32 %v10060_v26, %v6390_v56 }
 0xebf   :  { %v6385_v40 = vpop.f32.mrf.mxu0 }
 0xec0   :  { %v6402_v45 = vmul.f32 %v6399_v60, %v16094_v27  ;;  %v6391_v19 = vadd.f32 %v6385_v40, %v6289_v12 }
 0xec1   :  { %v12402_v52 = vpop.f32.mrf.mxu0 }
 0xec2   :  { %v6400_v13 = vadd.f32 %v10060_v26, %v6391_v19  ;;  %v6408_v32 = vadd.f32 %v6402_v45, %v6401_v44  ;;  %v10061_v19 = vld [vmem:[#allocation8 + $0x2] ss:$0 sm:$0xff] }
 0xec4   :  { %v6403_v46 = vmul.f32 %v6400_v13, %v16103_v6 }
 0xec6   :  { %v6409_v29 = vadd.f32 %v6408_v32, %v6403_v46 }
 0xec8   :  { %v6410_v58 = vrot.slane %v6409_v29, 4 }
 0xeca   :  { %v6411_v49 = vadd.f32 %v6410_v58, %v6409_v29 }
 0xecc   :  { %v6412_v31 = vrot.slane %v6411_v49, 2 }
 0xece   :  { %v6413_v30 = vadd.f32 %v6412_v31, %v6411_v49 }
 0xed0   :  { %v6414_v41 = vrot.slane %v6413_v30, 1 }
 0xed2   :  { %v6415_v38 = vadd.f32 %v6414_v41, %v6413_v30  ;;  %v6658_v30 = vld [vmem:[#allocation5 + $0x570] sm:$0xff]  ;;  %v6656_v41 = vld [vmem:[#allocation5 + $0x560] sm:$0xff] }
 0xed4   :  { %v6416_v24 = vmul.f32 0.0625, %v6415_v38  ;;  %v6654_v38 = vld [vmem:[#allocation5 + $0x550] sm:$0xff] }
 0xed6   :  { %v6417_v16 = vsub.f32 %v6401_v44, %v6416_v24  ;;  %v6418_v25 = vsub.f32 %v6402_v45, %v6416_v24  ;;  %v6419_v33 = vsub.f32 %v6403_v46, %v6416_v24  ;;  %v10062_v44 = vld [vmem:[#allocation10 + $0x2] ss:$0 sm:$0xff]  ;;  %v6652_v24 = vld [vmem:[#allocation5 + $0x540] sm:$0xff] }
 0xed8   :  { %v6420_v42 = vmul.f32 %v6417_v16, %v16099_v34  ;;  %v6421_v28 = vmul.f32 %v6418_v25, %v16094_v27  ;;  %v6422_v54 = vmul.f32 %v6419_v33, %v16103_v6 }
 0xeda   :  { %v6423_v0 = vmul.f32 %v6420_v42, %v6420_v42  ;;  %v6424_v3 = vmul.f32 %v6421_v28, %v6421_v28  ;;  %v6425_v50 = vmul.f32 %v6422_v54, %v6422_v54  ;;  %v6646_v42 = vld [vmem:[#allocation5 + $0x510] sm:$0xff]  ;;  %v6645_v28 = vld [vmem:[#allocation5 + $0x508] sm:$0xff]  ;;  %v6644_v54 = vld [vmem:[#allocation5 + $0x500] sm:$0xff] }
 0xedc   :  { %v6426_v53 = vadd.f32 %v6424_v3, %v6423_v0  ;;  %v6835_v0 = vld [vmem:[#allocation5 + $0x5f0] sm:$0xff]  ;;  %v6834_v3 = vld [vmem:[#allocation5 + $0x5e8] sm:$0xff] }
 0xede   :  { %v6427_v48 = vadd.f32 %v6426_v53, %v6425_v50  ;;  %v6832_v50 = vld [vmem:[#allocation5 + $0x5d8] sm:$0xff]  ;;  %v6831_v53 = vld [vmem:[#allocation5 + $0x5d0] sm:$0xff] }
 0xee0   :  { %v6428_v26 = vrot.slane %v6427_v48, 4 }
 0xee2   :  { %v6429_v14 = vadd.f32 %v6428_v26, %v6427_v48  ;;  %v6830_v48 = vld [vmem:[#allocation5 + $0x5c8] sm:$0xff]  ;;  %v6829_v26 = vld [vmem:[#allocation5 + $0x5c0] sm:$0xff] }
 0xee4   :  { %v6430_v56 = vrot.slane %v6429_v14, 2 }
 0xee6   :  { %v6431_v10 = vadd.f32 %v6430_v56, %v6429_v14  ;;  %v6828_v14 = vld [vmem:[#allocation5 + $0x5b8] sm:$0xff]  ;;  %v6627_v56 = vld [vmem:[#allocation5 + $0x480] sm:$0xff] }
 0xee7   :  { %12505 = vmatpush3.msra.mxu0 %v6627_v56 }
 0xee8   :  { %v6432_v12 = vrot.slane %v6431_v10, 1  ;;  %12556 = vmatprep.subr.mxu0 %v17382_v63 }
 0xeea   :  { %v6433_v4 = vadd.f32 %v6432_v12, %v6431_v10  ;;  %v6827_v10 = vld [vmem:[#allocation5 + $0x5b0] sm:$0xff]  ;;  %v6826_v12 = vld [vmem:[#allocation5 + $0x5a8] sm:$0xff] }
 0xeec   :  { %v6434_v60 = vmul.f32 0.0625, %v6433_v4  ;;  %v6825_v4 = vld [vmem:[#allocation5 + $0x5a0] sm:$0xff] }
 0xeee   :  { %v6435_v40 = vadd.f32 1e-05, %v6434_v60  ;;  %v6824_v60 = vld [vmem:[#allocation5 + $0x598] sm:$0xff] }
 0xef0   :  { %13367 = vrsqrt.f32 %v6435_v40  ;;  %v6823_v40 = vld [vmem:[#allocation5 + $0x590] sm:$0xff] }
 0xefd   :  { %v13368_v45 = vpop.eup %13367 }
 0xefe   :  { %v6439_v52 = vmul.f32 %v13368_v45, %v6419_v33  ;;  %v6438_v61 = vmul.f32 %v13368_v45, %v6418_v25  ;;  %v6437_v59 = vmul.f32 %v13368_v45, %v6417_v16  ;;  %v6650_v16 = vld [vmem:[#allocation5 + $0x530] sm:$0xff]  ;;  %v6649_v25 = vld [vmem:[#allocation5 + $0x528] sm:$0xff]  ;;  %v6648_v33 = vld [vmem:[#allocation5 + $0x520] sm:$0xff] }
 0xeff   :  { %v6822_v45 = vld [vmem:[#allocation5 + $0x588] sm:$0xff] }
 0xf00   :  { %v6448_v13 = vmul.f32 %v10061_v19, %v6439_v52  ;;  %v6447_v43 = vmul.f32 %v10061_v19, %v6438_v61  ;;  %v6446_v32 = vmul.f32 %v10061_v19, %v6437_v59  ;;  %v6821_v19 = vld [vmem:[#allocation5 + $0x580] sm:$0xff] }
 0xf02   :  { %v6457_v46 = vadd.f32 %v10062_v44, %v6448_v13  ;;  %v6456_v7 = vadd.f32 %v10062_v44, %v6447_v43  ;;  %v6455_v29 = vadd.f32 %v10062_v44, %v6446_v32 }
 0xf04   :  { %v6460_v57 = vmax.f32 %v6457_v46, 0.0  ;;  %v6459_v58 = vmax.f32 %v6456_v7, 0.0  ;;  %v6458_v49 = vmax.f32 %v6455_v29, 0.0 }
 0xf06   :  { %v16369_v2 = vmul.f32 %v6460_v57, %v16103_v6  ;;  %v16373_v22 = vmul.f32 %v6459_v58, %v16094_v27  ;;  %v16378_v31 = vmul.f32 %v6458_v49, %v16099_v34 }
 0xf08   :  { %12404 = vmatpush3.msra.mxu1 %v16369_v2 }
 0xf09   :  { %12405 = vmatprep.subr.mxu1 %v17382_v63 }
 0xf0a   :  { %12406 = vmatpush3.msra.mxu1 %v16373_v22 }
 0xf0b   :  { %12407 = vmatprep.subr.mxu1 %v17382_v63 }
 0xf0c   :  { %12408 = vmatpush3.msra.mxu1 %v16378_v31 }
 0xf0d   :  { %12410 = vmatmul.mubr.msk.f32.vlgmr.msra.gmra.mxu1 %vm4869_vm13, %v15011_v37  ;;  %12418 = vmatprep.subr.mxu1 %v17382_v63 }
 0xf0e   :  { %12419 = vmatpush3.msra.mxu1 %v16369_v2  ;;  %12412 = vmatprep.mubr.msk.f32.mxu1 %vm17453_vm5, %v17382_v63 }
 0xf0f   :  { %12420 = vmatprep.subr.mxu1 %v17382_v63 }
 0xf10   :  { %12421 = vmatpush3.msra.mxu1 %v16373_v22 }
 0xf11   :  { %12413 = vmatmul.mubr.msk.f32.gmra.mxu1 %vm4869_vm13, %v15036_v20  ;;  %12422 = vmatprep.subr.mxu1 %v17382_v63 }
 0xf12   :  { %12423 = vmatpush3.msra.mxu1 %v16378_v31  ;;  %12415 = vmatprep.mubr.msk.f32.mxu1 %vm17453_vm5, %v17382_v63 }
 0xf13   :  { %12433 = vmatprep.subr.mxu1 %v17382_v63 }
 0xf15   :  { %12416 = vmatmul.mubr.msk.f32.gmra.mxu1 %vm4869_vm13, %v15059_v17 }
 0xf16   :  { %12424 = vmatprep.mubr.msk.f32.mxu1 %vm17453_vm5, %v17382_v63 }
 0xf19   :  { %12425 = vmatmul.mubr.msk.f32.vlgmr.msra.gmra.mxu1 %vm4869_vm13, %v15017_v11 }
 0xf1a   :  { %12434 = vmatpush3.msra.mxu1 %v6659_v9  ;;  %12427 = vmatprep.mubr.msk.f32.mxu1 %vm17453_vm5, %v17382_v63 }
 0xf1b   :  { %12435 = vmatprep.subr.mxu1 %v17382_v63 }
 0xf1c   :  { %12436 = vmatpush3.msra.mxu1 %v6658_v30 }
 0xf1d   :  { %12437 = vmatprep.subr.mxu1 %v17382_v63  ;;  %12428 = vmatmul.mubr.msk.f32.gmra.mxu1 %vm4869_vm13, %v15042_v5 }
 0xf1e   :  { %12438 = vmatpush3.msra.mxu1 %v6657_v47  ;;  %12430 = vmatprep.mubr.msk.f32.mxu1 %vm17453_vm5, %v17382_v63 }
 0xf1f   :  { %12439 = vmatprep.subr.mxu1 %v17382_v63 }
 0xf20   :  { %12440 = vmatpush3.msra.mxu1 %v6656_v41 }
 0xf21   :  { %12441 = vmatprep.subr.mxu1 %v17382_v63  ;;  %12431 = vmatmul.mubr.msk.f32.gmra.mxu1 %vm4869_vm13, %v15065_v62 }
 0xf22   :  { %12442 = vmatpush3.msra.mxu1 %v6655_v51  ;;  %12465 = vmatprep.mubr.msk.f32.mxu1 %vm17453_vm5, %v17382_v63 }
 0xf23   :  { %12443 = vmatprep.subr.mxu1 %v17382_v63 }
 0xf24   :  { %12444 = vmatpush3.msra.mxu1 %v6654_v38 }
 0xf25   :  { %12445 = vmatprep.subr.mxu1 %v17382_v63 }
 0xf26   :  { %12446 = vmatpush3.msra.mxu1 %v6653_v39 }
 0xf27   :  { %12447 = vmatprep.subr.mxu1 %v17382_v63 }
 0xf28   :  { %12448 = vmatpush3.msra.mxu1 %v6652_v24 }
 0xf29   :  { %12449 = vmatprep.subr.mxu1 %v17382_v63 }
 0xf2a   :  { %12450 = vmatpush3.msra.mxu1 %v6651_v8 }
 0xf2b   :  { %12451 = vmatprep.subr.mxu1 %v17382_v63 }
 0xf2c   :  { %12452 = vmatpush3.msra.mxu1 %v6650_v16 }
 0xf2d   :  { %12453 = vmatprep.subr.mxu1 %v17382_v63 }
 0xf2e   :  { %12454 = vmatpush3.msra.mxu1 %v6649_v25 }
 0xf2f   :  { %12455 = vmatprep.subr.mxu1 %v17382_v63 }
 0xf30   :  { %12456 = vmatpush3.msra.mxu1 %v6648_v33 }
 0xf31   :  { %12457 = vmatprep.subr.mxu1 %v17382_v63 }
 0xf32   :  { %12458 = vmatpush3.msra.mxu1 %v6647_v23 }
 0xf33   :  { %12459 = vmatprep.subr.mxu1 %v17382_v63 }
 0xf34   :  { %12460 = vmatpush3.msra.mxu1 %v6646_v42  ;;  %v10069_v42 = vld [vmem:[#allocation7 + $0x3] ss:$0 sm:$0xff] }
 0xf35   :  { %12461 = vmatprep.subr.mxu1 %v17382_v63 }
 0xf36   :  { %12462 = vmatpush3.msra.mxu1 %v6645_v28 }
 0xf37   :  { %12463 = vmatprep.subr.mxu1 %v17382_v63 }
 0xf38   :  { %12464 = vmatpush3.msra.mxu1 %v6644_v54 }
 0xf39   :  { %12466 = vmatmul.mubr.f32.vlgmr.msra.gmra.mxu1 %v16378_v31  ;;  %12515 = vmatprep.subr.mxu1 %v17382_v63 }
 0xf3a   :  { %12468 = vmatprep.mubr.msk.f32.mxu1 %vm17453_vm5, %v17382_v63  ;;  %12516 = vmatpush3.msra.mxu1 %v6836_v36 }
 0xf3b   :  { %12517 = vmatprep.subr.mxu1 %v17382_v63 }
 0xf3c   :  { %12518 = vmatpush3.msra.mxu1 %v6835_v0 }
 0xf3d   :  { %12469 = vmatmul.mubr.f32.gmra.mxu1 %v16373_v22  ;;  %12519 = vmatprep.subr.mxu1 %v17382_v63 }
 0xf3e   :  { %12471 = vmatprep.mubr.msk.f32.mxu1 %vm17453_vm5, %v17382_v63  ;;  %12520 = vmatpush3.msra.mxu1 %v6834_v3 }
 0xf3f   :  { %12521 = vmatprep.subr.mxu1 %v17382_v63 }
 0xf40   :  { %12522 = vmatpush3.msra.mxu1 %v6833_v55 }
 0xf41   :  { %12472 = vmatmul.mubr.f32.gmra.mxu1 %v16369_v2  ;;  %12523 = vmatprep.subr.mxu1 %v17382_v63 }
 0xf42   :  { %12524 = vmatpush3.msra.mxu1 %v6832_v50  ;;  %12547 = vmatprep.mubr.msk.f32.mxu1 %vm17453_vm5, %v17382_v63 }
 0xf43   :  { %12525 = vmatprep.subr.mxu1 %v17382_v63 }
 0xf44   :  { %12526 = vmatpush3.msra.mxu1 %v6831_v53 }
 0xf45   :  { %12527 = vmatprep.subr.mxu1 %v17382_v63 }
 0xf46   :  { %12528 = vmatpush3.msra.mxu1 %v6830_v48 }
 0xf47   :  { %12529 = vmatprep.subr.mxu1 %v17382_v63 }
 0xf48   :  { %12530 = vmatpush3.msra.mxu1 %v6829_v26 }
 0xf49   :  { %12531 = vmatprep.subr.mxu1 %v17382_v63 }
 0xf4a   :  { %12532 = vmatpush3.msra.mxu1 %v6828_v14 }
 0xf4b   :  { %12533 = vmatprep.subr.mxu1 %v17382_v63 }
 0xf4c   :  { %12534 = vmatpush3.msra.mxu1 %v6827_v10  ;;  %v7173_v10 = vld [vmem:[#allocation5 + $0x678] sm:$0xff] }
 0xf4d   :  { %12535 = vmatprep.subr.mxu1 %v17382_v63 }
 0xf4e   :  { %12536 = vmatpush3.msra.mxu1 %v6826_v12  ;;  %v7172_v12 = vld [vmem:[#allocation5 + $0x670] sm:$0xff] }
 0xf4f   :  { %12537 = vmatprep.subr.mxu1 %v17382_v63 }
 0xf50   :  { %12538 = vmatpush3.msra.mxu1 %v6825_v4 }
 0xf51   :  { %12539 = vmatprep.subr.mxu1 %v17382_v63 }
 0xf52   :  { %12540 = vmatpush3.msra.mxu1 %v6824_v60 }
 0xf53   :  { %12541 = vmatprep.subr.mxu1 %v17382_v63 }
 0xf54   :  { %12542 = vmatpush3.msra.mxu1 %v6823_v40  ;;  %v7171_v40 = vld [vmem:[#allocation5 + $0x668] sm:$0xff] }
 0xf55   :  { %12543 = vmatprep.subr.mxu1 %v17382_v63 }
 0xf56   :  { %12544 = vmatpush3.msra.mxu1 %v6822_v45 }
 0xf57   :  { %12545 = vmatprep.subr.mxu1 %v17382_v63 }
 0xf58   :  { %12546 = vmatpush3.msra.mxu1 %v6821_v19  ;;  %v7170_v19 = vld [vmem:[#allocation5 + $0x660] sm:$0xff] }
 0xf59   :  { %12627 = vmatprep.subr.mxu1 %v17382_v63 }
 0xfcd   :  { %v6532_v52 = vpop.f32.mrf.mxu1 }
 0xfce   :  { %12507 = vmatmul.mubr.f32.vlgmr.msra.gmra.mxu0 %v6532_v52 }
 0xfcf   :  { %v12411_v61 = vpop.f32.mrf.mxu1  ;;  %12509 = vmatprep.mubr.msk.f32.mxu0 %vm17453_vm5, %v17382_v63 }
 0xfd0   :  { %v7169_v61 = vld [vmem:[#allocation5 + $0x658] sm:$0xff] }
 0xfd1   :  { %v6537_v59 = vpop.f32.mrf.mxu1 }
 0xfd2   :  { %12510 = vmatmul.mubr.f32.gmra.mxu0 %v6537_v59 }
 0xfd3   :  { %v12414_v44 = vpop.f32.mrf.mxu1  ;;  %12512 = vmatprep.mubr.msk.f32.mxu0 %vm17453_vm5, %v17382_v63 }
 0xfd4   :  { %v7168_v44 = vld [vmem:[#allocation5 + $0x650] sm:$0xff] }
 0xfd5   :  { %v6542_v13 = vpop.f32.mrf.mxu1 }
 0xfd6   :  { %12513 = vmatmul.mubr.f32.gmra.mxu0 %v6542_v13 }
 0xfd7   :  { %v12417_v43 = vpop.f32.mrf.mxu1  ;;  %12562 = vmatprep.mubr.msk.f32.mxu0 %vm17453_vm5, %v17382_v63 }
 0xfd8   :  { %v7167_v43 = vld [vmem:[#allocation5 + $0x648] sm:$0xff] }
 0xfd9   :  { %v6612_v32 = vpop.f32.mrf.mxu1 }
 0xfda   :  { %12548 = vmatmul.mubr.f32.vlgmr.msra.gmra.mxu1 %v6612_v32 }
 0xfdb   :  { %v12426_v46 = vpop.f32.mrf.mxu1  ;;  %12550 = vmatprep.mubr.msk.f32.mxu1 %vm17453_vm5, %v17382_v63  ;;  %12628 = vmatpush3.msra.mxu1 %v7173_v10  ;;  %v10071_v10 = vld [vmem:[#allocation10 + $0x3] ss:$0 sm:$0xff] }
 0xfdc   :  { %12629 = vmatprep.subr.mxu1 %v17382_v63  ;;  %v7166_v46 = vld [vmem:[#allocation5 + $0x640] sm:$0xff] }
 0xfdd   :  { %v6617_v7 = vpop.f32.mrf.mxu1  ;;  %12630 = vmatpush3.msra.mxu1 %v7172_v12 }
 0xfde   :  { %12551 = vmatmul.mubr.f32.gmra.mxu1 %v6617_v7  ;;  %12631 = vmatprep.subr.mxu1 %v17382_v63 }
 0xfdf   :  { %v12429_v29 = vpop.f32.mrf.mxu1  ;;  %12553 = vmatprep.mubr.msk.f32.mxu1 %vm17453_vm5, %v17382_v63  ;;  %12632 = vmatpush3.msra.mxu1 %v7171_v40 }
 0xfe0   :  { %12633 = vmatprep.subr.mxu1 %v17382_v63  ;;  %v7165_v29 = vld [vmem:[#allocation5 + $0x638] sm:$0xff] }
 0xfe1   :  { %v6622_v57 = vpop.f32.mrf.mxu1  ;;  %12634 = vmatpush3.msra.mxu1 %v7170_v19 }
 0xfe2   :  { %12554 = vmatmul.mubr.f32.gmra.mxu1 %v6622_v57  ;;  %12635 = vmatprep.subr.mxu1 %v17382_v63 }
 0xfe3   :  { %v12432_v58 = vpop.f32.mrf.mxu1  ;;  %12659 = vmatprep.mubr.msk.f32.mxu1 %vm17453_vm5, %v17382_v63  ;;  %12636 = vmatpush3.msra.mxu1 %v7169_v61 }
 0xfe4   :  { %12637 = vmatprep.subr.mxu1 %v17382_v63  ;;  %v7164_v58 = vld [vmem:[#allocation5 + $0x630] sm:$0xff] }
 0xfe5   :  { %12638 = vmatpush3.msra.mxu1 %v7168_v44 }
 0xfe6   :  { %12639 = vmatprep.subr.mxu1 %v17382_v63 }
 0xfe7   :  { %12640 = vmatpush3.msra.mxu1 %v7167_v43 }
 0xfe8   :  { %12641 = vmatprep.subr.mxu1 %v17382_v63 }
 0xfe9   :  { %12642 = vmatpush3.msra.mxu1 %v7166_v46 }
 0xfea   :  { %12643 = vmatprep.subr.mxu1 %v17382_v63 }
 0xfeb   :  { %12644 = vmatpush3.msra.mxu1 %v7165_v29  ;;  %v7187_v29 = vld [vmem:[#allocation5 + $0x6e0] sm:$0xff] }
 0xfec   :  { %12645 = vmatprep.subr.mxu1 %v17382_v63 }
 0xfed   :  { %12646 = vmatpush3.msra.mxu1 %v7164_v58  ;;  %v7185_v58 = vld [vmem:[#allocation5 + $0x6d0] sm:$0xff] }
 0xfee   :  { %12647 = vmatprep.subr.mxu1 %v17382_v63 }
 0xff9   :  { %v6726_v2 = vpop.f32.mrf.mxu1 }
 0xffb   :  { %v12467_v49 = vpop.f32.mrf.mxu1 }
 0xffc   :  { %v7163_v49 = vld [vmem:[#allocation5 + $0x628] sm:$0xff] }
 0xffd   :  { %v6731_v22 = vpop.f32.mrf.mxu1  ;;  %12648 = vmatpush3.msra.mxu1 %v7163_v49  ;;  %v7183_v49 = vld [vmem:[#allocation5 + $0x6c0] sm:$0xff] }
 0xffe   :  { %12649 = vmatprep.subr.mxu1 %v17382_v63 }
 0xfff   :  { %v12470_v31 = vpop.f32.mrf.mxu1 }
0x1001   :  { %v6736_v9 = vpop.f32.mrf.mxu1 }
0x1003   :  { %v12473_v30 = vpop.f32.mrf.mxu1 }
0x1004   :  { %v7162_v30 = vld [vmem:[#allocation5 + $0x620] sm:$0xff] }
0x1005   :  { %12650 = vmatpush3.msra.mxu1 %v7162_v30  ;;  %v7179_v30 = vld [vmem:[#allocation5 + $0x6a0] sm:$0xff] }
0x1006   :  { %12651 = vmatprep.subr.mxu1 %v17382_v63 }
0x108e   :  { %v6806_v47 = vpop.f32.mrf.mxu0 }
0x108f   :  { %v6807_v16 = vadd.f32 %v6806_v47, %v6726_v2 }
0x1090   :  { %v12508_v41 = vpop.f32.mrf.mxu0 }
0x1092   :  { %v6811_v51 = vpop.f32.mrf.mxu0 }
0x1093   :  { %v6812_v33 = vadd.f32 %v6811_v51, %v6731_v22 }
0x1094   :  { %v12511_v38 = vpop.f32.mrf.mxu0 }
0x1095   :  { %v7161_v38 = vld [vmem:[#allocation5 + $0x618] sm:$0xff] }
0x1096   :  { %v6816_v39 = vpop.f32.mrf.mxu0  ;;  %12652 = vmatpush3.msra.mxu1 %v7161_v38  ;;  %v7175_v38 = vld [vmem:[#allocation5 + $0x680] sm:$0xff] }
0x1097   :  { %v6817_v0 = vadd.f32 %v6816_v39, %v6736_v9  ;;  %12653 = vmatprep.subr.mxu1 %v17382_v63 }
0x1098   :  { %v12514_v24 = vpop.f32.mrf.mxu0 }
0x109a   :  { %v6903_v8 = vpop.f32.mrf.mxu1 }
0x109b   :  { %v6917_v23 = vadd.f32 %v6903_v8, %v6807_v16  ;;  %v7160_v8 = vld [vmem:[#allocation5 + $0x610] sm:$0xff] }
0x109c   :  { %v12549_v25 = vpop.f32.mrf.mxu1  ;;  %12654 = vmatpush3.msra.mxu1 %v7160_v8  ;;  %v7365_v8 = vld [vmem:[#allocation5 + $0x768] sm:$0xff] }
0x109d   :  { %v6926_v3 = vadd.f32 %v10069_v42, %v6917_v23  ;;  %12655 = vmatprep.subr.mxu1 %v17382_v63 }
0x109e   :  { %v6908_v28 = vpop.f32.mrf.mxu1 }
0x109f   :  { %v6918_v54 = vadd.f32 %v6908_v28, %v6812_v33  ;;  %v6929_v14 = vmul.f32 %v6926_v3, %v16099_v34  ;;  %v7159_v33 = vld [vmem:[#allocation5 + $0x608] sm:$0xff] }
0x10a0   :  { %v12552_v36 = vpop.f32.mrf.mxu1  ;;  %12656 = vmatpush3.msra.mxu1 %v7159_v33  ;;  %v7362_v33 = vld [vmem:[#allocation5 + $0x750] sm:$0xff] }
0x10a1   :  { %v6927_v55 = vadd.f32 %v10069_v42, %v6918_v54  ;;  %12657 = vmatprep.subr.mxu1 %v17382_v63 }
0x10a2   :  { %v6913_v50 = vpop.f32.mrf.mxu1 }
0x10a3   :  { %v6930_v53 = vmul.f32 %v6927_v55, %v16094_v27  ;;  %v6919_v48 = vadd.f32 %v6913_v50, %v6817_v0 }
0x10a4   :  { %v12555_v26 = vpop.f32.mrf.mxu1 }
0x10a5   :  { %v6928_v56 = vadd.f32 %v10069_v42, %v6919_v48  ;;  %v6936_v4 = vadd.f32 %v6930_v53, %v6929_v14  ;;  %v10070_v48 = vld [vmem:[#allocation8 + $0x3] ss:$0 sm:$0xff] }
0x10a7   :  { %v6931_v60 = vmul.f32 %v6928_v56, %v16103_v6 }
0x10a9   :  { %v6937_v45 = vadd.f32 %v6936_v4, %v6931_v60 }
0x10ab   :  { %v6938_v52 = vrot.slane %v6937_v45, 4 }
0x10ad   :  { %v6939_v59 = vadd.f32 %v6938_v52, %v6937_v45 }
0x10af   :  { %v6940_v13 = vrot.slane %v6939_v59, 2 }
0x10b1   :  { %v6941_v32 = vadd.f32 %v6940_v13, %v6939_v59 }
0x10b3   :  { %v6942_v7 = vrot.slane %v6941_v32, 1 }
0x10b5   :  { %v6943_v57 = vadd.f32 %v6942_v7, %v6941_v32  ;;  %v7188_v7 = vld [vmem:[#allocation5 + $0x6e8] sm:$0xff] }
0x10b7   :  { %v6944_v2 = vmul.f32 0.0625, %v6943_v57  ;;  %v7186_v57 = vld [vmem:[#allocation5 + $0x6d8] sm:$0xff] }
0x10b9   :  { %v6945_v22 = vsub.f32 %v6929_v14, %v6944_v2  ;;  %v6946_v31 = vsub.f32 %v6930_v53, %v6944_v2  ;;  %v6947_v9 = vsub.f32 %v6931_v60, %v6944_v2  ;;  %v7184_v2 = vld [vmem:[#allocation5 + $0x6c8] sm:$0xff] }
0x10bb   :  { %v6948_v47 = vmul.f32 %v6945_v22, %v16099_v34  ;;  %v6949_v41 = vmul.f32 %v6946_v31, %v16094_v27  ;;  %v6950_v51 = vmul.f32 %v6947_v9, %v16103_v6 }
0x10bd   :  { %v6951_v39 = vmul.f32 %v6948_v47, %v6948_v47  ;;  %v6952_v24 = vmul.f32 %v6949_v41, %v6949_v41  ;;  %v6953_v16 = vmul.f32 %v6950_v51, %v6950_v51  ;;  %v7178_v47 = vld [vmem:[#allocation5 + $0x698] sm:$0xff]  ;;  %v7177_v41 = vld [vmem:[#allocation5 + $0x690] sm:$0xff]  ;;  %v7176_v51 = vld [vmem:[#allocation5 + $0x688] sm:$0xff] }
0x10bf   :  { %v6954_v25 = vadd.f32 %v6952_v24, %v6951_v39  ;;  %v7367_v39 = vld [vmem:[#allocation5 + $0x778] sm:$0xff]  ;;  %v7366_v24 = vld [vmem:[#allocation5 + $0x770] sm:$0xff] }
0x10c1   :  { %v6955_v23 = vadd.f32 %v6954_v25, %v6953_v16  ;;  %v7364_v16 = vld [vmem:[#allocation5 + $0x760] sm:$0xff]  ;;  %v7363_v25 = vld [vmem:[#allocation5 + $0x758] sm:$0xff] }
0x10c3   :  { %v6956_v42 = vrot.slane %v6955_v23, 4 }
0x10c5   :  { %v6957_v28 = vadd.f32 %v6956_v42, %v6955_v23  ;;  %v7361_v23 = vld [vmem:[#allocation5 + $0x748] sm:$0xff]  ;;  %v7360_v42 = vld [vmem:[#allocation5 + $0x740] sm:$0xff] }
0x10c7   :  { %v6958_v54 = vrot.slane %v6957_v28, 2 }
0x10c9   :  { %v6959_v36 = vadd.f32 %v6958_v54, %v6957_v28  ;;  %v7359_v28 = vld [vmem:[#allocation5 + $0x738] sm:$0xff]  ;;  %v7158_v54 = vld [vmem:[#allocation5 + $0x600] sm:$0xff] }
0x10ca   :  { %12658 = vmatpush3.msra.mxu1 %v7158_v54  ;;  %v7700_v54 = vld [vmem:[#allocation5 + $0x7f0] sm:$0xff] }
0x10cb   :  { %v6960_v0 = vrot.slane %v6959_v36, 1  ;;  %12709 = vmatprep.subr.mxu1 %v17382_v63 }
0x10cd   :  { %v6961_v3 = vadd.f32 %v6960_v0, %v6959_v36  ;;  %v7358_v36 = vld [vmem:[#allocation5 + $0x730] sm:$0xff]  ;;  %v7357_v0 = vld [vmem:[#allocation5 + $0x728] sm:$0xff] }
0x10cf   :  { %v6962_v55 = vmul.f32 0.0625, %v6961_v3  ;;  %v7356_v3 = vld [vmem:[#allocation5 + $0x720] sm:$0xff] }
0x10d1   :  { %v6963_v50 = vadd.f32 1e-05, %v6962_v55  ;;  %v7355_v55 = vld [vmem:[#allocation5 + $0x718] sm:$0xff] }
0x10d3   :  { %13369 = vrsqrt.f32 %v6963_v50  ;;  %v7354_v50 = vld [vmem:[#allocation5 + $0x710] sm:$0xff] }
0x10e0   :  { %v13370_v53 = vpop.eup %13369 }
0x10e1   :  { %v6967_v26 = vmul.f32 %v13370_v53, %v6947_v9  ;;  %v6966_v14 = vmul.f32 %v13370_v53, %v6946_v31  ;;  %v6965_v56 = vmul.f32 %v13370_v53, %v6945_v22  ;;  %v7182_v22 = vld [vmem:[#allocation5 + $0x6b8] sm:$0xff]  ;;  %v7181_v31 = vld [vmem:[#allocation5 + $0x6b0] sm:$0xff]  ;;  %v7180_v9 = vld [vmem:[#allocation5 + $0x6a8] sm:$0xff] }
0x10e2   :  { %v7353_v53 = vld [vmem:[#allocation5 + $0x708] sm:$0xff] }
0x10e3   :  { %v6976_v12 = vmul.f32 %v10070_v48, %v6967_v26  ;;  %v6975_v4 = vmul.f32 %v10070_v48, %v6966_v14  ;;  %v6974_v60 = vmul.f32 %v10070_v48, %v6965_v56  ;;  %v7352_v48 = vld [vmem:[#allocation5 + $0x700] sm:$0xff] }
0x10e5   :  { %v6985_v40 = vadd.f32 %v10071_v10, %v6976_v12  ;;  %v6984_v45 = vadd.f32 %v10071_v10, %v6975_v4  ;;  %v6983_v19 = vadd.f32 %v10071_v10, %v6974_v60 }
0x10e7   :  { %v6988_v52 = vadd.f32 %v6985_v40, %v16249_v35  ;;  %v6987_v61 = vadd.f32 %v6984_v45, %v16253_v1  ;;  %v6986_v59 = vadd.f32 %v6983_v19, %v16258_v21  ;;  %v7190_v1 = vld [vmem:[#allocation5 + $0x6f8] sm:$0xff]  ;;  %v7189_v21 = vld [vmem:[#allocation5 + $0x6f0] sm:$0xff] }
0x10e9   :  { %v6991_v44 = vmax.f32 %v6988_v52, 0.0  ;;  %v6990_v13 = vmax.f32 %v6987_v61, 0.0  ;;  %v6989_v32 = vmax.f32 %v6986_v59, 0.0 }
0x10eb   :  { %v16492_v43 = vmul.f32 %v6991_v44, %v16103_v6  ;;  %v16496_v46 = vmul.f32 %v6990_v13, %v16094_v27  ;;  %v16501_v35 = vmul.f32 %v6989_v32, %v16099_v34 }
0x10ed   :  { %12557 = vmatpush3.msra.mxu0 %v16492_v43 }
0x10ee   :  { %12558 = vmatprep.subr.mxu0 %v17382_v63 }
0x10ef   :  { %12559 = vmatpush3.msra.mxu0 %v16496_v46 }
0x10f0   :  { %12560 = vmatprep.subr.mxu0 %v17382_v63 }
0x10f1   :  { %12561 = vmatpush3.msra.mxu0 %v16501_v35 }
0x10f2   :  { %12563 = vmatmul.mubr.msk.f32.vlgmr.msra.gmra.mxu0 %vm4869_vm13, %v15011_v37  ;;  %12571 = vmatprep.subr.mxu0 %v17382_v63 }
0x10f3   :  { %12572 = vmatpush3.msra.mxu0 %v16492_v43  ;;  %12565 = vmatprep.mubr.msk.f32.mxu0 %vm17453_vm5, %v17382_v63 }
0x10f4   :  { %12573 = vmatprep.subr.mxu0 %v17382_v63 }
0x10f5   :  { %12574 = vmatpush3.msra.mxu0 %v16496_v46 }
0x10f6   :  { %12566 = vmatmul.mubr.msk.f32.gmra.mxu0 %vm4869_vm13, %v15036_v20  ;;  %12575 = vmatprep.subr.mxu0 %v17382_v63 }
0x10f7   :  { %12576 = vmatpush3.msra.mxu0 %v16501_v35  ;;  %12568 = vmatprep.mubr.msk.f32.mxu0 %vm17453_vm5, %v17382_v63 }
0x10f8   :  { %12586 = vmatprep.subr.mxu0 %v17382_v63 }
0x10fa   :  { %12569 = vmatmul.mubr.msk.f32.gmra.mxu0 %vm4869_vm13, %v15059_v17 }
0x10fb   :  { %12577 = vmatprep.mubr.msk.f32.mxu0 %vm17453_vm5, %v17382_v63 }
0x10fe   :  { %12578 = vmatmul.mubr.msk.f32.vlgmr.msra.gmra.mxu0 %vm4869_vm13, %v15017_v11 }
0x10ff   :  { %12587 = vmatpush3.msra.mxu0 %v7190_v1  ;;  %12580 = vmatprep.mubr.msk.f32.mxu0 %vm17453_vm5, %v17382_v63 }
0x1100   :  { %12588 = vmatprep.subr.mxu0 %v17382_v63 }
0x1101   :  { %12589 = vmatpush3.msra.mxu0 %v7189_v21 }
0x1102   :  { %12590 = vmatprep.subr.mxu0 %v17382_v63  ;;  %12581 = vmatmul.mubr.msk.f32.gmra.mxu0 %vm4869_vm13, %v15042_v5 }
0x1103   :  { %12591 = vmatpush3.msra.mxu0 %v7188_v7  ;;  %12583 = vmatprep.mubr.msk.f32.mxu0 %vm17453_vm5, %v17382_v63 }
0x1104   :  { %12592 = vmatprep.subr.mxu0 %v17382_v63 }
0x1105   :  { %12593 = vmatpush3.msra.mxu0 %v7187_v29 }
0x1106   :  { %12594 = vmatprep.subr.mxu0 %v17382_v63  ;;  %12584 = vmatmul.mubr.msk.f32.gmra.mxu0 %vm4869_vm13, %v15065_v62 }
0x1107   :  { %12595 = vmatpush3.msra.mxu0 %v7186_v57  ;;  %12618 = vmatprep.mubr.msk.f32.mxu0 %vm17453_vm5, %v17382_v63 }
0x1108   :  { %12596 = vmatprep.subr.mxu0 %v17382_v63 }
0x1109   :  { %12597 = vmatpush3.msra.mxu0 %v7185_v58 }
0x110a   :  { %12598 = vmatprep.subr.mxu0 %v17382_v63 }
0x110b   :  { %12599 = vmatpush3.msra.mxu0 %v7184_v2 }
0x110c   :  { %12600 = vmatprep.subr.mxu0 %v17382_v63 }
0x110d   :  { %12601 = vmatpush3.msra.mxu0 %v7183_v49 }
0x110e   :  { %12602 = vmatprep.subr.mxu0 %v17382_v63 }
0x110f   :  { %12603 = vmatpush3.msra.mxu0 %v7182_v22 }
0x1110   :  { %12604 = vmatprep.subr.mxu0 %v17382_v63 }
0x1111   :  { %12605 = vmatpush3.msra.mxu0 %v7181_v31 }
0x1112   :  { %12606 = vmatprep.subr.mxu0 %v17382_v63 }
0x1113   :  { %12607 = vmatpush3.msra.mxu0 %v7180_v9 }
0x1114   :  { %12608 = vmatprep.subr.mxu0 %v17382_v63 }
0x1115   :  { %12609 = vmatpush3.msra.mxu0 %v7179_v30 }
0x1116   :  { %12610 = vmatprep.subr.mxu0 %v17382_v63 }
0x1117   :  { %12611 = vmatpush3.msra.mxu0 %v7178_v47 }
0x1118   :  { %12612 = vmatprep.subr.mxu0 %v17382_v63 }
0x1119   :  { %12613 = vmatpush3.msra.mxu0 %v7177_v41  ;;  %v10078_v41 = vld [vmem:[#allocation7 + $0x4] ss:$0 sm:$0xff] }
0x111a   :  { %12614 = vmatprep.subr.mxu0 %v17382_v63 }
0x111b   :  { %12615 = vmatpush3.msra.mxu0 %v7176_v51 }
0x111c   :  { %12616 = vmatprep.subr.mxu0 %v17382_v63 }
0x111d   :  { %12617 = vmatpush3.msra.mxu0 %v7175_v38 }
0x111e   :  { %12619 = vmatmul.mubr.f32.vlgmr.msra.gmra.mxu0 %v16501_v35  ;;  %12668 = vmatprep.subr.mxu0 %v17382_v63 }
0x111f   :  { %12621 = vmatprep.mubr.msk.f32.mxu0 %vm17453_vm5, %v17382_v63  ;;  %12669 = vmatpush3.msra.mxu0 %v7367_v39 }
0x1120   :  { %12670 = vmatprep.subr.mxu0 %v17382_v63 }
0x1121   :  { %12671 = vmatpush3.msra.mxu0 %v7366_v24 }
0x1122   :  { %12622 = vmatmul.mubr.f32.gmra.mxu0 %v16496_v46  ;;  %12672 = vmatprep.subr.mxu0 %v17382_v63 }
0x1123   :  { %12624 = vmatprep.mubr.msk.f32.mxu0 %vm17453_vm5, %v17382_v63  ;;  %12673 = vmatpush3.msra.mxu0 %v7365_v8 }
0x1124   :  { %12674 = vmatprep.subr.mxu0 %v17382_v63 }
0x1125   :  { %12675 = vmatpush3.msra.mxu0 %v7364_v16 }
0x1126   :  { %12625 = vmatmul.mubr.f32.gmra.mxu0 %v16492_v43  ;;  %12676 = vmatprep.subr.mxu0 %v17382_v63 }
0x1127   :  { %12677 = vmatpush3.msra.mxu0 %v7363_v25  ;;  %12700 = vmatprep.mubr.msk.f32.mxu0 %vm17453_vm5, %v17382_v63 }
0x1128   :  { %12678 = vmatprep.subr.mxu0 %v17382_v63 }
0x1129   :  { %12679 = vmatpush3.msra.mxu0 %v7362_v33 }
0x112a   :  { %12680 = vmatprep.subr.mxu0 %v17382_v63 }
0x112b   :  { %12681 = vmatpush3.msra.mxu0 %v7361_v23 }
0x112c   :  { %12682 = vmatprep.subr.mxu0 %v17382_v63 }
0x112d   :  { %12683 = vmatpush3.msra.mxu0 %v7360_v42 }
0x112e   :  { %12684 = vmatprep.subr.mxu0 %v17382_v63 }
0x112f   :  { %12685 = vmatpush3.msra.mxu0 %v7359_v28  ;;  %v7701_v28 = vld [vmem:[#allocation5 + $0x7f8] sm:$0xff] }
0x1130   :  { %12686 = vmatprep.subr.mxu0 %v17382_v63 }
0x1131   :  { %12687 = vmatpush3.msra.mxu0 %v7358_v36 }
0x1132   :  { %12688 = vmatprep.subr.mxu0 %v17382_v63 }
0x1133   :  { %12689 = vmatpush3.msra.mxu0 %v7357_v0 }
0x1134   :  { %12690 = vmatprep.subr.mxu0 %v17382_v63 }
0x1135   :  { %12691 = vmatpush3.msra.mxu0 %v7356_v3  ;;  %v7699_v3 = vld [vmem:[#allocation5 + $0x7e8] sm:$0xff] }
0x1136   :  { %12692 = vmatprep.subr.mxu0 %v17382_v63 }
0x1137   :  { %12693 = vmatpush3.msra.mxu0 %v7355_v55 }
0x1138   :  { %12694 = vmatprep.subr.mxu0 %v17382_v63 }
0x1139   :  { %12695 = vmatpush3.msra.mxu0 %v7354_v50 }
0x113a   :  { %12696 = vmatprep.subr.mxu0 %v17382_v63 }
0x113b   :  { %12697 = vmatpush3.msra.mxu0 %v7353_v53  ;;  %v7698_v53 = vld [vmem:[#allocation5 + $0x7e0] sm:$0xff] }
0x113c   :  { %12698 = vmatprep.subr.mxu0 %v17382_v63 }
0x113d   :  { %12699 = vmatpush3.msra.mxu0 %v7352_v48 }
0x113e   :  { %12780 = vmatprep.subr.mxu0 %v17382_v63 }
0x11b2   :  { %v7063_v26 = vpop.f32.mrf.mxu0 }
0x11b3   :  { %12660 = vmatmul.mubr.f32.vlgmr.msra.gmra.mxu1 %v7063_v26  ;;  %v7697_v26 = vld [vmem:[#allocation5 + $0x7d8] sm:$0xff] }
0x11b4   :  { %v12564_v14 = vpop.f32.mrf.mxu0  ;;  %12662 = vmatprep.mubr.msk.f32.mxu1 %vm17453_vm5, %v17382_v63 }
0x11b6   :  { %v7068_v56 = vpop.f32.mrf.mxu0 }
0x11b7   :  { %12663 = vmatmul.mubr.f32.gmra.mxu1 %v7068_v56  ;;  %v7696_v56 = vld [vmem:[#allocation5 + $0x7d0] sm:$0xff] }
0x11b8   :  { %v12567_v10 = vpop.f32.mrf.mxu0  ;;  %12665 = vmatprep.mubr.msk.f32.mxu1 %vm17453_vm5, %v17382_v63 }
0x11ba   :  { %v7073_v12 = vpop.f32.mrf.mxu0 }
0x11bb   :  { %12666 = vmatmul.mubr.f32.gmra.mxu1 %v7073_v12  ;;  %v7695_v12 = vld [vmem:[#allocation5 + $0x7c8] sm:$0xff] }
0x11bc   :  { %v12570_v4 = vpop.f32.mrf.mxu0  ;;  %12715 = vmatprep.mubr.msk.f32.mxu1 %vm17453_vm5, %v17382_v63 }
0x11be   :  { %v7143_v60 = vpop.f32.mrf.mxu0 }
0x11bf   :  { %12701 = vmatmul.mubr.f32.vlgmr.msra.gmra.mxu0 %v7143_v60  ;;  %v7694_v60 = vld [vmem:[#allocation5 + $0x7c0] sm:$0xff] }
0x11c0   :  { %v12579_v40 = vpop.f32.mrf.mxu0  ;;  %12703 = vmatprep.mubr.msk.f32.mxu0 %vm17453_vm5, %v17382_v63  ;;  %12781 = vmatpush3.msra.mxu0 %v7701_v28 }
0x11c1   :  { %12782 = vmatprep.subr.mxu0 %v17382_v63 }
0x11c2   :  { %v7148_v45 = vpop.f32.mrf.mxu0  ;;  %12783 = vmatpush3.msra.mxu0 %v7700_v54 }
0x11c3   :  { %12704 = vmatmul.mubr.f32.gmra.mxu0 %v7148_v45  ;;  %12784 = vmatprep.subr.mxu0 %v17382_v63  ;;  %v7693_v45 = vld [vmem:[#allocation5 + $0x7b8] sm:$0xff] }
0x11c4   :  { %v12582_v19 = vpop.f32.mrf.mxu0  ;;  %12706 = vmatprep.mubr.msk.f32.mxu0 %vm17453_vm5, %v17382_v63  ;;  %12785 = vmatpush3.msra.mxu0 %v7699_v3 }
0x11c5   :  { %12786 = vmatprep.subr.mxu0 %v17382_v63 }
0x11c6   :  { %v7153_v52 = vpop.f32.mrf.mxu0  ;;  %12787 = vmatpush3.msra.mxu0 %v7698_v53 }
0x11c7   :  { %12707 = vmatmul.mubr.f32.gmra.mxu0 %v7153_v52  ;;  %12788 = vmatprep.subr.mxu0 %v17382_v63  ;;  %v7692_v52 = vld [vmem:[#allocation5 + $0x7b0] sm:$0xff] }
0x11c8   :  { %v12585_v61 = vpop.f32.mrf.mxu0  ;;  %12812 = vmatprep.mubr.msk.f32.mxu0 %vm17453_vm5, %v17382_v63  ;;  %12789 = vmatpush3.msra.mxu0 %v7697_v26 }
0x11c9   :  { %12790 = vmatprep.subr.mxu0 %v17382_v63 }
0x11ca   :  { %12791 = vmatpush3.msra.mxu0 %v7696_v56 }
0x11cb   :  { %12792 = vmatprep.subr.mxu0 %v17382_v63 }
0x11cc   :  { %12793 = vmatpush3.msra.mxu0 %v7695_v12 }
0x11cd   :  { %12794 = vmatprep.subr.mxu0 %v17382_v63 }
0x11ce   :  { %12795 = vmatpush3.msra.mxu0 %v7694_v60  ;;  %v7718_v60 = vld [vmem:[#allocation5 + $0x878] sm:$0xff] }
0x11cf   :  { %12796 = vmatprep.subr.mxu0 %v17382_v63 }
0x11d0   :  { %12797 = vmatpush3.msra.mxu0 %v7693_v45  ;;  %v7716_v45 = vld [vmem:[#allocation5 + $0x868] sm:$0xff] }
0x11d1   :  { %12798 = vmatprep.subr.mxu0 %v17382_v63 }
0x11d2   :  { %12799 = vmatpush3.msra.mxu0 %v7692_v52  ;;  %v7714_v52 = vld [vmem:[#allocation5 + $0x858] sm:$0xff] }
0x11d3   :  { %12800 = vmatprep.subr.mxu0 %v17382_v63 }
0x11de   :  { %v7257_v59 = vpop.f32.mrf.mxu0 }
0x11e0   :  { %v12620_v44 = vpop.f32.mrf.mxu0 }
0x11e2   :  { %v7262_v13 = vpop.f32.mrf.mxu0 }
0x11e4   :  { %v12623_v32 = vpop.f32.mrf.mxu0 }
0x11e6   :  { %v7267_v1 = vpop.f32.mrf.mxu0 }
0x11e8   :  { %v12626_v21 = vpop.f32.mrf.mxu0 }
0x1273   :  { %v7337_v7 = vpop.f32.mrf.mxu1 }
0x1274   :  { %v7338_v31 = vadd.f32 %v7337_v7, %v7257_v59  ;;  %v7691_v59 = vld [vmem:[#allocation5 + $0x7a8] sm:$0xff]  ;;  %v7689_v7 = vld [vmem:[#allocation5 + $0x798] sm:$0xff] }
0x1275   :  { %v12661_v29 = vpop.f32.mrf.mxu1  ;;  %12801 = vmatpush3.msra.mxu0 %v7691_v59  ;;  %v7712_v59 = vld [vmem:[#allocation5 + $0x848] sm:$0xff] }
0x1276   :  { %12802 = vmatprep.subr.mxu0 %v17382_v63 }
0x1277   :  { %v7342_v57 = vpop.f32.mrf.mxu1 }
0x1278   :  { %v7343_v30 = vadd.f32 %v7342_v57, %v7262_v13  ;;  %v7690_v13 = vld [vmem:[#allocation5 + $0x7a0] sm:$0xff] }
0x1279   :  { %v12664_v58 = vpop.f32.mrf.mxu1  ;;  %12803 = vmatpush3.msra.mxu0 %v7690_v13  ;;  %v7710_v13 = vld [vmem:[#allocation5 + $0x838] sm:$0xff] }
0x127a   :  { %12804 = vmatprep.subr.mxu0 %v17382_v63 }
0x127b   :  { %v7347_v2 = vpop.f32.mrf.mxu1  ;;  %12805 = vmatpush3.msra.mxu0 %v7689_v7  ;;  %v7706_v7 = vld [vmem:[#allocation5 + $0x818] sm:$0xff] }
0x127c   :  { %v7348_v24 = vadd.f32 %v7347_v2, %v7267_v1  ;;  %v7688_v2 = vld [vmem:[#allocation5 + $0x790] sm:$0xff]  ;;  %12806 = vmatprep.subr.mxu0 %v17382_v63 }
0x127d   :  { %v12667_v49 = vpop.f32.mrf.mxu1  ;;  %12807 = vmatpush3.msra.mxu0 %v7688_v2  ;;  %v7895_v2 = vld [vmem:[#allocation5 + $0x8f8] sm:$0xff] }
0x127e   :  { %12808 = vmatprep.subr.mxu0 %v17382_v63 }
0x127f   :  { %v7434_v22 = vpop.f32.mrf.mxu0 }
0x1280   :  { %v7448_v47 = vadd.f32 %v7434_v22, %v7338_v31  ;;  %v7687_v31 = vld [vmem:[#allocation5 + $0x788] sm:$0xff] }
0x1281   :  { %v12702_v9 = vpop.f32.mrf.mxu0  ;;  %12809 = vmatpush3.msra.mxu0 %v7687_v31  ;;  %v7892_v31 = vld [vmem:[#allocation5 + $0x8e0] sm:$0xff] }
0x1282   :  { %v7457_v8 = vadd.f32 %v10078_v41, %v7448_v47  ;;  %12810 = vmatprep.subr.mxu0 %v17382_v63 }
0x1283   :  { %v7439_v51 = vpop.f32.mrf.mxu0 }
0x1284   :  { %v7449_v38 = vadd.f32 %v7439_v51, %v7343_v30  ;;  %v7460_v36 = vmul.f32 %v7457_v8, %v16099_v34 }
0x1285   :  { %v12705_v39 = vpop.f32.mrf.mxu0 }
0x1286   :  { %v7458_v16 = vadd.f32 %v10078_v41, %v7449_v38 }
0x1287   :  { %v7444_v25 = vpop.f32.mrf.mxu0 }
0x1288   :  { %v7461_v33 = vmul.f32 %v7458_v16, %v16094_v27  ;;  %v7450_v23 = vadd.f32 %v7444_v25, %v7348_v24 }
0x1289   :  { %v12708_v42 = vpop.f32.mrf.mxu0 }
0x128a   :  { %v7459_v0 = vadd.f32 %v10078_v41, %v7450_v23  ;;  %v7467_v55 = vadd.f32 %v7461_v33, %v7460_v36  ;;  %v10079_v23 = vld [vmem:[#allocation8 + $0x4] ss:$0 sm:$0xff] }
0x128c   :  { %v7462_v50 = vmul.f32 %v7459_v0, %v16103_v6 }
0x128e   :  { %v7468_v48 = vadd.f32 %v7467_v55, %v7462_v50 }
0x1290   :  { %v7469_v14 = vrot.slane %v7468_v48, 4 }
0x1292   :  { %v7470_v10 = vadd.f32 %v7469_v14, %v7468_v48 }
0x1294   :  { %v7471_v4 = vrot.slane %v7470_v10, 2 }
0x1296   :  { %v7472_v40 = vadd.f32 %v7471_v4, %v7470_v10 }
0x1298   :  { %v7473_v19 = vrot.slane %v7472_v40, 1 }
0x129a   :  { %v7474_v61 = vadd.f32 %v7473_v19, %v7472_v40  ;;  %v7717_v40 = vld [vmem:[#allocation5 + $0x870] sm:$0xff]  ;;  %v7715_v19 = vld [vmem:[#allocation5 + $0x860] sm:$0xff] }
0x129c   :  { %v7475_v44 = vmul.f32 0.0625, %v7474_v61  ;;  %v7713_v61 = vld [vmem:[#allocation5 + $0x850] sm:$0xff] }
0x129e   :  { %v7476_v32 = vsub.f32 %v7460_v36, %v7475_v44  ;;  %v7477_v1 = vsub.f32 %v7461_v33, %v7475_v44  ;;  %v7478_v21 = vsub.f32 %v7462_v50, %v7475_v44  ;;  %v10080_v36 = vld [vmem:[#allocation10 + $0x4] ss:$0 sm:$0xff]  ;;  %v7711_v44 = vld [vmem:[#allocation5 + $0x840] sm:$0xff] }
0x12a0   :  { %v7479_v29 = vmul.f32 %v7476_v32, %v16099_v34  ;;  %v7480_v57 = vmul.f32 %v7477_v1, %v16094_v27  ;;  %v7481_v58 = vmul.f32 %v7478_v21, %v16103_v6 }
0x12a2   :  { %v7482_v49 = vmul.f32 %v7479_v29, %v7479_v29  ;;  %v7483_v22 = vmul.f32 %v7480_v57, %v7480_v57  ;;  %v7484_v9 = vmul.f32 %v7481_v58, %v7481_v58  ;;  %v7705_v29 = vld [vmem:[#allocation5 + $0x810] sm:$0xff]  ;;  %v7704_v57 = vld [vmem:[#allocation5 + $0x808] sm:$0xff]  ;;  %v7703_v58 = vld [vmem:[#allocation5 + $0x800] sm:$0xff] }
0x12a4   :  { %v7485_v30 = vadd.f32 %v7483_v22, %v7482_v49  ;;  %v7894_v49 = vld [vmem:[#allocation5 + $0x8f0] sm:$0xff]  ;;  %v7893_v22 = vld [vmem:[#allocation5 + $0x8e8] sm:$0xff] }
0x12a6   :  { %v7486_v47 = vadd.f32 %v7485_v30, %v7484_v9  ;;  %v7891_v9 = vld [vmem:[#allocation5 + $0x8d8] sm:$0xff]  ;;  %v7890_v30 = vld [vmem:[#allocation5 + $0x8d0] sm:$0xff] }
0x12a8   :  { %v7487_v41 = vrot.slane %v7486_v47, 4 }
0x12aa   :  { %v7488_v51 = vadd.f32 %v7487_v41, %v7486_v47  ;;  %v7889_v47 = vld [vmem:[#allocation5 + $0x8c8] sm:$0xff]  ;;  %v7888_v41 = vld [vmem:[#allocation5 + $0x8c0] sm:$0xff] }
0x12ac   :  { %v7489_v38 = vrot.slane %v7488_v51, 2 }
0x12ae   :  { %v7490_v39 = vadd.f32 %v7489_v38, %v7488_v51  ;;  %v7887_v51 = vld [vmem:[#allocation5 + $0x8b8] sm:$0xff]  ;;  %v7686_v38 = vld [vmem:[#allocation5 + $0x780] sm:$0xff] }
0x12af   :  { %12811 = vmatpush3.msra.mxu0 %v7686_v38 }
0x12b0   :  { %v7491_v24 = vrot.slane %v7490_v39, 1  ;;  %12862 = vmatprep.subr.mxu0 %v17382_v63 }
0x12b2   :  { %v7492_v8 = vadd.f32 %v7491_v24, %v7490_v39  ;;  %v7886_v39 = vld [vmem:[#allocation5 + $0x8b0] sm:$0xff]  ;;  %v7885_v24 = vld [vmem:[#allocation5 + $0x8a8] sm:$0xff] }
0x12b4   :  { %v7493_v16 = vmul.f32 0.0625, %v7492_v8  ;;  %v7884_v8 = vld [vmem:[#allocation5 + $0x8a0] sm:$0xff] }
0x12b6   :  { %v7494_v25 = vadd.f32 1e-05, %v7493_v16  ;;  %v7883_v16 = vld [vmem:[#allocation5 + $0x898] sm:$0xff] }
0x12b8   :  { %13371 = vrsqrt.f32 %v7494_v25  ;;  %v7882_v25 = vld [vmem:[#allocation5 + $0x890] sm:$0xff] }
0x12c5   :  { %v13372_v33 = vpop.eup %13371 }
0x12c6   :  { %v7498_v42 = vmul.f32 %v13372_v33, %v7478_v21  ;;  %v7497_v28 = vmul.f32 %v13372_v33, %v7477_v1  ;;  %v7496_v54 = vmul.f32 %v13372_v33, %v7476_v32  ;;  %v7709_v32 = vld [vmem:[#allocation5 + $0x830] sm:$0xff]  ;;  %v7708_v1 = vld [vmem:[#allocation5 + $0x828] sm:$0xff]  ;;  %v7707_v21 = vld [vmem:[#allocation5 + $0x820] sm:$0xff] }
0x12c7   :  { %v7881_v33 = vld [vmem:[#allocation5 + $0x888] sm:$0xff] }
0x12c8   :  { %v7507_v0 = vmul.f32 %v10079_v23, %v7498_v42  ;;  %v7506_v3 = vmul.f32 %v10079_v23, %v7497_v28  ;;  %v7505_v55 = vmul.f32 %v10079_v23, %v7496_v54  ;;  %v7880_v23 = vld [vmem:[#allocation5 + $0x880] sm:$0xff] }
0x12ca   :  { %v7516_v50 = vadd.f32 %v10080_v36, %v7507_v0  ;;  %v7515_v53 = vadd.f32 %v10080_v36, %v7506_v3  ;;  %v7514_v48 = vadd.f32 %v10080_v36, %v7505_v55 }
0x12cc   :  { %v7519_v26 = vmax.f32 %v7516_v50, 0.0  ;;  %v7518_v14 = vmax.f32 %v7515_v53, 0.0  ;;  %v7517_v10 = vmax.f32 %v7514_v48, 0.0 }
0x12ce   :  { %v16612_v56 = vmul.f32 %v7519_v26, %v16103_v6  ;;  %v16616_v12 = vmul.f32 %v7518_v14, %v16094_v27  ;;  %v16621_v4 = vmul.f32 %v7517_v10, %v16099_v34 }
0x12d0   :  { %12710 = vmatpush3.msra.mxu1 %v16612_v56 }
0x12d1   :  { %12711 = vmatprep.subr.mxu1 %v17382_v63 }
0x12d2   :  { %12712 = vmatpush3.msra.mxu1 %v16616_v12 }
0x12d3   :  { %12713 = vmatprep.subr.mxu1 %v17382_v63 }
0x12d4   :  { %12714 = vmatpush3.msra.mxu1 %v16621_v4 }
0x12d5   :  { %12716 = vmatmul.mubr.msk.f32.vlgmr.msra.gmra.mxu1 %vm4869_vm13, %v15011_v37  ;;  %12724 = vmatprep.subr.mxu1 %v17382_v63 }
0x12d6   :  { %12725 = vmatpush3.msra.mxu1 %v16612_v56  ;;  %12718 = vmatprep.mubr.msk.f32.mxu1 %vm17453_vm5, %v17382_v63 }
0x12d7   :  { %12726 = vmatprep.subr.mxu1 %v17382_v63 }
0x12d8   :  { %12727 = vmatpush3.msra.mxu1 %v16616_v12 }
0x12d9   :  { %12719 = vmatmul.mubr.msk.f32.gmra.mxu1 %vm4869_vm13, %v15036_v20  ;;  %12728 = vmatprep.subr.mxu1 %v17382_v63 }
0x12da   :  { %12729 = vmatpush3.msra.mxu1 %v16621_v4  ;;  %12721 = vmatprep.mubr.msk.f32.mxu1 %vm17453_vm5, %v17382_v63 }
0x12db   :  { %12739 = vmatprep.subr.mxu1 %v17382_v63 }
0x12dd   :  { %12722 = vmatmul.mubr.msk.f32.gmra.mxu1 %vm4869_vm13, %v15059_v17 }
0x12de   :  { %12730 = vmatprep.mubr.msk.f32.mxu1 %vm17453_vm5, %v17382_v63 }
0x12e1   :  { %12731 = vmatmul.mubr.msk.f32.vlgmr.msra.gmra.mxu1 %vm4869_vm13, %v15017_v11 }
0x12e2   :  { %12740 = vmatpush3.msra.mxu1 %v7718_v60  ;;  %12733 = vmatprep.mubr.msk.f32.mxu1 %vm17453_vm5, %v17382_v63 }
0x12e3   :  { %12741 = vmatprep.subr.mxu1 %v17382_v63 }
0x12e4   :  { %12742 = vmatpush3.msra.mxu1 %v7717_v40 }
0x12e5   :  { %12743 = vmatprep.subr.mxu1 %v17382_v63  ;;  %12734 = vmatmul.mubr.msk.f32.gmra.mxu1 %vm4869_vm13, %v15042_v5 }
0x12e6   :  { %12744 = vmatpush3.msra.mxu1 %v7716_v45  ;;  %12736 = vmatprep.mubr.msk.f32.mxu1 %vm17453_vm5, %v17382_v63 }
0x12e7   :  { %12745 = vmatprep.subr.mxu1 %v17382_v63 }
0x12e8   :  { %12746 = vmatpush3.msra.mxu1 %v7715_v19 }
0x12e9   :  { %12747 = vmatprep.subr.mxu1 %v17382_v63  ;;  %12737 = vmatmul.mubr.msk.f32.gmra.mxu1 %vm4869_vm13, %v15065_v62 }
0x12ea   :  { %12748 = vmatpush3.msra.mxu1 %v7714_v52  ;;  %12771 = vmatprep.mubr.msk.f32.mxu1 %vm17453_vm5, %v17382_v63 }
0x12eb   :  { %12749 = vmatprep.subr.mxu1 %v17382_v63 }
0x12ec   :  { %12750 = vmatpush3.msra.mxu1 %v7713_v61 }
0x12ed   :  { %12751 = vmatprep.subr.mxu1 %v17382_v63 }
0x12ee   :  { %12752 = vmatpush3.msra.mxu1 %v7712_v59 }
0x12ef   :  { %12753 = vmatprep.subr.mxu1 %v17382_v63 }
0x12f0   :  { %12754 = vmatpush3.msra.mxu1 %v7711_v44 }
0x12f1   :  { %12755 = vmatprep.subr.mxu1 %v17382_v63 }
0x12f2   :  { %12756 = vmatpush3.msra.mxu1 %v7710_v13 }
0x12f3   :  { %12757 = vmatprep.subr.mxu1 %v17382_v63 }
0x12f4   :  { %12758 = vmatpush3.msra.mxu1 %v7709_v32 }
0x12f5   :  { %12759 = vmatprep.subr.mxu1 %v17382_v63 }
0x12f6   :  { %12760 = vmatpush3.msra.mxu1 %v7708_v1 }
0x12f7   :  { %12761 = vmatprep.subr.mxu1 %v17382_v63 }
0x12f8   :  { %12762 = vmatpush3.msra.mxu1 %v7707_v21 }
0x12f9   :  { %12763 = vmatprep.subr.mxu1 %v17382_v63 }
0x12fa   :  { %12764 = vmatpush3.msra.mxu1 %v7706_v7 }
0x12fb   :  { %12765 = vmatprep.subr.mxu1 %v17382_v63 }
0x12fc   :  { %12766 = vmatpush3.msra.mxu1 %v7705_v29  ;;  %v10087_v29 = vld [vmem:[#allocation7 + $0x5] ss:$0 sm:$0xff] }
0x12fd   :  { %12767 = vmatprep.subr.mxu1 %v17382_v63 }
0x12fe   :  { %12768 = vmatpush3.msra.mxu1 %v7704_v57 }
0x12ff   :  { %12769 = vmatprep.subr.mxu1 %v17382_v63 }
0x1300   :  { %12770 = vmatpush3.msra.mxu1 %v7703_v58 }
0x1301   :  { %12772 = vmatmul.mubr.f32.vlgmr.msra.gmra.mxu1 %v16621_v4  ;;  %12821 = vmatprep.subr.mxu1 %v17382_v63 }
0x1302   :  { %12774 = vmatprep.mubr.msk.f32.mxu1 %vm17453_vm5, %v17382_v63  ;;  %12822 = vmatpush3.msra.mxu1 %v7895_v2 }
0x1303   :  { %12823 = vmatprep.subr.mxu1 %v17382_v63 }
0x1304   :  { %12824 = vmatpush3.msra.mxu1 %v7894_v49 }
0x1305   :  { %12775 = vmatmul.mubr.f32.gmra.mxu1 %v16616_v12  ;;  %12825 = vmatprep.subr.mxu1 %v17382_v63 }
0x1306   :  { %12777 = vmatprep.mubr.msk.f32.mxu1 %vm17453_vm5, %v17382_v63  ;;  %12826 = vmatpush3.msra.mxu1 %v7893_v22 }
0x1307   :  { %12827 = vmatprep.subr.mxu1 %v17382_v63 }
0x1308   :  { %12828 = vmatpush3.msra.mxu1 %v7892_v31 }
0x1309   :  { %12778 = vmatmul.mubr.f32.gmra.mxu1 %v16612_v56  ;;  %12829 = vmatprep.subr.mxu1 %v17382_v63 }
0x130a   :  { %12830 = vmatpush3.msra.mxu1 %v7891_v9  ;;  %12853 = vmatprep.mubr.msk.f32.mxu1 %vm17453_vm5, %v17382_v63 }
0x130b   :  { %12831 = vmatprep.subr.mxu1 %v17382_v63 }
0x130c   :  { %12832 = vmatpush3.msra.mxu1 %v7890_v30 }
0x130d   :  { %12833 = vmatprep.subr.mxu1 %v17382_v63 }
0x130e   :  { %12834 = vmatpush3.msra.mxu1 %v7889_v47 }
0x130f   :  { %12835 = vmatprep.subr.mxu1 %v17382_v63 }
0x1310   :  { %12836 = vmatpush3.msra.mxu1 %v7888_v41 }
0x1311   :  { %12837 = vmatprep.subr.mxu1 %v17382_v63 }
0x1312   :  { %12838 = vmatpush3.msra.mxu1 %v7887_v51 }
0x1313   :  { %12839 = vmatprep.subr.mxu1 %v17382_v63 }
0x1314   :  { %12840 = vmatpush3.msra.mxu1 %v7886_v39  ;;  %v8232_v39 = vld [vmem:[#allocation5 + $0x978] sm:$0xff] }
0x1315   :  { %12841 = vmatprep.subr.mxu1 %v17382_v63 }
0x1316   :  { %12842 = vmatpush3.msra.mxu1 %v7885_v24  ;;  %v8231_v24 = vld [vmem:[#allocation5 + $0x970] sm:$0xff] }
0x1317   :  { %12843 = vmatprep.subr.mxu1 %v17382_v63 }
0x1318   :  { %12844 = vmatpush3.msra.mxu1 %v7884_v8 }
0x1319   :  { %12845 = vmatprep.subr.mxu1 %v17382_v63 }
0x131a   :  { %12846 = vmatpush3.msra.mxu1 %v7883_v16 }
0x131b   :  { %12847 = vmatprep.subr.mxu1 %v17382_v63 }
0x131c   :  { %12848 = vmatpush3.msra.mxu1 %v7882_v25  ;;  %v8230_v25 = vld [vmem:[#allocation5 + $0x968] sm:$0xff] }
0x131d   :  { %12849 = vmatprep.subr.mxu1 %v17382_v63 }
0x131e   :  { %12850 = vmatpush3.msra.mxu1 %v7881_v33 }
0x131f   :  { %12851 = vmatprep.subr.mxu1 %v17382_v63 }
0x1320   :  { %12852 = vmatpush3.msra.mxu1 %v7880_v23  ;;  %v8229_v23 = vld [vmem:[#allocation5 + $0x960] sm:$0xff] }
0x1321   :  { %12933 = vmatprep.subr.mxu1 %v17382_v63 }
0x1395   :  { %v7591_v42 = vpop.f32.mrf.mxu1 }
0x1396   :  { %12813 = vmatmul.mubr.f32.vlgmr.msra.gmra.mxu0 %v7591_v42 }
0x1397   :  { %v12717_v28 = vpop.f32.mrf.mxu1  ;;  %12815 = vmatprep.mubr.msk.f32.mxu0 %vm17453_vm5, %v17382_v63 }
0x1398   :  { %v8228_v28 = vld [vmem:[#allocation5 + $0x958] sm:$0xff] }
0x1399   :  { %v7596_v54 = vpop.f32.mrf.mxu1 }
0x139a   :  { %12816 = vmatmul.mubr.f32.gmra.mxu0 %v7596_v54 }
0x139b   :  { %v12720_v36 = vpop.f32.mrf.mxu1  ;;  %12818 = vmatprep.mubr.msk.f32.mxu0 %vm17453_vm5, %v17382_v63 }
0x139c   :  { %v8227_v36 = vld [vmem:[#allocation5 + $0x950] sm:$0xff] }
0x139d   :  { %v7601_v0 = vpop.f32.mrf.mxu1 }
0x139e   :  { %12819 = vmatmul.mubr.f32.gmra.mxu0 %v7601_v0 }
0x139f   :  { %v12723_v3 = vpop.f32.mrf.mxu1  ;;  %12868 = vmatprep.mubr.msk.f32.mxu0 %vm17453_vm5, %v17382_v63 }
0x13a0   :  { %v8226_v3 = vld [vmem:[#allocation5 + $0x948] sm:$0xff] }
0x13a1   :  { %v7671_v55 = vpop.f32.mrf.mxu1 }
0x13a2   :  { %12854 = vmatmul.mubr.f32.vlgmr.msra.gmra.mxu1 %v7671_v55 }
0x13a3   :  { %v12732_v50 = vpop.f32.mrf.mxu1  ;;  %12856 = vmatprep.mubr.msk.f32.mxu1 %vm17453_vm5, %v17382_v63  ;;  %12934 = vmatpush3.msra.mxu1 %v8232_v39  ;;  %v10089_v39 = vld [vmem:[#allocation10 + $0x5] ss:$0 sm:$0xff] }
0x13a4   :  { %12935 = vmatprep.subr.mxu1 %v17382_v63  ;;  %v8225_v50 = vld [vmem:[#allocation5 + $0x940] sm:$0xff] }
0x13a5   :  { %v7676_v53 = vpop.f32.mrf.mxu1  ;;  %12936 = vmatpush3.msra.mxu1 %v8231_v24 }
0x13a6   :  { %12857 = vmatmul.mubr.f32.gmra.mxu1 %v7676_v53  ;;  %12937 = vmatprep.subr.mxu1 %v17382_v63 }
0x13a7   :  { %v12735_v48 = vpop.f32.mrf.mxu1  ;;  %12859 = vmatprep.mubr.msk.f32.mxu1 %vm17453_vm5, %v17382_v63  ;;  %12938 = vmatpush3.msra.mxu1 %v8230_v25 }
0x13a8   :  { %12939 = vmatprep.subr.mxu1 %v17382_v63  ;;  %v8224_v48 = vld [vmem:[#allocation5 + $0x938] sm:$0xff] }
0x13a9   :  { %v7681_v26 = vpop.f32.mrf.mxu1  ;;  %12940 = vmatpush3.msra.mxu1 %v8229_v23 }
0x13aa   :  { %12860 = vmatmul.mubr.f32.gmra.mxu1 %v7681_v26  ;;  %12941 = vmatprep.subr.mxu1 %v17382_v63 }
0x13ab   :  { %v12738_v14 = vpop.f32.mrf.mxu1  ;;  %12965 = vmatprep.mubr.msk.f32.mxu1 %vm17453_vm5, %v17382_v63  ;;  %12942 = vmatpush3.msra.mxu1 %v8228_v28 }
0x13ac   :  { %12943 = vmatprep.subr.mxu1 %v17382_v63  ;;  %v8223_v14 = vld [vmem:[#allocation5 + $0x930] sm:$0xff] }
0x13ad   :  { %12944 = vmatpush3.msra.mxu1 %v8227_v36 }
0x13ae   :  { %12945 = vmatprep.subr.mxu1 %v17382_v63 }
0x13af   :  { %12946 = vmatpush3.msra.mxu1 %v8226_v3 }
0x13b0   :  { %12947 = vmatprep.subr.mxu1 %v17382_v63 }
0x13b1   :  { %12948 = vmatpush3.msra.mxu1 %v8225_v50 }
0x13b2   :  { %12949 = vmatprep.subr.mxu1 %v17382_v63 }
0x13b3   :  { %12950 = vmatpush3.msra.mxu1 %v8224_v48  ;;  %v8246_v48 = vld [vmem:[#allocation5 + $0x9e0] sm:$0xff] }
0x13b4   :  { %12951 = vmatprep.subr.mxu1 %v17382_v63 }
0x13b5   :  { %12952 = vmatpush3.msra.mxu1 %v8223_v14  ;;  %v8244_v14 = vld [vmem:[#allocation5 + $0x9d0] sm:$0xff] }
0x13b6   :  { %12953 = vmatprep.subr.mxu1 %v17382_v63 }
0x13c1   :  { %v7785_v56 = vpop.f32.mrf.mxu1 }
0x13c3   :  { %v12773_v10 = vpop.f32.mrf.mxu1 }
0x13c4   :  { %v8222_v10 = vld [vmem:[#allocation5 + $0x928] sm:$0xff] }
0x13c5   :  { %v7790_v12 = vpop.f32.mrf.mxu1  ;;  %12954 = vmatpush3.msra.mxu1 %v8222_v10  ;;  %v8242_v10 = vld [vmem:[#allocation5 + $0x9c0] sm:$0xff] }
0x13c6   :  { %12955 = vmatprep.subr.mxu1 %v17382_v63 }
0x13c7   :  { %v12776_v4 = vpop.f32.mrf.mxu1 }
0x13c9   :  { %v7795_v60 = vpop.f32.mrf.mxu1 }
0x13cb   :  { %v12779_v40 = vpop.f32.mrf.mxu1 }
0x13cc   :  { %v8221_v40 = vld [vmem:[#allocation5 + $0x920] sm:$0xff] }
0x13cd   :  { %12956 = vmatpush3.msra.mxu1 %v8221_v40  ;;  %v8238_v40 = vld [vmem:[#allocation5 + $0x9a0] sm:$0xff] }
0x13ce   :  { %12957 = vmatprep.subr.mxu1 %v17382_v63 }
0x1456   :  { %v7865_v45 = vpop.f32.mrf.mxu0 }
0x1457   :  { %v7866_v32 = vadd.f32 %v7865_v45, %v7785_v56 }
0x1458   :  { %v12814_v19 = vpop.f32.mrf.mxu0 }
0x145a   :  { %v7870_v52 = vpop.f32.mrf.mxu0 }
0x145b   :  { %v7871_v21 = vadd.f32 %v7870_v52, %v7790_v12 }
0x145c   :  { %v12817_v61 = vpop.f32.mrf.mxu0 }
0x145d   :  { %v8220_v61 = vld [vmem:[#allocation5 + $0x918] sm:$0xff] }
0x145e   :  { %v7875_v59 = vpop.f32.mrf.mxu0  ;;  %12958 = vmatpush3.msra.mxu1 %v8220_v61  ;;  %v8234_v61 = vld [vmem:[#allocation5 + $0x980] sm:$0xff] }
0x145f   :  { %v7876_v49 = vadd.f32 %v7875_v59, %v7795_v60  ;;  %12959 = vmatprep.subr.mxu1 %v17382_v63 }
0x1460   :  { %v12820_v44 = vpop.f32.mrf.mxu0 }
0x1462   :  { %v7962_v13 = vpop.f32.mrf.mxu1 }
0x1463   :  { %v7976_v7 = vadd.f32 %v7962_v13, %v7866_v32  ;;  %v8219_v13 = vld [vmem:[#allocation5 + $0x910] sm:$0xff] }
0x1464   :  { %v12855_v1 = vpop.f32.mrf.mxu1  ;;  %12960 = vmatpush3.msra.mxu1 %v8219_v13  ;;  %v8424_v13 = vld [vmem:[#allocation5 + $0xa68] sm:$0xff] }
0x1465   :  { %v7985_v22 = vadd.f32 %v10087_v29, %v7976_v7  ;;  %12961 = vmatprep.subr.mxu1 %v17382_v63 }
0x1466   :  { %v7967_v57 = vpop.f32.mrf.mxu1 }
0x1467   :  { %v7977_v58 = vadd.f32 %v7967_v57, %v7871_v21  ;;  %v7988_v51 = vmul.f32 %v7985_v22, %v16099_v34  ;;  %v8218_v21 = vld [vmem:[#allocation5 + $0x908] sm:$0xff] }
0x1468   :  { %v12858_v2 = vpop.f32.mrf.mxu1  ;;  %12962 = vmatpush3.msra.mxu1 %v8218_v21  ;;  %v8421_v21 = vld [vmem:[#allocation5 + $0xa50] sm:$0xff] }
0x1469   :  { %v7986_v31 = vadd.f32 %v10087_v29, %v7977_v58  ;;  %12963 = vmatprep.subr.mxu1 %v17382_v63 }
0x146a   :  { %v7972_v9 = vpop.f32.mrf.mxu1 }
0x146b   :  { %v7989_v30 = vmul.f32 %v7986_v31, %v16094_v27  ;;  %v7978_v47 = vadd.f32 %v7972_v9, %v7876_v49 }
0x146c   :  { %v12861_v41 = vpop.f32.mrf.mxu1 }
0x146d   :  { %v7987_v38 = vadd.f32 %v10087_v29, %v7978_v47  ;;  %v7995_v8 = vadd.f32 %v7989_v30, %v7988_v51  ;;  %v10088_v47 = vld [vmem:[#allocation8 + $0x5] ss:$0 sm:$0xff] }
0x146f   :  { %v7990_v16 = vmul.f32 %v7987_v38, %v16103_v6 }
0x1471   :  { %v7996_v33 = vadd.f32 %v7995_v8, %v7990_v16 }
0x1473   :  { %v7997_v42 = vrot.slane %v7996_v33, 4 }
0x1475   :  { %v7998_v54 = vadd.f32 %v7997_v42, %v7996_v33 }
0x1477   :  { %v7999_v0 = vrot.slane %v7998_v54, 2 }
0x1479   :  { %v8000_v55 = vadd.f32 %v7999_v0, %v7998_v54 }
0x147b   :  { %v8001_v53 = vrot.slane %v8000_v55, 1 }
0x147d   :  { %v8002_v26 = vadd.f32 %v8001_v53, %v8000_v55  ;;  %v8247_v53 = vld [vmem:[#allocation5 + $0x9e8] sm:$0xff] }
0x147f   :  { %v8003_v56 = vmul.f32 0.0625, %v8002_v26  ;;  %v8245_v26 = vld [vmem:[#allocation5 + $0x9d8] sm:$0xff] }
0x1481   :  { %v8004_v12 = vsub.f32 %v7988_v51, %v8003_v56  ;;  %v8005_v4 = vsub.f32 %v7989_v30, %v8003_v56  ;;  %v8006_v60 = vsub.f32 %v7990_v16, %v8003_v56  ;;  %v8243_v56 = vld [vmem:[#allocation5 + $0x9c8] sm:$0xff] }
0x1483   :  { %v8007_v45 = vmul.f32 %v8004_v12, %v16099_v34  ;;  %v8008_v19 = vmul.f32 %v8005_v4, %v16094_v27  ;;  %v8009_v52 = vmul.f32 %v8006_v60, %v16103_v6 }
0x1485   :  { %v8010_v59 = vmul.f32 %v8007_v45, %v8007_v45  ;;  %v8011_v44 = vmul.f32 %v8008_v19, %v8008_v19  ;;  %v8012_v32 = vmul.f32 %v8009_v52, %v8009_v52  ;;  %v8237_v45 = vld [vmem:[#allocation5 + $0x998] sm:$0xff]  ;;  %v8236_v19 = vld [vmem:[#allocation5 + $0x990] sm:$0xff]  ;;  %v8235_v52 = vld [vmem:[#allocation5 + $0x988] sm:$0xff] }
0x1487   :  { %v8013_v1 = vadd.f32 %v8011_v44, %v8010_v59  ;;  %v8426_v59 = vld [vmem:[#allocation5 + $0xa78] sm:$0xff]  ;;  %v8425_v44 = vld [vmem:[#allocation5 + $0xa70] sm:$0xff] }
0x1489   :  { %v8014_v7 = vadd.f32 %v8013_v1, %v8012_v32  ;;  %v8423_v32 = vld [vmem:[#allocation5 + $0xa60] sm:$0xff]  ;;  %v8422_v1 = vld [vmem:[#allocation5 + $0xa58] sm:$0xff] }
0x148b   :  { %v8015_v29 = vrot.slane %v8014_v7, 4 }
0x148d   :  { %v8016_v57 = vadd.f32 %v8015_v29, %v8014_v7  ;;  %v8420_v7 = vld [vmem:[#allocation5 + $0xa48] sm:$0xff]  ;;  %v8419_v29 = vld [vmem:[#allocation5 + $0xa40] sm:$0xff] }
0x148f   :  { %v8017_v58 = vrot.slane %v8016_v57, 2 }
0x1491   :  { %v8018_v2 = vadd.f32 %v8017_v58, %v8016_v57  ;;  %v8418_v57 = vld [vmem:[#allocation5 + $0xa38] sm:$0xff]  ;;  %v8217_v58 = vld [vmem:[#allocation5 + $0x900] sm:$0xff] }
0x1492   :  { %12964 = vmatpush3.msra.mxu1 %v8217_v58  ;;  %v8759_v58 = vld [vmem:[#allocation5 + $0xaf0] sm:$0xff] }
0x1493   :  { %v8019_v49 = vrot.slane %v8018_v2, 1  ;;  %13015 = vmatprep.subr.mxu1 %v17382_v63 }
0x1495   :  { %v8020_v22 = vadd.f32 %v8019_v49, %v8018_v2  ;;  %v8417_v2 = vld [vmem:[#allocation5 + $0xa30] sm:$0xff]  ;;  %v8416_v49 = vld [vmem:[#allocation5 + $0xa28] sm:$0xff] }
0x1497   :  { %v8021_v31 = vmul.f32 0.0625, %v8020_v22  ;;  %v8415_v22 = vld [vmem:[#allocation5 + $0xa20] sm:$0xff] }
0x1499   :  { %v8022_v9 = vadd.f32 1e-05, %v8021_v31  ;;  %v8414_v31 = vld [vmem:[#allocation5 + $0xa18] sm:$0xff] }
0x149b   :  { %13373 = vrsqrt.f32 %v8022_v9  ;;  %v8413_v9 = vld [vmem:[#allocation5 + $0xa10] sm:$0xff] }
0x14a8   :  { %v13374_v30 = vpop.eup %13373 }
0x14a9   :  { %v8026_v41 = vmul.f32 %v13374_v30, %v8006_v60  ;;  %v8025_v51 = vmul.f32 %v13374_v30, %v8005_v4  ;;  %v8024_v38 = vmul.f32 %v13374_v30, %v8004_v12  ;;  %v8241_v12 = vld [vmem:[#allocation5 + $0x9b8] sm:$0xff]  ;;  %v8240_v4 = vld [vmem:[#allocation5 + $0x9b0] sm:$0xff]  ;;  %v8239_v60 = vld [vmem:[#allocation5 + $0x9a8] sm:$0xff] }
0x14aa   :  { %v8412_v30 = vld [vmem:[#allocation5 + $0xa08] sm:$0xff] }
0x14ab   :  { %v8035_v24 = vmul.f32 %v10088_v47, %v8026_v41  ;;  %v8034_v8 = vmul.f32 %v10088_v47, %v8025_v51  ;;  %v8033_v16 = vmul.f32 %v10088_v47, %v8024_v38  ;;  %v8411_v47 = vld [vmem:[#allocation5 + $0xa00] sm:$0xff] }
0x14ad   :  { %v8044_v25 = vadd.f32 %v10089_v39, %v8035_v24  ;;  %v8043_v33 = vadd.f32 %v10089_v39, %v8034_v8  ;;  %v8042_v23 = vadd.f32 %v10089_v39, %v8033_v16 }
0x14af   :  { %v8047_v42 = vadd.f32 %v8044_v25, %v16492_v43  ;;  %v8046_v28 = vadd.f32 %v8043_v33, %v16496_v46  ;;  %v8045_v54 = vadd.f32 %v8042_v23, %v16501_v35  ;;  %v8249_v46 = vld [vmem:[#allocation5 + $0x9f8] sm:$0xff]  ;;  %v8248_v35 = vld [vmem:[#allocation5 + $0x9f0] sm:$0xff] }
0x14b1   :  { %v8050_v36 = vmax.f32 %v8047_v42, 0.0  ;;  %v8049_v0 = vmax.f32 %v8046_v28, 0.0  ;;  %v8048_v55 = vmax.f32 %v8045_v54, 0.0 }
0x14b3   :  { %v16735_v3 = vmul.f32 %v8050_v36, %v16103_v6  ;;  %v16739_v50 = vmul.f32 %v8049_v0, %v16094_v27  ;;  %v16744_v43 = vmul.f32 %v8048_v55, %v16099_v34 }
0x14b5   :  { %12863 = vmatpush3.msra.mxu0 %v16735_v3 }
0x14b6   :  { %12864 = vmatprep.subr.mxu0 %v17382_v63 }
0x14b7   :  { %12865 = vmatpush3.msra.mxu0 %v16739_v50 }
0x14b8   :  { %12866 = vmatprep.subr.mxu0 %v17382_v63 }
0x14b9   :  { %12867 = vmatpush3.msra.mxu0 %v16744_v43 }
0x14ba   :  { %12869 = vmatmul.mubr.msk.f32.vlgmr.msra.gmra.mxu0 %vm4869_vm13, %v15011_v37  ;;  %12877 = vmatprep.subr.mxu0 %v17382_v63 }
0x14bb   :  { %12878 = vmatpush3.msra.mxu0 %v16735_v3  ;;  %12871 = vmatprep.mubr.msk.f32.mxu0 %vm17453_vm5, %v17382_v63 }
0x14bc   :  { %12879 = vmatprep.subr.mxu0 %v17382_v63 }
0x14bd   :  { %12880 = vmatpush3.msra.mxu0 %v16739_v50 }
0x14be   :  { %12872 = vmatmul.mubr.msk.f32.gmra.mxu0 %vm4869_vm13, %v15036_v20  ;;  %12881 = vmatprep.subr.mxu0 %v17382_v63 }
0x14bf   :  { %12882 = vmatpush3.msra.mxu0 %v16744_v43  ;;  %12874 = vmatprep.mubr.msk.f32.mxu0 %vm17453_vm5, %v17382_v63 }
0x14c0   :  { %12892 = vmatprep.subr.mxu0 %v17382_v63 }
0x14c2   :  { %12875 = vmatmul.mubr.msk.f32.gmra.mxu0 %vm4869_vm13, %v15059_v17 }
0x14c3   :  { %12883 = vmatprep.mubr.msk.f32.mxu0 %vm17453_vm5, %v17382_v63 }
0x14c6   :  { %12884 = vmatmul.mubr.msk.f32.vlgmr.msra.gmra.mxu0 %vm4869_vm13, %v15017_v11 }
0x14c7   :  { %12893 = vmatpush3.msra.mxu0 %v8249_v46  ;;  %12886 = vmatprep.mubr.msk.f32.mxu0 %vm17453_vm5, %v17382_v63 }
0x14c8   :  { %12894 = vmatprep.subr.mxu0 %v17382_v63 }
0x14c9   :  { %12895 = vmatpush3.msra.mxu0 %v8248_v35 }
0x14ca   :  { %12896 = vmatprep.subr.mxu0 %v17382_v63  ;;  %12887 = vmatmul.mubr.msk.f32.gmra.mxu0 %vm4869_vm13, %v15042_v5 }
0x14cb   :  { %12897 = vmatpush3.msra.mxu0 %v8247_v53  ;;  %12889 = vmatprep.mubr.msk.f32.mxu0 %vm17453_vm5, %v17382_v63 }
0x14cc   :  { %12898 = vmatprep.subr.mxu0 %v17382_v63 }
0x14cd   :  { %12899 = vmatpush3.msra.mxu0 %v8246_v48 }
0x14ce   :  { %12900 = vmatprep.subr.mxu0 %v17382_v63  ;;  %12890 = vmatmul.mubr.msk.f32.gmra.mxu0 %vm4869_vm13, %v15065_v62 }
0x14cf   :  { %12901 = vmatpush3.msra.mxu0 %v8245_v26  ;;  %12924 = vmatprep.mubr.msk.f32.mxu0 %vm17453_vm5, %v17382_v63 }
0x14d0   :  { %12902 = vmatprep.subr.mxu0 %v17382_v63 }
0x14d1   :  { %12903 = vmatpush3.msra.mxu0 %v8244_v14 }
0x14d2   :  { %12904 = vmatprep.subr.mxu0 %v17382_v63 }
0x14d3   :  { %12905 = vmatpush3.msra.mxu0 %v8243_v56 }
0x14d4   :  { %12906 = vmatprep.subr.mxu0 %v17382_v63 }
0x14d5   :  { %12907 = vmatpush3.msra.mxu0 %v8242_v10 }
0x14d6   :  { %12908 = vmatprep.subr.mxu0 %v17382_v63 }
0x14d7   :  { %12909 = vmatpush3.msra.mxu0 %v8241_v12 }
0x14d8   :  { %12910 = vmatprep.subr.mxu0 %v17382_v63 }
0x14d9   :  { %12911 = vmatpush3.msra.mxu0 %v8240_v4 }
0x14da   :  { %12912 = vmatprep.subr.mxu0 %v17382_v63 }
0x14db   :  { %12913 = vmatpush3.msra.mxu0 %v8239_v60 }
0x14dc   :  { %12914 = vmatprep.subr.mxu0 %v17382_v63 }
0x14dd   :  { %12915 = vmatpush3.msra.mxu0 %v8238_v40 }
0x14de   :  { %12916 = vmatprep.subr.mxu0 %v17382_v63 }
0x14df   :  { %12917 = vmatpush3.msra.mxu0 %v8237_v45 }
0x14e0   :  { %12918 = vmatprep.subr.mxu0 %v17382_v63 }
0x14e1   :  { %12919 = vmatpush3.msra.mxu0 %v8236_v19  ;;  %v10096_v19 = vld [vmem:[#allocation7 + $0x6] ss:$0 sm:$0xff] }
0x14e2   :  { %12920 = vmatprep.subr.mxu0 %v17382_v63 }
0x14e3   :  { %12921 = vmatpush3.msra.mxu0 %v8235_v52 }
0x14e4   :  { %12922 = vmatprep.subr.mxu0 %v17382_v63 }
0x14e5   :  { %12923 = vmatpush3.msra.mxu0 %v8234_v61 }
0x14e6   :  { %12925 = vmatmul.mubr.f32.vlgmr.msra.gmra.mxu0 %v16744_v43  ;;  %12974 = vmatprep.subr.mxu0 %v17382_v63 }
0x14e7   :  { %12927 = vmatprep.mubr.msk.f32.mxu0 %vm17453_vm5, %v17382_v63  ;;  %12975 = vmatpush3.msra.mxu0 %v8426_v59 }
0x14e8   :  { %12976 = vmatprep.subr.mxu0 %v17382_v63 }
0x14e9   :  { %12977 = vmatpush3.msra.mxu0 %v8425_v44 }
0x14ea   :  { %12928 = vmatmul.mubr.f32.gmra.mxu0 %v16739_v50  ;;  %12978 = vmatprep.subr.mxu0 %v17382_v63 }
0x14eb   :  { %12930 = vmatprep.mubr.msk.f32.mxu0 %vm17453_vm5, %v17382_v63  ;;  %12979 = vmatpush3.msra.mxu0 %v8424_v13 }
0x14ec   :  { %12980 = vmatprep.subr.mxu0 %v17382_v63 }
0x14ed   :  { %12981 = vmatpush3.msra.mxu0 %v8423_v32 }
0x14ee   :  { %12931 = vmatmul.mubr.f32.gmra.mxu0 %v16735_v3  ;;  %12982 = vmatprep.subr.mxu0 %v17382_v63 }
0x14ef   :  { %12983 = vmatpush3.msra.mxu0 %v8422_v1  ;;  %13006 = vmatprep.mubr.msk.f32.mxu0 %vm17453_vm5, %v17382_v63 }
0x14f0   :  { %12984 = vmatprep.subr.mxu0 %v17382_v63 }
0x14f1   :  { %12985 = vmatpush3.msra.mxu0 %v8421_v21 }
0x14f2   :  { %12986 = vmatprep.subr.mxu0 %v17382_v63 }
0x14f3   :  { %12987 = vmatpush3.msra.mxu0 %v8420_v7 }
0x14f4   :  { %12988 = vmatprep.subr.mxu0 %v17382_v63 }
0x14f5   :  { %12989 = vmatpush3.msra.mxu0 %v8419_v29 }
0x14f6   :  { %12990 = vmatprep.subr.mxu0 %v17382_v63 }
0x14f7   :  { %12991 = vmatpush3.msra.mxu0 %v8418_v57  ;;  %v8760_v57 = vld [vmem:[#allocation5 + $0xaf8] sm:$0xff] }
0x14f8   :  { %12992 = vmatprep.subr.mxu0 %v17382_v63 }
0x14f9   :  { %12993 = vmatpush3.msra.mxu0 %v8417_v2 }
0x14fa   :  { %12994 = vmatprep.subr.mxu0 %v17382_v63 }
0x14fb   :  { %12995 = vmatpush3.msra.mxu0 %v8416_v49 }
0x14fc   :  { %12996 = vmatprep.subr.mxu0 %v17382_v63 }
0x14fd   :  { %12997 = vmatpush3.msra.mxu0 %v8415_v22  ;;  %v8758_v22 = vld [vmem:[#allocation5 + $0xae8] sm:$0xff] }
0x14fe   :  { %12998 = vmatprep.subr.mxu0 %v17382_v63 }
0x14ff   :  { %12999 = vmatpush3.msra.mxu0 %v8414_v31 }
0x1500   :  { %13000 = vmatprep.subr.mxu0 %v17382_v63 }
0x1501   :  { %13001 = vmatpush3.msra.mxu0 %v8413_v9 }
0x1502   :  { %13002 = vmatprep.subr.mxu0 %v17382_v63 }
0x1503   :  { %13003 = vmatpush3.msra.mxu0 %v8412_v30  ;;  %v8757_v30 = vld [vmem:[#allocation5 + $0xae0] sm:$0xff] }
0x1504   :  { %13004 = vmatprep.subr.mxu0 %v17382_v63 }
0x1505   :  { %13005 = vmatpush3.msra.mxu0 %v8411_v47 }
0x1506   :  { %13086 = vmatprep.subr.mxu0 %v17382_v63 }
0x157a   :  { %v8122_v41 = vpop.f32.mrf.mxu0 }
0x157b   :  { %12966 = vmatmul.mubr.f32.vlgmr.msra.gmra.mxu1 %v8122_v41  ;;  %v8756_v41 = vld [vmem:[#allocation5 + $0xad8] sm:$0xff] }
0x157c   :  { %v12870_v51 = vpop.f32.mrf.mxu0  ;;  %12968 = vmatprep.mubr.msk.f32.mxu1 %vm17453_vm5, %v17382_v63 }
0x157e   :  { %v8127_v38 = vpop.f32.mrf.mxu0 }
0x157f   :  { %12969 = vmatmul.mubr.f32.gmra.mxu1 %v8127_v38  ;;  %v8755_v38 = vld [vmem:[#allocation5 + $0xad0] sm:$0xff] }
0x1580   :  { %v12873_v39 = vpop.f32.mrf.mxu0  ;;  %12971 = vmatprep.mubr.msk.f32.mxu1 %vm17453_vm5, %v17382_v63 }
0x1582   :  { %v8132_v24 = vpop.f32.mrf.mxu0 }
0x1583   :  { %12972 = vmatmul.mubr.f32.gmra.mxu1 %v8132_v24  ;;  %v8754_v24 = vld [vmem:[#allocation5 + $0xac8] sm:$0xff] }
0x1584   :  { %v12876_v8 = vpop.f32.mrf.mxu0  ;;  %13021 = vmatprep.mubr.msk.f32.mxu1 %vm17453_vm5, %v17382_v63 }
0x1586   :  { %v8202_v16 = vpop.f32.mrf.mxu0 }
0x1587   :  { %13007 = vmatmul.mubr.f32.vlgmr.msra.gmra.mxu0 %v8202_v16  ;;  %v8753_v16 = vld [vmem:[#allocation5 + $0xac0] sm:$0xff] }
0x1588   :  { %v12885_v25 = vpop.f32.mrf.mxu0  ;;  %13009 = vmatprep.mubr.msk.f32.mxu0 %vm17453_vm5, %v17382_v63  ;;  %13087 = vmatpush3.msra.mxu0 %v8760_v57 }
0x1589   :  { %13088 = vmatprep.subr.mxu0 %v17382_v63 }
0x158a   :  { %v8207_v33 = vpop.f32.mrf.mxu0  ;;  %13089 = vmatpush3.msra.mxu0 %v8759_v58 }
0x158b   :  { %13010 = vmatmul.mubr.f32.gmra.mxu0 %v8207_v33  ;;  %13090 = vmatprep.subr.mxu0 %v17382_v63  ;;  %v8752_v33 = vld [vmem:[#allocation5 + $0xab8] sm:$0xff] }
0x158c   :  { %v12888_v23 = vpop.f32.mrf.mxu0  ;;  %13012 = vmatprep.mubr.msk.f32.mxu0 %vm17453_vm5, %v17382_v63  ;;  %13091 = vmatpush3.msra.mxu0 %v8758_v22 }
0x158d   :  { %13092 = vmatprep.subr.mxu0 %v17382_v63 }
0x158e   :  { %v8212_v42 = vpop.f32.mrf.mxu0  ;;  %13093 = vmatpush3.msra.mxu0 %v8757_v30 }
0x158f   :  { %13013 = vmatmul.mubr.f32.gmra.mxu0 %v8212_v42  ;;  %13094 = vmatprep.subr.mxu0 %v17382_v63  ;;  %v8751_v42 = vld [vmem:[#allocation5 + $0xab0] sm:$0xff] }
0x1590   :  { %v12891_v28 = vpop.f32.mrf.mxu0  ;;  %13118 = vmatprep.mubr.msk.f32.mxu0 %vm17453_vm5, %v17382_v63  ;;  %13095 = vmatpush3.msra.mxu0 %v8756_v41 }
0x1591   :  { %13096 = vmatprep.subr.mxu0 %v17382_v63 }
0x1592   :  { %13097 = vmatpush3.msra.mxu0 %v8755_v38 }
0x1593   :  { %13098 = vmatprep.subr.mxu0 %v17382_v63 }
0x1594   :  { %13099 = vmatpush3.msra.mxu0 %v8754_v24 }
0x1595   :  { %13100 = vmatprep.subr.mxu0 %v17382_v63 }
0x1596   :  { %13101 = vmatpush3.msra.mxu0 %v8753_v16  ;;  %v8775_v16 = vld [vmem:[#allocation5 + $0xb68] sm:$0xff] }
0x1597   :  { %13102 = vmatprep.subr.mxu0 %v17382_v63 }
0x1598   :  { %13103 = vmatpush3.msra.mxu0 %v8752_v33  ;;  %v8770_v33 = vld [vmem:[#allocation5 + $0xb40] sm:$0xff] }
0x1599   :  { %13104 = vmatprep.subr.mxu0 %v17382_v63 }
0x159a   :  { %13105 = vmatpush3.msra.mxu0 %v8751_v42  ;;  %v8767_v42 = vld [vmem:[#allocation5 + $0xb28] sm:$0xff] }
0x159b   :  { %13106 = vmatprep.subr.mxu0 %v17382_v63 }
0x15a6   :  { %v8316_v54 = vpop.f32.mrf.mxu0 }
0x15a8   :  { %v12926_v36 = vpop.f32.mrf.mxu0 }
0x15aa   :  { %v8321_v0 = vpop.f32.mrf.mxu0 }
0x15ac   :  { %v12929_v55 = vpop.f32.mrf.mxu0 }
0x15ae   :  { %v8326_v46 = vpop.f32.mrf.mxu0 }
0x15b0   :  { %v12932_v35 = vpop.f32.mrf.mxu0 }
0x163b   :  { %v8396_v53 = vpop.f32.mrf.mxu1 }
0x163c   :  { %v8397_v4 = vadd.f32 %v8396_v53, %v8316_v54  ;;  %v8750_v54 = vld [vmem:[#allocation5 + $0xaa8] sm:$0xff]  ;;  %v8748_v53 = vld [vmem:[#allocation5 + $0xa98] sm:$0xff] }
0x163d   :  { %v12967_v48 = vpop.f32.mrf.mxu1  ;;  %13107 = vmatpush3.msra.mxu0 %v8750_v54  ;;  %v8765_v54 = vld [vmem:[#allocation5 + $0xb18] sm:$0xff] }
0x163e   :  { %13108 = vmatprep.subr.mxu0 %v17382_v63 }
0x163f   :  { %v8401_v26 = vpop.f32.mrf.mxu1 }
0x1640   :  { %v8402_v40 = vadd.f32 %v8401_v26, %v8321_v0  ;;  %v8749_v0 = vld [vmem:[#allocation5 + $0xaa0] sm:$0xff] }
0x1641   :  { %v12970_v14 = vpop.f32.mrf.mxu1  ;;  %13109 = vmatpush3.msra.mxu0 %v8749_v0  ;;  %v8763_v0 = vld [vmem:[#allocation5 + $0xb08] sm:$0xff] }
0x1642   :  { %13110 = vmatprep.subr.mxu0 %v17382_v63 }
0x1643   :  { %v8406_v56 = vpop.f32.mrf.mxu1  ;;  %13111 = vmatpush3.msra.mxu0 %v8748_v53  ;;  %v8952_v53 = vld [vmem:[#allocation5 + $0xbe8] sm:$0xff] }
0x1644   :  { %v8407_v44 = vadd.f32 %v8406_v56, %v8326_v46  ;;  %v8747_v56 = vld [vmem:[#allocation5 + $0xa90] sm:$0xff]  ;;  %13112 = vmatprep.subr.mxu0 %v17382_v63 }
0x1645   :  { %v12973_v10 = vpop.f32.mrf.mxu1  ;;  %13113 = vmatpush3.msra.mxu0 %v8747_v56  ;;  %v8948_v56 = vld [vmem:[#allocation5 + $0xbc8] sm:$0xff] }
0x1646   :  { %13114 = vmatprep.subr.mxu0 %v17382_v63 }
0x1647   :  { %v8493_v12 = vpop.f32.mrf.mxu0 }
0x1648   :  { %v8507_v45 = vadd.f32 %v8493_v12, %v8397_v4  ;;  %v8746_v4 = vld [vmem:[#allocation5 + $0xa88] sm:$0xff] }
0x1649   :  { %v13008_v60 = vpop.f32.mrf.mxu0  ;;  %13115 = vmatpush3.msra.mxu0 %v8746_v4  ;;  %v8745_v4 = vld [vmem:[#allocation5 + $0xa80] sm:$0xff] }
0x164a   :  { %v8516_v13 = vadd.f32 %v10096_v19, %v8507_v45  ;;  %13116 = vmatprep.subr.mxu0 %v17382_v63 }
0x164b   :  { %v8498_v52 = vpop.f32.mrf.mxu0  ;;  %13117 = vmatpush3.msra.mxu0 %v8745_v4 }
0x164c   :  { %v8508_v61 = vadd.f32 %v8498_v52, %v8402_v40  ;;  %v8519_v2 = vmul.f32 %v8516_v13, %v16099_v34  ;;  %13168 = vmatprep.subr.mxu0 %v17382_v63 }
0x164d   :  { %v13011_v59 = vpop.f32.mrf.mxu0 }
0x164e   :  { %v8517_v32 = vadd.f32 %v10096_v19, %v8508_v61 }
0x164f   :  { %v8503_v1 = vpop.f32.mrf.mxu0 }
0x1650   :  { %v8520_v21 = vmul.f32 %v8517_v32, %v16094_v27  ;;  %v8509_v7 = vadd.f32 %v8503_v1, %v8407_v44 }
0x1651   :  { %v13014_v29 = vpop.f32.mrf.mxu0 }
0x1652   :  { %v8518_v49 = vadd.f32 %v10096_v19, %v8509_v7  ;;  %v8526_v31 = vadd.f32 %v8520_v21, %v8519_v2  ;;  %v10097_v7 = vld [vmem:[#allocation8 + $0x6] ss:$0 sm:$0xff] }
0x1654   :  { %v8521_v9 = vmul.f32 %v8518_v49, %v16103_v6 }
0x1656   :  { %v8527_v47 = vadd.f32 %v8526_v31, %v8521_v9 }
0x1658   :  { %v8528_v51 = vrot.slane %v8527_v47, 4 }
0x165a   :  { %v8529_v39 = vadd.f32 %v8528_v51, %v8527_v47 }
0x165c   :  { %v8530_v8 = vrot.slane %v8529_v39, 2 }
0x165e   :  { %v8531_v25 = vadd.f32 %v8530_v8, %v8529_v39 }
0x1660   :  { %v8532_v23 = vrot.slane %v8531_v25, 1 }
0x1662   :  { %v8533_v28 = vadd.f32 %v8532_v23, %v8531_v25  ;;  %v8772_v25 = vld [vmem:[#allocation5 + $0xb50] sm:$0xff]  ;;  %v8769_v23 = vld [vmem:[#allocation5 + $0xb38] sm:$0xff] }
0x1664   :  { %v8534_v36 = vmul.f32 0.0625, %v8533_v28  ;;  %v8766_v28 = vld [vmem:[#allocation5 + $0xb20] sm:$0xff] }
0x1666   :  { %v8535_v55 = vsub.f32 %v8519_v2, %v8534_v36  ;;  %v8536_v46 = vsub.f32 %v8520_v21, %v8534_v36  ;;  %v8537_v35 = vsub.f32 %v8521_v9, %v8534_v36  ;;  %v10098_v2 = vld [vmem:[#allocation10 + $0x6] ss:$0 sm:$0xff] }
0x1667   :  { %v8764_v36 = vld [vmem:[#allocation5 + $0xb10] sm:$0xff] }
0x1668   :  { %v8538_v48 = vmul.f32 %v8535_v55, %v16099_v34  ;;  %v8539_v26 = vmul.f32 %v8536_v46, %v16094_v27  ;;  %v8540_v14 = vmul.f32 %v8537_v35, %v16103_v6 }
0x166a   :  { %v8541_v10 = vmul.f32 %v8538_v48, %v8538_v48  ;;  %v8542_v12 = vmul.f32 %v8539_v26, %v8539_v26  ;;  %v8543_v60 = vmul.f32 %v8540_v14, %v8540_v14  ;;  %v8951_v48 = vld [vmem:[#allocation5 + $0xbe0] sm:$0xff]  ;;  %v8950_v26 = vld [vmem:[#allocation5 + $0xbd8] sm:$0xff]  ;;  %v8949_v14 = vld [vmem:[#allocation5 + $0xbd0] sm:$0xff] }
0x166c   :  { %v8544_v40 = vadd.f32 %v8542_v12, %v8541_v10  ;;  %v8947_v10 = vld [vmem:[#allocation5 + $0xbc0] sm:$0xff]  ;;  %v8946_v12 = vld [vmem:[#allocation5 + $0xbb8] sm:$0xff] }
0x166e   :  { %v8545_v45 = vadd.f32 %v8544_v40, %v8543_v60  ;;  %v8945_v60 = vld [vmem:[#allocation5 + $0xbb0] sm:$0xff]  ;;  %v8944_v40 = vld [vmem:[#allocation5 + $0xba8] sm:$0xff] }
0x1670   :  { %v8546_v19 = vrot.slane %v8545_v45, 4 }
0x1672   :  { %v8547_v52 = vadd.f32 %v8546_v19, %v8545_v45  ;;  %v8943_v45 = vld [vmem:[#allocation5 + $0xba0] sm:$0xff]  ;;  %v8942_v19 = vld [vmem:[#allocation5 + $0xb98] sm:$0xff] }
0x1674   :  { %v8548_v61 = vrot.slane %v8547_v52, 2 }
0x1676   :  { %v8549_v59 = vadd.f32 %v8548_v61, %v8547_v52  ;;  %v8941_v52 = vld [vmem:[#allocation5 + $0xb90] sm:$0xff]  ;;  %v8940_v61 = vld [vmem:[#allocation5 + $0xb88] sm:$0xff] }
0x1678   :  { %v8550_v44 = vrot.slane %v8549_v59, 1 }
0x167a   :  { %v8551_v13 = vadd.f32 %v8550_v44, %v8549_v59  ;;  %v8939_v59 = vld [vmem:[#allocation5 + $0xb80] sm:$0xff] }
0x167c   :  { %v8552_v32 = vmul.f32 0.0625, %v8551_v13 }
0x167e   :  { %v8553_v1 = vadd.f32 1e-05, %v8552_v32 }
0x1680   :  { %13375 = vrsqrt.f32 %v8553_v1 }
0x168d   :  { %v13376_v21 = vpop.eup %13375 }
0x168e   :  { %v8557_v29 = vmul.f32 %v13376_v21, %v8537_v35  ;;  %v8556_v57 = vmul.f32 %v13376_v21, %v8536_v46  ;;  %v8555_v58 = vmul.f32 %v13376_v21, %v8535_v55  ;;  %v8762_v55 = vld [vmem:[#allocation5 + $0xb00] sm:$0xff]  ;;  %v8954_v46 = vld [vmem:[#allocation5 + $0xbf8] sm:$0xff]  ;;  %v8953_v35 = vld [vmem:[#allocation5 + $0xbf0] sm:$0xff] }
0x1690   :  { %v8566_v49 = vmul.f32 %v10097_v7, %v8557_v29  ;;  %v8565_v22 = vmul.f32 %v10097_v7, %v8556_v57  ;;  %v8564_v31 = vmul.f32 %v10097_v7, %v8555_v58 }
0x1692   :  { %v8575_v9 = vadd.f32 %v10098_v2, %v8566_v49  ;;  %v8574_v30 = vadd.f32 %v10098_v2, %v8565_v22  ;;  %v8573_v47 = vadd.f32 %v10098_v2, %v8564_v31 }
0x1694   :  { %v8578_v41 = vmax.f32 %v8575_v9, 0.0  ;;  %v8577_v51 = vmax.f32 %v8574_v30, 0.0  ;;  %v8576_v39 = vmax.f32 %v8573_v47, 0.0 }
0x1696   :  { %v16855_v38 = vmul.f32 %v8578_v41, %v16103_v6  ;;  %v16859_v24 = vmul.f32 %v8577_v51, %v16094_v27  ;;  %v16864_v8 = vmul.f32 %v8576_v39, %v16099_v34  ;;  %v9204_v39 = vld [vmem:[%s17292_s6 + $0x70] sm:$0xff] }
0x1698   :  { %13016 = vmatpush3.msra.mxu1 %v16855_v38 }
0x1699   :  { %13017 = vmatprep.subr.mxu1 %v17382_v63 }
0x169a   :  { %13018 = vmatpush3.msra.mxu1 %v16859_v24 }
0x169b   :  { %13019 = vmatprep.subr.mxu1 %v17382_v63 }
0x169c   :  { %13020 = vmatpush3.msra.mxu1 %v16864_v8 }
0x169d   :  { %13022 = vmatmul.mubr.msk.f32.vlgmr.msra.gmra.mxu1 %vm4869_vm13, %v15011_v37  ;;  %13030 = vmatprep.subr.mxu1 %v17382_v63  ;;  %v8777_v37 = vld [vmem:[#allocation5 + $0xb78] sm:$0xff] }
0x169e   :  { %13031 = vmatpush3.msra.mxu1 %v16855_v38  ;;  %13024 = vmatprep.mubr.msk.f32.mxu1 %vm17453_vm5, %v17382_v63 }
0x169f   :  { %13032 = vmatprep.subr.mxu1 %v17382_v63 }
0x16a0   :  { %13033 = vmatpush3.msra.mxu1 %v16859_v24 }
0x16a1   :  { %13025 = vmatmul.mubr.msk.f32.gmra.mxu1 %vm4869_vm13, %v15036_v20  ;;  %13034 = vmatprep.subr.mxu1 %v17382_v63  ;;  %v8776_v20 = vld [vmem:[#allocation5 + $0xb70] sm:$0xff] }
0x16a2   :  { %13035 = vmatpush3.msra.mxu1 %v16864_v8  ;;  %13027 = vmatprep.mubr.msk.f32.mxu1 %vm17453_vm5, %v17382_v63 }
0x16a3   :  { %13045 = vmatprep.subr.mxu1 %v17382_v63 }
0x16a5   :  { %13028 = vmatmul.mubr.msk.f32.gmra.mxu1 %vm4869_vm13, %v15059_v17  ;;  %v8774_v17 = vld [vmem:[#allocation5 + $0xb60] sm:$0xff] }
0x16a6   :  { %13036 = vmatprep.mubr.msk.f32.mxu1 %vm17453_vm5, %v17382_v63 }
0x16a9   :  { %13037 = vmatmul.mubr.msk.f32.vlgmr.msra.gmra.mxu1 %vm4869_vm13, %v15017_v11  ;;  %v8773_v11 = vld [vmem:[#allocation5 + $0xb58] sm:$0xff] }
0x16aa   :  { %13046 = vmatpush3.msra.mxu1 %v8777_v37  ;;  %13039 = vmatprep.mubr.msk.f32.mxu1 %vm17453_vm5, %v17382_v63  ;;  %v9201_v37 = vld [vmem:[%s17292_s6 + $0x58] sm:$0xff] }
0x16ab   :  { %13047 = vmatprep.subr.mxu1 %v17382_v63 }
0x16ac   :  { %13048 = vmatpush3.msra.mxu1 %v8776_v20  ;;  %v9200_v20 = vld [vmem:[%s17292_s6 + $0x50] sm:$0xff] }
0x16ad   :  { %13049 = vmatprep.subr.mxu1 %v17382_v63  ;;  %13040 = vmatmul.mubr.msk.f32.gmra.mxu1 %vm4869_vm13, %v15042_v5  ;;  %v8771_v5 = vld [vmem:[#allocation5 + $0xb48] sm:$0xff] }
0x16ae   :  { %13050 = vmatpush3.msra.mxu1 %v8775_v16  ;;  %13042 = vmatprep.mubr.msk.f32.mxu1 %vm17453_vm5, %v17382_v63  ;;  %v9199_v16 = vld [vmem:[%s17292_s6 + $0x48] sm:$0xff] }
0x16af   :  { %13051 = vmatprep.subr.mxu1 %v17382_v63 }
0x16b0   :  { %13052 = vmatpush3.msra.mxu1 %v8774_v17  ;;  %v9198_v17 = vld [vmem:[%s17292_s6 + $0x40] sm:$0xff] }
0x16b1   :  { %13053 = vmatprep.subr.mxu1 %v17382_v63  ;;  %13043 = vmatmul.mubr.msk.f32.gmra.mxu1 %vm4869_vm13, %v15065_v62  ;;  %v8768_v62 = vld [vmem:[#allocation5 + $0xb30] sm:$0xff] }
0x16b2   :  { %13054 = vmatpush3.msra.mxu1 %v8773_v11  ;;  %13077 = vmatprep.mubr.msk.f32.mxu1 %vm17453_vm5, %v17382_v63  ;;  %v9197_v11 = vld [vmem:[%s17292_s6 + $0x38] sm:$0xff] }
0x16b3   :  { %13055 = vmatprep.subr.mxu1 %v17382_v63 }
0x16b4   :  { %13056 = vmatpush3.msra.mxu1 %v8772_v25  ;;  %v9196_v25 = vld [vmem:[%s17292_s6 + $0x30] sm:$0xff] }
0x16b5   :  { %13057 = vmatprep.subr.mxu1 %v17382_v63 }
0x16b6   :  { %13058 = vmatpush3.msra.mxu1 %v8771_v5  ;;  %v9195_v5 = vld [vmem:[%s17292_s6 + $0x28] sm:$0xff] }
0x16b7   :  { %13059 = vmatprep.subr.mxu1 %v17382_v63 }
0x16b8   :  { %13060 = vmatpush3.msra.mxu1 %v8770_v33  ;;  %v9194_v33 = vld [vmem:[%s17292_s6 + $0x20] sm:$0xff] }
0x16b9   :  { %13061 = vmatprep.subr.mxu1 %v17382_v63 }
0x16ba   :  { %13062 = vmatpush3.msra.mxu1 %v8769_v23 }
0x16bb   :  { %13063 = vmatprep.subr.mxu1 %v17382_v63 }
0x16bc   :  { %13064 = vmatpush3.msra.mxu1 %v8768_v62  ;;  %v9193_v62 = vld [vmem:[%s17292_s6 + $0x18] sm:$0xff] }
0x16bd   :  { %13065 = vmatprep.subr.mxu1 %v17382_v63 }
0x16be   :  { %13066 = vmatpush3.msra.mxu1 %v8767_v42 }
0x16bf   :  { %13067 = vmatprep.subr.mxu1 %v17382_v63 }
0x16c0   :  { %13068 = vmatpush3.msra.mxu1 %v8766_v28  ;;  %v9192_v28 = vld [vmem:[%s17292_s6 + $0x10] sm:$0xff] }
0x16c1   :  { %13069 = vmatprep.subr.mxu1 %v17382_v63 }
0x16c2   :  { %13070 = vmatpush3.msra.mxu1 %v8765_v54 }
0x16c3   :  { %13071 = vmatprep.subr.mxu1 %v17382_v63 }
0x16c4   :  { %13072 = vmatpush3.msra.mxu1 %v8764_v36  ;;  %v9191_v36 = vld [vmem:[%s17292_s6 + $0x8] sm:$0xff] }
0x16c5   :  { %13073 = vmatprep.subr.mxu1 %v17382_v63 }
0x16c6   :  { %13074 = vmatpush3.msra.mxu1 %v8763_v0 }
0x16c7   :  { %13075 = vmatprep.subr.mxu1 %v17382_v63 }
0x16c8   :  { %13076 = vmatpush3.msra.mxu1 %v8762_v55  ;;  %v9190_v55 = vld [vmem:[%s17292_s6] sm:$0xff] }
0x16c9   :  { %13078 = vmatmul.mubr.f32.vlgmr.msra.gmra.mxu1 %v16864_v8  ;;  %13127 = vmatprep.subr.mxu1 %v17382_v63  ;;  %v9202_v8 = vld [vmem:[%s17292_s6 + $0x60] sm:$0xff] }
0x16ca   :  { %13080 = vmatprep.mubr.msk.f32.mxu1 %vm17453_vm5, %v17382_v63  ;;  %13128 = vmatpush3.msra.mxu1 %v8954_v46 }
0x16cb   :  { %13129 = vmatprep.subr.mxu1 %v17382_v63 }
0x16cc   :  { %13130 = vmatpush3.msra.mxu1 %v8953_v35 }
0x16cd   :  { %13081 = vmatmul.mubr.f32.gmra.mxu1 %v16859_v24  ;;  %13131 = vmatprep.subr.mxu1 %v17382_v63  ;;  %v9203_v24 = vld [vmem:[%s17292_s6 + $0x68] sm:$0xff] }
0x16ce   :  { %13083 = vmatprep.mubr.msk.f32.mxu1 %vm17453_vm5, %v17382_v63  ;;  %13132 = vmatpush3.msra.mxu1 %v8952_v53 }
0x16cf   :  { %13133 = vmatprep.subr.mxu1 %v17382_v63 }
0x16d0   :  { %13134 = vmatpush3.msra.mxu1 %v8951_v48 }
0x16d1   :  { %13084 = vmatmul.mubr.f32.gmra.mxu1 %v16855_v38  ;;  %13135 = vmatprep.subr.mxu1 %v17382_v63  ;;  %v9205_v38 = vld [vmem:[%s17292_s6 + $0x78] sm:$0xff] }
0x16d2   :  { %13136 = vmatpush3.msra.mxu1 %v8950_v26  ;;  %13159 = vmatprep.mubr.msk.f32.mxu1 %vm17453_vm5, %v17382_v63 }
0x16d3   :  { %13137 = vmatprep.subr.mxu1 %v17382_v63 }
0x16d4   :  { %13138 = vmatpush3.msra.mxu1 %v8949_v14 }
0x16d5   :  { %13139 = vmatprep.subr.mxu1 %v17382_v63 }
0x16d6   :  { %13140 = vmatpush3.msra.mxu1 %v8948_v56 }
0x16d7   :  { %13141 = vmatprep.subr.mxu1 %v17382_v63 }
0x16d8   :  { %13142 = vmatpush3.msra.mxu1 %v8947_v10  ;;  %v10105_v10 = vld [vmem:[#allocation7 + $0x7] ss:$0 sm:$0xff] }
0x16d9   :  { %13143 = vmatprep.subr.mxu1 %v17382_v63 }
0x16da   :  { %13144 = vmatpush3.msra.mxu1 %v8946_v12 }
0x16db   :  { %13145 = vmatprep.subr.mxu1 %v17382_v63 }
0x16dc   :  { %13146 = vmatpush3.msra.mxu1 %v8945_v60 }
0x16dd   :  { %13147 = vmatprep.subr.mxu1 %v17382_v63 }
0x16de   :  { %13148 = vmatpush3.msra.mxu1 %v8944_v40 }
0x16df   :  { %13149 = vmatprep.subr.mxu1 %v17382_v63 }
0x16e0   :  { %13150 = vmatpush3.msra.mxu1 %v8943_v45 }
0x16e1   :  { %13151 = vmatprep.subr.mxu1 %v17382_v63 }
0x16e2   :  { %13152 = vmatpush3.msra.mxu1 %v8942_v19 }
0x16e3   :  { %13153 = vmatprep.subr.mxu1 %v17382_v63 }
0x16e4   :  { %13154 = vmatpush3.msra.mxu1 %v8941_v52 }
0x16e5   :  { %13155 = vmatprep.subr.mxu1 %v17382_v63 }
0x16e6   :  { %13156 = vmatpush3.msra.mxu1 %v8940_v61 }
0x16e7   :  { %13157 = vmatprep.subr.mxu1 %v17382_v63 }
0x16e8   :  { %13158 = vmatpush3.msra.mxu1 %v8939_v59 }
0x16e9   :  { %13221 = vmatprep.subr.mxu1 %v17382_v63 }
0x175d   :  { %v8650_v44 = vpop.f32.mrf.mxu1 }
0x175e   :  { %13119 = vmatmul.mubr.f32.vlgmr.msra.gmra.mxu0 %v8650_v44 }
0x175f   :  { %v13023_v13 = vpop.f32.mrf.mxu1  ;;  %13121 = vmatprep.mubr.msk.f32.mxu0 %vm17453_vm5, %v17382_v63 }
0x1761   :  { %v8655_v32 = vpop.f32.mrf.mxu1 }
0x1762   :  { %13122 = vmatmul.mubr.f32.gmra.mxu0 %v8655_v32 }
0x1763   :  { %v13026_v1 = vpop.f32.mrf.mxu1  ;;  %13124 = vmatprep.mubr.msk.f32.mxu0 %vm17453_vm5, %v17382_v63 }
0x1765   :  { %v8660_v21 = vpop.f32.mrf.mxu1 }
0x1766   :  { %13125 = vmatmul.mubr.f32.gmra.mxu0 %v8660_v21 }
0x1767   :  { %v13029_v7 = vpop.f32.mrf.mxu1  ;;  %13174 = vmatprep.mubr.msk.f32.mxu0 %vm17453_vm5, %v17382_v63 }
0x1769   :  { %v8730_v29 = vpop.f32.mrf.mxu1 }
0x176a   :  { %13160 = vmatmul.mubr.f32.vlgmr.msra.gmra.mxu1 %v8730_v29 }
0x176b   :  { %v13038_v57 = vpop.f32.mrf.mxu1  ;;  %13162 = vmatprep.mubr.msk.f32.mxu1 %vm17453_vm5, %v17382_v63  ;;  %13222 = vmatpush3.msra.mxu1 %v9205_v38 }
0x176c   :  { %13223 = vmatprep.subr.mxu1 %v17382_v63 }
0x176d   :  { %v8735_v58 = vpop.f32.mrf.mxu1  ;;  %13224 = vmatpush3.msra.mxu1 %v9204_v39 }
0x176e   :  { %13163 = vmatmul.mubr.f32.gmra.mxu1 %v8735_v58  ;;  %13225 = vmatprep.subr.mxu1 %v17382_v63 }
0x176f   :  { %v13041_v2 = vpop.f32.mrf.mxu1  ;;  %13165 = vmatprep.mubr.msk.f32.mxu1 %vm17453_vm5, %v17382_v63  ;;  %13226 = vmatpush3.msra.mxu1 %v9203_v24 }
0x1770   :  { %13227 = vmatprep.subr.mxu1 %v17382_v63 }
0x1771   :  { %v8740_v49 = vpop.f32.mrf.mxu1  ;;  %13228 = vmatpush3.msra.mxu1 %v9202_v8 }
0x1772   :  { %13166 = vmatmul.mubr.f32.gmra.mxu1 %v8740_v49  ;;  %13229 = vmatprep.subr.mxu1 %v17382_v63 }
0x1773   :  { %v13044_v22 = vpop.f32.mrf.mxu1  ;;  %13253 = vmatprep.mubr.msk.f32.mxu1 %vm17453_vm5, %v17382_v63  ;;  %13230 = vmatpush3.msra.mxu1 %v9201_v37 }
0x1774   :  { %13231 = vmatprep.subr.mxu1 %v17382_v63 }
0x1775   :  { %13232 = vmatpush3.msra.mxu1 %v9200_v20 }
0x1776   :  { %13233 = vmatprep.subr.mxu1 %v17382_v63 }
0x1777   :  { %13234 = vmatpush3.msra.mxu1 %v9199_v16 }
0x1778   :  { %13235 = vmatprep.subr.mxu1 %v17382_v63 }
0x1779   :  { %13236 = vmatpush3.msra.mxu1 %v9198_v17 }
0x177a   :  { %13237 = vmatprep.subr.mxu1 %v17382_v63 }
0x177b   :  { %13238 = vmatpush3.msra.mxu1 %v9197_v11 }
0x177c   :  { %13239 = vmatprep.subr.mxu1 %v17382_v63 }
0x177d   :  { %13240 = vmatpush3.msra.mxu1 %v9196_v25 }
0x177e   :  { %13241 = vmatprep.subr.mxu1 %v17382_v63 }
0x177f   :  { %13242 = vmatpush3.msra.mxu1 %v9195_v5 }
0x1780   :  { %13243 = vmatprep.subr.mxu1 %v17382_v63 }
0x1781   :  { %13244 = vmatpush3.msra.mxu1 %v9194_v33 }
0x1782   :  { %13245 = vmatprep.subr.mxu1 %v17382_v63 }
0x1783   :  { %13246 = vmatpush3.msra.mxu1 %v9193_v62 }
0x1784   :  { %13247 = vmatprep.subr.mxu1 %v17382_v63 }
0x1785   :  { %13248 = vmatpush3.msra.mxu1 %v9192_v28  ;;  %v10106_v28 = vld [vmem:[#allocation8 + $0x7] ss:$0 sm:$0xff] }
0x1786   :  { %13249 = vmatprep.subr.mxu1 %v17382_v63 }
0x1787   :  { %13250 = vmatpush3.msra.mxu1 %v9191_v36 }
0x1788   :  { %13251 = vmatprep.subr.mxu1 %v17382_v63 }
0x1789   :  { %v8844_v31 = vpop.f32.mrf.mxu1  ;;  %13252 = vmatpush3.msra.mxu1 %v9190_v55  ;;  %v10107_v55 = vld [vmem:[#allocation10 + $0x7] ss:$0 sm:$0xff] }
0x178a   :  { %13300 = vmatprep.subr.mxu1 %v17382_v63 }
0x178b   :  { %v13079_v9 = vpop.f32.mrf.mxu1 }
0x178d   :  { %v8849_v30 = vpop.f32.mrf.mxu1 }
0x178f   :  { %v13082_v47 = vpop.f32.mrf.mxu1 }
0x1791   :  { %v16953_v41 = vpop.f32.mrf.mxu1 }
0x1793   :  { %v13085_v51 = vpop.f32.mrf.mxu1 }
0x181e   :  { %v8924_v23 = vpop.f32.mrf.mxu0 }
0x181f   :  { %v8925_v48 = vadd.f32 %v8924_v23, %v8844_v31 }
0x1820   :  { %v13120_v42 = vpop.f32.mrf.mxu0 }
0x1822   :  { %v8929_v54 = vpop.f32.mrf.mxu0 }
0x1823   :  { %v8930_v14 = vadd.f32 %v8929_v54, %v8849_v30 }
0x1824   :  { %v13123_v0 = vpop.f32.mrf.mxu0 }
0x1826   :  { %v8934_v46 = vpop.f32.mrf.mxu0 }
0x1827   :  { %v8935_v40 = vadd.f32 %v8934_v46, %v16953_v41 }
0x1828   :  { %v13126_v35 = vpop.f32.mrf.mxu0 }
0x182a   :  { %v9021_v53 = vpop.f32.mrf.mxu1 }
0x182b   :  { %v9035_v56 = vadd.f32 %v9021_v53, %v8925_v48  ;;  %v9113_v48 = vmul.u32 6, %v13699_v15 }
0x182c   :  { %v13161_v26 = vpop.f32.mrf.mxu1 }
0x182d   :  { %v9044_v45 = vadd.f32 %v10105_v10, %v9035_v56 }
0x182e   :  { %v9026_v12 = vpop.f32.mrf.mxu1 }
0x182f   :  { %v9036_v4 = vadd.f32 %v9026_v12, %v8930_v14  ;;  %v9047_v13 = vmul.f32 %v9044_v45, %v16099_v34 }
0x1830   :  { %v13164_v60 = vpop.f32.mrf.mxu1 }
0x1831   :  { %v9045_v19 = vadd.f32 %v10105_v10, %v9036_v4  ;;  %v17030_v60 = vadd.s32 1, %v9113_v48  ;;  %v10132_v48 = vld [vmem:[%s17292_s6 + $0x128] sm:$0xff] }
0x1832   :  { %v9031_v52 = vpop.f32.mrf.mxu1 }
0x1833   :  { %v9048_v61 = vmul.f32 %v9045_v19, %v16094_v27  ;;  %v9037_v59 = vadd.f32 %v9031_v52, %v8935_v40  ;;  %vm9115_vm9 = vcmp.eq.s32.totalorder %v13719_v18, %v17030_v60 }
0x1834   :  { %v13167_v44 = vpop.f32.mrf.mxu1 }
0x1835   :  { %v9046_v32 = vadd.f32 %v10105_v10, %v9037_v59  ;;  %v9054_v1 = vadd.f32 %v9048_v61, %v9047_v13  ;;  %v10122_v59 = vld [vmem:[%s17292_s6 + $0xe0] sm:$0xff]  ;;  %v10121_v44 = vld [vmem:[%s17292_s6 + $0xd8] sm:$0xff] }
0x1837   :  { %v9049_v21 = vmul.f32 %v9046_v32, %v16103_v6  ;;  %v10119_v32 = vld [vmem:[%s17292_s6 + $0xc8] sm:$0xff] }
0x1839   :  { %v9055_v7 = vadd.f32 %v9054_v1, %v9049_v21  ;;  %v10118_v1 = vld [vmem:[%s17292_s6 + $0xc0] sm:$0xff] }
0x183b   :  { %v9056_v29 = vrot.slane %v9055_v7, 4 }
0x183d   :  { %v9057_v57 = vadd.f32 %v9056_v29, %v9055_v7  ;;  %v10116_v7 = vld [vmem:[%s17292_s6 + $0xb0] sm:$0xff]  ;;  %v10115_v29 = vld [vmem:[%s17292_s6 + $0xa8] sm:$0xff] }
0x183f   :  { %v9058_v58 = vrot.slane %v9057_v57, 2 }
0x1841   :  { %v9059_v2 = vadd.f32 %v9058_v58, %v9057_v57  ;;  %v10114_v57 = vld [vmem:[%s17292_s6 + $0xa0] sm:$0xff]  ;;  %v10113_v58 = vld [vmem:[%s17292_s6 + $0x98] sm:$0xff] }
0x1843   :  { %v9060_v49 = vrot.slane %v9059_v2, 1 }
0x1845   :  { %v9061_v22 = vadd.f32 %v9060_v49, %v9059_v2  ;;  %v10112_v2 = vld [vmem:[%s17292_s6 + $0x90] sm:$0xff]  ;;  %v10111_v49 = vld [vmem:[%s17292_s6 + $0x88] sm:$0xff] }
0x1847   :  { %v9062_v31 = vmul.f32 0.0625, %v9061_v22  ;;  %v10110_v22 = vld [vmem:[%s17292_s6 + $0x80] sm:$0xff] }
0x1849   :  { %v9063_v9 = vsub.f32 %v9047_v13, %v9062_v31  ;;  %v9064_v30 = vsub.f32 %v9048_v61, %v9062_v31  ;;  %v9065_v47 = vsub.f32 %v9049_v21, %v9062_v31  ;;  %v10123_v61 = vld [vmem:[%s17292_s6 + $0xe8] sm:$0xff]  ;;  %v10120_v13 = vld [vmem:[%s17292_s6 + $0xd0] sm:$0xff]  ;;  %v10117_v21 = vld [vmem:[%s17292_s6 + $0xb8] sm:$0xff]  ;;  %v9603_v31 = vadd.s32 3, %v17030_v60 }
0x184b   :  { %v9066_v41 = vmul.f32 %v9063_v9, %v16099_v34  ;;  %v9067_v51 = vmul.f32 %v9064_v30, %v16094_v27  ;;  %v9068_v38 = vmul.f32 %v9065_v47, %v16103_v6  ;;  %vm9604_vm3 = vcmp.eq.s32.totalorder %v13719_v18, %v9603_v31 }
0x184d   :  { %v9069_v39 = vmul.f32 %v9066_v41, %v9066_v41  ;;  %v9070_v24 = vmul.f32 %v9067_v51, %v9067_v51  ;;  %v9071_v8 = vmul.f32 %v9068_v38, %v9068_v38  ;;  %v9605_v41 = vsel %vm9604_vm3, 1.0, %v17382_v63  ;;  %v10159_v38 = vld [vmem:[%s17292_s6 + $0x1f8] sm:$0xff] }
0x184f   :  { %v9072_v37 = vadd.f32 %v9070_v24, %v9069_v39 }
0x1851   :  { %v9073_v20 = vadd.f32 %v9072_v37, %v9071_v8  ;;  %v10142_v8 = vld [vmem:[%s17292_s6 + $0x178] sm:$0xff]  ;;  %v10157_v37 = vld [vmem:[%s17292_s6 + $0x1e8] sm:$0xff] }
0x1853   :  { %v9074_v16 = vrot.slane %v9073_v20, 4 }
0x1855   :  { %v9075_v17 = vadd.f32 %v9074_v16, %v9073_v20  ;;  %v10141_v20 = vld [vmem:[%s17292_s6 + $0x170] sm:$0xff]  ;;  %v10156_v16 = vld [vmem:[%s17292_s6 + $0x1e0] sm:$0xff] }
0x1857   :  { %v9076_v11 = vrot.slane %v9075_v17, 2 }
0x1859   :  { %v9077_v25 = vadd.f32 %v9076_v11, %v9075_v17  ;;  %v10140_v17 = vld [vmem:[%s17292_s6 + $0x168] sm:$0xff]  ;;  %v10155_v11 = vld [vmem:[%s17292_s6 + $0x1d8] sm:$0xff] }
0x185b   :  { %v9078_v5 = vrot.slane %v9077_v25, 1 }
0x185d   :  { %v9079_v33 = vadd.f32 %v9078_v5, %v9077_v25  ;;  %v10139_v25 = vld [vmem:[%s17292_s6 + $0x160] sm:$0xff]  ;;  %v10154_v5 = vld [vmem:[%s17292_s6 + $0x1d0] sm:$0xff] }
0x185f   :  { %v9080_v23 = vmul.f32 0.0625, %v9079_v33  ;;  %v10138_v33 = vld [vmem:[%s17292_s6 + $0x158] sm:$0xff] }
0x1861   :  { %v9081_v62 = vadd.f32 1e-05, %v9080_v23  ;;  %v10153_v23 = vld [vmem:[%s17292_s6 + $0x1c8] sm:$0xff] }
0x1863   :  { %13377 = vrsqrt.f32 %v9081_v62  ;;  %v10137_v62 = vld [vmem:[%s17292_s6 + $0x150] sm:$0xff] }
0x1870   :  { %v13378_v42 = vpop.eup %13377 }
0x1871   :  { %v9085_v54 = vmul.f32 %v13378_v42, %v9065_v47  ;;  %v9084_v36 = vmul.f32 %v13378_v42, %v9064_v30  ;;  %v9083_v0 = vmul.f32 %v13378_v42, %v9063_v9  ;;  %v9439_v47 = vadd.s32 2, %v17030_v60  ;;  %v10152_v42 = vld [vmem:[%s17292_s6 + $0x1c0] sm:$0xff] }
0x1873   :  { %v9094_v46 = vmul.f32 %v10106_v28, %v9085_v54  ;;  %v9093_v35 = vmul.f32 %v10106_v28, %v9084_v36  ;;  %v9092_v53 = vmul.f32 %v10106_v28, %v9083_v0  ;;  %vm9440_vm4 = vcmp.eq.s32.totalorder %v13719_v18, %v9439_v47  ;;  %v10136_v28 = vld [vmem:[%s17292_s6 + $0x148] sm:$0xff]  ;;  %v10151_v54 = vld [vmem:[%s17292_s6 + $0x1b8] sm:$0xff]  ;;  %v10135_v36 = vld [vmem:[%s17292_s6 + $0x140] sm:$0xff] }
0x1874   :  { %v9441_v24 = vsel %vm9440_vm4, 1.0, %v17382_v63  ;;  %v10150_v0 = vld [vmem:[%s17292_s6 + $0x1b0] sm:$0xff] }
0x1875   :  { %v9103_v26 = vadd.f32 %v10107_v55, %v9094_v46  ;;  %v9102_v14 = vadd.f32 %v10107_v55, %v9093_v35  ;;  %v9101_v56 = vadd.f32 %v10107_v55, %v9092_v53  ;;  %v10134_v55 = vld [vmem:[%s17292_s6 + $0x138] sm:$0xff]  ;;  %v10149_v46 = vld [vmem:[%s17292_s6 + $0x1a8] sm:$0xff]  ;;  %v10133_v35 = vld [vmem:[%s17292_s6 + $0x130] sm:$0xff] }
0x1876   :  { %v10148_v53 = vld [vmem:[%s17292_s6 + $0x1a0] sm:$0xff] }
0x1877   :  { %v9106_v10 = vadd.f32 %v9103_v26, %v16735_v3  ;;  %v9105_v12 = vadd.f32 %v9102_v14, %v16739_v50  ;;  %v9104_v4 = vadd.f32 %v9101_v56, %v16744_v43  ;;  %v9206_v3 = vadd.s32 1, %v17030_v60  ;;  %v10124_v43 = vld [vmem:[%s17292_s6 + $0xf0] sm:$0xff]  ;;  %v10131_v26 = vld [vmem:[%s17292_s6 + $0x120] sm:$0xff]  ;;  %v10130_v14 = vld [vmem:[%s17292_s6 + $0x118] sm:$0xff] }
0x1878   :  { %v10129_v56 = vld [vmem:[%s17292_s6 + $0x110] sm:$0xff]  ;;  %v10127_v60 = vld [vmem:[%s17292_s6 + $0x100] sm:$0xff] }
0x1879   :  { %v9109_v40 = vmax.f32 %v9106_v10, 0.0  ;;  %v9108_v45 = vmax.f32 %v9105_v12, 0.0  ;;  %v9107_v52 = vmax.f32 %v9104_v4, 0.0  ;;  %vm9207_vm6 = vcmp.eq.s32.totalorder %v13719_v18, %v9206_v3  ;;  %v10158_v18 = vld [vmem:[%s17292_s6 + $0x1f0] sm:$0xff]  ;;  %v10147_v10 = vld [vmem:[%s17292_s6 + $0x198] sm:$0xff]  ;;  %v10128_v12 = vld [vmem:[%s17292_s6 + $0x108] sm:$0xff] }
0x187a   :  { %v10146_v4 = vld [vmem:[%s17292_s6 + $0x190] sm:$0xff] }
0x187b   :  { %v17033_v19 = vmul.f32 %v9109_v40, %v16103_v6  ;;  %v17039_v15 = vmul.f32 %v9108_v45, %v16094_v27  ;;  %v17045_v50 = vmul.f32 %v9107_v52, %v16099_v34  ;;  %v9116_v6 = vsel %vm9115_vm9, 1.0, %v17382_v63  ;;  %v10125_v34 = vld [vmem:[%s17292_s6 + $0xf8] sm:$0xff]  ;;  %v10145_v40 = vld [vmem:[%s17292_s6 + $0x188] sm:$0xff]  ;;  %v10144_v45 = vld [vmem:[%s17292_s6 + $0x180] sm:$0xff]  ;;  %s13479_s6 = scalar_lea.vmem %s9776_s19, 64 }
0x187c   :  { %v9208_v27 = vsel %vm9207_vm6, 1.0, %v17382_v63  ;;  %p13480_p11 = scmp.ne.s32.totalorder %s9776_s19, %s13479_s6  ;;  %p13485_p13 = scmp.lt.s32.totalorder %s13479_s6, %s13479_s6 }
0x187d   :  { %13169 = vmatpush3.msra.mxu0 %v17033_v19 }
0x187e   :  { %13170 = vmatprep.subr.mxu0 %v17382_v63  ;;  %p13486_p0 = por %p13485_p13, %p13484_p12 }
0x187f   :  { %13171 = vmatpush3.msra.mxu0 %v17039_v15 }
0x1880   :  { %13172 = vmatprep.subr.mxu0 %v17382_v63  ;;  %p13487_p1 = pnand %p13486_p0, %p13480_p11 }
0x1881   :  { %13173 = vmatpush3.msra.mxu0 %v17045_v50 }
0x1882   :  { %13175 = vmatmul.mubr.msk.f32.vlgmr.msra.gmra.mxu0 %vm4869_vm13, %v9116_v6  ;;  %13177 = vmatprep.subr.mxu0 %v17382_v63 }
0x1883   :  { %13178 = vmatpush3.msra.mxu0 %v17033_v19  ;;  %13183 = vmatprep.mubr.msk.f32.mxu0 %vm17453_vm5, %v17382_v63 }
0x1884   :  { %13179 = vmatprep.subr.mxu0 %v17382_v63 }
0x1885   :  { %13180 = vmatpush3.msra.mxu0 %v17039_v15 }
0x1886   :  { %13181 = vmatprep.subr.mxu0 %v17382_v63 }
0x1887   :  { %13182 = vmatpush3.msra.mxu0 %v17045_v50 }
0x1888   :  { %13184 = vmatmul.mubr.msk.f32.vlgmr.msra.gmra.mxu0 %vm4869_vm13, %v9208_v27  ;;  %13186 = vmatprep.subr.mxu0 %v17382_v63 }
0x1889   :  { %13187 = vmatpush3.msra.mxu0 %v10125_v34  ;;  %13218 = vmatprep.mubr.msk.f32.mxu0 %vm17453_vm5, %v17382_v63 }
0x188a   :  { %13188 = vmatprep.subr.mxu0 %v17382_v63 }
0x188b   :  { %13189 = vmatpush3.msra.mxu0 %v10124_v43 }
0x188c   :  { %13190 = vmatprep.subr.mxu0 %v17382_v63 }
0x188d   :  { %13191 = vmatpush3.msra.mxu0 %v10123_v61 }
0x188e   :  { %13192 = vmatprep.subr.mxu0 %v17382_v63 }
0x188f   :  { %13193 = vmatpush3.msra.mxu0 %v10122_v59 }
0x1890   :  { %13194 = vmatprep.subr.mxu0 %v17382_v63 }
0x1891   :  { %13195 = vmatpush3.msra.mxu0 %v10121_v44 }
0x1892   :  { %13196 = vmatprep.subr.mxu0 %v17382_v63 }
0x1893   :  { %13197 = vmatpush3.msra.mxu0 %v10120_v13 }
0x1894   :  { %13198 = vmatprep.subr.mxu0 %v17382_v63 }
0x1895   :  { %13199 = vmatpush3.msra.mxu0 %v10119_v32 }
0x1896   :  { %13200 = vmatprep.subr.mxu0 %v17382_v63 }
0x1897   :  { %13201 = vmatpush3.msra.mxu0 %v10118_v1 }
0x1898   :  { %13202 = vmatprep.subr.mxu0 %v17382_v63 }
0x1899   :  { %13203 = vmatpush3.msra.mxu0 %v10117_v21 }
0x189a   :  { %13204 = vmatprep.subr.mxu0 %v17382_v63 }
0x189b   :  { %13205 = vmatpush3.msra.mxu0 %v10116_v7 }
0x189c   :  { %13206 = vmatprep.subr.mxu0 %v17382_v63 }
0x189d   :  { %13207 = vmatpush3.msra.mxu0 %v10115_v29 }
0x189e   :  { %13208 = vmatprep.subr.mxu0 %v17382_v63 }
0x189f   :  { %13209 = vmatpush3.msra.mxu0 %v10114_v57 }
0x18a0   :  { %13210 = vmatprep.subr.mxu0 %v17382_v63 }
0x18a1   :  { %13211 = vmatpush3.msra.mxu0 %v10113_v58 }
0x18a2   :  { %13212 = vmatprep.subr.mxu0 %v17382_v63 }
0x18a3   :  { %13213 = vmatpush3.msra.mxu0 %v10112_v2 }
0x18a4   :  { %13214 = vmatprep.subr.mxu0 %v17382_v63 }
0x18a5   :  { %13215 = vmatpush3.msra.mxu0 %v10111_v49 }
0x18a6   :  { %13216 = vmatprep.subr.mxu0 %v17382_v63 }
0x18a7   :  { %13217 = vmatpush3.msra.mxu0 %v10110_v22 }
0x18a8   :  { %13256 = vmatprep.subr.mxu0 %v17382_v63 }
0x1942   :  { %v9186_v9 = vpop.f32.mrf.mxu0 }
0x1943   :  { %13254 = vmatmul.mubr.f32.vlgmr.msra.gmra.mxu1 %v9186_v9 }
0x1944   :  { %13301 = vmatpush3.msra.mxu1 %v17033_v19  ;;  %v13176_v30 = vpop.f32.mrf.mxu0  ;;  %13306 = vmatprep.mubr.msk.f32.mxu1 %vm17453_vm5, %v17382_v63 }
0x1945   :  { %13302 = vmatprep.subr.mxu1 %v17382_v63 }
0x1946   :  { %13303 = vmatpush3.msra.mxu1 %v17039_v15 }
0x1947   :  { %13304 = vmatprep.subr.mxu1 %v17382_v63 }
0x1948   :  { %13305 = vmatpush3.msra.mxu1 %v17045_v50  ;;  %v9278_v51 = vpop.f32.mrf.mxu0 }
0x1949   :  { %13219 = vmatmul.mubr.f32.vlgmr.msra.gmra.mxu0 %v9278_v51  ;;  %13307 = vmatmul.mubr.msk.f32.vlgmr.msra.gmra.mxu1 %vm4869_vm13, %v9605_v41 }
0x194a   :  { %13257 = vmatpush3.msra.mxu0 %v17033_v19  ;;  %13262 = vmatprep.mubr.msk.f32.mxu0 %vm17453_vm5, %v17382_v63  ;;  %v13185_v39 = vpop.f32.mrf.mxu0 }
0x194b   :  { %13258 = vmatprep.subr.mxu0 %v17382_v63  ;;  %13309 = vmatprep.subr.mxu1 %v17382_v63 }
0x194c   :  { %13259 = vmatpush3.msra.mxu0 %v17039_v15  ;;  %13310 = vmatpush3.msra.mxu1 %v10159_v38 }
0x194d   :  { %13260 = vmatprep.subr.mxu0 %v17382_v63  ;;  %13311 = vmatprep.subr.mxu1 %v17382_v63 }
0x194e   :  { %13261 = vmatpush3.msra.mxu0 %v17045_v50  ;;  %13312 = vmatpush3.msra.mxu1 %v10158_v18 }
0x194f   :  { %13263 = vmatmul.mubr.msk.f32.vlgmr.msra.gmra.mxu0 %vm4869_vm13, %v9441_v24  ;;  %13265 = vmatprep.subr.mxu0 %v17382_v63 }
0x1950   :  { %13266 = vmatpush3.msra.mxu0 %v10142_v8  ;;  %13313 = vmatprep.subr.mxu1 %v17382_v63 }
0x1951   :  { %13267 = vmatprep.subr.mxu0 %v17382_v63  ;;  %13314 = vmatpush3.msra.mxu1 %v10157_v37 }
0x1952   :  { %13268 = vmatpush3.msra.mxu0 %v10141_v20  ;;  %13315 = vmatprep.subr.mxu1 %v17382_v63 }
0x1953   :  { %13269 = vmatprep.subr.mxu0 %v17382_v63  ;;  %13316 = vmatpush3.msra.mxu1 %v10156_v16 }
0x1954   :  { %13270 = vmatpush3.msra.mxu0 %v10140_v17  ;;  %13317 = vmatprep.subr.mxu1 %v17382_v63 }
0x1955   :  { %13271 = vmatprep.subr.mxu0 %v17382_v63  ;;  %13318 = vmatpush3.msra.mxu1 %v10155_v11 }
0x1956   :  { %13272 = vmatpush3.msra.mxu0 %v10139_v25  ;;  %13319 = vmatprep.subr.mxu1 %v17382_v63 }
0x1957   :  { %13273 = vmatprep.subr.mxu0 %v17382_v63  ;;  %13320 = vmatpush3.msra.mxu1 %v10154_v5 }
0x1958   :  { %13274 = vmatpush3.msra.mxu0 %v10138_v33  ;;  %13321 = vmatprep.subr.mxu1 %v17382_v63 }
0x1959   :  { %13275 = vmatprep.subr.mxu0 %v17382_v63  ;;  %13322 = vmatpush3.msra.mxu1 %v10153_v23 }
0x195a   :  { %13276 = vmatpush3.msra.mxu0 %v10137_v62  ;;  %13323 = vmatprep.subr.mxu1 %v17382_v63 }
0x195b   :  { %13277 = vmatprep.subr.mxu0 %v17382_v63  ;;  %13324 = vmatpush3.msra.mxu1 %v10152_v42 }
0x195c   :  { %13278 = vmatpush3.msra.mxu0 %v10136_v28  ;;  %13325 = vmatprep.subr.mxu1 %v17382_v63 }
0x195d   :  { %13279 = vmatprep.subr.mxu0 %v17382_v63  ;;  %13326 = vmatpush3.msra.mxu1 %v10151_v54 }
0x195e   :  { %13280 = vmatpush3.msra.mxu0 %v10135_v36  ;;  %13327 = vmatprep.subr.mxu1 %v17382_v63 }
0x195f   :  { %13281 = vmatprep.subr.mxu0 %v17382_v63  ;;  %13328 = vmatpush3.msra.mxu1 %v10150_v0 }
0x1960   :  { %13282 = vmatpush3.msra.mxu0 %v10134_v55  ;;  %13329 = vmatprep.subr.mxu1 %v17382_v63 }
0x1961   :  { %13283 = vmatprep.subr.mxu0 %v17382_v63  ;;  %13330 = vmatpush3.msra.mxu1 %v10149_v46 }
0x1962   :  { %13284 = vmatpush3.msra.mxu0 %v10133_v35  ;;  %13331 = vmatprep.subr.mxu1 %v17382_v63 }
0x1963   :  { %13285 = vmatprep.subr.mxu0 %v17382_v63  ;;  %13332 = vmatpush3.msra.mxu1 %v10148_v53 }
0x1964   :  { %13286 = vmatpush3.msra.mxu0 %v10132_v48  ;;  %13333 = vmatprep.subr.mxu1 %v17382_v63 }
0x1965   :  { %13287 = vmatprep.subr.mxu0 %v17382_v63  ;;  %13297 = vmatprep.mubr.msk.f32.mxu0 %vm17453_vm5, %v17382_v63 }
0x1966   :  { %13288 = vmatpush3.msra.mxu0 %v10131_v26  ;;  %13341 = vmatprep.mubr.msk.f32.mxu1 %vm17453_vm5, %v17382_v63  ;;  %vm9767_vm5 = vcmask 257024  }
0x1967   :  { %13289 = vmatprep.subr.mxu0 %v17382_v63  ;;  %13334 = vmatpush3.msra.mxu1 %v10147_v10 }
0x1968   :  { %13290 = vmatpush3.msra.mxu0 %v10130_v14  ;;  %13335 = vmatprep.subr.mxu1 %v17382_v63 }
0x1969   :  { %13291 = vmatprep.subr.mxu0 %v17382_v63  ;;  %13336 = vmatpush3.msra.mxu1 %v10146_v4 }
0x196a   :  { %13292 = vmatpush3.msra.mxu0 %v10129_v56  ;;  %13337 = vmatprep.subr.mxu1 %v17382_v63 }
0x196b   :  { %13293 = vmatprep.subr.mxu0 %v17382_v63  ;;  %13338 = vmatpush3.msra.mxu1 %v10145_v40 }
0x196c   :  { %13294 = vmatpush3.msra.mxu0 %v10128_v12  ;;  %13339 = vmatprep.subr.mxu1 %v17382_v63 }
0x196d   :  { %13295 = vmatprep.subr.mxu0 %v17382_v63  ;;  %13340 = vmatpush3.msra.mxu1 %v10144_v45 }
0x196e   :  { %13296 = vmatpush3.msra.mxu0 %v10127_v60 }
0x1a03   :  { %v9435_v19 = vpop.f32.mrf.mxu1 }
0x1a05   :  { %v13255_v52 = vpop.f32.mrf.mxu1 }
0x1a09   :  { %v9365_v15 = vpop.f32.mrf.mxu0  ;;  %v9675_v3 = vpop.f32.mrf.mxu1 }
0x1a0a   :  { %v9436_v50 = vadd.f32 %v9435_v19, %v9365_v15  ;;  %13342 = vmatmul.mubr.f32.vlgmr.msra.gmra.mxu1 %v9675_v3 }
0x1a0b   :  { %v13220_v6 = vpop.f32.mrf.mxu0  ;;  %v13308_v27 = vpop.f32.mrf.mxu1 }
0x1a0f   :  { %v9511_v34 = vpop.f32.mrf.mxu0 }
0x1a10   :  { %13298 = vmatmul.mubr.f32.vlgmr.msra.gmra.mxu0 %v9511_v34 }
0x1a11   :  { %v13264_v43 = vpop.f32.mrf.mxu0 }
0x1aca   :  { %v9762_v61 = vpop.f32.mrf.mxu1 }
0x1acc   :  { %v13343_v59 = vpop.f32.mrf.mxu1 }
0x1ad0   :  { %v9598_v44 = vpop.f32.mrf.mxu0 }
0x1ad1   :  { %v9602_v13 = vadd.f32 %v9598_v44, %v9436_v50 }
0x1ad2   :  { %v13299_v32 = vpop.f32.mrf.mxu0 }
0x1ad3   :  { %v9766_v63 = vadd.f32 %v9762_v61, %v9602_v13 }
0x1ad5   :  { %9768 = vst.msk [vmem:[#allocation11] sm:$0xf] %vm9767_vm5, %v9766_v63 }
0x1ad6   :  { %13490 = shalt.err (!%p13487_p1)
}
0x1ad7   :  { %9778 = dma.vmem_to_hbm [thread:$0]  %s9776_s19, 64, %s17293_s7, [#allocation4]  }
0x1ad8   :  { %13505 = dma.done.wait [#allocation4], 64  }
0x1ad9   :  { %13506 = vsyncadd [#allocation4], 4294967232 }
0x1ada   :  { %9782 = vsyncpa [#allocation3], 1 }
0x1adb   :  { %9783 = vsyncpa [#allocation6], 1 }
0x1adc   :  { %9784 = vsyncpa [#allocation9], 1 }
0x1add   :  { %9785 = vsyncpa [#allocation4], 1 }

</bundles_post_ra>
